<compile_context>
chip_gen: v7x
topology: tpu7x:2x2x1
jax: 0.10.0
libtpu: 0.0.40
codegen_flags: <defaults>
</compile_context>

<pallas_src>
import jax
import jax.numpy as jnp
import numpy as np
from jax.experimental import pallas as pl
from jax.experimental.pallas import tpu as pltpu


# ---------------------------------------------------------------------------
# Kernel factory: one invocation == the FULL decode loop for one batch block.
# ---------------------------------------------------------------------------
def _make_decoder_kernel(T, P, P_pad, Pc, D):
  num_chunks = P_pad // Pc
  need_pad_mask = (P != P_pad)

  def kernel(h0_ref, c0_ref,            # (Bt, D) f32
             enc_ref,                   # (Bt, P_pad, E) bf16 (zero-padded pixels)
             att1_ref,                  # (Bt, P_pad, A) bf16 (enc @ W_enc_att + b)
             emb_ref,                   # (T, Bt, Em) bf16  (resident across t)
             dlen_ref,                  # (Bt, 1) int32 decode lengths
             wda_ref, bda_ref,          # (D, A) bf16, (1, A) f32
             wfa_ref, bfa_ref,          # (1, A) f32, (1, 1) f32
             wfb_ref, bfb_ref,          # (D, E) bf16, (1, E) f32
             wie_ref, wia_ref, whh_ref, blstm_ref,   # LSTM weights / (1,4D) bias
             hout_ref, alpha_ref,       # (T, Bt, D) bf16, (T, Bt, P_pad) f32
             h_scr, c_scr):             # (Bt, D) f32 recurrent state
    Bt = h_scr.shape[0]
    E = enc_ref.shape[2]

    # Seed the recurrent state for this batch block (no time grid axis anymore).
    h_scr[...] = h0_ref[...]
    c_scr[...] = c0_ref[...]

    dlens = dlen_ref[...]                       # (Bt, 1) int32
    wfa = wfa_ref[...]                          # (1, A) f32 (hoisted)
    if need_pad_mask:                           # hoisted out of the time loop
      pad_cols = jax.lax.broadcasted_iota(jnp.int32, (Bt, P_pad), 1) >= P

    @pl.loop(0, T)
    def _step(t):
      h = h_scr[...]                            # (Bt, D) f32
      c = c_scr[...]
      h_bf = h.astype(jnp.bfloat16)
      emb_t = emb_ref[t]                        # (Bt, Em) bf16
      keep = dlens > t                          # (Bt, 1) rows still decoding

      # ----- Attention scores, chunked over pixels (no (Bt,P,A) materialization)
      att2 = (jnp.dot(h_bf, wda_ref[...], preferred_element_type=jnp.float32)
              + bda_ref[...])                   # (Bt, A) f32
      chunks = []
      for ci in range(num_chunks):              # static, effectively unrolled
        p0 = ci * Pc
        s = jnp.maximum(
            att1_ref[:, p0:p0 + Pc, :].astype(jnp.float32) + att2[:, None, :],
            0.0)                                # (Bt, Pc, A)
        chunks.append(jnp.sum(s * wfa[None], axis=-1))           # (Bt, Pc)
      att = jnp.concatenate(chunks, axis=1) + bfa_ref[...]       # (Bt, P_pad)
      if need_pad_mask:
        att = jnp.where(pad_cols, -1e30, att)   # padded pixels -> alpha == 0
      att = att - jnp.max(att, axis=1, keepdims=True)
      p_exp = jnp.exp(att)
      denom = jnp.sum(p_exp, axis=1, keepdims=True)
      # NOTE: approx reciprocal (EUP slot, ~free). Rows sum to ~1; switch to an
      # exact divide if alphas ever feed the doubly-stochastic regularizer.
      alpha = p_exp * pl.reciprocal(denom, approx=True)          # (Bt, P_pad)

      # ----- Attention-weighted encoding: chunked VPU/XLU multiply-reduce
      # (replaces the M=1 batched MXU einsum; rides on slots with slack).
      awe = jnp.zeros((Bt, E), jnp.float32)
      for ci in range(num_chunks):
        p0 = ci * Pc
        a_c = alpha[:, p0:p0 + Pc]                               # (Bt, Pc)
        e_c = enc_ref[:, p0:p0 + Pc, :].astype(jnp.float32)      # (Bt, Pc, E)
        awe = awe + jnp.sum(a_c[:, :, None] * e_c, axis=1)       # (Bt, E)

      # ----- Gate (f_beta + sigmoid) -----
      gate = jax.nn.sigmoid(
          jnp.dot(h_bf, wfb_ref[...], preferred_element_type=jnp.float32)
          + bfb_ref[...])
      awe = gate * awe

      # ----- LSTMCell (PyTorch gate order i,f,g,o); W_ih pre-split => no concat
      gates = (jnp.dot(emb_t, wie_ref[...], preferred_element_type=jnp.float32)
               + jnp.dot(awe.astype(jnp.bfloat16), wia_ref[...],
                         preferred_element_type=jnp.float32)
               + jnp.dot(h_bf, whh_ref[...], preferred_element_type=jnp.float32)
               + blstm_ref[...])
      # (keep D a multiple of 128 at deployment sizes so these slices land on
      #  128-lane boundaries; sub-128 only at toy sizes)
      i_g = jax.nn.sigmoid(gates[:, 0:D])
      f_g = jax.nn.sigmoid(gates[:, D:2 * D])
      g_g = jnp.tanh(gates[:, 2 * D:3 * D])
      o_g = jax.nn.sigmoid(gates[:, 3 * D:4 * D])
      c_new = f_g * c + i_g * g_g
      h_new = o_g * jnp.tanh(c_new)

      # Finished rows keep their frozen state (== PyTorch's shrinking batch_size_t,
      # valid because cap_lens are sorted descending -- asserted in the wrapper).
      h_scr[...] = jnp.where(keep, h_new, h)
      c_scr[...] = jnp.where(keep, c_new, c)
      hout_ref[t] = h_new.astype(hout_ref.dtype)     # fc + masking in the wrapper
      alpha_ref[t] = jnp.where(keep, alpha, 0.0)

  return kernel


# ---------------------------------------------------------------------------
# Wrapper: hoisted precompute, pallas_call plumbing, post-kernel fc projection.
# ---------------------------------------------------------------------------
def decoder_with_attention_forward(encoder_out, captions, cap_lens, params,
                                   *, batch_block=None, p_chunk=32):
  B, H, W, E = encoder_out.shape
  P = H * W
  enc = encoder_out.reshape(B, P, E).astype(jnp.float32)

  cap_lens_np = np.asarray(cap_lens)
  # Masking-as-truncation is only equivalent to PyTorch's shrinking batch_size_t
  # when captions are sorted by length (as the dataset's collate_fn guarantees).
  assert np.all(cap_lens_np[:-1] >= cap_lens_np[1:]), \
      "cap_lens must be sorted in descending order"
  dec_lens = cap_lens_np - 1
  T = int(dec_lens[0])                     # mirrors decoder_cap_lens[0].item()

  emb_tab = params["embedding"]
  Em = emb_tab.shape[1]
  D = params["W_hh"].shape[0]
  A = params["W_dec_att"].shape[1]
  V = params["W_fc"].shape[1]

  # ---- batch blocking: Bt is the M dim of every MXU matmul in the kernel.
  # Production guidance: Bt in 64..256 (multiple of 8; multiple of 128 on v5e),
  # and Bt <= B/2 on v7x so the "parallel" axis feeds both TensorCores.
  Bt = B if batch_block is None else int(batch_block)
  assert B % Bt == 0, "batch_block must divide the batch size"
  assert Bt == B or Bt % 8 == 0, "batch_block must be a multiple of 8"
  nb = B // Bt

  # ---- pixel-axis padding to a lane-dense multiple of 128; chunk size Pc
  # always divides P_pad (P_pad is a multiple of 128, Pc a divisor of 128).
  P_pad = ((P + 127) // 128) * 128
  Pc = max(c for c in (8, 16, 32, 64, 128) if c <= max(8, int(p_chunk)))
  enc_pad = jnp.pad(enc, ((0, 0), (0, P_pad - P), (0, 0)))

  # ---- time-invariant precompute (single big matmuls, outside the decode loop)
  att1_bf = (jnp.dot(enc_pad.reshape(B * P_pad, E), params["W_enc_att"])
             .reshape(B, P_pad, A) + params["b_enc_att"]).astype(jnp.bfloat16)
  mean_enc = jnp.mean(enc, axis=1)                    # mean over REAL pixels only
  h0 = jnp.dot(mean_enc, params["W_init_h"]) + params["b_init_h"]
  c0 = jnp.dot(mean_enc, params["W_init_c"]) + params["b_init_c"]

  emb = jnp.take(emb_tab, captions, axis=0)           # (B, L, Em)
  emb_tm = jnp.transpose(emb[:, :T, :], (1, 0, 2)).astype(jnp.bfloat16)  # (T,B,Em)
  dlens_2d = jnp.asarray(dec_lens, jnp.int32).reshape(B, 1)

  enc_bf = enc_pad.astype(jnp.bfloat16)

  bf16 = lambda n: params[n].astype(jnp.bfloat16)
  wda, bda = bf16("W_dec_att"), params["b_dec_att"]
  wfa, bfa = params["W_full_att"], params["b_full_att"]     # VPU-only -> f32
  wfb, bfb = bf16("W_f_beta"), params["b_f_beta"]
  wie = params["W_ih"][:Em].astype(jnp.bfloat16)            # embedding part
  wia = params["W_ih"][Em:].astype(jnp.bfloat16)            # attention part
  whh = bf16("W_hh")
  blstm = params["b_ih"] + params["b_hh"]                   # (1, 4D) f32
  weights = [wda, bda, wfa, bfa, wfb, bfb, wie, wia, whh, blstm]

  # ---- per-block VMEM footprint -> generation-aware vmem limit ----
  def _nbytes(shape, dtype):
    return int(np.prod(shape)) * np.dtype(dtype).itemsize

  fp_bytes = (
      2 * _nbytes((Bt, P_pad, E), jnp.bfloat16)        # enc  (double-buffered)
      + 2 * _nbytes((Bt, P_pad, A), jnp.bfloat16)      # att1 (double-buffered)
      + 2 * _nbytes((T, Bt, Em), jnp.bfloat16)         # emb
      + 2 * (2 * _nbytes((Bt, D), jnp.float32) + _nbytes((Bt, 1), jnp.int32))
      + sum(_nbytes(w.shape, w.dtype) for w in weights)  # single-buffered consts
      + 2 * _nbytes((T, Bt, D), jnp.bfloat16)          # hout
      + 2 * _nbytes((T, Bt, P_pad), jnp.float32)       # alpha
      + 2 * _nbytes((Bt, D), jnp.float32))             # h/c scratch
  try:
    vmem_cap = int(pltpu.get_tpu_info().vmem_capacity_bytes)
  except Exception:
    vmem_cap = 64 * 1024 * 1024                        # conservative (v7x per-TC)
  vmem_limit = int(min(max(int(1.75 * fp_bytes) + (4 << 20), 32 << 20),
                       int(0.85 * vmem_cap)))

  kernel = _make_decoder_kernel(T, P, P_pad, Pc, D)
  out_shape = (jax.ShapeDtypeStruct((T, B, D), jnp.bfloat16),
               jax.ShapeDtypeStruct((T, B, P_pad), jnp.float32))

  def _run(single_buffer_consts):
    if single_buffer_consts:
      def const_spec(arr):
        nd = arr.ndim
        return pl.BlockSpec(arr.shape, lambda b, _n=nd: (0,) * _n,
                            pipeline_mode=pl.Buffered(1))
    else:
      def const_spec(arr):
        nd = arr.ndim
        return pl.BlockSpec(arr.shape, lambda b, _n=nd: (0,) * _n)

    in_specs = ([
        pl.BlockSpec((Bt, D), lambda b: (b, 0)),            # h0
        pl.BlockSpec((Bt, D), lambda b: (b, 0)),            # c0
        pl.BlockSpec((Bt, P_pad, E), lambda b: (b, 0, 0)),  # enc  (bf16)
        pl.BlockSpec((Bt, P_pad, A), lambda b: (b, 0, 0)),  # att1 (bf16)
        pl.BlockSpec((T, Bt, Em), lambda b: (0, b, 0)),     # emb, resident over t
        pl.BlockSpec((Bt, 1), lambda b: (b, 0)),            # dec_lens
    ] + [const_spec(w) for w in weights])

    out_specs = (pl.BlockSpec((T, Bt, D), lambda b: (0, b, 0)),
                 pl.BlockSpec((T, Bt, P_pad), lambda b: (0, b, 0)))

    return pl.pallas_call(
        kernel,
        grid=(nb,),
        in_specs=in_specs,
        out_specs=out_specs,
        out_shape=out_shape,
        scratch_shapes=[pltpu.VMEM((Bt, D), jnp.float32),   # h carried across t
                        pltpu.VMEM((Bt, D), jnp.float32)],  # c carried across t
        compiler_params=pltpu.CompilerParams(
            dimension_semantics=("parallel",),
            vmem_limit_bytes=vmem_limit),
    )(h0, c0, enc_bf, att1_bf, emb_tm, dlens_2d, *weights)

  try:
    hout_tm, alpha_tm = _run(True)
  except Exception:
    # Fallback for jax versions without BlockSpec pipeline_mode support;
    # identical semantics, constants just stay default double-buffered.
    hout_tm, alpha_tm = _run(False)

  # Final fc projection batched over all (t, b) rows at bf16 MXU rate; the mask
  # reproduces predictions[:batch_size_t, t]. Dropout(p=0.5) is identity in eval.
  logits = (jnp.dot(hout_tm.reshape(T * B, D),
                    params["W_fc"].astype(jnp.bfloat16),
                    preferred_element_type=jnp.float32)
            .reshape(T, B, V) + params["b_fc"])
  keep_tb = (jnp.asarray(dec_lens, jnp.int32)[None, :] >
             jnp.arange(T, dtype=jnp.int32)[:, None])[:, :, None]
  preds_tm = jnp.where(keep_tb, logits, 0.0)

  predictions = jnp.transpose(preds_tm, (1, 0, 2))          # (B, T, V)
  alphas = jnp.transpose(alpha_tm[:, :, :P], (1, 0, 2))     # (B, T, P)
  return predictions, alphas


# ---------------------------------------------------------------------------
# Deterministic parameter init (weights stored transposed as (in, out))
# ---------------------------------------------------------------------------
def init_params(key, E, D, A, V, Em):
  ks = jax.random.split(key, 18)
  u = lambda k, shp: jax.random.uniform(k, shp, jnp.float32, -0.1, 0.1)
  return {
      "embedding": u(ks[0], (V, Em)),
      "W_enc_att": u(ks[1], (E, A)), "b_enc_att": u(ks[2], (1, A)),
      "W_dec_att": u(ks[3], (D, A)), "b_dec_att": u(ks[4], (1, A)),
      "W_full_att": u(ks[5], (1, A)), "b_full_att": u(ks[6], (1, 1)),
      "W_f_beta": u(ks[7], (D, E)), "b_f_beta": u(ks[8], (1, E)),
      "W_ih": u(ks[9], (Em + E, 4 * D)), "b_ih": u(ks[10], (1, 4 * D)),
      "W_hh": u(ks[11], (D, 4 * D)), "b_hh": u(ks[12], (1, 4 * D)),
      "W_fc": u(ks[13], (D, V)), "b_fc": jnp.zeros((1, V), jnp.float32),
      "W_init_h": u(ks[14], (E, D)), "b_init_h": u(ks[15], (1, D)),
      "W_init_c": u(ks[16], (E, D)), "b_init_c": u(ks[17], (1, D)),
  }


# ---------------------------------------------------------------------------
# Pure-numpy reference (mirrors the PyTorch forward with eval-mode dropout)
# ---------------------------------------------------------------------------
def reference_forward(encoder_out, captions, cap_lens, params):
  p = {k: np.asarray(v, np.float32) for k, v in params.items()}
  enc = np.asarray(encoder_out, np.float32)
  B, H, W, E = enc.shape
  P = H * W
  enc = enc.reshape(B, P, E)
  captions = np.asarray(captions)
  dec_lens = np.asarray(cap_lens) - 1
  T = int(dec_lens[0])
  V = p["W_fc"].shape[1]
  D = p["W_hh"].shape[0]

  def sigmoid(x):
    return 1.0 / (1.0 + np.exp(-x))

  emb = p["embedding"][captions]
  mean_enc = enc.mean(axis=1)
  h = mean_enc @ p["W_init_h"] + p["b_init_h"][0]
  c = mean_enc @ p["W_init_c"] + p["b_init_c"][0]

  preds = np.zeros((B, T, V), np.float32)
  alphas = np.zeros((B, T, P), np.float32)
  for t in range(T):
    keep = (dec_lens > t)[:, None]
    att1 = enc @ p["W_enc_att"] + p["b_enc_att"][0]
    att2 = h @ p["W_dec_att"] + p["b_dec_att"][0]
    s = np.maximum(att1 + att2[:, None, :], 0.0)
    att = (s * p["W_full_att"][0]).sum(-1) + p["b_full_att"][0, 0]
    att = att - att.max(axis=1, keepdims=True)
    e = np.exp(att)
    alpha = e / e.sum(axis=1, keepdims=True)
    awe = (enc * alpha[:, :, None]).sum(axis=1)
    gate = sigmoid(h @ p["W_f_beta"] + p["b_f_beta"][0])
    awe = gate * awe
    x = np.concatenate([emb[:, t, :], awe], axis=1)
    gates = x @ p["W_ih"] + p["b_ih"][0] + h @ p["W_hh"] + p["b_hh"][0]
    i_g = sigmoid(gates[:, :D]); f_g = sigmoid(gates[:, D:2 * D])
    g_g = np.tanh(gates[:, 2 * D:3 * D]); o_g = sigmoid(gates[:, 3 * D:4 * D])
    c_new = f_g * c + i_g * g_g
    h_new = o_g * np.tanh(c_new)
    pred = h_new @ p["W_fc"] + p["b_fc"][0]
    preds[:, t] = np.where(keep, pred, 0.0)
    alphas[:, t] = np.where(keep, alpha, 0.0)
    h = np.where(keep, h_new, h)
    c = np.where(keep, c_new, c)
  return preds, alphas


if __name__ == "__main__":
  B, Hh, Ww = 16, 4, 4                 # batch, spatial  (P = 16 pixels)
  E, D, A, Em, V = 32, 32, 32, 16, 64  # encoder/decoder/attn dims, embed, vocab
  L = 8                                # max caption length (incl. bos/eos)

  key = jax.random.PRNGKey(0)
  k_enc, k_cap, k_par = jax.random.split(key, 3)
  encoder_out = jax.random.normal(k_enc, (B, Hh, Ww, E), jnp.float32)
  captions = jax.random.randint(k_cap, (B, L), 0, V, jnp.int32)
  cap_lens = jnp.array([8, 8, 7, 7, 6, 6, 5, 5, 4, 4, 3, 3, 2, 2, 2, 2],
                       dtype=jnp.int32)                    # sorted descending

  params = init_params(k_par, E, D, A, V, Em)

  preds, alphas = decoder_with_attention_forward(
      encoder_out, captions, cap_lens, params, batch_block=8, p_chunk=32)
  jax.block_until_ready((preds, alphas))

  ref_p, ref_a = reference_forward(encoder_out, captions, cap_lens, params)
  T = int(cap_lens[0]) - 1
  assert preds.shape == (B, T, V) and alphas.shape == (B, T, Hh * Ww)
  err_p = float(np.max(np.abs(np.asarray(preds, np.float32) - ref_p)))
  err_a = float(np.max(np.abs(np.asarray(alphas, np.float32) - ref_a)))
  assert err_p < 5e-2 and err_a < 5e-2, (err_p, err_a)
  print("KERNEL_OK")
</pallas_src>

<mosaic_0001>
module attributes {stable_mosaic.version = 11 : i64} {
  func.func @kernel(%arg0: i32, %arg1: memref<8x32xf32, #tpu.memory_space<vmem>>, %arg2: memref<8x32xf32, #tpu.memory_space<vmem>>, %arg3: memref<8x128x32xbf16, #tpu.memory_space<vmem>>, %arg4: memref<8x128x32xbf16, #tpu.memory_space<vmem>>, %arg5: memref<7x8x16xbf16, #tpu.memory_space<vmem>>, %arg6: memref<8x1xi32, #tpu.memory_space<vmem>>, %arg7: memref<32x32xbf16, #tpu.memory_space<vmem>>, %arg8: memref<1x32xf32, #tpu.memory_space<vmem>>, %arg9: memref<1x32xf32, #tpu.memory_space<vmem>>, %arg10: memref<1x1xf32, #tpu.memory_space<vmem>>, %arg11: memref<32x32xbf16, #tpu.memory_space<vmem>>, %arg12: memref<1x32xf32, #tpu.memory_space<vmem>>, %arg13: memref<16x128xbf16, #tpu.memory_space<vmem>>, %arg14: memref<32x128xbf16, #tpu.memory_space<vmem>>, %arg15: memref<32x128xbf16, #tpu.memory_space<vmem>>, %arg16: memref<1x128xf32, #tpu.memory_space<vmem>>, %arg17: memref<7x8x32xbf16, #tpu.memory_space<vmem>>, %arg18: memref<7x8x128xf32, #tpu.memory_space<vmem>>, %arg19: memref<8x32xf32, #tpu.memory_space<vmem>>, %arg20: memref<8x32xf32, #tpu.memory_space<vmem>>) attributes {dimension_semantics = [#tpu.dimension_semantics<parallel>], iteration_bounds = array<i64: 2>, scalar_prefetch = 0 : i64, scratch_operands = 2 : i64, tpu.core_type = #tpu.core_type<tc>, window_params = [{transform_indices = @transform_0, window_bounds = array<i64: 8, 32>}, {transform_indices = @transform_1, window_bounds = array<i64: 8, 32>}, {transform_indices = @transform_2, window_bounds = array<i64: 8, 128, 32>}, {transform_indices = @transform_3, window_bounds = array<i64: 8, 128, 32>}, {transform_indices = @transform_4, window_bounds = array<i64: 7, 8, 16>}, {transform_indices = @transform_5, window_bounds = array<i64: 8, 1>}, {pipeline_mode = #tpu.pipeline_mode<synchronous>, transform_indices = @transform_6, window_bounds = array<i64: 32, 32>}, {pipeline_mode = #tpu.pipeline_mode<synchronous>, transform_indices = @transform_7, window_bounds = array<i64: 1, 32>}, {pipeline_mode = #tpu.pipeline_mode<synchronous>, transform_indices = @transform_8, window_bounds = array<i64: 1, 32>}, {pipeline_mode = #tpu.pipeline_mode<synchronous>, transform_indices = @transform_9, window_bounds = array<i64: 1, 1>}, {pipeline_mode = #tpu.pipeline_mode<synchronous>, transform_indices = @transform_10, window_bounds = array<i64: 32, 32>}, {pipeline_mode = #tpu.pipeline_mode<synchronous>, transform_indices = @transform_11, window_bounds = array<i64: 1, 32>}, {pipeline_mode = #tpu.pipeline_mode<synchronous>, transform_indices = @transform_12, window_bounds = array<i64: 16, 128>}, {pipeline_mode = #tpu.pipeline_mode<synchronous>, transform_indices = @transform_13, window_bounds = array<i64: 32, 128>}, {pipeline_mode = #tpu.pipeline_mode<synchronous>, transform_indices = @transform_14, window_bounds = array<i64: 32, 128>}, {pipeline_mode = #tpu.pipeline_mode<synchronous>, transform_indices = @transform_15, window_bounds = array<i64: 1, 128>}, {transform_indices = @transform_16, window_bounds = array<i64: 7, 8, 32>}, {transform_indices = @transform_17, window_bounds = array<i64: 7, 8, 128>}]} {
    %c0 = arith.constant 0 : index
    %c0_0 = arith.constant 0 : index
    %0 = vector.load %arg1[%c0, %c0_0] : memref<8x32xf32, #tpu.memory_space<vmem>>, vector<8x32xf32>
    %c0_1 = arith.constant 0 : index
    %c0_2 = arith.constant 0 : index
    %1 = vector.load %arg19[%c0_1, %c0_2] : memref<8x32xf32, #tpu.memory_space<vmem>>, vector<8x32xf32>
    tpu.vector_store %arg19[%c0_1, %c0_2], %0 {strides = array<i32>} : memref<8x32xf32, #tpu.memory_space<vmem>>, vector<8x32xf32>,
    %c0_3 = arith.constant 0 : index
    %c0_4 = arith.constant 0 : index
    %2 = vector.load %arg2[%c0_3, %c0_4] : memref<8x32xf32, #tpu.memory_space<vmem>>, vector<8x32xf32>
    %c0_5 = arith.constant 0 : index
    %c0_6 = arith.constant 0 : index
    %3 = vector.load %arg20[%c0_5, %c0_6] : memref<8x32xf32, #tpu.memory_space<vmem>>, vector<8x32xf32>
    tpu.vector_store %arg20[%c0_5, %c0_6], %2 {strides = array<i32>} : memref<8x32xf32, #tpu.memory_space<vmem>>, vector<8x32xf32>,
    %c0_7 = arith.constant 0 : index
    %c0_8 = arith.constant 0 : index
    %4 = vector.load %arg6[%c0_7, %c0_8] : memref<8x1xi32, #tpu.memory_space<vmem>>, vector<8x1xi32>
    %c0_9 = arith.constant 0 : index
    %c0_10 = arith.constant 0 : index
    %5 = vector.load %arg9[%c0_9, %c0_10] : memref<1x32xf32, #tpu.memory_space<vmem>>, vector<1x32xf32>
    %6 = tpu.iota {dimensions = array<i32: 1>} : vector<8x128xi32>
    %c16_i32 = arith.constant 16 : i32
    %7 = vector.broadcast %c16_i32 : i32 to vector<8x128xi32>
    %8 = arith.cmpi sge, %6, %7 : vector<8x128xi32>
    %c0_i32 = arith.constant 0 : i32
    %c7_i32 = arith.constant 7 : i32
    %9 = arith.addi %c0_i32, %c7_i32 : i32
    %c1_i32 = arith.constant 1 : i32
    scf.for %arg21 = %c0_i32 to %9 step %c1_i32  : i32 {
      %c1_i32_12 = arith.constant 1 : i32
      %10 = arith.muli %arg21, %c1_i32_12 : i32
      %c0_i32_13 = arith.constant 0 : i32
      %11 = arith.addi %c0_i32_13, %10 : i32
      %c0_14 = arith.constant 0 : index
      %c0_15 = arith.constant 0 : index
      %12 = vector.load %arg19[%c0_14, %c0_15] : memref<8x32xf32, #tpu.memory_space<vmem>>, vector<8x32xf32>
      %c0_16 = arith.constant 0 : index
      %c0_17 = arith.constant 0 : index
      %13 = vector.load %arg20[%c0_16, %c0_17] : memref<8x32xf32, #tpu.memory_space<vmem>>, vector<8x32xf32>
      %14 = arith.truncf %12 : vector<8x32xf32> to vector<8x32xbf16>
      %15 = arith.index_cast %11 : i32 to index
      %c0_18 = arith.constant 0 : index
      %c0_19 = arith.constant 0 : index
      %16 = vector.load %arg5[%15, %c0_18, %c0_19] : memref<7x8x16xbf16, #tpu.memory_space<vmem>>, vector<1x8x16xbf16>
      %17 = vector.shape_cast %16 : vector<1x8x16xbf16> to vector<8x16xbf16>
      %18 = vector.broadcast %11 : i32 to vector<8x1xi32>
      %19 = arith.cmpi sgt, %4, %18 : vector<8x1xi32>
      %c0_20 = arith.constant 0 : index
      %c0_21 = arith.constant 0 : index
      %20 = vector.load %arg7[%c0_20, %c0_21] : memref<32x32xbf16, #tpu.memory_space<vmem>>, vector<32x32xbf16>
      %cst = arith.constant dense<0.000000e+00> : vector<8x32xf32>
      %21 = tpu.matmul %14, %20, %cst {dimension_numbers = #tpu.dot_dimension_numbers<[1], [0], [0], [1], [0, 0, 1, 1], [], []>} : vector<8x32xbf16>, vector<32x32xbf16>, vector<8x32xf32> -> vector<8x32xf32>
      %c0_22 = arith.constant 0 : index
      %c0_23 = arith.constant 0 : index
      %22 = vector.load %arg8[%c0_22, %c0_23] : memref<1x32xf32, #tpu.memory_space<vmem>>, vector<1x32xf32>
      %23 = vector.broadcast %22 : vector<1x32xf32> to vector<8x32xf32>
      %24 = arith.addf %21, %23 : vector<8x32xf32>
      %c0_24 = arith.constant 0 : index
      %c0_25 = arith.constant 0 : index
      %c0_26 = arith.constant 0 : index
      %25 = vector.load %arg4[%c0_24, %c0_25, %c0_26] : memref<8x128x32xbf16, #tpu.memory_space<vmem>>, vector<8x32x32xbf16>
      %26 = arith.extf %25 : vector<8x32x32xbf16> to vector<8x32x32xf32>
      %27 = vector.shape_cast %24 : vector<8x32xf32> to vector<8x1x32xf32>
      %28 = vector.broadcast %27 : vector<8x1x32xf32> to vector<8x32x32xf32>
      %29 = arith.addf %26, %28 : vector<8x32x32xf32>
      %cst_27 = arith.constant 0.000000e+00 : f32
      %30 = vector.broadcast %cst_27 : f32 to vector<8x32x32xf32>
      %31 = arith.maximumf %29, %30 : vector<8x32x32xf32>
      %32 = vector.shape_cast %5 : vector<1x32xf32> to vector<1x1x32xf32>
      %33 = vector.broadcast %32 : vector<1x1x32xf32> to vector<8x32x32xf32>
      %34 = arith.mulf %31, %33 : vector<8x32x32xf32>
      %cst_28 = arith.constant dense<0.000000e+00> : vector<8x32xf32>
      %35 = vector.multi_reduction <add>, %34, %cst_28 [2] : vector<8x32x32xf32> to vector<8x32xf32>
      %c0_29 = arith.constant 0 : index
      %c32 = arith.constant 32 : index
      %c0_30 = arith.constant 0 : index
      %36 = vector.load %arg4[%c0_29, %c32, %c0_30] : memref<8x128x32xbf16, #tpu.memory_space<vmem>>, vector<8x32x32xbf16>
      %37 = arith.extf %36 : vector<8x32x32xbf16> to vector<8x32x32xf32>
      %38 = vector.shape_cast %24 : vector<8x32xf32> to vector<8x1x32xf32>
      %39 = vector.broadcast %38 : vector<8x1x32xf32> to vector<8x32x32xf32>
      %40 = arith.addf %37, %39 : vector<8x32x32xf32>
      %cst_31 = arith.constant 0.000000e+00 : f32
      %41 = vector.broadcast %cst_31 : f32 to vector<8x32x32xf32>
      %42 = arith.maximumf %40, %41 : vector<8x32x32xf32>
      %43 = vector.shape_cast %5 : vector<1x32xf32> to vector<1x1x32xf32>
      %44 = vector.broadcast %43 : vector<1x1x32xf32> to vector<8x32x32xf32>
      %45 = arith.mulf %42, %44 : vector<8x32x32xf32>
      %cst_32 = arith.constant dense<0.000000e+00> : vector<8x32xf32>
      %46 = vector.multi_reduction <add>, %45, %cst_32 [2] : vector<8x32x32xf32> to vector<8x32xf32>
      %c0_33 = arith.constant 0 : index
      %c64 = arith.constant 64 : index
      %c0_34 = arith.constant 0 : index
      %47 = vector.load %arg4[%c0_33, %c64, %c0_34] : memref<8x128x32xbf16, #tpu.memory_space<vmem>>, vector<8x32x32xbf16>
      %48 = arith.extf %47 : vector<8x32x32xbf16> to vector<8x32x32xf32>
      %49 = vector.shape_cast %24 : vector<8x32xf32> to vector<8x1x32xf32>
      %50 = vector.broadcast %49 : vector<8x1x32xf32> to vector<8x32x32xf32>
      %51 = arith.addf %48, %50 : vector<8x32x32xf32>
      %cst_35 = arith.constant 0.000000e+00 : f32
      %52 = vector.broadcast %cst_35 : f32 to vector<8x32x32xf32>
      %53 = arith.maximumf %51, %52 : vector<8x32x32xf32>
      %54 = vector.shape_cast %5 : vector<1x32xf32> to vector<1x1x32xf32>
      %55 = vector.broadcast %54 : vector<1x1x32xf32> to vector<8x32x32xf32>
      %56 = arith.mulf %53, %55 : vector<8x32x32xf32>
      %cst_36 = arith.constant dense<0.000000e+00> : vector<8x32xf32>
      %57 = vector.multi_reduction <add>, %56, %cst_36 [2] : vector<8x32x32xf32> to vector<8x32xf32>
      %c0_37 = arith.constant 0 : index
      %c96 = arith.constant 96 : index
      %c0_38 = arith.constant 0 : index
      %58 = vector.load %arg4[%c0_37, %c96, %c0_38] : memref<8x128x32xbf16, #tpu.memory_space<vmem>>, vector<8x32x32xbf16>
      %59 = arith.extf %58 : vector<8x32x32xbf16> to vector<8x32x32xf32>
      %60 = vector.shape_cast %24 : vector<8x32xf32> to vector<8x1x32xf32>
      %61 = vector.broadcast %60 : vector<8x1x32xf32> to vector<8x32x32xf32>
      %62 = arith.addf %59, %61 : vector<8x32x32xf32>
      %cst_39 = arith.constant 0.000000e+00 : f32
      %63 = vector.broadcast %cst_39 : f32 to vector<8x32x32xf32>
      %64 = arith.maximumf %62, %63 : vector<8x32x32xf32>
      %65 = vector.shape_cast %5 : vector<1x32xf32> to vector<1x1x32xf32>
      %66 = vector.broadcast %65 : vector<1x1x32xf32> to vector<8x32x32xf32>
      %67 = arith.mulf %64, %66 : vector<8x32x32xf32>
      %cst_40 = arith.constant dense<0.000000e+00> : vector<8x32xf32>
      %68 = vector.multi_reduction <add>, %67, %cst_40 [2] : vector<8x32x32xf32> to vector<8x32xf32>
      %69 = tpu.concatenate %35, %46, %57, %68 in 1 : vector<8x32xf32>, vector<8x32xf32>, vector<8x32xf32>, vector<8x32xf32> -> vector<8x128xf32>
      %c0_41 = arith.constant 0 : index
      %c0_42 = arith.constant 0 : index
      %70 = vector.load %arg10[%c0_41, %c0_42] : memref<1x1xf32, #tpu.memory_space<vmem>>, vector<1x1xf32>
      %71 = vector.broadcast %70 : vector<1x1xf32> to vector<8x128xf32>
      %72 = arith.addf %69, %71 : vector<8x128xf32>
      %cst_43 = arith.constant -1.000000e+30 : f32
      %73 = vector.broadcast %cst_43 : f32 to vector<8x128xf32>
      %74 = arith.select %8, %73, %72 : vector<8x128xi1>, vector<8x128xf32>
      %cst_44 = arith.constant dense<0xFF800000> : vector<8xf32>
      %75 = vector.multi_reduction <maximumf>, %74, %cst_44 [1] : vector<8x128xf32> to vector<8xf32>
      %76 = vector.shape_cast %75 : vector<8xf32> to vector<8x1xf32>
      %77 = vector.broadcast %76 : vector<8x1xf32> to vector<8x128xf32>
      %78 = arith.subf %74, %77 : vector<8x128xf32>
      %79 = math.exp %78 : vector<8x128xf32>
      %cst_45 = arith.constant dense<0.000000e+00> : vector<8xf32>
      %80 = vector.multi_reduction <add>, %79, %cst_45 [1] : vector<8x128xf32> to vector<8xf32>
      %81 = vector.shape_cast %80 : vector<8xf32> to vector<8x1xf32>
      %82 = tpu.reciprocal %81 {approx = true} : vector<8x1xf32> -> vector<8x1xf32>
      %83 = vector.broadcast %82 : vector<8x1xf32> to vector<8x128xf32>
      %84 = arith.mulf %79, %83 : vector<8x128xf32>
      %cst_46 = arith.constant 0.000000e+00 : f32
      %85 = vector.broadcast %cst_46 : f32 to vector<8x32xf32>
      %86 = vector.extract_strided_slice %84 {offsets = [0, 0], sizes = [8, 32], strides = [1, 1]} : vector<8x128xf32> to vector<8x32xf32>
      %c0_47 = arith.constant 0 : index
      %c0_48 = arith.constant 0 : index
      %c0_49 = arith.constant 0 : index
      %87 = vector.load %arg3[%c0_47, %c0_48, %c0_49] : memref<8x128x32xbf16, #tpu.memory_space<vmem>>, vector<8x32x32xbf16>
      %88 = arith.extf %87 : vector<8x32x32xbf16> to vector<8x32x32xf32>
      %89 = vector.shape_cast %86 : vector<8x32xf32> to vector<8x32x1xf32>
      %90 = vector.broadcast %89 : vector<8x32x1xf32> to vector<8x32x32xf32>
      %91 = arith.mulf %90, %88 : vector<8x32x32xf32>
      %cst_50 = arith.constant dense<0.000000e+00> : vector<8x32xf32>
      %92 = vector.multi_reduction <add>, %91, %cst_50 [1] : vector<8x32x32xf32> to vector<8x32xf32>
      %93 = arith.addf %85, %92 : vector<8x32xf32>
      %94 = vector.extract_strided_slice %84 {offsets = [0, 32], sizes = [8, 32], strides = [1, 1]} : vector<8x128xf32> to vector<8x32xf32>
      %c0_51 = arith.constant 0 : index
      %c32_52 = arith.constant 32 : index
      %c0_53 = arith.constant 0 : index
      %95 = vector.load %arg3[%c0_51, %c32_52, %c0_53] : memref<8x128x32xbf16, #tpu.memory_space<vmem>>, vector<8x32x32xbf16>
      %96 = arith.extf %95 : vector<8x32x32xbf16> to vector<8x32x32xf32>
      %97 = vector.shape_cast %94 : vector<8x32xf32> to vector<8x32x1xf32>
      %98 = vector.broadcast %97 : vector<8x32x1xf32> to vector<8x32x32xf32>
      %99 = arith.mulf %98, %96 : vector<8x32x32xf32>
      %cst_54 = arith.constant dense<0.000000e+00> : vector<8x32xf32>
      %100 = vector.multi_reduction <add>, %99, %cst_54 [1] : vector<8x32x32xf32> to vector<8x32xf32>
      %101 = arith.addf %93, %100 : vector<8x32xf32>
      %102 = vector.extract_strided_slice %84 {offsets = [0, 64], sizes = [8, 32], strides = [1, 1]} : vector<8x128xf32> to vector<8x32xf32>
      %c0_55 = arith.constant 0 : index
      %c64_56 = arith.constant 64 : index
      %c0_57 = arith.constant 0 : index
      %103 = vector.load %arg3[%c0_55, %c64_56, %c0_57] : memref<8x128x32xbf16, #tpu.memory_space<vmem>>, vector<8x32x32xbf16>
      %104 = arith.extf %103 : vector<8x32x32xbf16> to vector<8x32x32xf32>
      %105 = vector.shape_cast %102 : vector<8x32xf32> to vector<8x32x1xf32>
      %106 = vector.broadcast %105 : vector<8x32x1xf32> to vector<8x32x32xf32>
      %107 = arith.mulf %106, %104 : vector<8x32x32xf32>
      %cst_58 = arith.constant dense<0.000000e+00> : vector<8x32xf32>
      %108 = vector.multi_reduction <add>, %107, %cst_58 [1] : vector<8x32x32xf32> to vector<8x32xf32>
      %109 = arith.addf %101, %108 : vector<8x32xf32>
      %110 = vector.extract_strided_slice %84 {offsets = [0, 96], sizes = [8, 32], strides = [1, 1]} : vector<8x128xf32> to vector<8x32xf32>
      %c0_59 = arith.constant 0 : index
      %c96_60 = arith.constant 96 : index
      %c0_61 = arith.constant 0 : index
      %111 = vector.load %arg3[%c0_59, %c96_60, %c0_61] : memref<8x128x32xbf16, #tpu.memory_space<vmem>>, vector<8x32x32xbf16>
      %112 = arith.extf %111 : vector<8x32x32xbf16> to vector<8x32x32xf32>
      %113 = vector.shape_cast %110 : vector<8x32xf32> to vector<8x32x1xf32>
      %114 = vector.broadcast %113 : vector<8x32x1xf32> to vector<8x32x32xf32>
      %115 = arith.mulf %114, %112 : vector<8x32x32xf32>
      %cst_62 = arith.constant dense<0.000000e+00> : vector<8x32xf32>
      %116 = vector.multi_reduction <add>, %115, %cst_62 [1] : vector<8x32x32xf32> to vector<8x32xf32>
      %117 = arith.addf %109, %116 : vector<8x32xf32>
      %c0_63 = arith.constant 0 : index
      %c0_64 = arith.constant 0 : index
      %118 = vector.load %arg11[%c0_63, %c0_64] : memref<32x32xbf16, #tpu.memory_space<vmem>>, vector<32x32xbf16>
      %cst_65 = arith.constant dense<0.000000e+00> : vector<8x32xf32>
      %119 = tpu.matmul %14, %118, %cst_65 {dimension_numbers = #tpu.dot_dimension_numbers<[1], [0], [0], [1], [0, 0, 1, 1], [], []>} : vector<8x32xbf16>, vector<32x32xbf16>, vector<8x32xf32> -> vector<8x32xf32>
      %c0_66 = arith.constant 0 : index
      %c0_67 = arith.constant 0 : index
      %120 = vector.load %arg12[%c0_66, %c0_67] : memref<1x32xf32, #tpu.memory_space<vmem>>, vector<1x32xf32>
      %121 = vector.broadcast %120 : vector<1x32xf32> to vector<8x32xf32>
      %122 = arith.addf %119, %121 : vector<8x32xf32>
      %123 = arith.negf %122 : vector<8x32xf32>
      %124 = math.exp %123 : vector<8x32xf32>
      %cst_68 = arith.constant 1.000000e+00 : f32
      %125 = vector.broadcast %cst_68 : f32 to vector<8x32xf32>
      %126 = arith.addf %125, %124 : vector<8x32xf32>
      %127 = arith.divf %125, %126 : vector<8x32xf32>
      %128 = arith.mulf %127, %117 : vector<8x32xf32>
      %c0_69 = arith.constant 0 : index
      %c0_70 = arith.constant 0 : index
      %129 = vector.load %arg13[%c0_69, %c0_70] : memref<16x128xbf16, #tpu.memory_space<vmem>>, vector<16x128xbf16>
      %cst_71 = arith.constant dense<0.000000e+00> : vector<8x128xf32>
      %130 = tpu.matmul %17, %129, %cst_71 {dimension_numbers = #tpu.dot_dimension_numbers<[1], [0], [0], [1], [0, 0, 1, 1], [], []>} : vector<8x16xbf16>, vector<16x128xbf16>, vector<8x128xf32> -> vector<8x128xf32>
      %131 = arith.truncf %128 : vector<8x32xf32> to vector<8x32xbf16>
      %c0_72 = arith.constant 0 : index
      %c0_73 = arith.constant 0 : index
      %132 = vector.load %arg14[%c0_72, %c0_73] : memref<32x128xbf16, #tpu.memory_space<vmem>>, vector<32x128xbf16>
      %cst_74 = arith.constant dense<0.000000e+00> : vector<8x128xf32>
      %133 = tpu.matmul %131, %132, %cst_74 {dimension_numbers = #tpu.dot_dimension_numbers<[1], [0], [0], [1], [0, 0, 1, 1], [], []>} : vector<8x32xbf16>, vector<32x128xbf16>, vector<8x128xf32> -> vector<8x128xf32>
      %134 = arith.addf %130, %133 : vector<8x128xf32>
      %c0_75 = arith.constant 0 : index
      %c0_76 = arith.constant 0 : index
      %135 = vector.load %arg15[%c0_75, %c0_76] : memref<32x128xbf16, #tpu.memory_space<vmem>>, vector<32x128xbf16>
      %cst_77 = arith.constant dense<0.000000e+00> : vector<8x128xf32>
      %136 = tpu.matmul %14, %135, %cst_77 {dimension_numbers = #tpu.dot_dimension_numbers<[1], [0], [0], [1], [0, 0, 1, 1], [], []>} : vector<8x32xbf16>, vector<32x128xbf16>, vector<8x128xf32> -> vector<8x128xf32>
      %137 = arith.addf %134, %136 : vector<8x128xf32>
      %c0_78 = arith.constant 0 : index
      %c0_79 = arith.constant 0 : index
      %138 = vector.load %arg16[%c0_78, %c0_79] : memref<1x128xf32, #tpu.memory_space<vmem>>, vector<1x128xf32>
      %139 = vector.broadcast %138 : vector<1x128xf32> to vector<8x128xf32>
      %140 = arith.addf %137, %139 : vector<8x128xf32>
      %141 = vector.extract_strided_slice %140 {offsets = [0, 0], sizes = [8, 32], strides = [1, 1]} : vector<8x128xf32> to vector<8x32xf32>
      %142 = arith.negf %141 : vector<8x32xf32>
      %143 = math.exp %142 : vector<8x32xf32>
      %cst_80 = arith.constant 1.000000e+00 : f32
      %144 = vector.broadcast %cst_80 : f32 to vector<8x32xf32>
      %145 = arith.addf %144, %143 : vector<8x32xf32>
      %146 = arith.divf %144, %145 : vector<8x32xf32>
      %147 = vector.extract_strided_slice %140 {offsets = [0, 32], sizes = [8, 32], strides = [1, 1]} : vector<8x128xf32> to vector<8x32xf32>
      %148 = arith.negf %147 : vector<8x32xf32>
      %149 = math.exp %148 : vector<8x32xf32>
      %cst_81 = arith.constant 1.000000e+00 : f32
      %150 = vector.broadcast %cst_81 : f32 to vector<8x32xf32>
      %151 = arith.addf %150, %149 : vector<8x32xf32>
      %152 = arith.divf %150, %151 : vector<8x32xf32>
      %153 = vector.extract_strided_slice %140 {offsets = [0, 64], sizes = [8, 32], strides = [1, 1]} : vector<8x128xf32> to vector<8x32xf32>
      %154 = math.tanh %153 : vector<8x32xf32>
      %155 = vector.extract_strided_slice %140 {offsets = [0, 96], sizes = [8, 32], strides = [1, 1]} : vector<8x128xf32> to vector<8x32xf32>
      %156 = arith.negf %155 : vector<8x32xf32>
      %157 = math.exp %156 : vector<8x32xf32>
      %cst_82 = arith.constant 1.000000e+00 : f32
      %158 = vector.broadcast %cst_82 : f32 to vector<8x32xf32>
      %159 = arith.addf %158, %157 : vector<8x32xf32>
      %160 = arith.divf %158, %159 : vector<8x32xf32>
      %161 = arith.mulf %152, %13 : vector<8x32xf32>
      %162 = arith.mulf %146, %154 : vector<8x32xf32>
      %163 = arith.addf %161, %162 : vector<8x32xf32>
      %164 = math.tanh %163 : vector<8x32xf32>
      %165 = arith.mulf %160, %164 : vector<8x32xf32>
      %166 = vector.shape_cast %19 : vector<8x1xi1> to vector<8x1xi1>
      %167 = vector.broadcast %166 : vector<8x1xi1> to vector<8x32xi1>
      %168 = arith.select %167, %165, %12 : vector<8x32xi1>, vector<8x32xf32>
      %c0_83 = arith.constant 0 : index
      %c0_84 = arith.constant 0 : index
      %169 = vector.load %arg19[%c0_83, %c0_84] : memref<8x32xf32, #tpu.memory_space<vmem>>, vector<8x32xf32>
      tpu.vector_store %arg19[%c0_83, %c0_84], %168 {strides = array<i32>} : memref<8x32xf32, #tpu.memory_space<vmem>>, vector<8x32xf32>,
      %170 = vector.shape_cast %19 : vector<8x1xi1> to vector<8x1xi1>
      %171 = vector.broadcast %170 : vector<8x1xi1> to vector<8x32xi1>
      %172 = arith.select %171, %163, %13 : vector<8x32xi1>, vector<8x32xf32>
      %c0_85 = arith.constant 0 : index
      %c0_86 = arith.constant 0 : index
      %173 = vector.load %arg20[%c0_85, %c0_86] : memref<8x32xf32, #tpu.memory_space<vmem>>, vector<8x32xf32>
      tpu.vector_store %arg20[%c0_85, %c0_86], %172 {strides = array<i32>} : memref<8x32xf32, #tpu.memory_space<vmem>>, vector<8x32xf32>,
      %174 = arith.truncf %165 : vector<8x32xf32> to vector<8x32xbf16>
      %175 = arith.index_cast %11 : i32 to index
      %c0_87 = arith.constant 0 : index
      %c0_88 = arith.constant 0 : index
      %176 = vector.load %arg17[%175, %c0_87, %c0_88] : memref<7x8x32xbf16, #tpu.memory_space<vmem>>, vector<1x8x32xbf16>
      %177 = vector.shape_cast %176 : vector<1x8x32xbf16> to vector<8x32xbf16>
      %178 = vector.shape_cast %174 : vector<8x32xbf16> to vector<1x8x32xbf16>
      tpu.vector_store %arg17[%175, %c0_87, %c0_88], %178 {strides = array<i32>} : memref<7x8x32xbf16, #tpu.memory_space<vmem>>, vector<1x8x32xbf16>,
      %cst_89 = arith.constant 0.000000e+00 : f32
      %179 = vector.shape_cast %19 : vector<8x1xi1> to vector<8x1xi1>
      %180 = vector.broadcast %179 : vector<8x1xi1> to vector<8x128xi1>
      %181 = vector.broadcast %cst_89 : f32 to vector<8x128xf32>
      %182 = arith.select %180, %84, %181 : vector<8x128xi1>, vector<8x128xf32>
      %183 = arith.index_cast %11 : i32 to index
      %c0_90 = arith.constant 0 : index
      %c0_91 = arith.constant 0 : index
      %184 = vector.load %arg18[%183, %c0_90, %c0_91] : memref<7x8x128xf32, #tpu.memory_space<vmem>>, vector<1x8x128xf32>
      %185 = vector.shape_cast %184 : vector<1x8x128xf32> to vector<8x128xf32>
      %186 = vector.shape_cast %182 : vector<8x128xf32> to vector<1x8x128xf32>
      tpu.vector_store %arg18[%183, %c0_90, %c0_91], %186 {strides = array<i32>} : memref<7x8x128xf32, #tpu.memory_space<vmem>>, vector<1x8x128xf32>,
    }
    %c7_i32_11 = arith.constant 7 : i32
    return
  }
  func.func @transform_0(%arg0: i32) -> (i32, i32) {
    %c0_i32 = arith.constant 0 : i32
    %c0_i32_0 = arith.constant 0 : i32
    return %arg0, %c0_i32 : i32, i32
  }
  func.func @transform_1(%arg0: i32) -> (i32, i32) {
    %c0_i32 = arith.constant 0 : i32
    %c0_i32_0 = arith.constant 0 : i32
    return %arg0, %c0_i32 : i32, i32
  }
  func.func @transform_2(%arg0: i32) -> (i32, i32, i32) {
    %c0_i32 = arith.constant 0 : i32
    %c0_i32_0 = arith.constant 0 : i32
    %c0_i32_1 = arith.constant 0 : i32
    return %arg0, %c0_i32, %c0_i32_0 : i32, i32, i32
  }
  func.func @transform_3(%arg0: i32) -> (i32, i32, i32) {
    %c0_i32 = arith.constant 0 : i32
    %c0_i32_0 = arith.constant 0 : i32
    %c0_i32_1 = arith.constant 0 : i32
    return %arg0, %c0_i32, %c0_i32_0 : i32, i32, i32
  }
  func.func @transform_4(%arg0: i32) -> (i32, i32, i32) {
    %c0_i32 = arith.constant 0 : i32
    %c0_i32_0 = arith.constant 0 : i32
    %c0_i32_1 = arith.constant 0 : i32
    return %c0_i32, %arg0, %c0_i32_0 : i32, i32, i32
  }
  func.func @transform_5(%arg0: i32) -> (i32, i32) {
    %c0_i32 = arith.constant 0 : i32
    %c0_i32_0 = arith.constant 0 : i32
    return %arg0, %c0_i32 : i32, i32
  }
  func.func @transform_6(%arg0: i32) -> (i32, i32) {
    %c0_i32 = arith.constant 0 : i32
    %c0_i32_0 = arith.constant 0 : i32
    %c0_i32_1 = arith.constant 0 : i32
    return %c0_i32, %c0_i32_0 : i32, i32
  }
  func.func @transform_7(%arg0: i32) -> (i32, i32) {
    %c0_i32 = arith.constant 0 : i32
    %c0_i32_0 = arith.constant 0 : i32
    %c0_i32_1 = arith.constant 0 : i32
    return %c0_i32, %c0_i32_0 : i32, i32
  }
  func.func @transform_8(%arg0: i32) -> (i32, i32) {
    %c0_i32 = arith.constant 0 : i32
    %c0_i32_0 = arith.constant 0 : i32
    %c0_i32_1 = arith.constant 0 : i32
    return %c0_i32, %c0_i32_0 : i32, i32
  }
  func.func @transform_9(%arg0: i32) -> (i32, i32) {
    %c0_i32 = arith.constant 0 : i32
    %c0_i32_0 = arith.constant 0 : i32
    %c0_i32_1 = arith.constant 0 : i32
    return %c0_i32, %c0_i32_0 : i32, i32
  }
  func.func @transform_10(%arg0: i32) -> (i32, i32) {
    %c0_i32 = arith.constant 0 : i32
    %c0_i32_0 = arith.constant 0 : i32
    %c0_i32_1 = arith.constant 0 : i32
    return %c0_i32, %c0_i32_0 : i32, i32
  }
  func.func @transform_11(%arg0: i32) -> (i32, i32) {
    %c0_i32 = arith.constant 0 : i32
    %c0_i32_0 = arith.constant 0 : i32
    %c0_i32_1 = arith.constant 0 : i32
    return %c0_i32, %c0_i32_0 : i32, i32
  }
  func.func @transform_12(%arg0: i32) -> (i32, i32) {
    %c0_i32 = arith.constant 0 : i32
    %c0_i32_0 = arith.constant 0 : i32
    %c0_i32_1 = arith.constant 0 : i32
    return %c0_i32, %c0_i32_0 : i32, i32
  }
  func.func @transform_13(%arg0: i32) -> (i32, i32) {
    %c0_i32 = arith.constant 0 : i32
    %c0_i32_0 = arith.constant 0 : i32
    %c0_i32_1 = arith.constant 0 : i32
    return %c0_i32, %c0_i32_0 : i32, i32
  }
  func.func @transform_14(%arg0: i32) -> (i32, i32) {
    %c0_i32 = arith.constant 0 : i32
    %c0_i32_0 = arith.constant 0 : i32
    %c0_i32_1 = arith.constant 0 : i32
    return %c0_i32, %c0_i32_0 : i32, i32
  }
  func.func @transform_15(%arg0: i32) -> (i32, i32) {
    %c0_i32 = arith.constant 0 : i32
    %c0_i32_0 = arith.constant 0 : i32
    %c0_i32_1 = arith.constant 0 : i32
    return %c0_i32, %c0_i32_0 : i32, i32
  }
  func.func @transform_16(%arg0: i32) -> (i32, i32, i32) {
    %c0_i32 = arith.constant 0 : i32
    %c0_i32_0 = arith.constant 0 : i32
    %c0_i32_1 = arith.constant 0 : i32
    return %c0_i32, %arg0, %c0_i32_0 : i32, i32, i32
  }
  func.func @transform_17(%arg0: i32) -> (i32, i32, i32) {
    %c0_i32 = arith.constant 0 : i32
    %c0_i32_0 = arith.constant 0 : i32
    %c0_i32_1 = arith.constant 0 : i32
    return %c0_i32, %arg0, %c0_i32_0 : i32, i32, i32
  }
}

module attributes {stable_mosaic.version = 11 : i64} {
  func.func @kernel(%arg0: i32, %arg1: memref<8x32xf32, #tpu.memory_space<vmem>>, %arg2: memref<8x32xf32, #tpu.memory_space<vmem>>, %arg3: memref<8x128x32xbf16, #tpu.memory_space<vmem>>, %arg4: memref<8x128x32xbf16, #tpu.memory_space<vmem>>, %arg5: memref<7x8x16xbf16, #tpu.memory_space<vmem>>, %arg6: memref<8x1xi32, #tpu.memory_space<vmem>>, %arg7: memref<32x32xbf16, #tpu.memory_space<vmem>>, %arg8: memref<1x32xf32, #tpu.memory_space<vmem>>, %arg9: memref<1x32xf32, #tpu.memory_space<vmem>>, %arg10: memref<1x1xf32, #tpu.memory_space<vmem>>, %arg11: memref<32x32xbf16, #tpu.memory_space<vmem>>, %arg12: memref<1x32xf32, #tpu.memory_space<vmem>>, %arg13: memref<16x128xbf16, #tpu.memory_space<vmem>>, %arg14: memref<32x128xbf16, #tpu.memory_space<vmem>>, %arg15: memref<32x128xbf16, #tpu.memory_space<vmem>>, %arg16: memref<1x128xf32, #tpu.memory_space<vmem>>, %arg17: memref<7x8x32xbf16, #tpu.memory_space<vmem>>, %arg18: memref<7x8x128xf32, #tpu.memory_space<vmem>>, %arg19: memref<8x32xf32, #tpu.memory_space<vmem>>, %arg20: memref<8x32xf32, #tpu.memory_space<vmem>>) attributes {dimension_semantics = [#tpu.dimension_semantics<parallel>], iteration_bounds = array<i64: 2>, scalar_prefetch = 0 : i64, scratch_operands = 2 : i64, tpu.core_type = #tpu.core_type<tc>, window_params = [{transform_indices = @transform_0, window_bounds = array<i64: 8, 32>}, {transform_indices = @transform_1, window_bounds = array<i64: 8, 32>}, {transform_indices = @transform_2, window_bounds = array<i64: 8, 128, 32>}, {transform_indices = @transform_3, window_bounds = array<i64: 8, 128, 32>}, {transform_indices = @transform_4, window_bounds = array<i64: 7, 8, 16>}, {transform_indices = @transform_5, window_bounds = array<i64: 8, 1>}, {pipeline_mode = #tpu.pipeline_mode<synchronous>, transform_indices = @transform_6, window_bounds = array<i64: 32, 32>}, {pipeline_mode = #tpu.pipeline_mode<synchronous>, transform_indices = @transform_7, window_bounds = array<i64: 1, 32>}, {pipeline_mode = #tpu.pipeline_mode<synchronous>, transform_indices = @transform_8, window_bounds = array<i64: 1, 32>}, {pipeline_mode = #tpu.pipeline_mode<synchronous>, transform_indices = @transform_9, window_bounds = array<i64: 1, 1>}, {pipeline_mode = #tpu.pipeline_mode<synchronous>, transform_indices = @transform_10, window_bounds = array<i64: 32, 32>}, {pipeline_mode = #tpu.pipeline_mode<synchronous>, transform_indices = @transform_11, window_bounds = array<i64: 1, 32>}, {pipeline_mode = #tpu.pipeline_mode<synchronous>, transform_indices = @transform_12, window_bounds = array<i64: 16, 128>}, {pipeline_mode = #tpu.pipeline_mode<synchronous>, transform_indices = @transform_13, window_bounds = array<i64: 32, 128>}, {pipeline_mode = #tpu.pipeline_mode<synchronous>, transform_indices = @transform_14, window_bounds = array<i64: 32, 128>}, {pipeline_mode = #tpu.pipeline_mode<synchronous>, transform_indices = @transform_15, window_bounds = array<i64: 1, 128>}, {transform_indices = @transform_16, window_bounds = array<i64: 7, 8, 32>}, {transform_indices = @transform_17, window_bounds = array<i64: 7, 8, 128>}]} {
    %c0 = arith.constant 0 : index
    %c0_0 = arith.constant 0 : index
    %0 = vector.load %arg1[%c0, %c0_0] : memref<8x32xf32, #tpu.memory_space<vmem>>, vector<8x32xf32>
    %c0_1 = arith.constant 0 : index
    %c0_2 = arith.constant 0 : index
    %1 = vector.load %arg19[%c0_1, %c0_2] : memref<8x32xf32, #tpu.memory_space<vmem>>, vector<8x32xf32>
    tpu.vector_store %arg19[%c0_1, %c0_2], %0 {strides = array<i32>} : memref<8x32xf32, #tpu.memory_space<vmem>>, vector<8x32xf32>,
    %c0_3 = arith.constant 0 : index
    %c0_4 = arith.constant 0 : index
    %2 = vector.load %arg2[%c0_3, %c0_4] : memref<8x32xf32, #tpu.memory_space<vmem>>, vector<8x32xf32>
    %c0_5 = arith.constant 0 : index
    %c0_6 = arith.constant 0 : index
    %3 = vector.load %arg20[%c0_5, %c0_6] : memref<8x32xf32, #tpu.memory_space<vmem>>, vector<8x32xf32>
    tpu.vector_store %arg20[%c0_5, %c0_6], %2 {strides = array<i32>} : memref<8x32xf32, #tpu.memory_space<vmem>>, vector<8x32xf32>,
    %c0_7 = arith.constant 0 : index
    %c0_8 = arith.constant 0 : index
    %4 = vector.load %arg6[%c0_7, %c0_8] : memref<8x1xi32, #tpu.memory_space<vmem>>, vector<8x1xi32>
    %c0_9 = arith.constant 0 : index
    %c0_10 = arith.constant 0 : index
    %5 = vector.load %arg9[%c0_9, %c0_10] : memref<1x32xf32, #tpu.memory_space<vmem>>, vector<1x32xf32>
    %6 = tpu.iota {dimensions = array<i32: 1>} : vector<8x128xi32>
    %c16_i32 = arith.constant 16 : i32
    %7 = vector.broadcast %c16_i32 : i32 to vector<8x128xi32>
    %8 = arith.cmpi sge, %6, %7 : vector<8x128xi32>
    %c0_i32 = arith.constant 0 : i32
    %c7_i32 = arith.constant 7 : i32
    %9 = arith.addi %c0_i32, %c7_i32 : i32
    %c1_i32 = arith.constant 1 : i32
    scf.for %arg21 = %c0_i32 to %9 step %c1_i32  : i32 {
      %c1_i32_12 = arith.constant 1 : i32
      %10 = arith.muli %arg21, %c1_i32_12 : i32
      %c0_i32_13 = arith.constant 0 : i32
      %11 = arith.addi %c0_i32_13, %10 : i32
      %c0_14 = arith.constant 0 : index
      %c0_15 = arith.constant 0 : index
      %12 = vector.load %arg19[%c0_14, %c0_15] : memref<8x32xf32, #tpu.memory_space<vmem>>, vector<8x32xf32>
      %c0_16 = arith.constant 0 : index
      %c0_17 = arith.constant 0 : index
      %13 = vector.load %arg20[%c0_16, %c0_17] : memref<8x32xf32, #tpu.memory_space<vmem>>, vector<8x32xf32>
      %14 = arith.truncf %12 : vector<8x32xf32> to vector<8x32xbf16>
      %15 = arith.index_cast %11 : i32 to index
      %c0_18 = arith.constant 0 : index
      %c0_19 = arith.constant 0 : index
      %16 = vector.load %arg5[%15, %c0_18, %c0_19] : memref<7x8x16xbf16, #tpu.memory_space<vmem>>, vector<1x8x16xbf16>
      %17 = vector.shape_cast %16 : vector<1x8x16xbf16> to vector<8x16xbf16>
      %18 = vector.broadcast %11 : i32 to vector<8x1xi32>
      %19 = arith.cmpi sgt, %4, %18 : vector<8x1xi32>
      %c0_20 = arith.constant 0 : index
      %c0_21 = arith.constant 0 : index
      %20 = vector.load %arg7[%c0_20, %c0_21] : memref<32x32xbf16, #tpu.memory_space<vmem>>, vector<32x32xbf16>
      %cst = arith.constant dense<0.000000e+00> : vector<8x32xf32>
      %21 = tpu.matmul %14, %20, %cst {dimension_numbers = #tpu.dot_dimension_numbers<[1], [0], [0], [1], [0, 0, 1, 1], [], []>} : vector<8x32xbf16>, vector<32x32xbf16>, vector<8x32xf32> -> vector<8x32xf32>
      %c0_22 = arith.constant 0 : index
      %c0_23 = arith.constant 0 : index
      %22 = vector.load %arg8[%c0_22, %c0_23] : memref<1x32xf32, #tpu.memory_space<vmem>>, vector<1x32xf32>
      %23 = vector.broadcast %22 : vector<1x32xf32> to vector<8x32xf32>
      %24 = arith.addf %21, %23 : vector<8x32xf32>
      %c0_24 = arith.constant 0 : index
      %c0_25 = arith.constant 0 : index
      %c0_26 = arith.constant 0 : index
      %25 = vector.load %arg4[%c0_24, %c0_25, %c0_26] : memref<8x128x32xbf16, #tpu.memory_space<vmem>>, vector<8x32x32xbf16>
      %26 = arith.extf %25 : vector<8x32x32xbf16> to vector<8x32x32xf32>
      %27 = vector.shape_cast %24 : vector<8x32xf32> to vector<8x1x32xf32>
      %28 = vector.broadcast %27 : vector<8x1x32xf32> to vector<8x32x32xf32>
      %29 = arith.addf %26, %28 : vector<8x32x32xf32>
      %cst_27 = arith.constant 0.000000e+00 : f32
      %30 = vector.broadcast %cst_27 : f32 to vector<8x32x32xf32>
      %31 = arith.maximumf %29, %30 : vector<8x32x32xf32>
      %32 = vector.shape_cast %5 : vector<1x32xf32> to vector<1x1x32xf32>
      %33 = vector.broadcast %32 : vector<1x1x32xf32> to vector<8x32x32xf32>
      %34 = arith.mulf %31, %33 : vector<8x32x32xf32>
      %cst_28 = arith.constant dense<0.000000e+00> : vector<8x32xf32>
      %35 = vector.multi_reduction <add>, %34, %cst_28 [2] : vector<8x32x32xf32> to vector<8x32xf32>
      %c0_29 = arith.constant 0 : index
      %c32 = arith.constant 32 : index
      %c0_30 = arith.constant 0 : index
      %36 = vector.load %arg4[%c0_29, %c32, %c0_30] : memref<8x128x32xbf16, #tpu.memory_space<vmem>>, vector<8x32x32xbf16>
      %37 = arith.extf %36 : vector<8x32x32xbf16> to vector<8x32x32xf32>
      %38 = vector.shape_cast %24 : vector<8x32xf32> to vector<8x1x32xf32>
      %39 = vector.broadcast %38 : vector<8x1x32xf32> to vector<8x32x32xf32>
      %40 = arith.addf %37, %39 : vector<8x32x32xf32>
      %cst_31 = arith.constant 0.000000e+00 : f32
      %41 = vector.broadcast %cst_31 : f32 to vector<8x32x32xf32>
      %42 = arith.maximumf %40, %41 : vector<8x32x32xf32>
      %43 = vector.shape_cast %5 : vector<1x32xf32> to vector<1x1x32xf32>
      %44 = vector.broadcast %43 : vector<1x1x32xf32> to vector<8x32x32xf32>
      %45 = arith.mulf %42, %44 : vector<8x32x32xf32>
      %cst_32 = arith.constant dense<0.000000e+00> : vector<8x32xf32>
      %46 = vector.multi_reduction <add>, %45, %cst_32 [2] : vector<8x32x32xf32> to vector<8x32xf32>
      %c0_33 = arith.constant 0 : index
      %c64 = arith.constant 64 : index
      %c0_34 = arith.constant 0 : index
      %47 = vector.load %arg4[%c0_33, %c64, %c0_34] : memref<8x128x32xbf16, #tpu.memory_space<vmem>>, vector<8x32x32xbf16>
      %48 = arith.extf %47 : vector<8x32x32xbf16> to vector<8x32x32xf32>
      %49 = vector.shape_cast %24 : vector<8x32xf32> to vector<8x1x32xf32>
      %50 = vector.broadcast %49 : vector<8x1x32xf32> to vector<8x32x32xf32>
      %51 = arith.addf %48, %50 : vector<8x32x32xf32>
      %cst_35 = arith.constant 0.000000e+00 : f32
      %52 = vector.broadcast %cst_35 : f32 to vector<8x32x32xf32>
      %53 = arith.maximumf %51, %52 : vector<8x32x32xf32>
      %54 = vector.shape_cast %5 : vector<1x32xf32> to vector<1x1x32xf32>
      %55 = vector.broadcast %54 : vector<1x1x32xf32> to vector<8x32x32xf32>
      %56 = arith.mulf %53, %55 : vector<8x32x32xf32>
      %cst_36 = arith.constant dense<0.000000e+00> : vector<8x32xf32>
      %57 = vector.multi_reduction <add>, %56, %cst_36 [2] : vector<8x32x32xf32> to vector<8x32xf32>
      %c0_37 = arith.constant 0 : index
      %c96 = arith.constant 96 : index
      %c0_38 = arith.constant 0 : index
      %58 = vector.load %arg4[%c0_37, %c96, %c0_38] : memref<8x128x32xbf16, #tpu.memory_space<vmem>>, vector<8x32x32xbf16>
      %59 = arith.extf %58 : vector<8x32x32xbf16> to vector<8x32x32xf32>
      %60 = vector.shape_cast %24 : vector<8x32xf32> to vector<8x1x32xf32>
      %61 = vector.broadcast %60 : vector<8x1x32xf32> to vector<8x32x32xf32>
      %62 = arith.addf %59, %61 : vector<8x32x32xf32>
      %cst_39 = arith.constant 0.000000e+00 : f32
      %63 = vector.broadcast %cst_39 : f32 to vector<8x32x32xf32>
      %64 = arith.maximumf %62, %63 : vector<8x32x32xf32>
      %65 = vector.shape_cast %5 : vector<1x32xf32> to vector<1x1x32xf32>
      %66 = vector.broadcast %65 : vector<1x1x32xf32> to vector<8x32x32xf32>
      %67 = arith.mulf %64, %66 : vector<8x32x32xf32>
      %cst_40 = arith.constant dense<0.000000e+00> : vector<8x32xf32>
      %68 = vector.multi_reduction <add>, %67, %cst_40 [2] : vector<8x32x32xf32> to vector<8x32xf32>
      %69 = tpu.concatenate %35, %46, %57, %68 in 1 : vector<8x32xf32>, vector<8x32xf32>, vector<8x32xf32>, vector<8x32xf32> -> vector<8x128xf32>
      %c0_41 = arith.constant 0 : index
      %c0_42 = arith.constant 0 : index
      %70 = vector.load %arg10[%c0_41, %c0_42] : memref<1x1xf32, #tpu.memory_space<vmem>>, vector<1x1xf32>
      %71 = vector.broadcast %70 : vector<1x1xf32> to vector<8x128xf32>
      %72 = arith.addf %69, %71 : vector<8x128xf32>
      %cst_43 = arith.constant -1.000000e+30 : f32
      %73 = vector.broadcast %cst_43 : f32 to vector<8x128xf32>
      %74 = arith.select %8, %73, %72 : vector<8x128xi1>, vector<8x128xf32>
      %cst_44 = arith.constant dense<0xFF800000> : vector<8xf32>
      %75 = vector.multi_reduction <maximumf>, %74, %cst_44 [1] : vector<8x128xf32> to vector<8xf32>
      %76 = vector.shape_cast %75 : vector<8xf32> to vector<8x1xf32>
      %77 = vector.broadcast %76 : vector<8x1xf32> to vector<8x128xf32>
      %78 = arith.subf %74, %77 : vector<8x128xf32>
      %79 = math.exp %78 : vector<8x128xf32>
      %cst_45 = arith.constant dense<0.000000e+00> : vector<8xf32>
      %80 = vector.multi_reduction <add>, %79, %cst_45 [1] : vector<8x128xf32> to vector<8xf32>
      %81 = vector.shape_cast %80 : vector<8xf32> to vector<8x1xf32>
      %82 = tpu.reciprocal %81 {approx = true} : vector<8x1xf32> -> vector<8x1xf32>
      %83 = vector.broadcast %82 : vector<8x1xf32> to vector<8x128xf32>
      %84 = arith.mulf %79, %83 : vector<8x128xf32>
      %cst_46 = arith.constant 0.000000e+00 : f32
      %85 = vector.broadcast %cst_46 : f32 to vector<8x32xf32>
      %86 = vector.extract_strided_slice %84 {offsets = [0, 0], sizes = [8, 32], strides = [1, 1]} : vector<8x128xf32> to vector<8x32xf32>
      %c0_47 = arith.constant 0 : index
      %c0_48 = arith.constant 0 : index
      %c0_49 = arith.constant 0 : index
      %87 = vector.load %arg3[%c0_47, %c0_48, %c0_49] : memref<8x128x32xbf16, #tpu.memory_space<vmem>>, vector<8x32x32xbf16>
      %88 = arith.extf %87 : vector<8x32x32xbf16> to vector<8x32x32xf32>
      %89 = vector.shape_cast %86 : vector<8x32xf32> to vector<8x32x1xf32>
      %90 = vector.broadcast %89 : vector<8x32x1xf32> to vector<8x32x32xf32>
      %91 = arith.mulf %90, %88 : vector<8x32x32xf32>
      %cst_50 = arith.constant dense<0.000000e+00> : vector<8x32xf32>
      %92 = vector.multi_reduction <add>, %91, %cst_50 [1] : vector<8x32x32xf32> to vector<8x32xf32>
      %93 = arith.addf %85, %92 : vector<8x32xf32>
      %94 = vector.extract_strided_slice %84 {offsets = [0, 32], sizes = [8, 32], strides = [1, 1]} : vector<8x128xf32> to vector<8x32xf32>
      %c0_51 = arith.constant 0 : index
      %c32_52 = arith.constant 32 : index
      %c0_53 = arith.constant 0 : index
      %95 = vector.load %arg3[%c0_51, %c32_52, %c0_53] : memref<8x128x32xbf16, #tpu.memory_space<vmem>>, vector<8x32x32xbf16>
      %96 = arith.extf %95 : vector<8x32x32xbf16> to vector<8x32x32xf32>
      %97 = vector.shape_cast %94 : vector<8x32xf32> to vector<8x32x1xf32>
      %98 = vector.broadcast %97 : vector<8x32x1xf32> to vector<8x32x32xf32>
      %99 = arith.mulf %98, %96 : vector<8x32x32xf32>
      %cst_54 = arith.constant dense<0.000000e+00> : vector<8x32xf32>
      %100 = vector.multi_reduction <add>, %99, %cst_54 [1] : vector<8x32x32xf32> to vector<8x32xf32>
      %101 = arith.addf %93, %100 : vector<8x32xf32>
      %102 = vector.extract_strided_slice %84 {offsets = [0, 64], sizes = [8, 32], strides = [1, 1]} : vector<8x128xf32> to vector<8x32xf32>
      %c0_55 = arith.constant 0 : index
      %c64_56 = arith.constant 64 : index
      %c0_57 = arith.constant 0 : index
      %103 = vector.load %arg3[%c0_55, %c64_56, %c0_57] : memref<8x128x32xbf16, #tpu.memory_space<vmem>>, vector<8x32x32xbf16>
      %104 = arith.extf %103 : vector<8x32x32xbf16> to vector<8x32x32xf32>
      %105 = vector.shape_cast %102 : vector<8x32xf32> to vector<8x32x1xf32>
      %106 = vector.broadcast %105 : vector<8x32x1xf32> to vector<8x32x32xf32>
      %107 = arith.mulf %106, %104 : vector<8x32x32xf32>
      %cst_58 = arith.constant dense<0.000000e+00> : vector<8x32xf32>
      %108 = vector.multi_reduction <add>, %107, %cst_58 [1] : vector<8x32x32xf32> to vector<8x32xf32>
      %109 = arith.addf %101, %108 : vector<8x32xf32>
      %110 = vector.extract_strided_slice %84 {offsets = [0, 96], sizes = [8, 32], strides = [1, 1]} : vector<8x128xf32> to vector<8x32xf32>
      %c0_59 = arith.constant 0 : index
      %c96_60 = arith.constant 96 : index
      %c0_61 = arith.constant 0 : index
      %111 = vector.load %arg3[%c0_59, %c96_60, %c0_61] : memref<8x128x32xbf16, #tpu.memory_space<vmem>>, vector<8x32x32xbf16>
      %112 = arith.extf %111 : vector<8x32x32xbf16> to vector<8x32x32xf32>
      %113 = vector.shape_cast %110 : vector<8x32xf32> to vector<8x32x1xf32>
      %114 = vector.broadcast %113 : vector<8x32x1xf32> to vector<8x32x32xf32>
      %115 = arith.mulf %114, %112 : vector<8x32x32xf32>
      %cst_62 = arith.constant dense<0.000000e+00> : vector<8x32xf32>
      %116 = vector.multi_reduction <add>, %115, %cst_62 [1] : vector<8x32x32xf32> to vector<8x32xf32>
      %117 = arith.addf %109, %116 : vector<8x32xf32>
      %c0_63 = arith.constant 0 : index
      %c0_64 = arith.constant 0 : index
      %118 = vector.load %arg11[%c0_63, %c0_64] : memref<32x32xbf16, #tpu.memory_space<vmem>>, vector<32x32xbf16>
      %cst_65 = arith.constant dense<0.000000e+00> : vector<8x32xf32>
      %119 = tpu.matmul %14, %118, %cst_65 {dimension_numbers = #tpu.dot_dimension_numbers<[1], [0], [0], [1], [0, 0, 1, 1], [], []>} : vector<8x32xbf16>, vector<32x32xbf16>, vector<8x32xf32> -> vector<8x32xf32>
      %c0_66 = arith.constant 0 : index
      %c0_67 = arith.constant 0 : index
      %120 = vector.load %arg12[%c0_66, %c0_67] : memref<1x32xf32, #tpu.memory_space<vmem>>, vector<1x32xf32>
      %121 = vector.broadcast %120 : vector<1x32xf32> to vector<8x32xf32>
      %122 = arith.addf %119, %121 : vector<8x32xf32>
      %123 = arith.negf %122 : vector<8x32xf32>
      %124 = math.exp %123 : vector<8x32xf32>
      %cst_68 = arith.constant 1.000000e+00 : f32
      %125 = vector.broadcast %cst_68 : f32 to vector<8x32xf32>
      %126 = arith.addf %125, %124 : vector<8x32xf32>
      %127 = arith.divf %125, %126 : vector<8x32xf32>
      %128 = arith.mulf %127, %117 : vector<8x32xf32>
      %c0_69 = arith.constant 0 : index
      %c0_70 = arith.constant 0 : index
      %129 = vector.load %arg13[%c0_69, %c0_70] : memref<16x128xbf16, #tpu.memory_space<vmem>>, vector<16x128xbf16>
      %cst_71 = arith.constant dense<0.000000e+00> : vector<8x128xf32>
      %130 = tpu.matmul %17, %129, %cst_71 {dimension_numbers = #tpu.dot_dimension_numbers<[1], [0], [0], [1], [0, 0, 1, 1], [], []>} : vector<8x16xbf16>, vector<16x128xbf16>, vector<8x128xf32> -> vector<8x128xf32>
      %131 = arith.truncf %128 : vector<8x32xf32> to vector<8x32xbf16>
      %c0_72 = arith.constant 0 : index
      %c0_73 = arith.constant 0 : index
      %132 = vector.load %arg14[%c0_72, %c0_73] : memref<32x128xbf16, #tpu.memory_space<vmem>>, vector<32x128xbf16>
      %cst_74 = arith.constant dense<0.000000e+00> : vector<8x128xf32>
      %133 = tpu.matmul %131, %132, %cst_74 {dimension_numbers = #tpu.dot_dimension_numbers<[1], [0], [0], [1], [0, 0, 1, 1], [], []>} : vector<8x32xbf16>, vector<32x128xbf16>, vector<8x128xf32> -> vector<8x128xf32>
      %134 = arith.addf %130, %133 : vector<8x128xf32>
      %c0_75 = arith.constant 0 : index
      %c0_76 = arith.constant 0 : index
      %135 = vector.load %arg15[%c0_75, %c0_76] : memref<32x128xbf16, #tpu.memory_space<vmem>>, vector<32x128xbf16>
      %cst_77 = arith.constant dense<0.000000e+00> : vector<8x128xf32>
      %136 = tpu.matmul %14, %135, %cst_77 {dimension_numbers = #tpu.dot_dimension_numbers<[1], [0], [0], [1], [0, 0, 1, 1], [], []>} : vector<8x32xbf16>, vector<32x128xbf16>, vector<8x128xf32> -> vector<8x128xf32>
      %137 = arith.addf %134, %136 : vector<8x128xf32>
      %c0_78 = arith.constant 0 : index
      %c0_79 = arith.constant 0 : index
      %138 = vector.load %arg16[%c0_78, %c0_79] : memref<1x128xf32, #tpu.memory_space<vmem>>, vector<1x128xf32>
      %139 = vector.broadcast %138 : vector<1x128xf32> to vector<8x128xf32>
      %140 = arith.addf %137, %139 : vector<8x128xf32>
      %141 = vector.extract_strided_slice %140 {offsets = [0, 0], sizes = [8, 32], strides = [1, 1]} : vector<8x128xf32> to vector<8x32xf32>
      %142 = arith.negf %141 : vector<8x32xf32>
      %143 = math.exp %142 : vector<8x32xf32>
      %cst_80 = arith.constant 1.000000e+00 : f32
      %144 = vector.broadcast %cst_80 : f32 to vector<8x32xf32>
      %145 = arith.addf %144, %143 : vector<8x32xf32>
      %146 = arith.divf %144, %145 : vector<8x32xf32>
      %147 = vector.extract_strided_slice %140 {offsets = [0, 32], sizes = [8, 32], strides = [1, 1]} : vector<8x128xf32> to vector<8x32xf32>
      %148 = arith.negf %147 : vector<8x32xf32>
      %149 = math.exp %148 : vector<8x32xf32>
      %cst_81 = arith.constant 1.000000e+00 : f32
      %150 = vector.broadcast %cst_81 : f32 to vector<8x32xf32>
      %151 = arith.addf %150, %149 : vector<8x32xf32>
      %152 = arith.divf %150, %151 : vector<8x32xf32>
      %153 = vector.extract_strided_slice %140 {offsets = [0, 64], sizes = [8, 32], strides = [1, 1]} : vector<8x128xf32> to vector<8x32xf32>
      %154 = math.tanh %153 : vector<8x32xf32>
      %155 = vector.extract_strided_slice %140 {offsets = [0, 96], sizes = [8, 32], strides = [1, 1]} : vector<8x128xf32> to vector<8x32xf32>
      %156 = arith.negf %155 : vector<8x32xf32>
      %157 = math.exp %156 : vector<8x32xf32>
      %cst_82 = arith.constant 1.000000e+00 : f32
      %158 = vector.broadcast %cst_82 : f32 to vector<8x32xf32>
      %159 = arith.addf %158, %157 : vector<8x32xf32>
      %160 = arith.divf %158, %159 : vector<8x32xf32>
      %161 = arith.mulf %152, %13 : vector<8x32xf32>
      %162 = arith.mulf %146, %154 : vector<8x32xf32>
      %163 = arith.addf %161, %162 : vector<8x32xf32>
      %164 = math.tanh %163 : vector<8x32xf32>
      %165 = arith.mulf %160, %164 : vector<8x32xf32>
      %166 = vector.shape_cast %19 : vector<8x1xi1> to vector<8x1xi1>
      %167 = vector.broadcast %166 : vector<8x1xi1> to vector<8x32xi1>
      %168 = arith.select %167, %165, %12 : vector<8x32xi1>, vector<8x32xf32>
      %c0_83 = arith.constant 0 : index
      %c0_84 = arith.constant 0 : index
      %169 = vector.load %arg19[%c0_83, %c0_84] : memref<8x32xf32, #tpu.memory_space<vmem>>, vector<8x32xf32>
      tpu.vector_store %arg19[%c0_83, %c0_84], %168 {strides = array<i32>} : memref<8x32xf32, #tpu.memory_space<vmem>>, vector<8x32xf32>,
      %170 = vector.shape_cast %19 : vector<8x1xi1> to vector<8x1xi1>
      %171 = vector.broadcast %170 : vector<8x1xi1> to vector<8x32xi1>
      %172 = arith.select %171, %163, %13 : vector<8x32xi1>, vector<8x32xf32>
      %c0_85 = arith.constant 0 : index
      %c0_86 = arith.constant 0 : index
      %173 = vector.load %arg20[%c0_85, %c0_86] : memref<8x32xf32, #tpu.memory_space<vmem>>, vector<8x32xf32>
      tpu.vector_store %arg20[%c0_85, %c0_86], %172 {strides = array<i32>} : memref<8x32xf32, #tpu.memory_space<vmem>>, vector<8x32xf32>,
      %174 = arith.truncf %165 : vector<8x32xf32> to vector<8x32xbf16>
      %175 = arith.index_cast %11 : i32 to index
      %c0_87 = arith.constant 0 : index
      %c0_88 = arith.constant 0 : index
      %176 = vector.load %arg17[%175, %c0_87, %c0_88] : memref<7x8x32xbf16, #tpu.memory_space<vmem>>, vector<1x8x32xbf16>
      %177 = vector.shape_cast %176 : vector<1x8x32xbf16> to vector<8x32xbf16>
      %178 = vector.shape_cast %174 : vector<8x32xbf16> to vector<1x8x32xbf16>
      tpu.vector_store %arg17[%175, %c0_87, %c0_88], %178 {strides = array<i32>} : memref<7x8x32xbf16, #tpu.memory_space<vmem>>, vector<1x8x32xbf16>,
      %cst_89 = arith.constant 0.000000e+00 : f32
      %179 = vector.shape_cast %19 : vector<8x1xi1> to vector<8x1xi1>
      %180 = vector.broadcast %179 : vector<8x1xi1> to vector<8x128xi1>
      %181 = vector.broadcast %cst_89 : f32 to vector<8x128xf32>
      %182 = arith.select %180, %84, %181 : vector<8x128xi1>, vector<8x128xf32>
      %183 = arith.index_cast %11 : i32 to index
      %c0_90 = arith.constant 0 : index
      %c0_91 = arith.constant 0 : index
      %184 = vector.load %arg18[%183, %c0_90, %c0_91] : memref<7x8x128xf32, #tpu.memory_space<vmem>>, vector<1x8x128xf32>
      %185 = vector.shape_cast %184 : vector<1x8x128xf32> to vector<8x128xf32>
      %186 = vector.shape_cast %182 : vector<8x128xf32> to vector<1x8x128xf32>
      tpu.vector_store %arg18[%183, %c0_90, %c0_91], %186 {strides = array<i32>} : memref<7x8x128xf32, #tpu.memory_space<vmem>>, vector<1x8x128xf32>,
    }
    %c7_i32_11 = arith.constant 7 : i32
    return
  }
  func.func @transform_0(%arg0: i32) -> (i32, i32) {
    %c0_i32 = arith.constant 0 : i32
    %c0_i32_0 = arith.constant 0 : i32
    return %arg0, %c0_i32 : i32, i32
  }
  func.func @transform_1(%arg0: i32) -> (i32, i32) {
    %c0_i32 = arith.constant 0 : i32
    %c0_i32_0 = arith.constant 0 : i32
    return %arg0, %c0_i32 : i32, i32
  }
  func.func @transform_2(%arg0: i32) -> (i32, i32, i32) {
    %c0_i32 = arith.constant 0 : i32
    %c0_i32_0 = arith.constant 0 : i32
    %c0_i32_1 = arith.constant 0 : i32
    return %arg0, %c0_i32, %c0_i32_0 : i32, i32, i32
  }
  func.func @transform_3(%arg0: i32) -> (i32, i32, i32) {
    %c0_i32 = arith.constant 0 : i32
    %c0_i32_0 = arith.constant 0 : i32
    %c0_i32_1 = arith.constant 0 : i32
    return %arg0, %c0_i32, %c0_i32_0 : i32, i32, i32
  }
  func.func @transform_4(%arg0: i32) -> (i32, i32, i32) {
    %c0_i32 = arith.constant 0 : i32
    %c0_i32_0 = arith.constant 0 : i32
    %c0_i32_1 = arith.constant 0 : i32
    return %c0_i32, %arg0, %c0_i32_0 : i32, i32, i32
  }
  func.func @transform_5(%arg0: i32) -> (i32, i32) {
    %c0_i32 = arith.constant 0 : i32
    %c0_i32_0 = arith.constant 0 : i32
    return %arg0, %c0_i32 : i32, i32
  }
  func.func @transform_6(%arg0: i32) -> (i32, i32) {
    %c0_i32 = arith.constant 0 : i32
    %c0_i32_0 = arith.constant 0 : i32
    %c0_i32_1 = arith.constant 0 : i32
    return %c0_i32, %c0_i32_0 : i32, i32
  }
  func.func @transform_7(%arg0: i32) -> (i32, i32) {
    %c0_i32 = arith.constant 0 : i32
    %c0_i32_0 = arith.constant 0 : i32
    %c0_i32_1 = arith.constant 0 : i32
    return %c0_i32, %c0_i32_0 : i32, i32
  }
  func.func @transform_8(%arg0: i32) -> (i32, i32) {
    %c0_i32 = arith.constant 0 : i32
    %c0_i32_0 = arith.constant 0 : i32
    %c0_i32_1 = arith.constant 0 : i32
    return %c0_i32, %c0_i32_0 : i32, i32
  }
  func.func @transform_9(%arg0: i32) -> (i32, i32) {
    %c0_i32 = arith.constant 0 : i32
    %c0_i32_0 = arith.constant 0 : i32
    %c0_i32_1 = arith.constant 0 : i32
    return %c0_i32, %c0_i32_0 : i32, i32
  }
  func.func @transform_10(%arg0: i32) -> (i32, i32) {
    %c0_i32 = arith.constant 0 : i32
    %c0_i32_0 = arith.constant 0 : i32
    %c0_i32_1 = arith.constant 0 : i32
    return %c0_i32, %c0_i32_0 : i32, i32
  }
  func.func @transform_11(%arg0: i32) -> (i32, i32) {
    %c0_i32 = arith.constant 0 : i32
    %c0_i32_0 = arith.constant 0 : i32
    %c0_i32_1 = arith.constant 0 : i32
    return %c0_i32, %c0_i32_0 : i32, i32
  }
  func.func @transform_12(%arg0: i32) -> (i32, i32) {
    %c0_i32 = arith.constant 0 : i32
    %c0_i32_0 = arith.constant 0 : i32
    %c0_i32_1 = arith.constant 0 : i32
    return %c0_i32, %c0_i32_0 : i32, i32
  }
  func.func @transform_13(%arg0: i32) -> (i32, i32) {
    %c0_i32 = arith.constant 0 : i32
    %c0_i32_0 = arith.constant 0 : i32
    %c0_i32_1 = arith.constant 0 : i32
    return %c0_i32, %c0_i32_0 : i32, i32
  }
  func.func @transform_14(%arg0: i32) -> (i32, i32) {
    %c0_i32 = arith.constant 0 : i32
    %c0_i32_0 = arith.constant 0 : i32
    %c0_i32_1 = arith.constant 0 : i32
    return %c0_i32, %c0_i32_0 : i32, i32
  }
  func.func @transform_15(%arg0: i32) -> (i32, i32) {
    %c0_i32 = arith.constant 0 : i32
    %c0_i32_0 = arith.constant 0 : i32
    %c0_i32_1 = arith.constant 0 : i32
    return %c0_i32, %c0_i32_0 : i32, i32
  }
  func.func @transform_16(%arg0: i32) -> (i32, i32, i32) {
    %c0_i32 = arith.constant 0 : i32
    %c0_i32_0 = arith.constant 0 : i32
    %c0_i32_1 = arith.constant 0 : i32
    return %c0_i32, %arg0, %c0_i32_0 : i32, i32, i32
  }
  func.func @transform_17(%arg0: i32) -> (i32, i32, i32) {
    %c0_i32 = arith.constant 0 : i32
    %c0_i32_0 = arith.constant 0 : i32
    %c0_i32_1 = arith.constant 0 : i32
    return %c0_i32, %arg0, %c0_i32_0 : i32, i32, i32
  }
}

</mosaic_0001>

<bundles_post_ra>
// kernel: tpu_custom_call.1
= control target key start
LH: loop header
LB: loop body
LE: loop exit
PB: predicated region body
PF: predicated region fallthrough
CT: control target
= control target key end

     0   :  { %s8339_s0 = inlined_call_operand.vmem [shape: f32[16,32], index: 0, kind: input, shape index: {}]   ;;  %s8340_s1 = inlined_call_operand.vmem [shape: f32[16,32], index: 1, kind: input, shape index: {}]   ;;  %s8341_s2 = inlined_call_operand.vmem [shape: bf16[16,128,32], index: 2, kind: input, shape index: {}]   ;;  %s8342_s3 = inlined_call_operand.vmem [shape: bf16[16,128,32], index: 3, kind: input, shape index: {}]   ;;  %s8343_s4 = inlined_call_operand.vmem [shape: bf16[7,16,16], index: 4, kind: input, shape index: {}]   ;;  %s8344_s5 = inlined_call_operand.vmem [shape: s32[16,1], index: 5, kind: input, shape index: {}]   ;;  %s8345_s6 = inlined_call_operand.vmem [shape: bf16[32,32], index: 6, kind: input, shape index: {}]   ;;  %s8346_s7 = inlined_call_operand.vmem [shape: f32[1,32], index: 7, kind: input, shape index: {}]   ;;  %s8347_s8 = inlined_call_operand.vmem [shape: f32[1,32], index: 8, kind: input, shape index: {}]   ;;  %s8348_s9 = inlined_call_operand.<no memory space> [shape: f32[1,1], index: 9, kind: input, shape index: {}]   ;;  %s8349_s10 = inlined_call_operand.vmem [shape: bf16[32,32], index: 10, kind: input, shape index: {}]   ;;  %s8350_s11 = inlined_call_operand.vmem [shape: f32[1,32], index: 11, kind: input, shape index: {}]   ;;  %s8351_s12 = inlined_call_operand.vmem [shape: bf16[16,128], index: 12, kind: input, shape index: {}]   ;;  %s8352_s13 = inlined_call_operand.vmem [shape: bf16[32,128], index: 13, kind: input, shape index: {}]   ;;  %s8353_s14 = inlined_call_operand.vmem [shape: bf16[32,128], index: 14, kind: input, shape index: {}]   ;;  %s8354_s15 = inlined_call_operand.vmem [shape: f32[1,128], index: 15, kind: input, shape index: {}]   ;;  %s8355_s16 = inlined_call_operand.hbm [shape: bf16[7,16,32], index: 16, kind: output, shape index: {0}]   ;;  %s8356_s17 = inlined_call_operand.hbm [shape: f32[7,16,128], index: 17, kind: output, shape index: {1}]  }
   0x1   :  { %8401 = sst [smem:[#allocation61_spill]] %s8339_s0  ;;  %v23_v0 = vstv %s8348_s9 }
   0x2   :  { %8402 = sst [smem:[#allocation62_spill]] %s8340_s1  ;;  %24 = vst [vmem:[#allocation4] sm:$0x1] %v23_v0 }
   0x3   :  { %8403 = sst [smem:[#allocation63_spill]] %s8341_s2 }
   0x4   :  { %8404 = sst [smem:[#allocation64_spill]] %s8343_s4 }
   0x5   :  { %8405 = sst [smem:[#allocation65_spill]] %s8347_s8 }
   0x6   :  { %8406 = sst [smem:[#allocation66_spill]] %s8355_s16 }
   0x7   :  { %8407 = sst [smem:[#allocation67_spill]] %s8356_s17 }
   0x8   :  { %25 = vsyncpa [#allocation7], 0 }
   0x9   :  { %27 = vsyncpa [#allocation7 + $0x1], 0 }
   0xa   :  { %28 = vsyncpa [#allocation9], 0 }
   0xb   :  { %30 = vsyncpa [#allocation9 + $0x1], 0  ;;  %s5706_s26 = smov 0   ;;  %s5708_s27 = smov 0  }
   0xc   :  { %s5710_s28 = smov 0   ;;  %s5712_s29 = smov 0  }
   0xd LB: > { %8408 = sst [smem:[#allocation12_spill]] %s5581_s26  ;;  %s5727_s9 = sadd.s32 4294967295, %s5593_s29   ;;  %s5593_s29 = sphi %s5712_s29, %s8766_s29   ;;  %s5589_s28 = sphi %s5710_s28, %s8769_s28   ;;  %s5585_s27 = sphi %s5708_s27, %s8768_s27   ;;  %s5581_s26 = sphi %s5706_s26, %s8767_s26  }
   0xe   : > { %8409 = sst [smem:[#allocation13_spill]] %s5585_s27  ;;  %s4664_s0 = sadd.s32 4294967294, %s5593_s29  }
   0xf   : > { %8410 = sst [smem:[#allocation14_spill]] %s5589_s28  ;;  %s5731_s30 = sadd.s32 1, %s5593_s29  }
  0x10   : > { %8411 = sst [smem:[#allocation15_spill]] %s5593_s29  ;;  %s147_s18 = sadd.s32 1, %s5589_s28 }
  0x11   : > { %8412 = sst [smem:[#allocation16_spill]] %s5731_s30  ;;  %s144_s19 = ssub.s32 %s5593_s29, %s5731_s30 }
  0x12   : > { %p154_p0 = scmp.ne.s32.totalorder %s5589_s28, %s5585_s27  ;;  %p145_p1 = scmp.eq.s32.totalorder %s144_s19, 0 }
  0x13   : > { %p155_p2 = scmp.eq.s32.totalorder %s5593_s29, 0  ;;  %p420_p3 = scmp.eq.s32.totalorder %s5727_s9, 1 }
  0x14   : > { %p425_p4 = scmp.ne.s32.totalorder %s5585_s27, %s5581_s26  ;;  %p426_p7 = scmp.eq.s32.totalorder %s4664_s0, 1 }
  0x15   : > { %s5743_s1 = scalar_select %p145_p1, %s5589_s28, %s147_s18  }
  0x16   : > { %p156_p5 = por %p155_p2, %p154_p0  ;;  %p5745_p6 = por %p420_p3, %p154_p0 }
  0x17   : > { %8413 = sst [smem:[#allocation17_spill]] %s5743_s1  ;;  %p5749_p8 = por %p426_p7, %p425_p4 }
  0x18   : > { %s8414_s20 = scalar_select %p5745_p6, 1, 0 }
  0x19   : > { %s8416_s21 = scalar_select %p5749_p8, 1, 0 }
  0x1a   : > { %8415 = sst [smem:[#allocation18_spill]] %s8414_s20  ;;  %p4666_p9 = scmp.ge.s32.totalorder %s5593_s29, 2 }
  0x1b   : > { %8417 = sst [smem:[#allocation19_spill]] %s8416_s21 }
  0x1c   : > { %498 = sbr.rel (%p4666_p9) target bundleno = 49 (0x31), region = 56 }
  0x23   : > { %535 = sbr.rel (!%p156_p5) target bundleno = 49 (0x31), region = 76  ;;  %s537_s22 = sand.u32 (%p156_p5), 1, %s5589_s28  }
  0x24   : > { %s4667_s23 = sshll.u32 (%p156_p5), %s5593_s29, 2  ;;  %s5400_s24 = smul.u32 (%p156_p5), 28, %s537_s22 }
  0x25   : > { %s8418_s4 = sld [smem:[#allocation64_spill]] (%p156_p5) }
  0x26   : > { %s539_s0 = scalar_lea.vmem (%p156_p5), [#allocation5], %s5400_s24 }
  0x2b   : > { %s541_s19 = scalar_lea.vmem %s8418_s4, %s4667_s23 }
  0x2c   : > { %v557_v1 = vld [vmem:[%s541_s19] sm:$0xf]  ;;  %v559_v2 = vld [vmem:[%s541_s19 + $0x8] sm:$0xf]  ;;  %v561_v3 = vld [vmem:[%s541_s19 + $0x10] sm:$0xf] }
  0x2d   : > { %v563_v4 = vld [vmem:[%s541_s19 + $0x18] sm:$0xf]  ;;  %v565_v5 = vld [vmem:[%s541_s19 + $0x20] sm:$0xf]  ;;  %558 = vst [vmem:[%s539_s0] sm:$0xf] %v557_v1 }
  0x2e   : > { %560 = vst [vmem:[%s539_s0 + $0x4] sm:$0xf] %v559_v2  ;;  %562 = vst [vmem:[%s539_s0 + $0x8] sm:$0xf] %v561_v3  ;;  %v567_v6 = vld [vmem:[%s541_s19 + $0x28] sm:$0xf] }
  0x2f   : > { %564 = vst [vmem:[%s539_s0 + $0xc] sm:$0xf] %v563_v4  ;;  %566 = vst [vmem:[%s539_s0 + $0x10] sm:$0xf] %v565_v5  ;;  %v569_v7 = vld [vmem:[%s541_s19 + $0x30] sm:$0xf] }
  0x30   : > { %568 = vst [vmem:[%s539_s0 + $0x14] sm:$0xf] %v567_v6  ;;  %570 = vst [vmem:[%s539_s0 + $0x18] sm:$0xf] %v569_v7 }
  0x31 PF: > { %p4668_p10 = scmp.ge.s32.totalorder %s5593_s29, 1  ;;  %p613_p11 = scmp.lt.s32.totalorder %s5593_s29, 3 }
  0x33   : > { %p614_p12 = pnand %p4668_p10, %p613_p11 }
  0x35   : > { %617 = sbr.rel (%p614_p12) target bundleno = 2197 (0x895), region = 121 }
  0x3c   : > { %s5764_s22 = sand.u32 1, %s5585_s27   ;;  %p700_p13 = scmp.lt.s32.totalorder %s5727_s9, 1  ;;  %v8368_v9 = vlaneseq  ;;  %vm8383_vm1 = vcmask 261120  }
  0x3d   : > { %s8419_s8 = sld [smem:[#allocation65_spill]]  ;;  %s5401_s25 = smul.u32 28, %s5764_s22 }
  0x3e   : > { %s4671_s18 = sshll.u32 %s5727_s9, 3  ;;  %s5402_s19 = smul.u32 56, %s5764_s22  ;;  %v5776_v10 = vand.u32 127, %v8368_v9 }
  0x3f   : > { %p709_p0 = scmp.lt.s32.totalorder %s4671_s18, 15  ;;  %s8422_s27 = sld [smem:[#allocation61_spill]] }
  0x40   : > { %8421 = vst [vmem:[#allocation21_spill] sm:$0xff] %v5776_v10  ;;  %s701_s0 = scalar_select %p700_p13, %s5727_s9, 1 }
  0x41   : > { %s8771_s18 = smov (!%p709_p0, %s4671_s18), 15  ;;  %s8423_s2 = sld [smem:[#allocation63_spill]] }
  0x42   : > { %s4669_s4 = sshll.u32 %s701_s0, 3  ;;  %s4707_s24 = sshll.u32 %s8771_s18, 6 }
  0x43   : > { %v5770_v8 = vld [vmem:[%s8419_s8] ss:$0 sm:$0xff]  ;;  %s5791_s17 = scalar_lea.vmem %s8342_s3, %s4707_s24  ;;  %s725_s0 = scalar_lea.vmem %s8344_s5, %s4669_s4 }
  0x44   : > { %8420 = vst [vmem:[#allocation20_spill] sm:$0xff] %v5770_v8  ;;  %s8424_s1 = sld [smem:[#allocation62_spill]]  ;;  %v5800_v12 = vld [vmem:[%s725_s0] sm:$0xff]  ;;  %s5803_s8 = scalar_lea.vmem [#allocation5], %s5401_s25 }
  0x45   : > { %s703_s23 = scalar_lea.vmem %s8422_s27, %s4669_s4  ;;  %8425 = vst [vmem:[#allocation22_spill] sm:$0xff] %v5800_v12  ;;  %s5805_s26 = scalar_lea.vmem [#allocation6], %s5401_s25 }
  0x46   : > { %v727_v11 = vld [vmem:[%s703_s23] sm:$0xff]  ;;  %s5807_s30 = scalar_lea.vmem [#allocation8], %s5402_s19  ;;  %s5809_s21 = smov 0  }
  0x47   : > { %s5786_s29 = scalar_lea.vmem %s8423_s2, %s4707_s24  ;;  %729 = vst.msk [vmem:[#allocation2] sm:$0xff] %vm8383_vm1, %v727_v11 }
  0x4a   : > { %s707_s18 = scalar_lea.vmem %s8424_s1, %s4669_s4 }
  0x4b   : > { %v730_v13 = vld [vmem:[%s707_s18] sm:$0xff] }
  0x4c   : > { %731 = vst.msk [vmem:[#allocation3] sm:$0xff] %vm8383_vm1, %v730_v13 }
  0x4d LB: >> { %v8426_v10 = vld [vmem:[#allocation21_spill] sm:$0xff]  ;;  %v8427_v8 = vld [vmem:[#allocation20_spill] sm:$0xff]  ;;  %v8369_v15 = vmov 0.0   ;;  %v5470_v16 = vld [vmem:[%s8345_s6 + $0x8] sm:$0xff]   ;;  %vm8372_vm2 = vmmov 0   ;;  %vm8429_vm1 = vcmask 261120   ;;  %v8430_v9 = vlaneseq  ;;  %s5597_s21 = sphi %s5809_s21, %s742_s21  }
  0x4e   : >> { %v5469_v14 = vld [vmem:[%s8345_s6] sm:$0xff]   ;;  %5362 = vmatprep.subr.bf16.mxu0 %v8369_v15  ;;  %5370 = vmatprep.subr.bf16.mxu1 %v8369_v15  ;;  %v5601_v19 = vmov 1966171168   ;;  %v5237_v32 = vld [vmem:[%s5791_s17 + $0x10] sm:$0xff]   ;;  %v5238_v40 = vld [vmem:[%s5791_s17 + $0x18] sm:$0xff]   ;;  %vm1978_vm3 = vcmask 130112  }
  0x4f   : >> { %5363 = vmatpush3.bf16.msra.mxu0 %v5469_v14  ;;  %5366 = vmatprep.mubr.msk.bf16.mxu0 %vm8372_vm2, %v8369_v15  ;;  %v743_v17 = vld [vmem:[#allocation2] sm:$0xff]  ;;  %v884_v20 = vunpack.c.l.s4 %v5601_v19  ;;  %v5835_v22 = vshrl.u32 %v8430_v9, 7  ;;  %v4777_v38 = vunpack.c.h.bf16 %v5237_v32  ;;  %v5860_v46 = vld [vmem:[%s5791_s17 + $0x30] sm:$0xff]   ;;  %v5863_v47 = vld [vmem:[%s5791_s17 + $0x8] sm:$0xff]   ;;  %v4781_v50 = vunpack.c.h.bf16 %v5238_v40  ;;  %s5603_s1 = smov 32   ;;  %s4678_s23 = sshll.u32 %s5597_s21, 2 }
  0x50   : >> { %5364 = vmatprep.subr.bf16.mxu0 %v8369_v15  ;;  %5374 = vmatprep.mubr.msk.bf16.mxu1 %vm8372_vm2, %v8369_v15  ;;  %v5827_v18 = vpack.c.bf16 %v743_v17, %v743_v17  ;;  %v4679_v23 = vld [vmem:[%s8346_s7] ss:$0 sm:$0xff]  ;;  %v5270_v48 = vld [vmem:[%s5791_s17 + $0x38] sm:$0xff]   ;;  %v4776_v51 = vunpack.c.l.bf16 %v5237_v32  ;;  %v4905_v54 = vunpack.c.h.bf16 %v5860_v46  ;;  %v4716_v55 = vunpack.c.l.bf16 %v5863_v47  ;;  %s747_s24 = scalar_lea.vmem %s5803_s8, %s4678_s23 [#allocation5]  ;;  %s4702_s27 = sshll.u32 %s5597_s21, 3 }
  0x51   : >> { %v885_v21 = vunpack.c.0.s8 %v884_v20  ;;  %8431 = vst [vmem:[#allocation24_spill] sm:$0xff] %v5835_v22  ;;  %v4711_v33 = vld [vmem:[%s5791_s17] sm:$0xff]   ;;  %v5844_v34 = vsub.s32 0, %v5835_v22  ;;  %v4908_v56 = vunpack.c.l.bf16 %v5270_v48  ;;  %v4780_v0 = vunpack.c.l.bf16 %v5238_v40  ;;  %s4458_s18 = scalar_lea.vmem %s5807_s30, %s4702_s27 [#allocation8]  ;;  %s5604_s0 = smov 96  }
  0x52   : >> { %8428 = vst [vmem:[#allocation23_spill] sm:$0xff] %v5827_v18  ;;  %v5849_v37 = vld [vmem:[%s5791_s17 + $0x20] sm:$0xff]   ;;  %v4712_v39 = vunpack.c.l.bf16 %v4711_v33  ;;  %v4713_v45 = vunpack.c.h.bf16 %v4711_v33  ;;  %v4909_v20 = vunpack.c.h.bf16 %v5270_v48  ;;  %v4717_v33 = vunpack.c.h.bf16 %v5863_v47  ;;  %s5605_s28 = smov 64   ;;  %s4453_s27 = scalar_lea.vmem %s5805_s26, %s4678_s23 [#allocation6] }
  0x53   : >> { %5365 = vmatpush3.bf16.msra.mxu0 %v5470_v16  ;;  %v888_v24 = vsub.s32 %v885_v21, %v5835_v22  ;;  %8432 = vst [vmem:[#allocation25_spill] sm:$0xff] %v5844_v34  ;;  %v4841_v44 = vunpack.c.h.bf16 %v5849_v37  ;;  %v4840_v21 = vunpack.c.l.bf16 %v5849_v37  ;;  %vm2184_vm4 = vcmask 392512  }
  0x54   : >> { %5378 = vmatprep.subr.bf16.mxu0 %v8369_v15  ;;  %vm1985_vm5 = vcmask 195712   ;;  %vm2191_vm6 = vcmask 458112   ;;  %vm2198_vm7 = vcmask 523712   ;;  %vm2383_vm8 = vcmask 654912  }
  0x55   : >> { %vm1992_vm9 = vcmask 261312   ;;  %vm2390_vm10 = vcmask 720512   ;;  %vm8386_vm11 = vcmask 917312   ;;  %vm2589_vm12 = vcmask 982912  }
  0x56   : >> { %5367 = vmatmul.mubr.msk.bf16.vlgmr.msra.gmra.mrb[0].mxu0 %vm8429_vm1, %v5827_v18  ;;  %vm2596_vm13 = vcmask 1048512   ;;  %vm2397_vm14 = vcmask 786112   ;;  %vm8385_vm15 = vcmask 1041409   ;;  %vm2131_vm0 = vcmask 1043459  }
  0x57   : >> { %5382 = vmatprep.mubr.msk.bf16.mxu0 %vm8372_vm2, %v8369_v15  ;;  %vm8384_vm2 = vcmask 1042434  }
 0x129   : >> { %v811_v25 = vpop.f32.mrb[0].mxu0 }
 0x12a   : >> { %v812_v26 = vadd.f32 %v4679_v23, %v811_v25  ;;  %v5368_v27 = vpop.f32.mrb[1].mxu0 }
 0x12b   : >> { %v814_v28 = vpop.f32.mrb[2].mxu0 }
 0x12c   : >> { %v882_v29 = vcombine.high %v812_v26, %v812_v26  ;;  %v889_v30 = vrot.slane %v812_v26, %v888_v24  ;;  %v5369_v31 = vpop.f32.mrb[3].mxu0  ;;  %v5223_v28 = vld [vmem:[%s5791_s17 + $0x40] sm:$0xff]  }
 0x12e   : >> { %v896_v35 = vrot.slane %v882_v29, %v888_v24  ;;  %v5846_v36 = vrot.slane %v889_v30, %v888_v24  ;;  %v897_v61 = vcombine.high %v889_v30, %v889_v30 }
 0x130   : >> { %v898_v41 = vcombine.high %v896_v35, %v896_v35  ;;  %v5852_v42 = vrot.slane %v896_v35, %v888_v24  ;;  %v5856_v43 = vrot.slane %v5846_v36, %v5844_v34  ;;  %v5884_v19 = vrot.slane %v897_v61, %v888_v24 }
 0x131   : >> { %v4720_v35 = vunpack.c.l.bf16 %v5223_v28  ;;  %v4904_v61 = vunpack.c.l.bf16 %v5860_v46  ;;  %v927_v46 = vcombine.high %v5846_v36, %v5846_v36 }
 0x132   : >> { %v5866_v49 = vrot.slane %v898_v41, %v888_v24  ;;  %v1234_v52 = vadd.f32 %v4777_v38, %v5856_v43  ;;  %v971_v53 = vadd.f32 %v4712_v39, %v5856_v43  ;;  %v1490_v59 = vadd.f32 %v4841_v44, %v5856_v43  ;;  %v5254_v41 = vld [vmem:[%s5791_s17 + $0x28] sm:$0xff]  }
 0x133   : >> { %v972_v60 = vadd.f32 %v4713_v45, %v5856_v43  ;;  %v1236_v62 = vadd.f32 %v4781_v50, %v5856_v43  ;;  %v1233_v63 = vadd.f32 %v4776_v51, %v5856_v43  ;;  %v1746_v7 = vadd.f32 %v4905_v54, %v5856_v43 }
 0x134   : >> { %v1266_v57 = vmax.f32 %v1234_v52, 0.0  ;;  %v1003_v58 = vmax.f32 %v971_v53, 0.0  ;;  %v1522_v3 = vmax.f32 %v1490_v59, 0.0  ;;  %v973_v11 = vadd.f32 %v4716_v55, %v5856_v43 }
 0x135   : >> { %v1004_v4 = vmax.f32 %v972_v60, 0.0  ;;  %v1268_v5 = vmax.f32 %v1236_v62, 0.0  ;;  %v1265_v6 = vmax.f32 %v1233_v63, 0.0  ;;  %v1778_v26 = vmax.f32 %v1746_v7, 0.0 }
 0x136   : >> { %v1298_v1 = vmul.f32 %v8427_v8, %v1266_v57  ;;  %v1041_v2 = vmul.f32 %v8427_v8, %v1003_v58  ;;  %v1554_v16 = vmul.f32 %v8427_v8, %v1522_v3  ;;  %v1005_v27 = vmax.f32 %v973_v11, 0.0  ;;  %v5917_v3 = vld [vmem:[%s5791_s17 + $0x48] sm:$0xff]  }
 0x137   : >> { %v1042_v17 = vmul.f32 %v8427_v8, %v1004_v4  ;;  %v1300_v23 = vmul.f32 %v8427_v8, %v1268_v5  ;;  %v1297_v25 = vmul.f32 %v8427_v8, %v1265_v6  ;;  %v1747_v31 = vadd.f32 %v4908_v56, %v5856_v43  ;;  %v5239_v56 = vld [vmem:[%s5791_s17 + $0x50] sm:$0xff]  }
 0x138   : >> { %v1332_v13 = vsel %vm8429_vm1, %v1298_v1, 0.0  ;;  %v1073_v14 = vsel %vm8429_vm1, %v1041_v2, 0.0  ;;  %v1588_v29 = vsel %vm8429_vm1, %v1554_v16, 0.0  ;;  %v1235_v24 = vadd.f32 %v4780_v0, %v5856_v43 }
 0x139   : >> { %1333 = vadd.xlane.f32.xlu1 %v1332_v13  ;;  %1074 = vadd.xlane.f32.xlu0 %v1073_v14  ;;  %v1076_v30 = vsel %vm8429_vm1, %v1042_v17, 0.0  ;;  %v5896_v32 = vrot.slane %v5884_v19, %v5844_v34  ;;  %v1338_v37 = vsel %vm8429_vm1, %v1300_v23, 0.0  ;;  %v1329_v38 = vsel %vm8429_vm1, %v1297_v25, 0.0 }
 0x13a   : >> { %v1810_v39 = vmul.f32 %v8427_v8, %v1778_v26  ;;  %v1043_v40 = vmul.f32 %v8427_v8, %v1005_v27  ;;  %v1779_v44 = vmax.f32 %v1747_v31, 0.0  ;;  %v1267_v45 = vmax.f32 %v1235_v24, 0.0 }
 0x13b   : >> { %v1748_v48 = vadd.f32 %v4909_v20, %v5856_v43  ;;  %v1489_v50 = vadd.f32 %v4840_v21, %v5856_v43  ;;  %v4844_v47 = vunpack.c.l.bf16 %v5254_v41  ;;  %v4721_v51 = vunpack.c.h.bf16 %v5223_v28  ;;  %v5225_v21 = vld [vmem:[%s5791_s17 + $0x80] sm:$0xff]  }
 0x13c   : >> { %v1844_v52 = vsel %vm8429_vm1, %v1810_v39, 0.0  ;;  %v1079_v53 = vsel %vm8429_vm1, %v1043_v40, 0.0  ;;  %v974_v54 = vadd.f32 %v4717_v33, %v5856_v43  ;;  %v975_v55 = vadd.f32 %v4720_v35, %v5896_v32  ;;  %v5941_v35 = vld [vmem:[%s5791_s17 + $0x58] sm:$0xff]  }
 0x13d   : >> { %1589 = vadd.xlane.f32.xlu1 %v1588_v29  ;;  %1077 = vadd.xlane.f32.xlu0 %v1076_v30  ;;  %v1811_v57 = vmul.f32 %v8427_v8, %v1779_v44  ;;  %v1299_v58 = vmul.f32 %v8427_v8, %v1267_v45  ;;  %v1780_v59 = vmax.f32 %v1748_v48, 0.0  ;;  %v1521_v60 = vmax.f32 %v1489_v50, 0.0 }
 0x13e   : >> { %v4785_v62 = vunpack.c.h.bf16 %v5239_v56  ;;  %v1006_v63 = vmax.f32 %v974_v54, 0.0  ;;  %v1007_v0 = vmax.f32 %v975_v55, 0.0  ;;  %v1491_v1 = vadd.f32 %v4844_v47, %v5856_v43 }
 0x13f   : >> { %v976_v2 = vadd.f32 %v4721_v51, %v5896_v32  ;;  %v1847_v4 = vsel %vm8429_vm1, %v1811_v57, 0.0  ;;  %v1335_v5 = vsel %vm8429_vm1, %v1299_v58, 0.0  ;;  %v1812_v6 = vmul.f32 %v8427_v8, %v1780_v59  ;;  %v5241_v51 = vld [vmem:[%s5791_s17 + $0x90] sm:$0xff]  }
 0x140   : >> { %v1553_v7 = vmul.f32 %v8427_v8, %v1521_v60  ;;  %v4845_v11 = vunpack.c.h.bf16 %v5254_v41  ;;  %v4724_v13 = vunpack.c.l.bf16 %v5917_v3  ;;  %v1044_v14 = vmul.f32 %v8427_v8, %v1006_v63 }
 0x141   : >> { %1339 = vadd.xlane.f32.xlu1 %v1338_v37  ;;  %1330 = vadd.xlane.f32.xlu0 %v1329_v38  ;;  %v1045_v16 = vmul.f32 %v8427_v8, %v1007_v0  ;;  %v1523_v17 = vmax.f32 %v1491_v1, 0.0  ;;  %v1008_v20 = vmax.f32 %v976_v2, 0.0  ;;  %v1850_v23 = vsel %vm8429_vm1, %v1812_v6, 0.0 }
 0x142   : >> { %v1585_v25 = vsel %vm8429_vm1, %v1553_v7, 0.0  ;;  %v1745_v26 = vadd.f32 %v4904_v61, %v5856_v43  ;;  %v1238_v27 = vadd.f32 %v4785_v62, %v5896_v32  ;;  %v5934_v36 = vrot.slane %v927_v46, %v5844_v34  ;;  %v5255_v61 = vld [vmem:[%s5791_s17 + $0x60] sm:$0xff]  }
 0x143   : >> { %v4784_v28 = vunpack.c.l.bf16 %v5239_v56  ;;  %v4729_v29 = vunpack.c.h.bf16 %v5225_v21  ;;  %v1082_v30 = vsel %vm8429_vm1, %v1044_v14, 0.0  ;;  %v1085_v31 = vsel %vm8429_vm1, %v1045_v16, 0.0 }
 0x144   : >> { %v1555_v24 = vmul.f32 %v8427_v8, %v1523_v17  ;;  %v1046_v33 = vmul.f32 %v8427_v8, %v1008_v20  ;;  %v1777_v37 = vmax.f32 %v1745_v26, 0.0  ;;  %v1270_v38 = vmax.f32 %v1238_v27, 0.0 }
 0x145   : >> { %1845 = vadd.xlane.f32.xlu1 %v1844_v52  ;;  %1080 = vadd.xlane.f32.xlu0 %v1079_v53  ;;  %v1492_v39 = vadd.f32 %v4845_v11, %v5856_v43  ;;  %v977_v40 = vadd.f32 %v4724_v13, %v5896_v32  ;;  %v4728_v41 = vunpack.c.l.bf16 %v5225_v21  ;;  %v4788_v44 = vunpack.c.l.bf16 %v5941_v35  ;;  %v5963_v11 = vld [vmem:[%s5791_s17 + $0x88] sm:$0xff]  }
 0x146   : >> { %v1591_v45 = vsel %vm8429_vm1, %v1555_v24, 0.0  ;;  %v1088_v48 = vsel %vm8429_vm1, %v1046_v33, 0.0  ;;  %v1237_v50 = vadd.f32 %v4784_v28, %v5896_v32  ;;  %v980_v47 = vadd.f32 %v4729_v29, %v5934_v36  ;;  %v5976_v28 = vld [vmem:[%s5791_s17 + $0x98] sm:$0xff]  }
 0x147   : >> { %v1809_v52 = vmul.f32 %v8427_v8, %v1777_v37  ;;  %v1302_v43 = vmul.f32 %v8427_v8, %v1270_v38  ;;  %v1524_v53 = vmax.f32 %v1492_v39, 0.0  ;;  %v1009_v54 = vmax.f32 %v977_v40, 0.0 }
 0x148   : >> { %v4792_v55 = vunpack.c.l.bf16 %v5241_v51  ;;  %v4793_v56 = vunpack.c.h.bf16 %v5241_v51  ;;  %v1269_v57 = vmax.f32 %v1237_v50, 0.0  ;;  %v1012_v58 = vmax.f32 %v980_v47, 0.0 }
 0x149   : >> { %1848 = vadd.xlane.f32.xlu1 %v1847_v4  ;;  %1336 = vadd.xlane.f32.xlu0 %v1335_v5  ;;  %v979_v59 = vadd.f32 %v4728_v41, %v5934_v36  ;;  %v1239_v60 = vadd.f32 %v4788_v44, %v5896_v32  ;;  %v1841_v62 = vsel %vm8429_vm1, %v1809_v52, 0.0  ;;  %v1344_v63 = vsel %vm8429_vm1, %v1302_v43, 0.0  ;;  %v5257_v41 = vld [vmem:[%s5791_s17 + $0xa0] sm:$0xff]   ;;  %v5988_v44 = vld [vmem:[%s5791_s17 + $0x68] sm:$0xff]  }
 0x14a   : >> { %v1556_v0 = vmul.f32 %v8427_v8, %v1524_v53  ;;  %v1047_v1 = vmul.f32 %v8427_v8, %v1009_v54  ;;  %v4848_v2 = vunpack.c.l.bf16 %v5255_v61  ;;  %v4849_v4 = vunpack.c.h.bf16 %v5255_v61 }
 0x14b   : >> { %v1301_v5 = vmul.f32 %v8427_v8, %v1269_v57  ;;  %v1050_v6 = vmul.f32 %v8427_v8, %v1012_v58  ;;  %v1011_v7 = vmax.f32 %v979_v59, 0.0  ;;  %v1271_v46 = vmax.f32 %v1239_v60, 0.0 }
 0x14c   : >> { %v1594_v13 = vsel %vm8429_vm1, %v1556_v0, 0.0  ;;  %v1091_v14 = vsel %vm8429_vm1, %v1047_v1, 0.0  ;;  %v1241_v16 = vadd.f32 %v4792_v55, %v5934_v36  ;;  %v1242_v17 = vadd.f32 %v4793_v56, %v5934_v36  ;;  %v5271_v55 = vld [vmem:[%s5791_s17 + $0x70] sm:$0xff]  }
 0x14d   : >> { %1851 = vadd.xlane.f32.xlu1 %v1850_v23  ;;  %1586 = vadd.xlane.f32.xlu0 %v1585_v25  ;;  %v4732_v20 = vunpack.c.l.bf16 %v5963_v11  ;;  %v4725_v21 = vunpack.c.h.bf16 %v5917_v3  ;;  %v1341_v23 = vsel %vm8429_vm1, %v1301_v5, 0.0  ;;  %v1100_v25 = vsel %vm8429_vm1, %v1050_v6, 0.0 }
 0x14e   : >> { %v1049_v26 = vmul.f32 %v8427_v8, %v1011_v7  ;;  %v1303_v27 = vmul.f32 %v8427_v8, %v1271_v46  ;;  %v1273_v29 = vmax.f32 %v1241_v16, 0.0  ;;  %v1494_v24 = vadd.f32 %v4849_v4, %v5896_v32 }
 0x14f   : >> { %v4789_v3 = vunpack.c.h.bf16 %v5941_v35  ;;  %v4796_v33 = vunpack.c.l.bf16 %v5976_v28  ;;  %v981_v39 = vadd.f32 %v4732_v20, %v5934_v36  ;;  %v978_v40 = vadd.f32 %v4725_v21, %v5896_v32  ;;  %v5229_v20 = vld [vmem:[%s5791_s17 + $0x100] sm:$0xff]  }
 0x150   : >> { %v1097_v37 = vsel %vm8429_vm1, %v1049_v26, 0.0  ;;  %v1347_v38 = vsel %vm8429_vm1, %v1303_v27, 0.0  ;;  %v1526_v35 = vmax.f32 %v1494_v24, 0.0  ;;  %v4856_v47 = vunpack.c.l.bf16 %v5257_v41 }
 0x151   : >> { %1083 = vadd.xlane.f32.xlu0 %v1082_v30  ;;  %1086 = vadd.xlane.f32.xlu1 %v1085_v31  ;;  %v1274_v30 = vmax.f32 %v1242_v17, 0.0  ;;  %v1493_v31 = vadd.f32 %v4848_v2, %v5896_v32  ;;  %v4852_v51 = vunpack.c.l.bf16 %v5988_v44  ;;  %v1013_v52 = vmax.f32 %v981_v39, 0.0 }
 0x152   : >> { %v1010_v43 = vmax.f32 %v978_v40, 0.0  ;;  %v1240_v53 = vadd.f32 %v4789_v3, %v5896_v32  ;;  %v1243_v54 = vadd.f32 %v4796_v33, %v5934_v36  ;;  %v1558_v59 = vmul.f32 %v8427_v8, %v1526_v35  ;;  %v5245_v33 = vld [vmem:[%s5791_s17 + $0x110] sm:$0xff]  }
 0x153   : >> { %v1525_v50 = vmax.f32 %v1493_v31, 0.0  ;;  %v4912_v60 = vunpack.c.l.bf16 %v5271_v55  ;;  %v4857_v61 = vunpack.c.h.bf16 %v5257_v41  ;;  %v1497_v5 = vadd.f32 %v4856_v47, %v5934_v36 }
 0x154   : >> { %v1272_v0 = vmax.f32 %v1240_v53, 0.0  ;;  %v1275_v1 = vmax.f32 %v1243_v54, 0.0  ;;  %v1600_v4 = vsel %vm8429_vm1, %v1558_v59, 0.0  ;;  %v1495_v6 = vadd.f32 %v4852_v51, %v5896_v32  ;;  %v5273_v59 = vld [vmem:[%s5791_s17 + $0xb0] sm:$0xff]  }
 0x155   : >> { %1592 = vadd.xlane.f32.xlu0 %v1591_v45  ;;  %1089 = vadd.xlane.f32.xlu1 %v1088_v48  ;;  %v1305_v45 = vmul.f32 %v8427_v8, %v1273_v29  ;;  %v1306_v48 = vmul.f32 %v8427_v8, %v1274_v30  ;;  %v1557_v58 = vmul.f32 %v8427_v8, %v1525_v50  ;;  %v4733_v7 = vunpack.c.h.bf16 %v5963_v11 }
 0x156   : >> { %v4913_v46 = vunpack.c.h.bf16 %v5271_v55  ;;  %v1304_v16 = vmul.f32 %v8427_v8, %v1272_v0  ;;  %v1307_v17 = vmul.f32 %v8427_v8, %v1275_v1  ;;  %v1529_v21 = vmax.f32 %v1497_v5, 0.0 }
 0x157   : >> { %v1353_v56 = vsel %vm8429_vm1, %v1305_v45, 0.0  ;;  %v1356_v57 = vsel %vm8429_vm1, %v1306_v48, 0.0  ;;  %v1597_v2 = vsel %vm8429_vm1, %v1557_v58, 0.0  ;;  %v1498_v26 = vadd.f32 %v4857_v61, %v5934_v36 }
 0x158   : >> { %v6016_v11 = vrot.slane %v5852_v42, %v5844_v34  ;;  %v4745_v27 = vunpack.c.h.bf16 %v5229_v20  ;;  %v4744_v29 = vunpack.c.l.bf16 %v5229_v20  ;;  %v1350_v30 = vsel %vm8429_vm1, %v1304_v16, 0.0 }
 0x159   : >> { %1842 = vadd.xlane.f32.xlu0 %v1841_v62  ;;  %1345 = vadd.xlane.f32.xlu1 %v1344_v63  ;;  %v1051_v62 = vmul.f32 %v8427_v8, %v1013_v52  ;;  %v1048_v63 = vmul.f32 %v8427_v8, %v1010_v43  ;;  %v1359_v31 = vsel %vm8429_vm1, %v1307_v17, 0.0  ;;  %v982_v24 = vadd.f32 %v4733_v7, %v5934_v36  ;;  %v6046_v7 = vld [vmem:[%s5791_s17 + $0x78] sm:$0xff]  }
 0x15a   : >> { %v1750_v3 = vadd.f32 %v4913_v46, %v5896_v32  ;;  %v1530_v40 = vmax.f32 %v1498_v26, 0.0  ;;  %v4809_v41 = vunpack.c.h.bf16 %v5245_v33  ;;  %v4797_v45 = vunpack.c.h.bf16 %v5976_v28 }
 0x15b   : >> { %v1014_v48 = vmax.f32 %v982_v24, 0.0  ;;  %v988_v35 = vadd.f32 %v4745_v27, %v6016_v11  ;;  %v987_v47 = vadd.f32 %v4744_v29, %v6016_v11  ;;  %v4853_v28 = vunpack.c.h.bf16 %v5988_v44  ;;  %v6056_v27 = vld [vmem:[%s5791_s17 + $0x120] sm:$0xff]  }
 0x15c   : >> { %v1782_v50 = vmax.f32 %v1750_v3, 0.0  ;;  %v1562_v53 = vmul.f32 %v8427_v8, %v1530_v40  ;;  %v4808_v54 = vunpack.c.l.bf16 %v5245_v33  ;;  %v1244_v0 = vadd.f32 %v4797_v45, %v5934_v36  ;;  %v6067_v45 = vld [vmem:[%s5791_s17 + $0x108] sm:$0xff]  }
 0x15d   : >> { %1595 = vadd.xlane.f32.xlu0 %v1594_v13  ;;  %1092 = vadd.xlane.f32.xlu1 %v1091_v14  ;;  %v1103_v13 = vsel %vm8429_vm1, %v1051_v62, 0.0  ;;  %v1094_v14 = vsel %vm8429_vm1, %v1048_v63, 0.0  ;;  %v1052_v55 = vmul.f32 %v8427_v8, %v1014_v48  ;;  %v1019_v58 = vmax.f32 %v987_v47, 0.0 }
 0x15e   : >> { %v1612_v62 = vsel %vm8429_vm1, %v1562_v53, 0.0  ;;  %v1250_v63 = vadd.f32 %v4809_v41, %v6016_v11  ;;  %v4920_v44 = vunpack.c.l.bf16 %v5273_v59  ;;  %v1249_v16 = vadd.f32 %v4808_v54, %v6016_v11  ;;  %v6064_v41 = vld [vmem:[%s5791_s17 + $0xb8] sm:$0xff]  }
 0x15f   : >> { %v4916_v20 = vunpack.c.l.bf16 %v6046_v7  ;;  %v4872_v3 = vunpack.c.l.bf16 %v6056_v27  ;;  %v4921_v33 = vunpack.c.h.bf16 %v5273_v59 }
 0x160   : >> { %v1282_v46 = vmax.f32 %v1250_v63, 0.0  ;;  %v1281_v24 = vmax.f32 %v1249_v16, 0.0 }
 0x161   : >> { %1342 = vadd.xlane.f32.xlu0 %v1341_v23  ;;  %1101 = vadd.xlane.f32.xlu1 %v1100_v25  ;;  %v1527_v23 = vmax.f32 %v1495_v6, 0.0  ;;  %v1749_v25 = vadd.f32 %v4912_v60, %v5896_v32  ;;  %v5258_v60 = vld [vmem:[%s5791_s17 + $0xa8] sm:$0xff]   ;;  %v1057_v6 = vmul.f32 %v8427_v8, %v1019_v58  ;;  %v1751_v40 = vadd.f32 %v4916_v20, %v5896_v32 }
 0x162   : >> { %v4860_v1 = vunpack.c.l.bf16 %v5258_v60  ;;  %v4861_v17 = vunpack.c.h.bf16 %v5258_v60  ;;  %v1314_v29 = vmul.f32 %v8427_v8, %v1282_v46  ;;  %v1313_v47 = vmul.f32 %v8427_v8, %v1281_v24 }
 0x163   : >> { %v1781_v39 = vmax.f32 %v1749_v25, 0.0  ;;  %v1753_v25 = vadd.f32 %v4920_v44, %v5934_v36  ;;  %v1783_v54 = vmax.f32 %v1751_v40, 0.0  ;;  %v1505_v59 = vadd.f32 %v4872_v3, %v6016_v11 }
 0x164   : >> { %v1499_v26 = vadd.f32 %v4860_v1, %v5934_v36  ;;  %v1380_v48 = vsel %vm8429_vm1, %v1314_v29, 0.0  ;;  %v1377_v58 = vsel %vm8429_vm1, %v1313_v47, 0.0  ;;  %v1754_v60 = vadd.f32 %v4921_v33, %v5934_v36 }
 0x165   : >> { %1098 = vadd.xlane.f32.xlu0 %v1097_v37  ;;  %1348 = vadd.xlane.f32.xlu1 %v1347_v38  ;;  %v1561_v37 = vmul.f32 %v8427_v8, %v1529_v21  ;;  %v1559_v38 = vmul.f32 %v8427_v8, %v1527_v23  ;;  %v1813_v43 = vmul.f32 %v8427_v8, %v1781_v39  ;;  %v1121_v23 = vsel %vm8429_vm1, %v1057_v6, 0.0 }
 0x166   : >> { %v1500_v39 = vadd.f32 %v4861_v17, %v5934_v36  ;;  %v1815_v1 = vmul.f32 %v8427_v8, %v1783_v54  ;;  %v4917_v24 = vunpack.c.h.bf16 %v6046_v7  ;;  %v4749_v47 = vunpack.c.h.bf16 %v6067_v45 }
 0x167   : >> { %v1609_v51 = vsel %vm8429_vm1, %v1561_v37, 0.0  ;;  %v1603_v52 = vsel %vm8429_vm1, %v1559_v38, 0.0  ;;  %v1853_v61 = vsel %vm8429_vm1, %v1813_v43, 0.0  ;;  %v1785_v37 = vmax.f32 %v1753_v25, 0.0 }
 0x168   : >> { %v1531_v38 = vmax.f32 %v1499_v26, 0.0  ;;  %v1859_v17 = vsel %vm8429_vm1, %v1815_v1, 0.0 }
 0x169   : >> { %1354 = vadd.xlane.f32.xlu0 %v1353_v56  ;;  %1357 = vadd.xlane.f32.xlu1 %v1356_v57  ;;  %v1814_v56 = vmul.f32 %v8427_v8, %v1782_v50  ;;  %v1020_v57 = vmax.f32 %v988_v35, 0.0  ;;  %v1817_v43 = vmul.f32 %v8427_v8, %v1785_v37 }
 0x16a   : >> { %v1563_v53 = vmul.f32 %v8427_v8, %v1531_v38 }
 0x16b   : >> { %v1058_v5 = vmul.f32 %v8427_v8, %v1020_v57  ;;  %v1865_v63 = vsel %vm8429_vm1, %v1817_v43, 0.0 }
 0x16d   : >> { %1598 = vadd.xlane.f32.xlu0 %v1597_v2  ;;  %1601 = vadd.xlane.f32.xlu1 %v1600_v4  ;;  %v1106_v2 = vsel %vm8429_vm1, %v1052_v55, 0.0  ;;  %v1856_v4 = vsel %vm8429_vm1, %v1814_v56, 0.0  ;;  %v1124_v21 = vsel %vm8429_vm1, %v1058_v5, 0.0  ;;  %v6078_v55 = vld [vmem:[%s5791_s17 + $0x128] sm:$0xff]   ;;  %v6081_v56 = vld [vmem:[%s5791_s17 + $0x118] sm:$0xff]   ;;  %v1786_v5 = vmax.f32 %v1754_v60, 0.0 }
 0x16e   : >> { %v4813_v60 = vunpack.c.h.bf16 %v6081_v56 }
 0x16f   : >> { %v1818_v26 = vmul.f32 %v8427_v8, %v1786_v5  ;;  %v990_v5 = vadd.f32 %v4749_v47, %v6016_v11 }
 0x171   : >> { %1104 = vadd.xlane.f32.xlu0 %v1103_v13  ;;  %1095 = vadd.xlane.f32.xlu1 %v1094_v14  ;;  %v1276_v13 = vmax.f32 %v1244_v0, 0.0  ;;  %v1496_v14 = vadd.f32 %v4853_v28, %v5896_v32  ;;  %v1532_v28 = vmax.f32 %v1500_v39, 0.0  ;;  %v1615_v0 = vsel %vm8429_vm1, %v1563_v53, 0.0  ;;  %v6116_v39 = vld [vmem:[%s5791_s17 + $0xc0] sm:$0xff]  }
 0x173   : >> { %v1564_v44 = vmul.f32 %v8427_v8, %v1532_v28  ;;  %v6130_v28 = vld [vmem:[%s5791_s17 + $0xd0] sm:$0xff]  }
 0x175   : >> { %1351 = vadd.xlane.f32.xlu0 %v1350_v30  ;;  %1360 = vadd.xlane.f32.xlu1 %v1359_v31  ;;  %v1308_v30 = vmul.f32 %v8427_v8, %v1276_v13  ;;  %v1528_v31 = vmax.f32 %v1496_v14, 0.0  ;;  %v4873_v14 = vunpack.c.h.bf16 %v6056_v27  ;;  %v1618_v16 = vsel %vm8429_vm1, %v1564_v44, 0.0  ;;  %v6143_v44 = vld [vmem:[%s5791_s17 + $0xc8] sm:$0xff]  }
 0x176   : >> { %v929_v27 = vcombine.high %v5884_v19, %v5884_v19 }
 0x177   : >> { %v1362_v50 = vsel %vm8429_vm1, %v1308_v30, 0.0  ;;  %v1560_v35 = vmul.f32 %v8427_v8, %v1528_v31  ;;  %v1506_v38 = vadd.f32 %v4873_v14, %v6016_v11 }
 0x178   : >> { %v6123_v7 = vrot.slane %v929_v27, %v5844_v34 }
 0x179   : >> { %1610 = vadd.xlane.f32.xlu0 %v1609_v51  ;;  %1604 = vadd.xlane.f32.xlu1 %v1603_v52  ;;  %v4924_v51 = vunpack.c.l.bf16 %v6064_v41  ;;  %v4748_v52 = vunpack.c.l.bf16 %v6067_v45  ;;  %v1606_v57 = vsel %vm8429_vm1, %v1560_v35, 0.0  ;;  %v4736_v35 = vunpack.c.l.bf16 %v6116_v39 }
 0x17a   : >> { %v1538_v53 = vmax.f32 %v1506_v38, 0.0  ;;  %v4801_v45 = vunpack.c.h.bf16 %v6130_v28 }
 0x17b   : >> { %v1755_v6 = vadd.f32 %v4924_v51, %v5934_v36  ;;  %v989_v46 = vadd.f32 %v4748_v52, %v6016_v11 }
 0x17c   : >> { %v1246_v14 = vadd.f32 %v4801_v45, %v6123_v7  ;;  %v6184_v45 = vld [vmem:[%s5791_s17 + $0x140] sm:$0xff]  }
 0x17d   : >> { %1854 = vadd.xlane.f32.xlu0 %v1853_v61  ;;  %1613 = vadd.xlane.f32.xlu1 %v1612_v62  ;;  %v4876_v61 = vunpack.c.l.bf16 %v6078_v55  ;;  %v4812_v62 = vunpack.c.l.bf16 %v6081_v56  ;;  %v1787_v29 = vmax.f32 %v1755_v6, 0.0  ;;  %v1021_v30 = vmax.f32 %v989_v46, 0.0 }
 0x17e   : >> { %v4740_v56 = vunpack.c.l.bf16 %v6143_v44  ;;  %v4925_v6 = vunpack.c.h.bf16 %v6064_v41 }
 0x17f   : >> { %v1507_v20 = vadd.f32 %v4876_v61, %v6016_v11  ;;  %v1059_v19 = vmul.f32 %v8427_v8, %v1021_v30  ;;  %v1278_v30 = vmax.f32 %v1246_v14, 0.0 }
 0x181   : >> { %1107 = vadd.xlane.f32.xlu0 %v1106_v2  ;;  %1857 = vadd.xlane.f32.xlu1 %v1856_v4  ;;  %v6094_v2 = vld [vmem:[%s5791_s17 + $0x130] sm:$0xff]   ;;  %v1537_v4 = vmax.f32 %v1505_v59, 0.0  ;;  %v1539_v3 = vmax.f32 %v1507_v20, 0.0  ;;  %v1752_v59 = vadd.f32 %v4917_v24, %v5896_v32  ;;  %v983_v32 = vadd.f32 %v4736_v35, %v6123_v7 }
 0x182   : >> { %v4937_v13 = vunpack.c.h.bf16 %v6094_v2  ;;  %v1756_v24 = vadd.f32 %v4925_v6, %v5934_v36 }
 0x183   : >> { %v1569_v25 = vmul.f32 %v8427_v8, %v1537_v4  ;;  %v1571_v51 = vmul.f32 %v8427_v8, %v1539_v3  ;;  %v1784_v4 = vmax.f32 %v1752_v59, 0.0  ;;  %v6163_v3 = vld [vmem:[%s5791_s17 + $0xe0] sm:$0xff]  }
 0x184   : >> { %v1762_v37 = vadd.f32 %v4937_v13, %v6016_v11  ;;  %v1788_v35 = vmax.f32 %v1756_v24, 0.0 }
 0x185   : >> { %1125 = vadd.xlane.f32.xlu1 %v1124_v21  ;;  %1122 = vadd.xlane.f32.xlu0 %v1121_v23  ;;  %v1251_v21 = vadd.f32 %v4812_v62, %v6016_v11  ;;  %v6105_v23 = vld [vmem:[%s5791_s17 + $0x138] sm:$0xff]   ;;  %v1633_v40 = vsel %vm8429_vm1, %v1569_v25, 0.0  ;;  %v1639_v61 = vsel %vm8429_vm1, %v1571_v51, 0.0  ;;  %v1015_v25 = vmax.f32 %v983_v32, 0.0 }
 0x186   : >> { %v4940_v31 = vunpack.c.l.bf16 %v6105_v23  ;;  %v1794_v43 = vmax.f32 %v1762_v37, 0.0  ;;  %v1820_v59 = vmul.f32 %v8427_v8, %v1788_v35 }
 0x187   : >> { %v1283_v33 = vmax.f32 %v1251_v21, 0.0  ;;  %v1816_v21 = vmul.f32 %v8427_v8, %v1784_v4  ;;  %v1053_v38 = vmul.f32 %v8427_v8, %v1015_v25 }
 0x188   : >> { %v1874_v4 = vsel %vm8429_vm1, %v1820_v59, 0.0 }
 0x189   : >> { %1381 = vadd.xlane.f32.xlu1 %v1380_v48  ;;  %1363 = vadd.xlane.f32.xlu0 %v1362_v50  ;;  %v1868_v48 = vsel %vm8429_vm1, %v1818_v26, 0.0  ;;  %v1819_v50 = vmul.f32 %v8427_v8, %v1787_v29  ;;  %v1315_v52 = vmul.f32 %v8427_v8, %v1283_v33  ;;  %v1022_v26 = vmax.f32 %v990_v5, 0.0 }
 0x18a   : >> { %v4936_v29 = vunpack.c.l.bf16 %v6094_v2  ;;  %v1862_v37 = vsel %vm8429_vm1, %v1816_v21, 0.0  ;;  %v4864_v2 = vunpack.c.l.bf16 %v6163_v3  ;;  %v1109_v47 = vsel %vm8429_vm1, %v1053_v38, 0.0 }
 0x18b   : >> { %v1871_v54 = vsel %vm8429_vm1, %v1819_v50, 0.0  ;;  %v1383_v62 = vsel %vm8429_vm1, %v1315_v52, 0.0  ;;  %v1310_v50 = vmul.f32 %v8427_v8, %v1278_v30 }
 0x18d   : >> { %1607 = vadd.xlane.f32.xlu1 %v1606_v57  ;;  %1378 = vadd.xlane.f32.xlu0 %v1377_v58  ;;  %v1127_v57 = vsel %vm8429_vm1, %v1059_v19, 0.0  ;;  %v1763_v58 = vadd.f32 %v4940_v31, %v6016_v11  ;;  %v985_v31 = vadd.f32 %v4740_v56, %v6123_v7 }
 0x18f   : >> { %v1795_v1 = vmax.f32 %v1763_v58, 0.0  ;;  %v1017_v19 = vmax.f32 %v985_v31, 0.0  ;;  %v4865_v31 = vunpack.c.h.bf16 %v6163_v3 }
 0x191   : >> { %1866 = vadd.xlane.f32.xlu1 %v1865_v63  ;;  %1616 = vadd.xlane.f32.xlu0 %v1615_v0  ;;  %v1826_v63 = vmul.f32 %v8427_v8, %v1794_v43  ;;  %v1570_v0 = vmul.f32 %v8427_v8, %v1538_v53  ;;  %v1827_v20 = vmul.f32 %v8427_v8, %v1795_v1  ;;  %v4741_v53 = vunpack.c.h.bf16 %v6143_v44 }
 0x192   : >> { %v1761_v43 = vadd.f32 %v4936_v29, %v6016_v11  ;;  %v1055_v58 = vmul.f32 %v8427_v8, %v1017_v19  ;;  %v4752_v44 = vunpack.c.l.bf16 %v6184_v45  ;;  %v6214_v29 = vld [vmem:[%s5791_s17 + $0xe8] sm:$0xff]  }
 0x193   : >> { %v1892_v46 = vsel %vm8429_vm1, %v1826_v63, 0.0  ;;  %v1636_v13 = vsel %vm8429_vm1, %v1570_v0, 0.0  ;;  %v1895_v33 = vsel %vm8429_vm1, %v1827_v20, 0.0  ;;  %v4737_v0 = vunpack.c.h.bf16 %v6116_v39 }
 0x194   : >> { %v1115_v1 = vsel %vm8429_vm1, %v1055_v58, 0.0  ;;  %v986_v32 = vadd.f32 %v4741_v53, %v6123_v7  ;;  %v4800_v39 = vunpack.c.l.bf16 %v6130_v28 }
 0x195   : >> { %1619 = vadd.xlane.f32.xlu1 %v1618_v16  ;;  %1860 = vadd.xlane.f32.xlu0 %v1859_v17  ;;  %v1252_v16 = vadd.f32 %v4813_v60, %v6016_v11  ;;  %v6154_v17 = vld [vmem:[%s5791_s17 + $0xd8] sm:$0xff]   ;;  %v984_v25 = vadd.f32 %v4737_v0, %v6123_v7  ;;  %v6257_v0 = vld [vmem:[%s5791_s17 + $0x188] sm:$0xff]  }
 0x196   : >> { %v4804_v41 = vunpack.c.l.bf16 %v6154_v17  ;;  %v4805_v14 = vunpack.c.h.bf16 %v6154_v17  ;;  %v1018_v20 = vmax.f32 %v986_v32, 0.0  ;;  %v1245_v3 = vadd.f32 %v4800_v39, %v6123_v7 }
 0x197   : >> { %v1284_v27 = vmax.f32 %v1252_v16, 0.0  ;;  %v6203_v16 = vld [vmem:[%s5791_s17 + $0x150] sm:$0xff]   ;;  %v1016_v19 = vmax.f32 %v984_v25, 0.0  ;;  %v4869_v32 = vunpack.c.h.bf16 %v6214_v29  ;;  %v928_v25 = vcombine.high %v5852_v42, %v5852_v42 }
 0x198   : >> { %v1247_v52 = vadd.f32 %v4804_v41, %v6123_v7  ;;  %v6211_v41 = vld [vmem:[%s5791_s17 + $0x148] sm:$0xff]   ;;  %v4816_v24 = vunpack.c.l.bf16 %v6203_v16  ;;  %v4817_v38 = vunpack.c.h.bf16 %v6203_v16  ;;  %v1248_v35 = vadd.f32 %v4805_v14, %v6123_v7 }
 0x199   : >> { %1634 = vadd.xlane.f32.xlu1 %v1633_v40  ;;  %1869 = vadd.xlane.f32.xlu0 %v1868_v48  ;;  %v1060_v40 = vmul.f32 %v8427_v8, %v1022_v26  ;;  %v4877_v48 = vunpack.c.h.bf16 %v6078_v55  ;;  %v1316_v36 = vmul.f32 %v8427_v8, %v1284_v27  ;;  %v4941_v55 = vunpack.c.h.bf16 %v6105_v23  ;;  %v6208_v26 = vld [vmem:[%s5791_s17 + $0xf0] sm:$0xff]  }
 0x19a   : >> { %v1279_v60 = vmax.f32 %v1247_v52, 0.0  ;;  %v6190_v23 = vrot.slane %v5866_v49, %v5844_v34 }
 0x19b   : >> { %v1130_v51 = vsel %vm8429_vm1, %v1060_v40, 0.0  ;;  %v1508_v63 = vadd.f32 %v4877_v48, %v6016_v11  ;;  %v1764_v5 = vadd.f32 %v4941_v55, %v6016_v11  ;;  %v4756_v40 = vunpack.c.l.bf16 %v6211_v41  ;;  %v6228_v48 = vld [vmem:[%s5791_s17 + $0x180] sm:$0xff]  }
 0x19c   : >> { %v1311_v56 = vmul.f32 %v8427_v8, %v1279_v60  ;;  %v991_v11 = vadd.f32 %v4752_v44, %v6190_v23  ;;  %v4760_v59 = vunpack.c.l.bf16 %v6228_v48  ;;  %v1277_v44 = vmax.f32 %v1245_v3, 0.0 }
 0x19d   : >> { %1872 = vadd.xlane.f32.xlu1 %v1871_v54  ;;  %1128 = vadd.xlane.f32.xlu0 %v1127_v57  ;;  %v1368_v54 = vsel %vm8429_vm1, %v1310_v50, 0.0  ;;  %v1386_v57 = vsel %vm8429_vm1, %v1316_v36, 0.0  ;;  %v1796_v21 = vmax.f32 %v1764_v5, 0.0  ;;  %v6231_v50 = vld [vmem:[%s5791_s17 + $0x158] sm:$0xff]   ;;  %v1056_v36 = vmul.f32 %v8427_v8, %v1018_v20 }
 0x19e   : >> { %v1371_v28 = vsel %vm8429_vm1, %v1311_v56, 0.0  ;;  %v1023_v55 = vmax.f32 %v991_v11, 0.0  ;;  %v4820_v58 = vunpack.c.l.bf16 %v6231_v50  ;;  %v6262_v5 = vld [vmem:[%s5791_s17 + $0x198] sm:$0xff]   ;;  %v4764_v20 = vunpack.c.l.bf16 %v6257_v0 }
 0x19f   : >> { %v1828_v53 = vmul.f32 %v8427_v8, %v1796_v21  ;;  %v1118_v56 = vsel %vm8429_vm1, %v1056_v36, 0.0  ;;  %v4757_v21 = vunpack.c.h.bf16 %v6211_v41  ;;  %v1973_v36 = vadd.s32 4294967288, %v8426_v10 }
 0x1a0   : >> { %v1254_v9 = vadd.f32 %v4817_v38, %v6190_v23  ;;  %v1980_v38 = vadd.s32 4294967280, %v8426_v10 }
 0x1a1   : >> { %1640 = vadd.xlane.f32.xlu1 %v1639_v61  ;;  %1384 = vadd.xlane.f32.xlu0 %v1383_v62  ;;  %v1793_v61 = vmax.f32 %v1761_v43, 0.0  ;;  %v1501_v62 = vadd.f32 %v4864_v2, %v6123_v7  ;;  %v4868_v2 = vunpack.c.l.bf16 %v6214_v29 }
 0x1a3   : >> { %v1825_v6 = vmul.f32 %v8427_v8, %v1793_v61 }
 0x1a5   : >> { %1893 = vadd.xlane.f32.xlu1 %v1892_v46  ;;  %1637 = vadd.xlane.f32.xlu0 %v1636_v13  ;;  %v1533_v46 = vmax.f32 %v1501_v62, 0.0  ;;  %v1540_v13 = vmax.f32 %v1508_v63, 0.0  ;;  %v1889_v17 = vsel %vm8429_vm1, %v1825_v6, 0.0  ;;  %v6254_v63 = vld [vmem:[%s5791_s17 + $0xf8] sm:$0xff]   ;;  %v1898_v6 = vsel %vm8429_vm1, %v1828_v53, 0.0 }
 0x1a6   : >> { %v4932_v39 = vunpack.c.l.bf16 %v6254_v63  ;;  %v6342_v53 = vsub.s32 %v1980_v38, %v5835_v22 }
 0x1a7   : >> { %v1565_v30 = vmul.f32 %v8427_v8, %v1533_v46  ;;  %v1572_v27 = vmul.f32 %v8427_v8, %v1540_v13  ;;  %v1054_v46 = vmul.f32 %v8427_v8, %v1016_v19  ;;  %v1061_v13 = vmul.f32 %v8427_v8, %v1023_v55 }
 0x1a9   : >> { %1896 = vadd.xlane.f32.xlu1 %v1895_v33  ;;  %1863 = vadd.xlane.f32.xlu0 %v1862_v37  ;;  %v4753_v33 = vunpack.c.h.bf16 %v6184_v45  ;;  %v4929_v37 = vunpack.c.h.bf16 %v6208_v26  ;;  %v1621_v52 = vsel %vm8429_vm1, %v1565_v30, 0.0  ;;  %v1642_v43 = vsel %vm8429_vm1, %v1572_v27, 0.0  ;;  %v6277_v30 = vld [vmem:[%s5791_s17 + $0x168] sm:$0xff]   ;;  %v6280_v27 = vld [vmem:[%s5791_s17 + $0x1a0] sm:$0xff]  }
 0x1aa   : >> { %v1502_v45 = vadd.f32 %v4865_v31, %v6123_v7  ;;  %v1309_v31 = vmul.f32 %v8427_v8, %v1277_v44  ;;  %v1112_v3 = vsel %vm8429_vm1, %v1054_v46, 0.0  ;;  %v1133_v42 = vsel %vm8429_vm1, %v1061_v13, 0.0 }
 0x1ab   : >> { %v6294_v44 = vrot.slane %v928_v25, %v5844_v34  ;;  %v6305_v13 = vsub.s32 %v1973_v36, %v5835_v22 }
 0x1ac   : >> { %v1534_v11 = vmax.f32 %v1502_v45, 0.0 }
 0x1ad   : >> { %1110 = vadd.xlane.f32.xlu1 %v1109_v47  ;;  %1131 = vadd.xlane.f32.xlu0 %v1130_v51  ;;  %v6237_v47 = vld [vmem:[%s5791_s17 + $0x190] sm:$0xff]   ;;  %v6240_v51 = vld [vmem:[%s5791_s17 + $0x160] sm:$0xff]  }
 0x1ae   : >> { %v4825_v60 = vunpack.c.h.bf16 %v6237_v47  ;;  %v4824_v61 = vunpack.c.l.bf16 %v6237_v47  ;;  %v4881_v62 = vunpack.c.h.bf16 %v6240_v51  ;;  %v4880_v14 = vunpack.c.l.bf16 %v6240_v51 }
 0x1b1   : >> { %1369 = vadd.xlane.f32.xlu1 %v1368_v54  ;;  %1387 = vadd.xlane.f32.xlu0 %v1386_v57  ;;  %v4761_v54 = vunpack.c.h.bf16 %v6228_v48  ;;  %v4928_v57 = vunpack.c.l.bf16 %v6208_v26  ;;  %v1987_v48 = vadd.s32 4294967272, %v8426_v10 }
 0x1b5   : >> { %1116 = vadd.xlane.f32.xlu1 %v1115_v1  ;;  %1875 = vadd.xlane.f32.xlu0 %v1874_v4  ;;  %v1280_v1 = vmax.f32 %v1248_v35, 0.0  ;;  %v1253_v4 = vadd.f32 %v4816_v24, %v6190_v23  ;;  %v992_v35 = vadd.f32 %v4753_v33, %v6190_v23 }
 0x1b7   : >> { %v1312_v24 = vmul.f32 %v8427_v8, %v1280_v1  ;;  %v1285_v19 = vmax.f32 %v1253_v4, 0.0  ;;  %v6298_v4 = vsub.s32 %v8426_v10, %v5835_v22 }
 0x1b9   : >> { %1372 = vadd.xlane.f32.xlu1 %v1371_v28  ;;  %1890 = vadd.xlane.f32.xlu0 %v1889_v17  ;;  %v4828_v28 = vunpack.c.l.bf16 %v6262_v5  ;;  %v4821_v17 = vunpack.c.h.bf16 %v6231_v50  ;;  %v1374_v46 = vsel %vm8429_vm1, %v1312_v24, 0.0  ;;  %v1317_v25 = vmul.f32 %v8427_v8, %v1285_v19 }
 0x1bd   : >> { %1622 = vadd.xlane.f32.xlu1 %v1621_v52  ;;  %1643 = vadd.xlane.f32.xlu0 %v1642_v43  ;;  %v1758_v52 = vadd.f32 %v4929_v37, %v6123_v7  ;;  %v2179_v43 = vadd.s32 4294967256, %v8426_v10  ;;  %v1566_v37 = vmul.f32 %v8427_v8, %v1534_v11  ;;  %v993_v11 = vadd.f32 %v4756_v40, %v6190_v23 }
 0x1be   : >> { %v1503_v40 = vadd.f32 %v4868_v2, %v6123_v7  ;;  %v1286_v2 = vmax.f32 %v1254_v9, 0.0  ;;  %v1757_v9 = vadd.f32 %v4928_v57, %v6123_v7 }
 0x1bf   : >> { %v6315_v15 = vsub.s32 %v2179_v43, %v5835_v22  ;;  %v1624_v19 = vsel %vm8429_vm1, %v1566_v37, 0.0  ;;  %v1389_v37 = vsel %vm8429_vm1, %v1317_v25, 0.0  ;;  %v1025_v45 = vmax.f32 %v993_v11, 0.0 }
 0x1c1   : >> { %1119 = vadd.xlane.f32.xlu1 %v1118_v56  ;;  %1899 = vadd.xlane.f32.xlu0 %v1898_v6  ;;  %v2174_v56 = vadd.s32 4294967264, %v8426_v10  ;;  %v1365_v6 = vsel %vm8429_vm1, %v1309_v31, 0.0  ;;  %v2378_v31 = vadd.s32 4294967224, %v8426_v10 }
 0x1c3   : >> { %v6322_v16 = vsub.s32 %v2174_v56, %v5835_v22  ;;  %v996_v56 = vadd.f32 %v4761_v54, %v6294_v44  ;;  %v2186_v54 = vadd.s32 4294967248, %v8426_v10  ;;  %v6358_v26 = vsub.s32 %v2378_v31, %v5835_v22 }
 0x1c4   : >> { %v1789_v31 = vmax.f32 %v1757_v9, 0.0 }
 0x1c5   : >> { %1113 = vadd.xlane.f32.xlu0 %v1112_v3  ;;  %1134 = vadd.xlane.f32.xlu1 %v1133_v42  ;;  %v1024_v3 = vmax.f32 %v992_v35, 0.0  ;;  %v1790_v42 = vmax.f32 %v1758_v52, 0.0  ;;  %v8371_v35 = vmov 0  }
 0x1c6   : >> { %v1334_v1 = vpop.xlane.xlu1 %1333  ;;  %v1075_v33 = vpop.xlane.xlu0 %1074  ;;  %5467 = vset.pattern.permute.xlu0 %v8371_v35  ;;  %5468 = vset.pattern.permute.xlu1 %v8371_v35 }
 0x1c7   : >> { %v1972_v52 = vrot.slane %v1075_v33, %v6298_v4  ;;  %v2193_v33 = vadd.s32 4294967240, %v8426_v10 }
 0x1c9   : >> { %1366 = vadd.xlane.f32.xlu0 %v1365_v6  ;;  %1375 = vadd.xlane.f32.xlu1 %v1374_v46  ;;  %v1062_v6 = vmul.f32 %v8427_v8, %v1024_v3  ;;  %v1822_v46 = vmul.f32 %v8427_v8, %v1790_v42  ;;  %v1535_v3 = vmax.f32 %v1503_v40, 0.0  ;;  %v2183_v42 = vrot.slane %v1334_v1, %v6315_v15 }
 0x1ca   : >> { %v6318_v24 = vpop.xlane.xlu1 %1589  ;;  %v1078_v36 = vpop.xlane.xlu0 %1077  ;;  %v1063_v40 = vmul.f32 %v8427_v8, %v1025_v45  ;;  %v6361_v57 = vsub.s32 %v2193_v33, %v5835_v22  ;;  %v2373_v45 = vadd.s32 4294967232, %v8426_v10 }
 0x1cb   : >> { %v1977_v43 = vrot.slane %v1078_v36, %v6305_v13  ;;  %v2577_v36 = vadd.s32 4294967192, %v8426_v10  ;;  %v1880_v38 = vsel %vm8429_vm1, %v1822_v46, 0.0 }
 0x1cd   : >> { %v1979_v55 = vsel %vm1978_vm3, %v1977_v43, %v1972_v52  ;;  %1625 = vadd.xlane.f32.xlu0 %v1624_v19  ;;  %1390 = vadd.xlane.f32.xlu1 %v1389_v37  ;;  %v1028_v19 = vmax.f32 %v996_v56, 0.0  ;;  %v1255_v52 = vadd.f32 %v4820_v58, %v6190_v23  ;;  %v1136_v43 = vsel %vm8429_vm1, %v1062_v6, 0.0 }
 0x1ce   : >> { %v1340_v25 = vpop.xlane.xlu1 %1339  ;;  %v1331_v35 = vpop.xlane.xlu0 %1330  ;;  %v1318_v37 = vmul.f32 %v8427_v8, %v1286_v2  ;;  %v6367_v56 = vsub.s32 %v2186_v54, %v5835_v22  ;;  %v1567_v6 = vmul.f32 %v8427_v8, %v1535_v3  ;;  %v1258_v3 = vadd.f32 %v4825_v60, %v6294_v44 }
 0x1cf   : >> { %v2178_v11 = vrot.slane %v1331_v35, %v6322_v16  ;;  %v1066_v2 = vmul.f32 %v8427_v8, %v1028_v19  ;;  %v1287_v33 = vmax.f32 %v1255_v52, 0.0  ;;  %v2584_v19 = vadd.s32 4294967184, %v8426_v10 }
 0x1d0   : >> { %v1392_v54 = vsel %vm8429_vm1, %v1318_v37, 0.0  ;;  %v1627_v52 = vsel %vm8429_vm1, %v1567_v6, 0.0  ;;  %v1821_v60 = vmul.f32 %v8427_v8, %v1789_v31  ;;  %v1510_v6 = vadd.f32 %v4881_v62, %v6190_v23 }
 0x1d1   : >> { %v2185_v1 = vsel %vm2184_vm4, %v2183_v42, %v2178_v11  ;;  %1137 = vadd.xlane.f32.xlu0 %v1136_v43  ;;  %1881 = vadd.xlane.f32.xlu1 %v1880_v38  ;;  %v995_v42 = vadd.f32 %v4760_v59, %v6294_v44  ;;  %v6377_v11 = vsub.s32 %v2577_v36, %v5835_v22  ;;  %v1139_v43 = vsel %vm8429_vm1, %v1063_v40, 0.0 }
 0x1d2   : >> { %v6364_v58 = vpop.xlane.xlu1 %1845  ;;  %v1081_v35 = vpop.xlane.xlu0 %1080  ;;  %v6391_v38 = vsub.s32 %v2373_v45, %v5835_v22  ;;  %v1148_v37 = vsel %vm8429_vm1, %v1066_v2, 0.0  ;;  %v1319_v40 = vmul.f32 %v8427_v8, %v1287_v33  ;;  %v2591_v31 = vadd.s32 4294967176, %v8426_v10 }
 0x1d3   : >> { %v1984_v46 = vrot.slane %v1081_v35, %v6342_v53  ;;  %v1027_v35 = vmax.f32 %v995_v42, 0.0  ;;  %v6407_v2 = vsub.s32 %v1987_v48, %v5835_v22  ;;  %v2385_v62 = vadd.s32 4294967216, %v8426_v10 }
 0x1d4   : >> { %v2382_v42 = vrot.slane %v6318_v24, %v6358_v26  ;;  %v1395_v48 = vsel %vm8429_vm1, %v1319_v40, 0.0  ;;  %v6429_v29 = vsub.s32 %v2584_v19, %v5835_v22  ;;  %v4933_v40 = vunpack.c.h.bf16 %v6254_v63 }
 0x1d5   : >> { %v1986_v9 = vsel %vm1985_vm5, %v1984_v46, %v1979_v55  ;;  %1393 = vadd.xlane.f32.xlu0 %v1392_v54  ;;  %1140 = vadd.xlane.f32.xlu1 %v1139_v43  ;;  %v2197_v46 = vrot.slane %v1340_v25, %v6361_v57  ;;  %v1290_v54 = vmax.f32 %v1258_v3, 0.0  ;;  %v1257_v43 = vadd.f32 %v4824_v61, %v6294_v44 }
 0x1d6   : >> { %v6387_v59 = vpop.xlane.xlu1 %1848  ;;  %v1337_v36 = vpop.xlane.xlu0 %1336  ;;  %v1877_v61 = vsel %vm8429_vm1, %v1821_v60, 0.0  ;;  %v1759_v60 = vadd.f32 %v4932_v39, %v6123_v7  ;;  %v1509_v39 = vadd.f32 %v4880_v14, %v6190_v23  ;;  %v2392_v14 = vadd.s32 4294967208, %v8426_v10 }
 0x1d7   : >> { %v2190_v55 = vrot.slane %v1337_v36, %v6367_v56  ;;  %v1065_v36 = vmul.f32 %v8427_v8, %v1027_v35 }
 0x1d9   : >> { %v2192_v45 = vsel %vm2191_vm6, %v2190_v55, %v2185_v1  ;;  %1628 = vadd.xlane.f32.xlu0 %v1627_v52  ;;  %1149 = vadd.xlane.f32.xlu1 %v1148_v37  ;;  %v1504_v1 = vadd.f32 %v4869_v32, %v6123_v7  ;;  %v1322_v52 = vmul.f32 %v8427_v8, %v1290_v54  ;;  %v1289_v55 = vmax.f32 %v1257_v43, 0.0 }
 0x1da   : >> { %v6410_v25 = vsel %vm2198_vm7, %v2197_v46, %v2192_v45  ;;  %v6412_v33 = vpop.xlane.xlu1 %1851  ;;  %v1587_v47 = vpop.xlane.xlu0 %1586  ;;  %v1542_v37 = vmax.f32 %v1510_v6, 0.0  ;;  %v6432_v32 = vsub.s32 %v2591_v31, %v5835_v22  ;;  %v2572_v54 = vadd.s32 4294967200, %v8426_v10 }
 0x1db   : >> { %v2377_v3 = vrot.slane %v1587_v47, %v6391_v38  ;;  %v1536_v43 = vmax.f32 %v1504_v1, 0.0  ;;  %v1145_v6 = vsel %vm8429_vm1, %v1065_v36, 0.0  ;;  %v6443_v45 = vsub.s32 %v2385_v62, %v5835_v22 }
 0x1dc   : >> { %v997_v31 = vadd.f32 %v4764_v20, %v6294_v44  ;;  %v1404_v47 = vsel %vm8429_vm1, %v1322_v52, 0.0  ;;  %v1574_v1 = vmul.f32 %v8427_v8, %v1542_v37  ;;  %v6456_v20 = vsub.s32 %v2572_v54, %v5835_v22 }
 0x1dd   : >> { %v2384_v24 = vsel %vm2383_vm8, %v2382_v42, %v2377_v3  ;;  %1878 = vadd.xlane.f32.xlu0 %v1877_v61  ;;  %1396 = vadd.xlane.f32.xlu1 %v1395_v48  ;;  %v1321_v61 = vmul.f32 %v8427_v8, %v1289_v55  ;;  %v1791_v42 = vmax.f32 %v1759_v60, 0.0  ;;  %v1568_v48 = vmul.f32 %v8427_v8, %v1536_v43 }
 0x1de   : >> { %v1084_v35 = vpop.xlane.xlu0 %1083  ;;  %v1087_v46 = vpop.xlane.xlu1 %1086  ;;  %v1541_v36 = vmax.f32 %v1509_v39, 0.0  ;;  %v994_v52 = vadd.f32 %v4757_v21, %v6190_v23  ;;  %v1029_v60 = vmax.f32 %v997_v31, 0.0  ;;  %v1648_v54 = vsel %vm8429_vm1, %v1574_v1, 0.0  ;;  %v6484_v1 = vld [vmem:[%s5791_s17 + $0x170] sm:$0xff]  }
 0x1df   : >> { %v1991_v19 = vrot.slane %v1084_v35, %v6407_v2  ;;  %v1401_v35 = vsel %vm8429_vm1, %v1321_v61, 0.0  ;;  %v1259_v43 = vadd.f32 %v4828_v28, %v6294_v44  ;;  %v1630_v31 = vsel %vm8429_vm1, %v1568_v48, 0.0 }
 0x1e0   : >> { %v1256_v61 = vadd.f32 %v4821_v17, %v6190_v23  ;;  %v8433_v28 = vunpack.c.l.bf16 %v6277_v30  ;;  %v2588_v48 = vrot.slane %v6387_v59, %v6429_v29 }
 0x1e1   : >> { %v6452_v51 = vsel %vm1992_vm9, %v1991_v19, %v1986_v9  ;;  %1146 = vadd.xlane.f32.xlu0 %v1145_v6  ;;  %1405 = vadd.xlane.f32.xlu1 %v1404_v47  ;;  %v1997_v9 = vrot.slane %v1087_v46, %v6298_v4  ;;  %v1823_v19 = vmul.f32 %v8427_v8, %v1791_v42  ;;  %v1026_v47 = vmax.f32 %v994_v52, 0.0 }
 0x1e2   : >> { %v1593_v62 = vpop.xlane.xlu0 %1592  ;;  %v1090_v3 = vpop.xlane.xlu1 %1089  ;;  %v6474_v46 = vsub.s32 %v2392_v14, %v5835_v22  ;;  %v2581_v42 = vrot.slane %v6364_v58, %v6377_v11  ;;  %v1291_v17 = vmax.f32 %v1259_v43, 0.0  ;;  %v2595_v52 = vrot.slane %v6412_v33, %v6432_v32 }
 0x1e3   : >> { %v2389_v55 = vrot.slane %v1593_v62, %v6443_v45  ;;  %v2001_v37 = vrot.slane %v1090_v3, %v6305_v13  ;;  %v1573_v62 = vmul.f32 %v8427_v8, %v1541_v36  ;;  %v1067_v3 = vmul.f32 %v8427_v8, %v1029_v60 }
 0x1e4   : >> { %v1883_v50 = vsel %vm8429_vm1, %v1823_v19, 0.0  ;;  %v4945_v58 = vunpack.c.h.bf16 %v6484_v1  ;;  %v1064_v59 = vmul.f32 %v8427_v8, %v1026_v47  ;;  %v1288_v60 = vmax.f32 %v1256_v61, 0.0 }
 0x1e5   : >> { %v2391_v41 = vsel %vm2390_vm10, %v2389_v55, %v2384_v24  ;;  %v2002_v21 = vsel %vm1978_vm3, %v2001_v37, %v1997_v9  ;;  %1402 = vadd.xlane.f32.xlu0 %v1401_v35  ;;  %1649 = vadd.xlane.f32.xlu1 %v1648_v54  ;;  %v1511_v24 = vadd.f32 %v8433_v28, %v6190_v23  ;;  %v8434_v35 = vunpack.c.l.bf16 %v6280_v27 }
 0x1e6   : >> { %v1843_v39 = vpop.xlane.xlu0 %1842  ;;  %v1346_v6 = vpop.xlane.xlu1 %1345  ;;  %v1151_v28 = vsel %vm8429_vm1, %v1067_v3, 0.0  ;;  %v8435_v47 = vunpack.c.h.bf16 %v6280_v27  ;;  %v1320_v3 = vmul.f32 %v8427_v8, %v1288_v60  ;;  %v1760_v27 = vadd.f32 %v4933_v40, %v6123_v7 }
 0x1e7   : >> { %v2576_v14 = vrot.slane %v1843_v39, %v6456_v20  ;;  %v1513_v54 = vadd.f32 %v8434_v35, %v6294_v44  ;;  %v1543_v43 = vmax.f32 %v1511_v24, 0.0  ;;  %v4765_v40 = vunpack.c.h.bf16 %v6257_v0 }
 0x1e8   : >> { %v1514_v61 = vadd.f32 %v8435_v47, %v6294_v44 }
 0x1e9   : >> { %v2583_v9 = vsel %vm8386_vm11, %v2581_v42, %v2576_v14  ;;  %1631 = vadd.xlane.f32.xlu0 %v1630_v31  ;;  %1884 = vadd.xlane.f32.xlu1 %v1883_v50  ;;  %v1645_v31 = vsel %vm8429_vm1, %v1573_v62, 0.0  ;;  %v1323_v42 = vmul.f32 %v8427_v8, %v1291_v17  ;;  %v6515_v14 = vld [vmem:[%s5791_s17 + $0x1a8] sm:$0xff]   ;;  %v1545_v17 = vmax.f32 %v1513_v54, 0.0 }
 0x1ea   : >> { %v2590_v36 = vsel %vm2589_vm12, %v2588_v48, %v2583_v9  ;;  %v1596_v55 = vpop.xlane.xlu0 %1595  ;;  %v1093_v37 = vpop.xlane.xlu1 %1092  ;;  %v2207_v9 = vrot.slane %v1346_v6, %v6315_v15  ;;  %v1575_v35 = vmul.f32 %v8427_v8, %v1543_v43  ;;  %v1546_v7 = vmax.f32 %v1514_v61, 0.0 }
 0x1eb   : >> { %v2396_v33 = vrot.slane %v1596_v55, %v6474_v46  ;;  %v2006_v19 = vrot.slane %v1093_v37, %v6342_v53  ;;  %v6506_v39 = vsel %vm2596_vm13, %v2595_v52, %v2590_v36  ;;  %v4944_v52 = vunpack.c.l.bf16 %v6484_v1  ;;  %v6533_v55 = vld [vmem:[%s5791_s17 + $0x178] sm:$0xff]  }
 0x1ec   : >> { %v4892_v36 = vunpack.c.l.bf16 %v6515_v14  ;;  %v1142_v37 = vsel %vm8429_vm1, %v1064_v59, 0.0  ;;  %v1407_v60 = vsel %vm8429_vm1, %v1323_v42, 0.0  ;;  %v1577_v54 = vmul.f32 %v8427_v8, %v1545_v17  ;;  %v6547_v42 = vld [vmem:[%s5791_s17 + $0x1b0] sm:$0xff]  }
 0x1ed   : >> { %v6518_v48 = vsel %vm2397_vm14, %v2396_v33, %v2391_v41  ;;  %v6521_v24 = vsel %vm1985_vm5, %v2006_v19, %v2002_v21  ;;  %1646 = vadd.xlane.f32.xlu0 %v1645_v31  ;;  %1152 = vadd.xlane.f32.xlu1 %v1151_v28  ;;  %v1766_v21 = vadd.f32 %v4945_v58, %v6190_v23  ;;  %v1398_v58 = vsel %vm8429_vm1, %v1320_v3, 0.0 }
 0x1ee   : >> { %v1343_v62 = vpop.xlane.xlu0 %1342  ;;  %v1102_v50 = vpop.xlane.xlu1 %1101  ;;  %v1792_v33 = vmax.f32 %v1760_v27, 0.0  ;;  %v4948_v59 = vunpack.c.l.bf16 %v6533_v55  ;;  %v1651_v0 = vsel %vm8429_vm1, %v1575_v35, 0.0  ;;  %v1578_v47 = vmul.f32 %v8427_v8, %v1546_v7  ;;  %v6566_v7 = vld [vmem:[%s5791_s17 + $0x1b8] sm:$0xff]  }
 0x1ef   : >> { %v2203_v41 = vrot.slane %v1343_v62, %v6322_v16  ;;  %v2020_v19 = vrot.slane %v1102_v50, %v6305_v13  ;;  %v1798_v28 = vmax.f32 %v1766_v21, 0.0  ;;  %v1765_v61 = vadd.f32 %v4944_v52, %v6190_v23 }
 0x1f0   : >> { %v1515_v62 = vadd.f32 %v4892_v36, %v6294_v44  ;;  %v4829_v21 = vunpack.c.h.bf16 %v6262_v5  ;;  %v4953_v52 = vunpack.c.h.bf16 %v6547_v42 }
 0x1f1   : >> { %v2208_v63 = vsel %vm2184_vm4, %v2207_v9, %v2203_v41  ;;  %1143 = vadd.xlane.f32.xlu0 %v1142_v37  ;;  %1408 = vadd.xlane.f32.xlu1 %v1407_v60  ;;  %v1657_v9 = vsel %vm8429_vm1, %v1577_v54, 0.0  ;;  %v998_v41 = vadd.f32 %v4765_v40, %v6294_v44  ;;  %v1824_v60 = vmul.f32 %v8427_v8, %v1792_v33 }
 0x1f2   : >> { %v1099_v6 = vpop.xlane.xlu0 %1098  ;;  %v1349_v1 = vpop.xlane.xlu1 %1348  ;;  %v1830_v35 = vmul.f32 %v8427_v8, %v1798_v28  ;;  %v1767_v40 = vadd.f32 %v4948_v59, %v6190_v23  ;;  %v930_v54 = vcombine.high %v5866_v49, %v5866_v49  ;;  %v4956_v28 = vunpack.c.l.bf16 %v6566_v7 }
 0x1f3   : >> { %v2016_v43 = vrot.slane %v1099_v6, %v6298_v4  ;;  %v2212_v31 = vrot.slane %v1349_v1, %v6367_v56  ;;  %v1797_v6 = vmax.f32 %v1765_v61, 0.0  ;;  %v1547_v1 = vmax.f32 %v1515_v62, 0.0 }
 0x1f4   : >> { %v1886_v61 = vsel %vm8429_vm1, %v1824_v60, 0.0 }
 0x1f5   : >> { %v2021_v3 = vsel %vm1978_vm3, %v2020_v19, %v2016_v43  ;;  %v6555_v50 = vsel %vm2191_vm6, %v2212_v31, %v2208_v63  ;;  %1399 = vadd.xlane.f32.xlu0 %v1398_v58  ;;  %1652 = vadd.xlane.f32.xlu1 %v1651_v0  ;;  %v1660_v63 = vsel %vm8429_vm1, %v1578_v47, 0.0  ;;  %v4885_v58 = vunpack.c.h.bf16 %v6277_v30  ;;  %v6579_v0 = vld [vmem:[%s5791_s17 + $0x1c0] sm:$0xff]  }
 0x1f6   : >> { %v1355_v17 = vpop.xlane.xlu0 %1354  ;;  %v1358_v27 = vpop.xlane.xlu1 %1357  ;;  %v1030_v43 = vmax.f32 %v998_v41, 0.0  ;;  %v1260_v31 = vadd.f32 %v4829_v21, %v6294_v44  ;;  %v1904_v30 = vsel %vm8429_vm1, %v1830_v35, 0.0  ;;  %v1829_v62 = vmul.f32 %v8427_v8, %v1797_v6 }
 0x1f7   : >> { %v2222_v37 = vrot.slane %v1355_v17, %v6322_v16  ;;  %v2226_v36 = vrot.slane %v1358_v27, %v6315_v15  ;;  %v1579_v49 = vmul.f32 %v8427_v8, %v1547_v1  ;;  %v1799_v17 = vmax.f32 %v1767_v40, 0.0 }
 0x1f8   : >> { %v1770_v27 = vadd.f32 %v4953_v52, %v6294_v44  ;;  %v4952_v41 = vunpack.c.l.bf16 %v6547_v42  ;;  %v4769_v21 = vunpack.c.h.bf16 %v6579_v0  ;;  %v1068_v35 = vmul.f32 %v8427_v8, %v1030_v43  ;;  %v6602_v42 = vld [vmem:[%s5791_s17 + $0x1d0] sm:$0xff]  }
 0x1f9   : >> { %v6571_v5 = vsel %vm2184_vm4, %v2226_v36, %v2222_v37  ;;  %1658 = vadd.xlane.f32.xlu0 %v1657_v9  ;;  %1661 = vadd.xlane.f32.xlu1 %v1660_v63  ;;  %v6594_v37 = vrot.slane %v930_v54, %v5844_v34  ;;  %v1292_v63 = vmax.f32 %v1260_v31, 0.0  ;;  %v1512_v1 = vadd.f32 %v4885_v58, %v6190_v23 }
 0x1fa   : >> { %v1599_v33 = vpop.xlane.xlu0 %1598  ;;  %v1602_v19 = vpop.xlane.xlu1 %1601  ;;  %v1771_v40 = vadd.f32 %v4956_v28, %v6294_v44  ;;  %v1663_v54 = vsel %vm8429_vm1, %v1579_v49, 0.0 }
 0x1fb   : >> { %v2402_v59 = vrot.slane %v1599_v33, %v6391_v38  ;;  %v2406_v47 = vrot.slane %v1602_v19, %v6358_v26  ;;  %v1901_v33 = vsel %vm8429_vm1, %v1829_v62, 0.0  ;;  %v1831_v19 = vmul.f32 %v8427_v8, %v1799_v17 }
 0x1fc   : >> { %v4833_v62 = vunpack.c.h.bf16 %v6602_v42  ;;  %v1324_v49 = vmul.f32 %v8427_v8, %v1292_v63  ;;  %v1803_v17 = vmax.f32 %v1771_v40, 0.0 }
 0x1fd   : >> { %v6589_v9 = vsel %vm2383_vm8, %v2406_v47, %v2402_v59  ;;  %1887 = vadd.xlane.f32.xlu0 %v1886_v61  ;;  %1905 = vadd.xlane.f32.xlu1 %v1904_v30  ;;  %v1802_v59 = vmax.f32 %v1770_v27, 0.0  ;;  %v1154_v61 = vsel %vm8429_vm1, %v1068_v35, 0.0  ;;  %v4893_v30 = vunpack.c.h.bf16 %v6515_v14  ;;  %v6624_v27 = vld [vmem:[%s5791_s17 + $0x1c8] sm:$0xff]  }
 0x1fe   : >> { %v1105_v36 = vpop.xlane.xlu0 %1104  ;;  %v1096_v60 = vpop.xlane.xlu1 %1095  ;;  %v1000_v35 = vadd.f32 %v4769_v21, %v6594_v37  ;;  %v4772_v40 = vunpack.c.l.bf16 %v6624_v27 }
 0x1ff   : >> { %v2025_v52 = vrot.slane %v1105_v36, %v6342_v53  ;;  %v2011_v6 = vrot.slane %v1096_v60, %v6407_v2  ;;  %v1834_v36 = vmul.f32 %v8427_v8, %v1802_v59  ;;  %v1769_v60 = vadd.f32 %v4952_v41, %v6294_v44 }
 0x200   : >> { %v1410_v41 = vsel %vm8429_vm1, %v1324_v49, 0.0  ;;  %v1032_v59 = vmax.f32 %v1000_v35, 0.0 }
 0x201   : >> { %v6608_v43 = vsel %vm1985_vm5, %v2025_v52, %v2021_v3  ;;  %v2012_v31 = vsel %vm1992_vm9, %v2011_v6, %v6521_v24  ;;  %1902 = vadd.xlane.f32.xlu0 %v1901_v33  ;;  %1664 = vadd.xlane.f32.xlu1 %v1663_v54  ;;  %v1544_v24 = vmax.f32 %v1512_v1, 0.0  ;;  %v4949_v1 = vunpack.c.h.bf16 %v6533_v55  ;;  %v5252_v54 = vld [vmem:[%s5791_s17 + $0x1d8] sm:$0xff]  }
 0x202   : >> { %v6614_v58 = vsel %vm8385_vm15, %v2012_v31, %v6452_v51  ;;  %v1352_v28 = vpop.xlane.xlu0 %1351  ;;  %v6616_v47 = vpop.xlane.xlu1 %1360  ;;  %v1907_v51 = vsel %vm8429_vm1, %v1831_v19, 0.0  ;;  %v1516_v33 = vadd.f32 %v4893_v30, %v6294_v44  ;;  %v1801_v19 = vmax.f32 %v1769_v60, 0.0 }
 0x203   : >> { %v2217_v3 = vrot.slane %v1352_v28, %v6361_v57  ;;  %v1576_v21 = vmul.f32 %v8427_v8, %v1544_v24  ;;  %v1262_v31 = vadd.f32 %v4833_v62, %v6594_v37  ;;  %v1001_v24 = vadd.f32 %v4772_v40, %v6594_v37 }
 0x204   : >> { %v1548_v30 = vmax.f32 %v1516_v33, 0.0  ;;  %v1833_v62 = vmul.f32 %v8427_v8, %v1801_v19  ;;  %v1070_v60 = vmul.f32 %v8427_v8, %v1032_v59  ;;  %v4832_v40 = vunpack.c.l.bf16 %v6602_v42 }
 0x205   : >> { %v2218_v14 = vsel %vm2198_vm7, %v2217_v3, %v6555_v50  ;;  %1155 = vadd.xlane.f32.xlu0 %v1154_v61  ;;  %1908 = vadd.xlane.f32.xlu1 %v1907_v51  ;;  %v1835_v50 = vmul.f32 %v8427_v8, %v1803_v17  ;;  %v1768_v61 = vadd.f32 %v4949_v1, %v6190_v23  ;;  %v4836_v3 = vunpack.c.l.bf16 %v5252_v54  ;;  %v5267_v51 = vld [vmem:[%s5791_s17 + $0x1e0] sm:$0xff]  }
 0x206   : >> { %v6634_v63 = vsel %vm8385_vm15, %v2218_v14, %v6410_v25  ;;  %v6636_v52 = vpop.xlane.xlu0 %1610  ;;  %v6638_v6 = vpop.xlane.xlu1 %1604  ;;  %v1916_v25 = vsel %vm8429_vm1, %v1834_v36, 0.0  ;;  %v1654_v49 = vsel %vm8429_vm1, %v1576_v21, 0.0  ;;  %v4768_v17 = vunpack.c.l.bf16 %v6579_v0 }
 0x207   : >> { %v1919_v36 = vsel %vm8429_vm1, %v1835_v50, 0.0  ;;  %v1294_v35 = vmax.f32 %v1262_v31, 0.0  ;;  %v1800_v1 = vmax.f32 %v1768_v61, 0.0  ;;  %v4897_v21 = vunpack.c.h.bf16 %v5267_v51 }
 0x208   : >> { %v1033_v50 = vmax.f32 %v1001_v24, 0.0  ;;  %v999_v33 = vadd.f32 %v4768_v17, %v6594_v37  ;;  %v1160_v19 = vsel %vm8429_vm1, %v1070_v60, 0.0  ;;  %v1580_v59 = vmul.f32 %v8427_v8, %v1548_v30 }
 0x209   : >> { %1411 = vadd.xlane.f32.xlu0 %v1410_v41  ;;  %1917 = vadd.xlane.f32.xlu1 %v1916_v25  ;;  %v1263_v41 = vadd.f32 %v4836_v3, %v6594_v37  ;;  %v1913_v25 = vsel %vm8429_vm1, %v1833_v62, 0.0  ;;  %v1326_v31 = vmul.f32 %v8427_v8, %v1294_v35  ;;  %v4837_v42 = vunpack.c.h.bf16 %v5252_v54 }
 0x20a   : >> { %v6649_v55 = vpop.xlane.xlu0 %1854  ;;  %v6651_v28 = vpop.xlane.xlu1 %1613  ;;  %v4896_v3 = vunpack.c.l.bf16 %v5267_v51  ;;  %v1832_v30 = vmul.f32 %v8427_v8, %v1800_v1  ;;  %v1518_v62 = vadd.f32 %v4897_v21, %v6594_v37  ;;  %v1031_v60 = vmax.f32 %v999_v33, 0.0 }
 0x20b   : >> { %v2231_v54 = vrot.slane %v6616_v47, %v6367_v56  ;;  %v1666_v51 = vsel %vm8429_vm1, %v1580_v59, 0.0  ;;  %v1261_v35 = vadd.f32 %v4832_v40, %v6594_v37  ;;  %v1264_v1 = vadd.f32 %v4837_v42, %v6594_v37 }
 0x20c   : >> { %v1517_v33 = vadd.f32 %v4896_v3, %v6594_v37 }
 0x20d   : >> { %1655 = vadd.xlane.f32.xlu0 %v1654_v49  ;;  %1920 = vadd.xlane.f32.xlu1 %v1919_v36  ;;  %v1295_v36 = vmax.f32 %v1263_v41, 0.0  ;;  %v1293_v42 = vmax.f32 %v1261_v35, 0.0 }
 0x20e   : >> { %v1108_v14 = vpop.xlane.xlu0 %1107  ;;  %v6661_v23 = vpop.xlane.xlu1 %1857 }
 0x20f   : >> { %v2030_v0 = vrot.slane %v1108_v14, %v6407_v2  ;;  %v6690_v14 = vld [vmem:[%s5791_s17 + $0x1e8] sm:$0xff]   ;;  %v1327_v47 = vmul.f32 %v8427_v8, %v1295_v36  ;;  %v5283_v36 = vld [vmem:[%s5791_s17 + $0x1f0] sm:$0xff]  }
 0x210   : >> { %v4900_v59 = vunpack.c.l.bf16 %v6690_v14  ;;  %v4961_v35 = vunpack.c.h.bf16 %v5283_v36 }
 0x211   : >> { %v2031_v61 = vsel %vm1992_vm9, %v2030_v0, %v6608_v43  ;;  %1914 = vadd.xlane.f32.xlu0 %v1913_v25  ;;  %1161 = vadd.xlane.f32.xlu1 %v1160_v19  ;;  %v1071_v43 = vmul.f32 %v8427_v8, %v1033_v50  ;;  %v1910_v0 = vsel %vm8429_vm1, %v1832_v30, 0.0  ;;  %v1550_v50 = vmax.f32 %v1518_v62, 0.0 }
 0x212   : >> { %v6675_v49 = vsel %vm8384_vm2, %v2031_v61, %v6614_v58  ;;  %v6677_v24 = vpop.xlane.xlu1 %1125  ;;  %v6679_v17 = vpop.xlane.xlu0 %1122  ;;  %v1416_v58 = vsel %vm8429_vm1, %v1326_v31, 0.0  ;;  %v1069_v19 = vmul.f32 %v8427_v8, %v1031_v60  ;;  %v2232_v31 = vsel %vm2191_vm6, %v2231_v54, %v6571_v5 }
 0x213   : >> { %8436 = vst [vmem:[#allocation26_spill] sm:$0xff] %v6675_v49  ;;  %v1163_v40 = vsel %vm8429_vm1, %v1071_v43, 0.0  ;;  %v2411_v61 = vrot.slane %v6638_v6, %v6443_v45  ;;  %v4773_v30 = vunpack.c.h.bf16 %v6624_v27  ;;  %v1296_v62 = vmax.f32 %v1264_v1, 0.0 }
 0x214   : >> { %v1419_v5 = vsel %vm8429_vm1, %v1327_v47, 0.0  ;;  %v1582_v6 = vmul.f32 %v8427_v8, %v1550_v50  ;;  %v1549_v54 = vmax.f32 %v1517_v33, 0.0 }
 0x215   : >> { %1667 = vadd.xlane.f32.xlu0 %v1666_v51  ;;  %1417 = vadd.xlane.f32.xlu1 %v1416_v58  ;;  %v1519_v58 = vadd.f32 %v4900_v59, %v6594_v37  ;;  %v2412_v1 = vsel %vm2390_vm10, %v2411_v61, %v6589_v9  ;;  %v1328_v9 = vmul.f32 %v8427_v8, %v1296_v62 }
 0x216   : >> { %v6693_v41 = vpop.xlane.xlu1 %1381  ;;  %v1364_v21 = vpop.xlane.xlu0 %1363  ;;  %v1672_v59 = vsel %vm8429_vm1, %v1582_v6, 0.0  ;;  %v1774_v61 = vadd.f32 %v4961_v35, %v6594_v37 }
 0x217   : >> { %v2236_v25 = vrot.slane %v1364_v21, %v6361_v57  ;;  %v4960_v21 = vunpack.c.l.bf16 %v5283_v36  ;;  %v1422_v6 = vsel %vm8429_vm1, %v1328_v9, 0.0 }
 0x219   : >> { %v2237_v3 = vsel %vm2198_vm7, %v2236_v25, %v2232_v31  ;;  %1911 = vadd.xlane.f32.xlu0 %v1910_v0  ;;  %1164 = vadd.xlane.f32.xlu1 %v1163_v40  ;;  %v1325_v0 = vmul.f32 %v8427_v8, %v1293_v42  ;;  %v1002_v25 = vadd.f32 %v4773_v30, %v6594_v37  ;;  %v1551_v31 = vmax.f32 %v1519_v58, 0.0 }
 0x21a   : >> { %v6711_v43 = vsel %vm8384_vm2, %v2237_v3, %v6634_v63  ;;  %v1608_v60 = vpop.xlane.xlu1 %1607  ;;  %v6713_v51 = vpop.xlane.xlu0 %1378  ;;  %v1157_v63 = vsel %vm8429_vm1, %v1069_v19, 0.0  ;;  %v1581_v19 = vmul.f32 %v8427_v8, %v1549_v54  ;;  %v1773_v42 = vadd.f32 %v4960_v21, %v6594_v37 }
 0x21b   : >> { %8437 = vst [vmem:[#allocation27_spill] sm:$0xff] %v6711_v43  ;;  %v2416_v27 = vrot.slane %v1608_v60, %v6474_v46  ;;  %v1413_v30 = vsel %vm8429_vm1, %v1325_v0, 0.0  ;;  %v1034_v36 = vmax.f32 %v1002_v25, 0.0  ;;  %v4901_v3 = vunpack.c.h.bf16 %v6690_v14  ;;  %v5284_v60 = vld [vmem:[%s5791_s17 + $0x1f8] sm:$0xff]  }
 0x21c   : >> { %v1669_v54 = vsel %vm8429_vm1, %v1581_v19, 0.0  ;;  %v1806_v58 = vmax.f32 %v1774_v61, 0.0  ;;  %v1805_v35 = vmax.f32 %v1773_v42, 0.0  ;;  %v4965_v21 = vunpack.c.h.bf16 %v5284_v60 }
 0x21d   : >> { %v2417_v47 = vsel %vm2397_vm14, %v2416_v27, %v2412_v1  ;;  %1420 = vadd.xlane.f32.xlu1 %v1419_v5  ;;  %1158 = vadd.xlane.f32.xlu0 %v1157_v63  ;;  %v1583_v27 = vmul.f32 %v8427_v8, %v1551_v31  ;;  %v1520_v1 = vadd.f32 %v4901_v3, %v6594_v37  ;;  %v4964_v63 = vunpack.c.l.bf16 %v5284_v60 }
 0x21e   : >> { %v6727_v50 = vsel %vm8385_vm15, %v2417_v47, %v6518_v48  ;;  %v6729_v33 = vpop.xlane.xlu1 %1866  ;;  %v6731_v40 = vpop.xlane.xlu0 %1616  ;;  %v4957_v48 = vunpack.c.h.bf16 %v6566_v7  ;;  %v1072_v7 = vmul.f32 %v8427_v8, %v1034_v36  ;;  %v1838_v9 = vmul.f32 %v8427_v8, %v1806_v58 }
 0x21f   : >> { %v1675_v47 = vsel %vm8429_vm1, %v1583_v27, 0.0  ;;  %v1837_v19 = vmul.f32 %v8427_v8, %v1805_v35  ;;  %v1552_v61 = vmax.f32 %v1520_v1, 0.0  ;;  %v1775_v42 = vadd.f32 %v4964_v63, %v6594_v37 }
 0x220   : >> { %v1772_v14 = vadd.f32 %v4957_v48, %v6294_v44  ;;  %v1166_v31 = vsel %vm8429_vm1, %v1072_v7, 0.0  ;;  %v1928_v48 = vsel %vm8429_vm1, %v1838_v9, 0.0 }
 0x221   : >> { %1673 = vadd.xlane.f32.xlu1 %v1672_v59  ;;  %1414 = vadd.xlane.f32.xlu0 %v1413_v30  ;;  %v1776_v59 = vadd.f32 %v4965_v21, %v6594_v37  ;;  %v1925_v60 = vsel %vm8429_vm1, %v1837_v19, 0.0  ;;  %v1807_v27 = vmax.f32 %v1775_v42, 0.0 }
 0x222   : >> { %v6742_v62 = vpop.xlane.xlu1 %1619  ;;  %v6744_v5 = vpop.xlane.xlu0 %1860  ;;  %v1804_v44 = vmax.f32 %v1772_v14, 0.0 }
 0x223   : >> { %v1808_v3 = vmax.f32 %v1776_v59, 0.0  ;;  %v1839_v14 = vmul.f32 %v8427_v8, %v1807_v27 }
 0x225   : >> { %1423 = vadd.xlane.f32.xlu1 %v1422_v6  ;;  %1670 = vadd.xlane.f32.xlu0 %v1669_v54  ;;  %v1836_v6 = vmul.f32 %v8427_v8, %v1804_v44  ;;  %v1584_v54 = vmul.f32 %v8427_v8, %v1552_v61  ;;  %v1840_v7 = vmul.f32 %v8427_v8, %v1808_v3  ;;  %v1931_v9 = vsel %vm8429_vm1, %v1839_v14, 0.0 }
 0x226   : >> { %v6752_v0 = vpop.xlane.xlu1 %1634  ;;  %v6754_v25 = vpop.xlane.xlu0 %1869 }
 0x227   : >> { %v1922_v35 = vsel %vm8429_vm1, %v1836_v6, 0.0  ;;  %v1678_v21 = vsel %vm8429_vm1, %v1584_v54, 0.0  ;;  %v4684_v54 = vld [vmem:[#allocation4] ss:$0 sm:$0xff] }
 0x229   : >> { %1676 = vadd.xlane.f32.xlu1 %v1675_v47  ;;  %1167 = vadd.xlane.f32.xlu0 %v1166_v31  ;;  %v1934_v47 = vsel %vm8429_vm1, %v1840_v7, 0.0  ;;  %vm2133_vm1 = vcmask 1044484  }
 0x22a   : >> { %v6762_v30 = vpop.xlane.xlu1 %1872  ;;  %v6764_v36 = vpop.xlane.xlu0 %1128 }
 0x22d   : >> { %1929 = vadd.xlane.f32.xlu1 %v1928_v48  ;;  %1926 = vadd.xlane.f32.xlu0 %v1925_v60 }
 0x22e   : >> { %v6770_v58 = vpop.xlane.xlu1 %1640  ;;  %v6772_v37 = vpop.xlane.xlu0 %1384 }
 0x231   : >> { %1923 = vadd.xlane.f32.xlu1 %v1922_v35  ;;  %1679 = vadd.xlane.f32.xlu0 %v1678_v21 }
 0x232   : >> { %v6778_v1 = vpop.xlane.xlu1 %1893  ;;  %v6780_v63 = vpop.xlane.xlu0 %1637 }
 0x235   : >> { %1935 = vadd.xlane.f32.xlu1 %v1934_v47  ;;  %1932 = vadd.xlane.f32.xlu0 %v1931_v9 }
 0x236   : >> { %v6784_v19 = vpop.xlane.xlu1 %1896  ;;  %v6786_v59 = vpop.xlane.xlu0 %1863 }
 0x23a   : >> { %v6788_v31 = vpop.xlane.xlu1 %1110  ;;  %v6790_v44 = vpop.xlane.xlu0 %1131 }
 0x23e   : >> { %v6792_v61 = vpop.xlane.xlu1 %1369  ;;  %v6794_v42 = vpop.xlane.xlu0 %1387 }
 0x242   : >> { %v6796_v48 = vpop.xlane.xlu1 %1116  ;;  %v6798_v3 = vpop.xlane.xlu0 %1875 }
 0x246   : >> { %v6800_v60 = vpop.xlane.xlu1 %1372  ;;  %v6802_v6 = vpop.xlane.xlu0 %1890 }
 0x24a   : >> { %v6804_v27 = vpop.xlane.xlu1 %1622  ;;  %v6806_v35 = vpop.xlane.xlu0 %1643 }
 0x24b   : >> { %8438 = vst [vmem:[#allocation28_spill] sm:$0xff] %v6804_v27  ;;  %2751 = vperm.xlu0 %5467, %v4684_v54  }
 0x24e   : >> { %v6808_v21 = vpop.xlane.xlu1 %1119  ;;  %v6810_v7 = vpop.xlane.xlu0 %1899 }
 0x24f   : >> { %8439 = vst [vmem:[#allocation29_spill] sm:$0xff] %v6810_v7 }
 0x252   : >> { %v6812_v14 = vpop.xlane.xlu0 %1113  ;;  %v6814_v47 = vpop.xlane.xlu1 %1134 }
 0x253   : >> { %8440 = vst [vmem:[#allocation30_spill] sm:$0xff] %v6814_v47 }
 0x256   : >> { %v6816_v9 = vpop.xlane.xlu0 %1366  ;;  %v6818_v8 = vpop.xlane.xlu1 %1375 }
 0x25a   : >> { %v6820_v12 = vpop.xlane.xlu0 %1625  ;;  %v6822_v18 = vpop.xlane.xlu1 %1390 }
 0x25b   : >> { %8441 = vst [vmem:[#allocation31_spill] sm:$0xff] %v6820_v12  ;;  %8442 = vst [vmem:[#allocation32_spill] sm:$0xff] %v6822_v18 }
 0x25e   : >> { %v6824_v34 = vpop.xlane.xlu0 %1137  ;;  %v6826_v22 = vpop.xlane.xlu1 %1881 }
 0x25f   : >> { %8443 = vst [vmem:[#allocation33_spill] sm:$0xff] %v6824_v34  ;;  %8444 = vst [vmem:[#allocation34_spill] sm:$0xff] %v6826_v22 }
 0x262   : >> { %v6828_v54 = vpop.xlane.xlu0 %1393  ;;  %v6830_v10 = vpop.xlane.xlu1 %1140 }
 0x263   : >> { %8445 = vst [vmem:[#allocation35_spill] sm:$0xff] %v6828_v54  ;;  %8446 = vst [vmem:[#allocation36_spill] sm:$0xff] %v6830_v10 }
 0x266   : >> { %v6832_v7 = vpop.xlane.xlu0 %1628  ;;  %v6834_v43 = vpop.xlane.xlu1 %1149 }
 0x267   : >> { %8447 = vst [vmem:[#allocation37_spill] sm:$0xff] %v6832_v7  ;;  %8448 = vst [vmem:[#allocation38_spill] sm:$0xff] %v6834_v43 }
 0x26a   : >> { %v6836_v47 = vpop.xlane.xlu0 %1878  ;;  %v6838_v49 = vpop.xlane.xlu1 %1396 }
 0x26b   : >> { %8449 = vst [vmem:[#allocation39_spill] sm:$0xff] %v6836_v47  ;;  %8450 = vst [vmem:[#allocation40_spill] sm:$0xff] %v6838_v49 }
 0x26e   : >> { %v6840_v27 = vpop.xlane.xlu0 %1146  ;;  %v6842_v12 = vpop.xlane.xlu1 %1405 }
 0x26f   : >> { %8451 = vst [vmem:[#allocation41_spill] sm:$0xff] %v6840_v27  ;;  %8452 = vst [vmem:[#allocation42_spill] sm:$0xff] %v6842_v12 }
 0x272   : >> { %v6844_v18 = vpop.xlane.xlu0 %1402  ;;  %v6846_v34 = vpop.xlane.xlu1 %1649 }
 0x273   : >> { %8453 = vst [vmem:[#allocation43_spill] sm:$0xff] %v6844_v18  ;;  %8454 = vst [vmem:[#allocation44_spill] sm:$0xff] %v6846_v34 }
 0x276   : >> { %v6848_v22 = vpop.xlane.xlu0 %1631  ;;  %v6850_v54 = vpop.xlane.xlu1 %1884 }
 0x277   : >> { %8455 = vst [vmem:[#allocation45_spill] sm:$0xff] %v6848_v22  ;;  %8456 = vst [vmem:[#allocation46_spill] sm:$0xff] %v6850_v54 }
 0x27a   : >> { %v6852_v10 = vpop.xlane.xlu0 %1646  ;;  %v6854_v7 = vpop.xlane.xlu1 %1152 }
 0x27b   : >> { %8457 = vst [vmem:[#allocation47_spill] sm:$0xff] %v6852_v10  ;;  %8458 = vst [vmem:[#allocation48_spill] sm:$0xff] %v6854_v7 }
 0x27e   : >> { %v6856_v43 = vpop.xlane.xlu0 %1143  ;;  %v6858_v47 = vpop.xlane.xlu1 %1408 }
 0x27f   : >> { %8459 = vst [vmem:[#allocation49_spill] sm:$0xff] %v6856_v43 }
 0x282   : >> { %v6860_v49 = vpop.xlane.xlu0 %1399  ;;  %v6862_v27 = vpop.xlane.xlu1 %1652 }
 0x283   : >> { %8460 = vst [vmem:[#allocation50_spill] sm:$0xff] %v6860_v49  ;;  %8461 = vst [vmem:[#allocation51_spill] sm:$0xff] %v6862_v27  ;;  %v2425_v49 = vrot.slane %v6651_v28, %v6358_v26  ;;  %v2421_v28 = vrot.slane %v6636_v52, %v6391_v38  ;;  %v2039_v52 = vrot.slane %v6812_v14, %v6305_v13 }
 0x284   : >> { %v2629_v14 = vrot.slane %v6762_v30, %v6429_v29 }
 0x286   : >> { %v6864_v12 = vpop.xlane.xlu0 %1658  ;;  %v6866_v18 = vpop.xlane.xlu1 %1661 }
 0x287   : >> { %8462 = vst [vmem:[#allocation52_spill] sm:$0xff] %v6864_v12  ;;  %8463 = vst [vmem:[#allocation53_spill] sm:$0xff] %v6866_v18  ;;  %v2605_v12 = vrot.slane %v6661_v23, %v6377_v11  ;;  %v2601_v23 = vrot.slane %v6649_v55, %v6456_v20 }
 0x28a   : >> { %v6868_v34 = vpop.xlane.xlu0 %1887  ;;  %v6870_v22 = vpop.xlane.xlu1 %1905 }
 0x28b   : >> { %8464 = vst [vmem:[#allocation54_spill] sm:$0xff] %v6868_v34  ;;  %8465 = vst [vmem:[#allocation55_spill] sm:$0xff] %v6870_v22  ;;  %v2058_v22 = vrot.slane %v6677_v24, %v6305_v13  ;;  %v2264_v24 = vrot.slane %v6693_v41, %v6315_v15  ;;  %v2606_v34 = vsel %vm8386_vm11, %v2605_v12, %v2601_v23 }
 0x28c   : >> { %v2620_v12 = vrot.slane %v6729_v33, %v6456_v20  ;;  %v2245_v33 = vrot.slane %v6792_v61, %v6315_v15  ;;  %v2468_v23 = vrot.slane %v6770_v58, %v6443_v45  ;;  %v2274_v58 = vrot.slane %v6794_v42, %v6361_v57 }
 0x28e   : >> { %v6872_v54 = vpop.xlane.xlu0 %1902  ;;  %v6874_v10 = vpop.xlane.xlu1 %1664 }
 0x28f   : >> { %8466 = vst [vmem:[#allocation56_spill] sm:$0xff] %v6872_v54  ;;  %8467 = vst [vmem:[#allocation57_spill] sm:$0xff] %v6874_v10  ;;  %v2054_v54 = vrot.slane %v6679_v17, %v6298_v4  ;;  %v2260_v10 = vrot.slane %v6713_v51, %v6322_v16  ;;  %v2610_v17 = vrot.slane %v6744_v5, %v6429_v29 }
 0x290   : >> { %v2426_v51 = vsel %vm2383_vm8, %v2425_v49, %v2421_v28  ;;  %v2241_v49 = vrot.slane %v6816_v9, %v6322_v16  ;;  %v2035_v28 = vrot.slane %v6788_v31, %v6298_v4  ;;  %v2063_v31 = vrot.slane %v6764_v36, %v6342_v53 }
 0x291   : >> { %v2265_v41 = vsel %vm2184_vm4, %v2264_v24, %v2260_v10  ;;  %v2463_v10 = vrot.slane %v6780_v63, %v6358_v26  ;;  %v2044_v63 = vrot.slane %v6796_v48, %v6342_v53  ;;  %v2269_v24 = vrot.slane %v6772_v37, %v6367_v56 }
 0x292   : >> { %v6876_v7 = vpop.xlane.xlu0 %1155  ;;  %v6878_v43 = vpop.xlane.xlu1 %1908  ;;  %v2040_v9 = vsel %vm1978_vm3, %v2039_v52, %v2035_v28  ;;  %v2246_v61 = vsel %vm2184_vm4, %v2245_v33, %v2241_v49  ;;  %v2250_v48 = vrot.slane %v6800_v60, %v6367_v56  ;;  %v2049_v37 = vrot.slane %v6808_v21, %v6407_v2 }
 0x293   : >> { %8468 = vst [vmem:[#allocation58_spill] sm:$0xff] %v6878_v43  ;;  %v2430_v43 = vrot.slane %v6731_v40, %v6443_v45  ;;  %v2624_v40 = vrot.slane %v6754_v25, %v6377_v11 }
 0x294   : >> { %v2251_v60 = vsel %vm2191_vm6, %v2250_v48, %v2246_v61  ;;  %v8475_v61 = vld [vmem:[#allocation33_spill] sm:$0xff] }
 0x295   : >> { %v2431_v5 = vsel %vm2390_vm10, %v2430_v43, %v2426_v51  ;;  %v2615_v43 = vrot.slane %v6786_v59, %v6432_v32  ;;  %v2625_v30 = vsel %vm8386_vm11, %v2624_v40, %v2620_v12  ;;  %v2634_v59 = vrot.slane %v6798_v3, %v6432_v32  ;;  %v8477_v48 = vld [vmem:[#allocation37_spill] sm:$0xff] }
 0x296   : >> { %v6884_v27 = vpop.xlane.xlu0 %1411  ;;  %v6886_v18 = vpop.xlane.xlu1 %1917  ;;  %v2630_v36 = vsel %vm2589_vm12, %v2629_v14, %v2625_v30  ;;  %v2662_v3 = vrot.slane %v6778_v1, %v6377_v11  ;;  %v2045_v51 = vsel %vm1985_vm5, %v2044_v63, %v2040_v9  ;;  %v2068_v40 = vrot.slane %v6790_v44, %v6407_v2  ;;  %v8472_v30 = vld [vmem:[#allocation31_spill] sm:$0xff]  ;;  %v8473_v9 = vld [vmem:[#allocation26_spill] sm:$0xff] }
 0x297   : >> { %8469 = vst [vmem:[#allocation59_spill] sm:$0xff] %v6884_v27  ;;  %8470 = vst [vmem:[#allocation60_spill] sm:$0xff] %v6886_v18  ;;  %v2435_v18 = vrot.slane %v6742_v62, %v6474_v46  ;;  %v2059_v62 = vsel %vm1978_vm3, %v2058_v22, %v2054_v54  ;;  %v2611_v22 = vsel %vm2589_vm12, %v2610_v17, %v2606_v34 }
 0x298   : >> { %v2473_v12 = vrot.slane %v6806_v35, %v6474_v46  ;;  %v2255_v44 = vrot.slane %v6818_v8, %v6361_v57  ;;  %v2064_v21 = vsel %vm1985_vm5, %v2063_v31, %v2059_v62  ;;  %v2667_v14 = vrot.slane %v6784_v19, %v6429_v29 }
 0x299   : >> { %v2436_v25 = vsel %vm2397_vm14, %v2435_v18, %v2431_v5  ;;  %v2459_v18 = vrot.slane %v6752_v0, %v6391_v38  ;;  %v2658_v0 = vrot.slane %v6802_v6, %v6456_v20  ;;  %v2616_v6 = vsel %vm2596_vm13, %v2615_v43, %v2611_v22 }
 0x29a   : >> { %v6912_v55 = vpop.xlane.xlu0 %1655  ;;  %v6914_v27 = vpop.xlane.xlu1 %1920  ;;  %v2635_v5 = vsel %vm2596_vm13, %v2634_v59, %v2630_v36  ;;  %v2533_v42 = vsel %vm8384_vm2, %v2436_v25, %v6727_v50  ;;  %v2050_v28 = vsel %vm1992_vm9, %v2049_v37, %v2045_v51  ;;  %v2270_v22 = vsel %vm2191_vm6, %v2269_v24, %v2265_v41  ;;  %v8474_v59 = vld [vmem:[#allocation27_spill] sm:$0xff]  ;;  %v8479_v51 = vld [vmem:[#allocation30_spill] sm:$0xff] }
 0x29b   : >> { %v2464_v17 = vsel %vm2383_vm8, %v2463_v10, %v2459_v18  ;;  %v2663_v49 = vsel %vm8386_vm11, %v2662_v3, %v2658_v0  ;;  %v2731_v10 = vsel %vm8385_vm15, %v2616_v6, %v6506_v39  ;;  %v2256_v43 = vsel %vm2198_vm7, %v2255_v44, %v2251_v60  ;;  %v8471_v39 = vld [vmem:[#allocation28_spill] sm:$0xff]  ;;  %v8481_v60 = vld [vmem:[#allocation45_spill] sm:$0xff]  ;;  %v8483_v44 = vld [vmem:[#allocation39_spill] sm:$0xff] }
 0x29c   : >> { %v2469_v35 = vsel %vm2390_vm10, %v2468_v23, %v2464_v17  ;;  %v2069_v8 = vsel %vm1992_vm9, %v2068_v40, %v2064_v21  ;;  %v2275_v50 = vsel %vm2198_vm7, %v2274_v58, %v2270_v22  ;;  %v6995_v62 = vsel %vm8384_vm2, %v2635_v5, %v2731_v10  ;;  %v8476_v23 = vld [vmem:[#allocation35_spill] sm:$0xff]  ;;  %v8478_v17 = vld [vmem:[#allocation29_spill] sm:$0xff]  ;;  %v8480_v58 = vld [vmem:[#allocation36_spill] sm:$0xff] }
 0x29d   : >> { %v6998_v19 = vsel %vm2589_vm12, %v2667_v14, %v2663_v49  ;;  %v2440_v33 = vrot.slane %v8471_v39, %v6391_v38  ;;  %v2474_v18 = vsel %vm2397_vm14, %v2473_v12, %v2469_v35  ;;  %v2444_v31 = vrot.slane %v8472_v30, %v6358_v26  ;;  %v8482_v49 = vld [vmem:[#allocation32_spill] sm:$0xff]  ;;  %v8485_v39 = vld [vmem:[#allocation41_spill] sm:$0xff] }
 0x29e   : >> { %v6941_v34 = vpop.xlane.xlu0 %1914  ;;  %v6943_v54 = vpop.xlane.xlu1 %1161  ;;  %v2132_v63 = vsel %vm2131_vm0, %v2050_v28, %v8473_v9  ;;  %v2335_v0 = vsel %vm2131_vm0, %v2256_v43, %v8474_v59  ;;  %v2077_v36 = vrot.slane %v8475_v61, %v6305_v13  ;;  %v2283_v24 = vrot.slane %v8476_v23, %v6315_v15  ;;  %v8484_v14 = vld [vmem:[#allocation40_spill] sm:$0xff]  ;;  %v8486_v9 = vld [vmem:[#allocation43_spill] sm:$0xff] }
 0x29f   : >> { %v2449_v3 = vrot.slane %v8477_v48, %v6443_v45  ;;  %v2672_v6 = vrot.slane %v8478_v17, %v6432_v32  ;;  %v2073_v40 = vrot.slane %v8479_v51, %v6298_v4  ;;  %v2082_v37 = vrot.slane %v8480_v58, %v6342_v53  ;;  %v8487_v48 = vld [vmem:[#allocation34_spill] sm:$0xff] }
 0x2a0   : >> { %v2454_v5 = vrot.slane %v8481_v60, %v6474_v46  ;;  %v2279_v12 = vrot.slane %v8482_v49, %v6322_v16  ;;  %v2639_v21 = vrot.slane %v8483_v44, %v6456_v20  ;;  %v2288_v28 = vrot.slane %v8484_v14, %v6367_v56  ;;  %v8489_v60 = vld [vmem:[#allocation42_spill] sm:$0xff] }
 0x2a1   : >> { %v2134_v22 = vsel %vm2133_vm1, %v2069_v8, %v2132_v63  ;;  %vm2135_vm2 = vcmask 1045509   ;;  %v2445_v43 = vsel %vm2383_vm8, %v2444_v31, %v2440_v33  ;;  %v2092_v30 = vrot.slane %v8485_v39, %v6298_v4  ;;  %v8488_v33 = vld [vmem:[#allocation38_spill] sm:$0xff] }
 0x2a2   : >> { %v6971_v52 = vpop.xlane.xlu0 %1667  ;;  %v6973_v1 = vpop.xlane.xlu1 %1417  ;;  %v2298_v59 = vrot.slane %v8486_v9, %v6322_v16  ;;  %v2336_v61 = vsel %vm2133_vm1, %v2275_v50, %v2335_v0  ;;  %v2078_v23 = vsel %vm1978_vm3, %v2077_v36, %v2073_v40  ;;  %v2643_v51 = vrot.slane %v8487_v48, %v6377_v11  ;;  %v8490_v36 = vld [vmem:[#allocation46_spill] sm:$0xff]  ;;  %v8493_v9 = vld [vmem:[#allocation47_spill] sm:$0xff]  ;;  %v8494_v48 = vld [vmem:[#allocation48_spill] sm:$0xff] }
 0x2a3   : >> { %v2284_v8 = vsel %vm2184_vm4, %v2283_v24, %v2279_v12  ;;  %v2450_v63 = vsel %vm2390_vm10, %v2449_v3, %v2445_v43  ;;  %v2083_v58 = vsel %vm1985_vm5, %v2082_v37, %v2078_v23  ;;  %v2096_v31 = vrot.slane %v8488_v33, %v6305_v13  ;;  %v8491_v24 = vld [vmem:[#allocation49_spill] sm:$0xff] }
 0x2a4   : >> { %v2302_v49 = vrot.slane %v8489_v60, %v6315_v15  ;;  %v2455_v44 = vsel %vm2397_vm14, %v2454_v5, %v2450_v63  ;;  %v2644_v50 = vsel %vm8386_vm11, %v2643_v51, %v2639_v21  ;;  %v2289_v0 = vsel %vm2191_vm6, %v2288_v28, %v2284_v8  ;;  %v8492_v5 = vld [vmem:[#allocation44_spill] sm:$0xff]  ;;  %v8496_v63 = vld [vmem:[#allocation51_spill] sm:$0xff] }
 0x2a5   : >> { %v2648_v40 = vrot.slane %v8490_v36, %v6429_v29  ;;  %v2087_v3 = vrot.slane %v8491_v24, %v6407_v2  ;;  %vm2137_vm15 = vcmask 1046534   ;;  %v2097_v14 = vsel %vm1978_vm3, %v2096_v31, %v2092_v30  ;;  %v8495_v30 = vld [vmem:[#allocation50_spill] sm:$0xff] }
 0x2a6   : >> { %v7000_v25 = vpop.xlane.xlu0 %1911  ;;  %v7002_v41 = vpop.xlane.xlu1 %1164  ;;  %v2303_v43 = vsel %vm2184_vm4, %v2302_v49, %v2298_v59  ;;  %v2482_v39 = vrot.slane %v8492_v5, %v6358_v26  ;;  %vm2139_vm11 = vcmask 1047559   ;;  %v2534_v28 = vsel %vm2131_vm0, %v2455_v44, %v2533_v42 }
 0x2a7   : >> { %v2478_v23 = vrot.slane %v8493_v9, %v6391_v38  ;;  %v2101_v51 = vrot.slane %v8494_v48, %v6342_v53  ;;  %v2307_v8 = vrot.slane %v6858_v47, %v6367_v56  ;;  %v2293_v59 = vrot.slane %v8495_v30, %v6361_v57  ;;  %v8497_v47 = vld [vmem:[#allocation59_spill] sm:$0xff] }
 0x2a8   : >> { %v2487_v33 = vrot.slane %v8496_v63, %v6443_v45  ;;  %v2649_v31 = vsel %vm2589_vm12, %v2648_v40, %v2644_v50  ;;  %v2088_v60 = vsel %vm1992_vm9, %v2087_v3, %v2083_v58  ;;  %v2106_v49 = vrot.slane %v6876_v7, %v6407_v2 }
 0x2a9   : >> { %v2312_v44 = vrot.slane %v8497_v47, %v6361_v57  ;;  %v2115_v5 = vrot.slane %v6943_v54, %v6305_v13  ;;  %v2308_v7 = vsel %vm2191_vm6, %v2307_v8, %v2303_v43  ;;  %v2136_v50 = vsel %vm2135_vm2, %v2088_v60, %v2134_v22 }
 0x2aa   : >> { %v1421_v10 = vpop.xlane.xlu1 %1420  ;;  %v1159_v35 = vpop.xlane.xlu0 %1158  ;;  %v2294_v40 = vsel %vm2198_vm7, %v2293_v59, %v2289_v0  ;;  %v2120_v3 = vrot.slane %v7002_v41, %v6342_v53  ;;  %v8501_v53 = vld [vmem:[#allocation57_spill] sm:$0xff]  ;;  %v2492_v59 = vrot.slane %v6912_v55, %v6474_v46 }
 0x2ab   : >> { %v2111_v42 = vrot.slane %v1159_v35, %v6298_v4  ;;  %v2102_v35 = vsel %vm1985_vm5, %v2101_v51, %v2097_v14  ;;  %v2326_v58 = vrot.slane %v1421_v10, %v6367_v56  ;;  %v8498_v56 = vld [vmem:[#allocation52_spill] sm:$0xff]  ;;  %v8499_v10 = vld [vmem:[#allocation53_spill] sm:$0xff]  ;;  %v2337_v9 = vsel %vm2135_vm2, %v2294_v40, %v2336_v61 }
 0x2ac   : >> { %v2107_v54 = vsel %vm1992_vm9, %v2106_v49, %v2102_v35  ;;  %v2497_v22 = vrot.slane %v8498_v56, %v6391_v38  ;;  %v2501_v0 = vrot.slane %v8499_v10, %v6358_v26  ;;  %v2506_v41 = vrot.slane %v8501_v53, %v6443_v45  ;;  %v8502_v61 = vld [vmem:[#allocation56_spill] sm:$0xff]  ;;  %v8505_v35 = vld [vmem:[#allocation58_spill] sm:$0xff] }
 0x2ad   : >> { %v2116_v13 = vsel %vm1978_vm3, %v2115_v5, %v2111_v42  ;;  %vm2740_vm3 = vcmask 523264   ;;  %v2138_v8 = vsel %vm2137_vm15, %v2107_v54, %v2136_v50  ;;  %v2677_v63 = vrot.slane %v8502_v61, %v6456_v20 }
 0x2ae   : >> { %v7057_v37 = vpop.xlane.xlu1 %1673  ;;  %v1415_v12 = vpop.xlane.xlu0 %1414  ;;  %v2121_v51 = vsel %vm1985_vm5, %v2120_v3, %v2116_v13  ;;  %v2502_v47 = vsel %vm2383_vm8, %v2501_v0, %v2497_v22  ;;  %vm8507_vm5 = vcmask 917312  }
 0x2af   : >> { %v2317_v21 = vrot.slane %v1415_v12, %v6322_v16  ;;  %v2321_v16 = vrot.slane %v6973_v1, %v6315_v15  ;;  %v2535_v12 = vsel %vm2133_vm1, %v2474_v18, %v2534_v28  ;;  %v2483_v1 = vsel %vm2383_vm8, %v2482_v39, %v2478_v23  ;;  %v8500_v23 = vld [vmem:[#allocation54_spill] sm:$0xff] }
 0x2b0   : >> { %v2488_v18 = vsel %vm2390_vm10, %v2487_v33, %v2483_v1  ;;  %v2653_v48 = vrot.slane %v8500_v23, %v6432_v32  ;;  %v2511_v33 = vrot.slane %v6971_v52, %v6474_v46 }
 0x2b1   : >> { %v2322_v15 = vsel %vm2184_vm4, %v2321_v16, %v2317_v21  ;;  %vm8503_vm4 = vcmask 261120  }
 0x2b2   : >> { %v1424_v36 = vpop.xlane.xlu1 %1423  ;;  %v1671_v24 = vpop.xlane.xlu0 %1670  ;;  %v2327_v14 = vsel %vm2191_vm6, %v2326_v58, %v2322_v15  ;;  %v2654_v5 = vsel %vm2596_vm13, %v2653_v48, %v2649_v31  ;;  %v8504_v15 = vld [vmem:[#allocation55_spill] sm:$0xff]  ;;  %v8506_v58 = vld [vmem:[#allocation60_spill] sm:$0xff]  ;;  %vm8508_vm6 = vmmov %vm8507_vm5 }
 0x2b3   : >> { %v2331_v4 = vrot.slane %v1424_v36, %v6361_v57  ;;  %v2313_v57 = vsel %vm2198_vm7, %v2312_v44, %v2308_v7  ;;  %v2696_v44 = vrot.slane %v6941_v34, %v6456_v20  ;;  %v2516_v55 = vrot.slane %v1671_v24, %v6391_v38 }
 0x2b4   : >> { %v2338_v30 = vsel %vm2137_vm15, %v2313_v57, %v2337_v9  ;;  %v2681_v52 = vrot.slane %v8504_v15, %v6377_v11  ;;  %v2686_v7 = vrot.slane %v8505_v35, %v6429_v29  ;;  %v2700_v50 = vrot.slane %v8506_v58, %v6377_v11  ;;  %v5472_v35 = vld [vmem:[%s8349_s10 + $0x8] sm:$0xff]  }
 0x2b5   : >> { %v2332_v21 = vsel %vm2198_vm7, %v2331_v4, %v2327_v14  ;;  %v2507_v4 = vsel %vm2390_vm10, %v2506_v41, %v2502_v47  ;;  %v2493_v34 = vsel %vm2397_vm14, %v2492_v59, %v2488_v18  ;;  %v2520_v38 = vrot.slane %v7057_v37, %v6358_v26  ;;  %vm8509_vm7 = vmmov %vm8507_vm5 }
 0x2b6   : >> { %v1677_v43 = vpop.xlane.xlu1 %1676  ;;  %v1168_v39 = vpop.xlane.xlu0 %1167  ;;  %v2339_v49 = vsel %vm2139_vm11, %v2332_v21, %v2338_v30  ;;  %v2682_v31 = vsel %vm8507_vm5, %v2681_v52, %v2677_v63  ;;  %v2705_v24 = vrot.slane %v6914_v27, %v6429_v29  ;;  %v2512_v40 = vsel %vm2397_vm14, %v2511_v33, %v2507_v4  ;;  %v5471_v4 = vld [vmem:[%s8349_s10] sm:$0xff]  }
 0x2b7   : >> { %v2125_v28 = vrot.slane %v1168_v39, %v6407_v2  ;;  %v2525_v1 = vrot.slane %v1677_v43, %v6443_v45  ;;  %v2691_v45 = vrot.slane %v7000_v25, %v6432_v32  ;;  %v2701_v57 = vsel %vm8508_vm6, %v2700_v50, %v2696_v44  ;;  %v8514_v44 = vld [vmem:[#allocation25_spill] sm:$0xff]  ;;  %5371 = vmatpush3.bf16.msra.mxu1 %v5471_v4 }
 0x2b8   : >> { %v2521_v3 = vsel %vm2383_vm8, %v2520_v38, %v2516_v55  ;;  %v2536_v37 = vsel %vm2135_vm2, %v2493_v34, %v2535_v12  ;;  %v2733_v25 = vsel %vm2131_vm0, %v2654_v5, %v6995_v62  ;;  %v2687_v39 = vsel %vm2589_vm12, %v2686_v7, %v2682_v31  ;;  %v8516_v7 = vld [vmem:[#allocation23_spill] sm:$0xff] }
 0x2b9   : >> { %v2126_v2 = vsel %vm1992_vm9, %v2125_v28, %v2121_v51  ;;  %v2526_v14 = vsel %vm2390_vm10, %v2525_v1, %v2521_v3  ;;  %v2537_v56 = vsel %vm2137_vm15, %v2512_v40, %v2536_v37  ;;  %v2692_v12 = vsel %vm2596_vm13, %v2691_v45, %v2687_v39  ;;  %vm8517_vm10 = vmmov %vm8503_vm4 }
 0x2ba   : >> { %v1930_v16 = vpop.xlane.xlu1 %1929  ;;  %v1927_v42 = vpop.xlane.xlu0 %1926  ;;  %v2140_v60 = vsel %vm2139_vm11, %v2126_v2, %v2138_v8  ;;  %vm2742_vm8 = vcmask 785408   ;;  %v8510_v8 = vld [vmem:[#allocation21_spill] sm:$0xff]  ;;  %v8515_v1 = vmov 0.0  }
 0x2bb   : >> { %v2739_v36 = vsel %vm8503_vm4, %v2140_v60, %v2339_v49  ;;  %v2719_v27 = vrot.slane %v1930_v16, %v6377_v11  ;;  %v2715_v43 = vrot.slane %v1927_v42, %v6456_v20  ;;  %v2706_v11 = vsel %vm2589_vm12, %v2705_v24, %v2701_v57  ;;  %v8512_v16 = vld [vmem:[#allocation24_spill] sm:$0xff]  ;;  %5372 = vmatprep.subr.bf16.mxu1 %v8515_v1 }
 0x2bc   : >> { %vm8511_vm9 = vcmp.ge.s32.totalorder %v8510_v8, 16  ;;  %v2850_v42 = vsub.s32 1, %v8512_v16  ;;  %v2869_v47 = vsub.s32 2, %v8512_v16  ;;  %v2888_v15 = vsub.s32 3, %v8512_v16  ;;  %5373 = vmatpush3.bf16.msra.mxu1 %v5472_v35  ;;  %v5304_v35 = vld [vmem:[%s5786_s29 + $0x90] sm:$0xff]  }
 0x2bd   : >> { %5386 = vmatprep.subr.bf16.mxu1 %v8515_v1  ;;  %v2907_v58 = vsub.s32 4, %v8512_v16  ;;  %v2926_v34 = vsub.s32 5, %v8512_v16  ;;  %v2945_v31 = vsub.s32 6, %v8512_v16  ;;  %v2964_v40 = vsub.s32 7, %v8512_v16 }
 0x2be   : >> { %v1924_v13 = vpop.xlane.xlu1 %1923  ;;  %v1680_v54 = vpop.xlane.xlu0 %1679 }
 0x2bf   : >> { %v2710_v18 = vrot.slane %v1924_v13, %v6432_v32  ;;  %v2530_v26 = vrot.slane %v1680_v54, %v6474_v46  ;;  %v2673_v46 = vsel %vm2596_vm13, %v2672_v6, %v6998_v19  ;;  %v2720_v19 = vsel %vm8509_vm7, %v2719_v27, %v2715_v43  ;;  %5375 = vmatmul.mubr.msk.bf16.vlgmr.msra.gmra.mrb[0].mxu1 %vm8517_vm10, %v8516_v7 }
 0x2c0   : >> { %v2734_v17 = vsel %vm2133_vm1, %v2673_v46, %v2733_v25 }
 0x2c1   : >> { %v2531_v22 = vsel %vm2397_vm14, %v2530_v26, %v2526_v14  ;;  %v2711_v0 = vsel %vm2596_vm13, %v2710_v18, %v2706_v11  ;;  %v2735_v6 = vsel %vm2135_vm2, %v2692_v12, %v2734_v17  ;;  %vm8536_vm14 = vmmov %vm8503_vm4 }
 0x2c2   : >> { %v1936_v20 = vpop.xlane.xlu1 %1935  ;;  %v1933_v10 = vpop.xlane.xlu0 %1932  ;;  %v2538_v62 = vsel %vm2139_vm11, %v2531_v22, %v2537_v56  ;;  %v2736_v53 = vsel %vm2137_vm15, %v2711_v0, %v2735_v6 }
 0x2c3   : >> { %v2729_v21 = vrot.slane %v1936_v20, %v6432_v32  ;;  %v2724_v28 = vrot.slane %v1933_v10, %v6429_v29  ;;  %v2741_v9 = vsel %vm2740_vm3, %v2739_v36, %v2538_v62  ;;  %vm8537_vm3 = vmmov %vm8503_vm4 }
 0x2c4   : >> { %vm8540_vm5 = vmmov %vm8537_vm3 }
 0x2c5   : >> { %v2725_v23 = vsel %vm2589_vm12, %v2724_v28, %v2720_v19  ;;  %vm8518_vm12 = vmmov 0   ;;  %vm8541_vm6 = vmmov %vm8537_vm3 }
 0x2c6   : >> { %v2730_v48 = vsel %vm2596_vm13, %v2729_v21, %v2725_v23  ;;  %5388 = vmatprep.mubr.msk.bf16.mxu1 %vm8518_vm12, %v8515_v1  ;;  %vm8535_vm13 = vmmov %vm8503_vm4  ;;  %v7502_v1 = vld [vmem:[%s5786_s29 + $0x110] sm:$0xff]  }
 0x2c7   : >> { %v2737_v41 = vsel %vm2139_vm11, %v2730_v48, %v2736_v53  ;;  %vm8539_vm4 = vmmov %vm8537_vm3 }
 0x2c8   : >> { %v2743_v32 = vsel %vm2742_vm8, %v2741_v9, %v2737_v41  ;;  %vm8542_vm7 = vmmov %vm8537_vm3 }
 0x2c9   : >> { %vm8543_vm8 = vmmov %vm8537_vm3 }
 0x2ca   : >> { %v2752_v51 = vpop.permute.xlu0 %2751  ;;  %vm8547_vm10 = vmmov %vm8537_vm3 }
 0x2cb   : >> { %v2754_v29 = vadd.f32 %v2752_v51, %v2743_v32 }
 0x2cd   : >> { %v2755_v30 = vsel %vm8511_vm9, -1e+30, %v2754_v29  ;;  %vm8544_vm9 = vmmov %vm8537_vm3 }
 0x2ce   : >> { %2756 = vmax.xlane.f32.xlu1 %v2755_v30 }
 0x35b   : >> { %v2757_v59 = vpop.xlane.xlu1 %2756 }
 0x35c   : >> { %v2758_v2 = vsub.f32 %v2755_v30, %v2757_v59 }
 0x35e   : >> { %v2759_v61 = vmul.f32 1.442695, %v2758_v2 }
 0x360   : >> { %5478 = vpow2.f32 %v2759_v61  ;;  %v5288_v61 = vld [vmem:[%s5786_s29 + $0x80] sm:$0xff]  }
 0x36a   : >> { %v5479_v63 = vpop.eup %5478 }
 0x36b   : >> { %2761 = vadd.xlane.f32.xlu1 %v5479_v63 }
 0x3f8   : >> { %v2762_v33 = vpop.xlane.xlu1 %2761 }
 0x3f9   : >> { %5480 = vrcp.f32 %v2762_v33 }
 0x403   : >> { %v5481_v60 = vpop.eup %5480 }
 0x404   : >> { %v7183_v49 = vmul.f32 %v5481_v60, %v5479_v63  ;;  %v5289_v63 = vld [vmem:[%s5786_s29 + $0x88] sm:$0xff]   ;;  %v4984_v60 = vunpack.c.l.bf16 %v5288_v61 }
 0x406   : >> { %8513 = vst [vmem:[#allocation28_spill] sm:$0xff] %v7183_v49  ;;  %v7188_v55 = vrot.slane %v7183_v49, %v8514_v44  ;;  %v7191_v36 = vrot.slane %v7183_v49, %v2850_v42  ;;  %v7196_v5 = vrot.slane %v7183_v49, %v2869_v47  ;;  %v7206_v52 = vrot.slane %v7183_v49, %v2888_v15 }
 0x407   : >> { %v7234_v50 = vrot.slane %v7183_v49, %v2907_v58  ;;  %v7248_v38 = vrot.slane %v7183_v49, %v2926_v34  ;;  %v7268_v24 = vrot.slane %v7183_v49, %v2945_v31  ;;  %v7290_v54 = vrot.slane %v7183_v49, %v2964_v40  ;;  %v5305_v34 = vld [vmem:[%s5786_s29 + $0x98] sm:$0xff]   ;;  %v5310_v31 = vld [vmem:[%s5786_s29 + $0x150] sm:$0xff]  }
 0x408   : >> { %3207 = vbcast.lane.b32.xlu0 %v7191_v36, 288  ;;  %2834 = vbcast.lane.b32.xlu1 %v7188_v55, 256  ;;  %v4985_v42 = vunpack.c.h.bf16 %v5288_v61  ;;  %v4988_v47 = vunpack.c.l.bf16 %v5289_v63  ;;  %v5049_v49 = vunpack.c.h.bf16 %v5304_v35 }
 0x409   : >> { %8519 = vst [vmem:[#allocation31_spill] sm:$0xff] %v7234_v50 }
 0x40c   : >> { %2872 = vbcast.lane.b32.xlu0 %v7196_v5, 256  ;;  %2838 = vbcast.lane.b32.xlu1 %v7188_v55, 264 }
 0x410   : >> { %3223 = vbcast.lane.b32.xlu0 %v7196_v5, 288  ;;  %2853 = vbcast.lane.b32.xlu1 %v7191_v36, 256 }
 0x414   : >> { %2842 = vbcast.lane.b32.xlu0 %v7188_v55, 272  ;;  %2857 = vbcast.lane.b32.xlu1 %v7191_v36, 264 }
 0x418   : >> { %2891 = vbcast.lane.b32.xlu0 %v7206_v52, 256  ;;  %3191 = vbcast.lane.b32.xlu1 %v7188_v55, 288 }
 0x41c   : >> { %3199 = vbcast.lane.b32.xlu0 %v7188_v55, 304  ;;  %3195 = vbcast.lane.b32.xlu1 %v7188_v55, 296 }
 0x420   : >> { %3239 = vbcast.lane.b32.xlu0 %v7206_v52, 288  ;;  %3211 = vbcast.lane.b32.xlu1 %v7191_v36, 296 }
 0x424   : >> { %3527 = vbcast.lane.b32.xlu0 %v7188_v55, 320  ;;  %2876 = vbcast.lane.b32.xlu1 %v7196_v5, 264 }
 0x428   : >> { %3543 = vbcast.lane.b32.xlu0 %v7191_v36, 320  ;;  %3227 = vbcast.lane.b32.xlu1 %v7196_v5, 296 }
 0x42c   : >> { %2880 = vbcast.lane.b32.xlu0 %v7196_v5, 272  ;;  %2861 = vbcast.lane.b32.xlu1 %v7191_v36, 272 }
 0x430   : >> { %2914 = vbcast.lane.b32.xlu0 %v7234_v50, 264  ;;  %2895 = vbcast.lane.b32.xlu1 %v7206_v52, 264 }
 0x434   : >> { %3255 = vbcast.lane.b32.xlu0 %v7234_v50, 288  ;;  %3215 = vbcast.lane.b32.xlu1 %v7191_v36, 304 }
 0x438   : >> { %3559 = vbcast.lane.b32.xlu0 %v7196_v5, 320  ;;  %3243 = vbcast.lane.b32.xlu1 %v7206_v52, 296 }
 0x43c   : >> { %2846 = vbcast.lane.b32.xlu0 %v7188_v55, 280  ;;  %3531 = vbcast.lane.b32.xlu1 %v7188_v55, 328 }
 0x440   : >> { %2899 = vbcast.lane.b32.xlu0 %v7206_v52, 272  ;;  %3547 = vbcast.lane.b32.xlu1 %v7191_v36, 328 }
 0x444   : >> { %2933 = vbcast.lane.b32.xlu0 %v7248_v38, 264  ;;  %2910 = vbcast.lane.b32.xlu1 %v7234_v50, 256 }
 0x448   : >> { %3219 = vbcast.lane.b32.xlu0 %v7191_v36, 312  ;;  %3231 = vbcast.lane.b32.xlu1 %v7196_v5, 304 }
 0x44c   : >> { %3271 = vbcast.lane.b32.xlu0 %v7248_v38, 288  ;;  %3259 = vbcast.lane.b32.xlu1 %v7234_v50, 296 }
 0x450   : >> { %3535 = vbcast.lane.b32.xlu0 %v7188_v55, 336  ;;  %3563 = vbcast.lane.b32.xlu1 %v7196_v5, 328 }
 0x454   : >> { %3575 = vbcast.lane.b32.xlu0 %v7206_v52, 320  ;;  %2865 = vbcast.lane.b32.xlu1 %v7191_v36, 280 }
 0x458   : >> { %3863 = vbcast.lane.b32.xlu0 %v7188_v55, 352  ;;  %2929 = vbcast.lane.b32.xlu1 %v7248_v38, 256 }
 0x45c   : >> { %3879 = vbcast.lane.b32.xlu0 %v7191_v36, 352  ;;  %3203 = vbcast.lane.b32.xlu1 %v7188_v55, 312 }
 0x460   : >> { %2884 = vbcast.lane.b32.xlu0 %v7196_v5, 280  ;;  %3247 = vbcast.lane.b32.xlu1 %v7206_v52, 304 }
 0x464   : >> { %2948 = vbcast.lane.b32.xlu0 %v7268_v24, 256  ;;  %3275 = vbcast.lane.b32.xlu1 %v7248_v38, 296 }
 0x468   : >> { %3235 = vbcast.lane.b32.xlu0 %v7196_v5, 312  ;;  %3551 = vbcast.lane.b32.xlu1 %v7191_v36, 336 }
 0x46c   : >> { %3287 = vbcast.lane.b32.xlu0 %v7268_v24, 288  ;;  %3579 = vbcast.lane.b32.xlu1 %v7206_v52, 328 }
 0x470   : >> { %3567 = vbcast.lane.b32.xlu0 %v7196_v5, 336  ;;  %3867 = vbcast.lane.b32.xlu1 %v7188_v55, 360 }
 0x474   : >> { %3595 = vbcast.lane.b32.xlu0 %v7234_v50, 328  ;;  %3883 = vbcast.lane.b32.xlu1 %v7191_v36, 360 }
 0x478   : >> { %3899 = vbcast.lane.b32.xlu0 %v7196_v5, 360  ;;  %2918 = vbcast.lane.b32.xlu1 %v7234_v50, 272 }
 0x47a   : >> { %v7283_v45 = vpop.permute.xlu0 %3207  ;;  %v7285_v13 = vpop.permute.xlu1 %2834 }
 0x47c   : >> { %2937 = vbcast.lane.b32.xlu0 %v7248_v38, 272  ;;  %2952 = vbcast.lane.b32.xlu1 %v7268_v24, 264 }
 0x47e   : >> { %v7292_v57 = vpop.permute.xlu0 %2872  ;;  %v7294_v3 = vpop.permute.xlu1 %2838 }
 0x47f   : >> { %v2989_v4 = vmul.f32 %v4984_v60, %v7292_v57 }
 0x480   : >> { %2971 = vbcast.lane.b32.xlu0 %v7290_v54, 264  ;;  %3263 = vbcast.lane.b32.xlu1 %v7234_v50, 304 }
 0x482   : >> { %v7298_v18 = vpop.permute.xlu0 %3223  ;;  %v7300_v26 = vpop.permute.xlu1 %2853 }
 0x484   : >> { %3279 = vbcast.lane.b32.xlu0 %v7248_v38, 304  ;;  %3291 = vbcast.lane.b32.xlu1 %v7268_v24, 296 }
 0x486   : >> { %v7304_v37 = vpop.permute.xlu0 %2842  ;;  %v7306_v14 = vpop.permute.xlu1 %2857 }
 0x488   : >> { %3307 = vbcast.lane.b32.xlu0 %v7290_v54, 296  ;;  %3591 = vbcast.lane.b32.xlu1 %v7234_v50, 320 }
 0x48a   : >> { %v7310_v27 = vpop.permute.xlu0 %2891  ;;  %v7312_v43 = vpop.permute.xlu1 %3191 }
 0x48c   : >> { %3555 = vbcast.lane.b32.xlu0 %v7191_v36, 344  ;;  %3895 = vbcast.lane.b32.xlu1 %v7196_v5, 352 }
 0x48e   : >> { %v7316_v25 = vpop.permute.xlu0 %3199  ;;  %v7318_v39 = vpop.permute.xlu1 %3195 }
 0x48f   : >> { %8520 = vst [vmem:[#allocation26_spill] sm:$0xff] %v7316_v25 }
 0x490   : >> { %3607 = vbcast.lane.b32.xlu0 %v7248_v38, 320  ;;  %2903 = vbcast.lane.b32.xlu1 %v7206_v52, 280 }
 0x492   : >> { %v7322_v56 = vpop.permute.xlu0 %3239  ;;  %v7324_v22 = vpop.permute.xlu1 %3211 }
 0x494   : >> { %3871 = vbcast.lane.b32.xlu0 %v7188_v55, 368  ;;  %2967 = vbcast.lane.b32.xlu1 %v7290_v54, 256 }
 0x496   : >> { %v7328_v46 = vpop.permute.xlu0 %3527  ;;  %v2877_v12 = vpop.permute.xlu1 %2876 }
 0x497   : >> { %v2990_v15 = vmul.f32 %v4985_v42, %v2877_v12  ;;  %v3039_v12 = vsel %vm8536_vm14, %v2989_v4, 0.0  ;;  %v5072_v42 = vunpack.c.l.bf16 %v5310_v31  ;;  %vm8549_vm14 = vmmov %vm8537_vm3 }
 0x498   : >> { %3911 = vbcast.lane.b32.xlu0 %v7206_v52, 352  ;;  %3251 = vbcast.lane.b32.xlu1 %v7206_v52, 312 }
 0x499   : >> { %v3040_v61 = vsel %vm8535_vm13, %v2990_v15, 0.0  ;;  %vm8548_vm13 = vmmov %vm8537_vm3 }
 0x49a   : >> { %v7332_v11 = vpop.permute.xlu0 %3543  ;;  %v7334_v20 = vpop.permute.xlu1 %3227  ;;  %v3041_v60 = vadd.f32 %v3040_v61, %v3039_v12 }
 0x49b   : >> { %v3326_v15 = vmul.f32 %v5049_v49, %v7334_v20 }
 0x49c   : >> { %2922 = vbcast.lane.b32.xlu0 %v7234_v50, 280  ;;  %3303 = vbcast.lane.b32.xlu1 %v7290_v54, 288 }
 0x49d   : >> { %v3376_v20 = vsel %vm8540_vm5, %v3326_v15, 0.0  ;;  %vm8556_vm5 = vmmov %vm8537_vm3 }
 0x49e   : >> { %v2881_v10 = vpop.permute.xlu0 %2880  ;;  %v7338_v62 = vpop.permute.xlu1 %2861 }
 0x49f   : >> { %8521 = vst [vmem:[#allocation27_spill] sm:$0xff] %v7338_v62  ;;  %v2991_v58 = vmul.f32 %v4988_v47, %v2881_v10  ;;  %v5052_v10 = vunpack.c.l.bf16 %v5305_v34 }
 0x4a0   : >> { %3267 = vbcast.lane.b32.xlu0 %v7234_v50, 312  ;;  %3539 = vbcast.lane.b32.xlu1 %v7188_v55, 344 }
 0x4a1   : >> { %v3042_v57 = vsel %vm8537_vm3, %v2991_v58, 0.0 }
 0x4a2   : >> { %v7342_v0 = vpop.permute.xlu0 %2914  ;;  %v7344_v21 = vpop.permute.xlu1 %2895 }
 0x4a4   : >> { %3571 = vbcast.lane.b32.xlu0 %v7196_v5, 344  ;;  %3583 = vbcast.lane.b32.xlu1 %v7206_v52, 336 }
 0x4a6   : >> { %v7348_v28 = vpop.permute.xlu0 %3255  ;;  %v7350_v9 = vpop.permute.xlu1 %3215 }
 0x4a7   : >> { %8522 = vst [vmem:[#allocation33_spill] sm:$0xff] %v7350_v9 }
 0x4a8   : >> { %3623 = vbcast.lane.b32.xlu0 %v7268_v24, 320  ;;  %3611 = vbcast.lane.b32.xlu1 %v7248_v38, 328 }
 0x4aa   : >> { %v7354_v17 = vpop.permute.xlu0 %3559  ;;  %v7356_v19 = vpop.permute.xlu1 %3243 }
 0x4ab   : >> { %8523 = vst [vmem:[#allocation35_spill] sm:$0xff] %v7354_v17 }
 0x4ac   : >> { %3903 = vbcast.lane.b32.xlu0 %v7196_v5, 368  ;;  %3887 = vbcast.lane.b32.xlu1 %v7191_v36, 368 }
 0x4ae   : >> { %v7360_v6 = vpop.permute.xlu0 %2846  ;;  %v7362_v23 = vpop.permute.xlu1 %3531 }
 0x4af   : >> { %8524 = vst [vmem:[#allocation37_spill] sm:$0xff] %v7360_v6  ;;  %8525 = vst [vmem:[#allocation29_spill] sm:$0xff] %v7362_v23 }
 0x4b0   : >> { %3931 = vbcast.lane.b32.xlu0 %v7234_v50, 360  ;;  %3915 = vbcast.lane.b32.xlu1 %v7206_v52, 360 }
 0x4b2   : >> { %v7366_v48 = vpop.permute.xlu0 %2899  ;;  %v7368_v53 = vpop.permute.xlu1 %3547 }
 0x4b4   : >> { %2975 = vbcast.lane.b32.xlu0 %v7290_v54, 272  ;;  %2956 = vbcast.lane.b32.xlu1 %v7268_v24, 272 }
 0x4b6   : >> { %v7372_v41 = vpop.permute.xlu0 %2933  ;;  %v7374_v32 = vpop.permute.xlu1 %2910 }
 0x4b7   : >> { %8526 = vst [vmem:[#allocation30_spill] sm:$0xff] %v7372_v41  ;;  %8527 = vst [vmem:[#allocation36_spill] sm:$0xff] %v7374_v32  ;;  %v4989_v41 = vunpack.c.h.bf16 %v5289_v63  ;;  %v5073_v63 = vunpack.c.h.bf16 %v5310_v31 }
 0x4b8   : >> { %3311 = vbcast.lane.b32.xlu0 %v7290_v54, 304  ;;  %3295 = vbcast.lane.b32.xlu1 %v7268_v24, 304 }
 0x4ba   : >> { %v7378_v51 = vpop.permute.xlu0 %3219  ;;  %v3232_v29 = vpop.permute.xlu1 %3231 }
 0x4bb   : >> { %8528 = vst [vmem:[#allocation45_spill] sm:$0xff] %v7378_v51  ;;  %v3327_v58 = vmul.f32 %v5052_v10, %v3232_v29  ;;  %v5322_v51 = vld [vmem:[%s5786_s29 + $0xe0] sm:$0xff]  }
 0x4bc   : >> { %3615 = vbcast.lane.b32.xlu0 %v7248_v38, 336  ;;  %3599 = vbcast.lane.b32.xlu1 %v7234_v50, 336  ;;  %v5120_v31 = vunpack.c.l.bf16 %v5322_v51  ;;  %v7443_v10 = vld [vmem:[%s5786_s29 + $0x40] sm:$0xff]  }
 0x4be   : >> { %v3272_v8 = vpop.permute.xlu0 %3271  ;;  %v7382_v30 = vpop.permute.xlu1 %3259 }
 0x4bf   : >> { %8529 = vst [vmem:[#allocation32_spill] sm:$0xff] %v7382_v30 }
 0x4c0   : >> { %3643 = vbcast.lane.b32.xlu0 %v7290_v54, 328  ;;  %3627 = vbcast.lane.b32.xlu1 %v7268_v24, 328 }
 0x4c2   : >> { %v7386_v59 = vpop.permute.xlu0 %3535  ;;  %v7388_v2 = vpop.permute.xlu1 %3563 }
 0x4c3   : >> { %8530 = vst [vmem:[#allocation39_spill] sm:$0xff] %v7386_v59  ;;  %8531 = vst [vmem:[#allocation40_spill] sm:$0xff] %v7388_v2  ;;  %v7484_v59 = vld [vmem:[%s5786_s29 + $0x20] sm:$0xff]  }
 0x4c4   : >> { %3891 = vbcast.lane.b32.xlu0 %v7191_v36, 376  ;;  %3927 = vbcast.lane.b32.xlu1 %v7234_v50, 352 }
 0x4c6   : >> { %v7394_v33 = vpop.permute.xlu0 %3575  ;;  %v7396_v16 = vpop.permute.xlu1 %2865 }
 0x4c7   : >> { %8532 = vst [vmem:[#allocation41_spill] sm:$0xff] %v7396_v16  ;;  %v3337_v16 = vmul.f32 %v5072_v42, %v3272_v8  ;;  %v3378_v8 = vsel %vm8542_vm7, %v3327_v58, 0.0  ;;  %v5121_v58 = vunpack.c.h.bf16 %v5322_v51  ;;  %v7469_v51 = vld [vmem:[%s5786_s29 + $0xd0] sm:$0xff]   ;;  %vm8568_vm7 = vmmov %vm8537_vm3 }
 0x4c8   : >> { %3943 = vbcast.lane.b32.xlu0 %v7248_v38, 352  ;;  %2941 = vbcast.lane.b32.xlu1 %v7248_v38, 280 }
 0x4ca   : >> { %v7400_v44 = vpop.permute.xlu0 %3863  ;;  %v7402_v36 = vpop.permute.xlu1 %2929 }
 0x4cb   : >> { %8533 = vst [vmem:[#allocation43_spill] sm:$0xff] %v7402_v36  ;;  %v5048_v36 = vunpack.c.l.bf16 %v5304_v35  ;;  %v3043_v35 = vadd.f32 %v3042_v57, %v3041_v60  ;;  %v5332_v60 = vld [vmem:[%s5786_s29 + $0x30] sm:$0xff]  }
 0x4cc   : >> { %2960 = vbcast.lane.b32.xlu0 %v7268_v24, 280  ;;  %3283 = vbcast.lane.b32.xlu1 %v7248_v38, 312  ;;  %v5161_v2 = vunpack.c.h.bf16 %v5332_v60 }
 0x4cd   : >> { %v3325_v4 = vmul.f32 %v5048_v36, %v7298_v18  ;;  %v7433_v18 = vld [vmem:[%s5786_s29 + $0x50] sm:$0xff]   ;;  %v3414_v36 = vsel %vm8543_vm8, %v3337_v16, 0.0  ;;  %vm8571_vm8 = vmmov %vm8537_vm3 }
 0x4ce   : >> { %v7410_v40 = vpop.permute.xlu0 %3879  ;;  %v7412_v7 = vpop.permute.xlu1 %3203 }
 0x4cf   : >> { %8534 = vst [vmem:[#allocation34_spill] sm:$0xff] %v7412_v7  ;;  %v3375_v29 = vsel %vm8541_vm6, %v3325_v4, 0.0  ;;  %vm8557_vm6 = vmmov %vm8537_vm3 }
 0x4d0   : >> { %3603 = vbcast.lane.b32.xlu0 %v7234_v50, 344  ;;  %3587 = vbcast.lane.b32.xlu1 %v7206_v52, 344  ;;  %v3377_v42 = vadd.f32 %v3376_v20, %v3375_v29  ;;  %v7457_v20 = vld [vmem:[%s5786_s29 + $0xc0] sm:$0xff]   ;;  %v3665_v29 = vmul.f32 %v5120_v31, %v7394_v33  ;;  %v7492_v33 = vld [vmem:[%s5786_s29 + $0x48] sm:$0xff]  }
 0x4d2   : >> { %v2885_v47 = vpop.permute.xlu0 %2884  ;;  %v7419_v25 = vpop.permute.xlu1 %3247 }
 0x4d3   : >> { %8538 = vst [vmem:[#allocation38_spill] sm:$0xff] %v7419_v25  ;;  %v2992_v7 = vmul.f32 %v4989_v41, %v2885_v47  ;;  %v5053_v41 = vunpack.c.h.bf16 %v5305_v34 }
 0x4d4   : >> { %3907 = vbcast.lane.b32.xlu0 %v7196_v5, 376  ;;  %3639 = vbcast.lane.b32.xlu1 %v7290_v54, 320 }
 0x4d5   : >> { %v3044_v61 = vsel %vm8539_vm4, %v2992_v7, 0.0  ;;  %v7436_v7 = vld [vmem:[%s5786_s29] sm:$0xff]   ;;  %vm8554_vm4 = vmmov %vm8537_vm3 }
 0x4d6   : >> { %v3045_v12 = vadd.f32 %v3044_v61, %v3043_v35  ;;  %v7427_v6 = vpop.permute.xlu0 %2948  ;;  %v3276_v49 = vpop.permute.xlu1 %3275  ;;  %v7451_v35 = vld [vmem:[%s5786_s29 + $0x8] sm:$0xff]  }
 0x4d7   : >> { %v3338_v5 = vmul.f32 %v5073_v63, %v3276_v49  ;;  %8545 = vst [vmem:[#allocation42_spill] sm:$0xff] %v7451_v35 }
 0x4d8   : >> { %v3046_v57 = vrot.slane %v3045_v12, 4  ;;  %3959 = vbcast.lane.b32.xlu0 %v7268_v24, 352  ;;  %3875 = vbcast.lane.b32.xlu1 %v7188_v55, 376 }
 0x4d9   : >> { %v3415_v34 = vsel %vm8544_vm9, %v3338_v5, 0.0  ;;  %v3379_v5 = vadd.f32 %v3378_v8, %v3377_v42  ;;  %v5334_v42 = vld [vmem:[%s5786_s29 + $0x70] sm:$0xff]   ;;  %vm8572_vm9 = vmmov %vm8537_vm3 }
 0x4da   : >> { %v3047_v47 = vadd.f32 %v3046_v57, %v3045_v12  ;;  %v7446_v55 = vadd.f32 %v3415_v34, %v3414_v36  ;;  %v3236_v15 = vpop.permute.xlu0 %3235  ;;  %v7448_v63 = vpop.permute.xlu1 %3551  ;;  %v7460_v12 = vld [vmem:[%s5786_s29 + $0x10] sm:$0xff]   ;;  %v5160_v36 = vunpack.c.l.bf16 %v5332_v60  ;;  %v7495_v60 = vld [vmem:[%s5786_s29 + $0x100] sm:$0xff]  }
 0x4db   : >> { %v3328_v4 = vmul.f32 %v5053_v41, %v3236_v15  ;;  %v7466_v41 = vld [vmem:[%s5786_s29 + $0x18] sm:$0xff]   ;;  %v5296_v15 = vld [vmem:[%s5786_s29 + $0x180] sm:$0xff]  }
 0x4dc   : >> { %2979 = vbcast.lane.b32.xlu0 %v7290_v54, 280  ;;  %3919 = vbcast.lane.b32.xlu1 %v7206_v52, 368  ;;  %8546 = vst [vmem:[#allocation46_spill] sm:$0xff] %v7466_v41  ;;  %v3048_v16 = vrot.slane %v3047_v47, 2  ;;  %v8565_v41 = vunpack.c.h.bf16 %v7443_v10 }
 0x4dd   : >> { %v3380_v34 = vsel %vm8547_vm10, %v3328_v4, 0.0  ;;  %v5168_v4 = vunpack.c.l.bf16 %v5334_v42  ;;  %vm8573_vm10 = vmmov %vm8537_vm3 }
 0x4de   : >> { %v3381_v61 = vadd.f32 %v3380_v34, %v3379_v5  ;;  %v7476_v57 = vpop.permute.xlu0 %3287  ;;  %v3580_v49 = vpop.permute.xlu1 %3579  ;;  %v7487_v5 = vld [vmem:[%s5786_s29 + $0x60] sm:$0xff]   ;;  %v3049_v30 = vadd.f32 %v3048_v16, %v3047_v47 }
 0x4df   : >> { %v3666_v31 = vmul.f32 %v5121_v58, %v3580_v49  ;;  %v3724_v58 = vsel %vm8548_vm13, %v3665_v29, 0.0  ;;  %v3989_v49 = vmul.f32 %v5160_v36, %v7400_v44  ;;  %v7511_v44 = vld [vmem:[%s5786_s29 + $0x58] sm:$0xff]   ;;  %v7517_v16 = vld [vmem:[%s5786_s29 + $0xa0] sm:$0xff]   ;;  %v8564_v29 = vunpack.c.l.bf16 %v7451_v35  ;;  %vm8574_vm13 = vmmov %vm8537_vm3 }
 0x4e0   : >> { %v3382_v34 = vrot.slane %v3381_v61, 4  ;;  %3619 = vbcast.lane.b32.xlu0 %v7248_v38, 344  ;;  %3947 = vbcast.lane.b32.xlu1 %v7248_v38, 360  ;;  %8552 = vst [vmem:[#allocation47_spill] sm:$0xff] %v7511_v44  ;;  %8553 = vst [vmem:[#allocation48_spill] sm:$0xff] %v7517_v16  ;;  %v7624_v35 = vld [vmem:[%s5786_s29 + $0x158] sm:$0xff]  }
 0x4e1   : >> { %v3725_v8 = vsel %vm8549_vm14, %v3666_v31, 0.0  ;;  %v5169_v31 = vunpack.c.h.bf16 %v5334_v42  ;;  %8570 = vst [vmem:[#allocation57_spill] sm:$0xff] %v7624_v35  ;;  %vm8575_vm14 = vmmov %vm8537_vm3 }
 0x4e2   : >> { %v3383_v32 = vadd.f32 %v3382_v34, %v3381_v61  ;;  %v7504_v23 = vadd.f32 %v3725_v8, %v3724_v58  ;;  %v7506_v17 = vpop.permute.xlu0 %3567  ;;  %v3868_v9 = vpop.permute.xlu1 %3867  ;;  %v4021_v34 = vsel %vm8537_vm3, %v3989_v49, 0.0  ;;  %v3050_v58 = vrot.slane %v3049_v30, 1  ;;  %v7544_v49 = vld [vmem:[%s5786_s29 + $0x28] sm:$0xff]  }
 0x4e3   : >> { %8551 = vst [vmem:[#allocation44_spill] sm:$0xff] %v7506_v17  ;;  %v3990_v36 = vmul.f32 %v5161_v2, %v3868_v9  ;;  %v3993_v9 = vmul.f32 %v5168_v4, %v7410_v40  ;;  %v7535_v40 = vld [vmem:[%s5786_s29 + $0xc8] sm:$0xff]  }
 0x4e4   : >> { %8550 = vst [vmem:[#allocation49_spill] sm:$0xff] %v7504_v23  ;;  %v3384_v61 = vrot.slane %v3383_v32, 2  ;;  %3923 = vbcast.lane.b32.xlu0 %v7206_v52, 376  ;;  %3299 = vbcast.lane.b32.xlu1 %v7268_v24, 312  ;;  %v3051_v42 = vadd.f32 %v3050_v58, %v3049_v30  ;;  %v7565_v58 = vld [vmem:[%s5786_s29 + $0x190] sm:$0xff]  }
 0x4e5   : >> { %v4022_v2 = vsel %vm8554_vm4, %v3990_v36, 0.0  ;;  %v7581_v30 = vld [vmem:[%s5786_s29 + $0xb0] sm:$0xff]   ;;  %vm8577_vm4 = vmmov %vm8537_vm3 }
 0x4e6   : >> { %v3385_v62 = vadd.f32 %v3384_v61, %v3383_v32  ;;  %v7527_v47 = vadd.f32 %v4022_v2, %v4021_v34  ;;  %v7529_v52 = vpop.permute.xlu0 %3595  ;;  %v3884_v25 = vpop.permute.xlu1 %3883  ;;  %v7550_v61 = vld [vmem:[%s5786_s29 + $0xd8] sm:$0xff]   ;;  %v7553_v32 = vld [vmem:[%s5786_s29 + $0x68] sm:$0xff]  }
 0x4e7   : >> { %v3994_v4 = vmul.f32 %v5169_v31, %v3884_v25  ;;  %v4034_v25 = vsel %vm8556_vm5, %v3993_v9, 0.0  ;;  %v5016_v31 = vunpack.c.l.bf16 %v5296_v15  ;;  %v7578_v9 = vld [vmem:[%s5786_s29 + $0x120] sm:$0xff]   ;;  %vm8579_vm5 = vmmov %vm8537_vm3 }
 0x4e8   : >> { %8555 = vst [vmem:[#allocation50_spill] sm:$0xff] %v7527_v47  ;;  %v3386_v34 = vrot.slane %v3385_v62, 1  ;;  %3975 = vbcast.lane.b32.xlu0 %v7290_v54, 352  ;;  %3631 = vbcast.lane.b32.xlu1 %v7268_v24, 336 }
 0x4e9   : >> { %v4035_v36 = vsel %vm8557_vm6, %v3994_v4, 0.0  ;;  %v7584_v4 = vld [vmem:[%s5786_s29 + $0x108] sm:$0xff]   ;;  %vm8583_vm6 = vmmov %vm8537_vm3 }
 0x4ea   : >> { %v3387_v8 = vadd.f32 %v3386_v34, %v3385_v62  ;;  %v7555_v2 = vadd.f32 %v4035_v36, %v4034_v25  ;;  %v7557_v23 = vpop.permute.xlu0 %3899  ;;  %v7559_v17 = vpop.permute.xlu1 %2918  ;;  %v7568_v62 = vld [vmem:[%s5786_s29 + $0xa8] sm:$0xff]   ;;  %v5017_v34 = vunpack.c.h.bf16 %v5296_v15  ;;  %v8561_v36 = vunpack.c.h.bf16 %v7436_v7 }
 0x4eb   : >> { %8559 = vst [vmem:[#allocation59_spill] sm:$0xff] %v7559_v17  ;;  %8560 = vst [vmem:[#allocation52_spill] sm:$0xff] %v7568_v62  ;;  %v2986_v17 = vmul.f32 %v8565_v41, %v7306_v14  ;;  %v8567_v14 = vunpack.c.l.bf16 %v7433_v18 }
 0x4ec   : >> { %8558 = vst [vmem:[#allocation51_spill] sm:$0xff] %v7555_v2  ;;  %v2982_v25 = vmul.f32 %v8561_v36, %v7294_v3  ;;  %v7575_v47 = vadd.f32 %v3387_v8, %v3051_v42  ;;  %3635 = vbcast.lane.b32.xlu0 %v7268_v24, 344  ;;  %3935 = vbcast.lane.b32.xlu1 %v7234_v50, 368  ;;  %v8563_v3 = vunpack.c.l.bf16 %v7436_v7  ;;  %v5108_v42 = vunpack.c.l.bf16 %v7553_v32  ;;  %v7595_v2 = vld [vmem:[%s5786_s29 + $0x1c0] sm:$0xff]  }
 0x4ed   : >> { %v3005_v8 = vmul.f32 %v5016_v31, %v7427_v6  ;;  %v5080_v7 = vunpack.c.l.bf16 %v7565_v58  ;;  %v7608_v31 = vld [vmem:[%s5786_s29 + $0x118] sm:$0xff]   ;;  %v5129_v36 = vunpack.c.h.bf16 %v7578_v9  ;;  %v3321_v41 = vmul.f32 %v8567_v14, %v7283_v45 }
 0x4ee   : >> { %8562 = vst [vmem:[#allocation53_spill] sm:$0xff] %v7575_v47  ;;  %v2981_v15 = vmul.f32 %v8563_v3, %v7285_v13  ;;  %v2983_v47 = vmul.f32 %v8564_v29, %v7304_v37  ;;  %v7605_v3 = vpop.permute.xlu0 %2937  ;;  %v2953_v6 = vpop.permute.xlu1 %2952  ;;  %v3014_v16 = vsel %vm8568_vm7, %v2982_v25, 0.0  ;;  %v8569_v13 = vunpack.c.l.bf16 %v7443_v10  ;;  %v7627_v37 = vld [vmem:[%s5786_s29 + $0x1d0] sm:$0xff]   ;;  %vm8584_vm7 = vmmov %vm8537_vm3 }
 0x4ef   : >> { %8566 = vst [vmem:[#allocation54_spill] sm:$0xff] %v7605_v3  ;;  %v3006_v29 = vmul.f32 %v5017_v34, %v2953_v6  ;;  %v3091_v45 = vsel %vm8572_vm9, %v3005_v8, 0.0  ;;  %v3027_v10 = vsel %vm8575_vm14, %v2986_v17, 0.0  ;;  %v5081_v6 = vunpack.c.h.bf16 %v7565_v58  ;;  %vm8590_vm9 = vmmov %vm8537_vm3 }
 0x4f0   : >> { %v2985_v3 = vmul.f32 %v8569_v13, %v7300_v26  ;;  %3967 = vbcast.lane.b32.xlu0 %v7268_v24, 368  ;;  %3963 = vbcast.lane.b32.xlu1 %v7268_v24, 360  ;;  %v3013_v34 = vsel %vm8571_vm8, %v2981_v15, 0.0  ;;  %v3016_v26 = vsel %vm8574_vm13, %v2983_v47, 0.0  ;;  %v8576_v13 = vunpack.c.l.bf16 %v7457_v20  ;;  %vm8585_vm8 = vmmov %vm8537_vm3 }
 0x4f1   : >> { %v3092_v25 = vsel %vm8573_vm10, %v3006_v29, 0.0  ;;  %v3015_v8 = vadd.f32 %v3014_v16, %v3013_v34  ;;  %v5076_v29 = vunpack.c.l.bf16 %v7624_v35  ;;  %v7648_v50 = vsel %vm8537_vm3, %v3321_v41, 0.0  ;;  %v7656_v16 = vld [vmem:[%s5786_s29 + $0x160] sm:$0xff]   ;;  %vm8591_vm10 = vmmov %vm8537_vm3 }
 0x4f2   : >> { %v2993_v14 = vmul.f32 %v8576_v13, %v7310_v27  ;;  %v7638_v44 = vadd.f32 %v3092_v25, %v3091_v45  ;;  %v7640_v62 = vpop.permute.xlu0 %2971  ;;  %v7642_v15 = vpop.permute.xlu1 %3263  ;;  %v3026_v17 = vsel %vm8577_vm4, %v2985_v3, 0.0  ;;  %v5128_v27 = vunpack.c.l.bf16 %v7578_v9  ;;  %vm8593_vm13 = vmmov %vm8537_vm3 }
 0x4f3   : >> { %v5109_v45 = vunpack.c.h.bf16 %v7553_v32  ;;  %v7658_v34 = vadd.f32 %v3016_v26, %v3015_v8  ;;  %v7660_v58 = vadd.f32 %v3027_v10, %v3026_v17  ;;  %v8578_v41 = vunpack.c.l.bf16 %v7460_v12  ;;  %vm8594_vm14 = vmmov %vm8537_vm3 }
 0x4f4   : >> { %3955 = vbcast.lane.b32.xlu0 %v7248_v38, 376  ;;  %3315 = vbcast.lane.b32.xlu1 %v7290_v54, 312  ;;  %v3341_v3 = vmul.f32 %v5080_v7, %v7476_v57  ;;  %v3052_v13 = vsel %vm8579_vm5, %v2993_v14, 0.0  ;;  %v8580_v9 = vunpack.c.h.bf16 %v7460_v12  ;;  %v5176_v26 = vunpack.c.l.bf16 %v7581_v30  ;;  %vm8596_vm4 = vmmov %vm8537_vm3 }
 0x4f5   : >> { %v7665_v25 = vmul.f32 %v8578_v41, %v7312_v43  ;;  %v4997_v10 = vunpack.c.h.bf16 %v7535_v40  ;;  %v8581_v43 = vunpack.c.h.bf16 %v7487_v5  ;;  %v3659_v17 = vmul.f32 %v5108_v42, %v7448_v63  ;;  %vm8597_vm5 = vmmov %vm8537_vm3 }
 0x4f6   : >> { %v7672_v47 = vmul.f32 %v8580_v9, %v7318_v39  ;;  %v3280_v32 = vpop.permute.xlu0 %3279  ;;  %v3292_v35 = vpop.permute.xlu1 %3291  ;;  %v8582_v39 = vunpack.c.l.bf16 %v7487_v5  ;;  %v5024_v41 = vunpack.c.l.bf16 %v7595_v2  ;;  %v5061_v9 = vunpack.c.h.bf16 %v7550_v61  ;;  %v7693_v5 = vld [vmem:[%s5786_s29 + $0x38] sm:$0xff]  }
 0x4f7   : >> { %v3658_v8 = vmul.f32 %v8581_v43, %v7368_v53  ;;  %v3339_v57 = vmul.f32 %v5076_v29, %v3280_v32  ;;  %v3342_v7 = vmul.f32 %v5081_v6, %v3292_v35  ;;  %v3427_v53 = vsel %vm8583_vm6, %v3341_v3, 0.0  ;;  %vm8598_vm6 = vmmov %vm8537_vm3 }
 0x4f8   : >> { %v3657_v12 = vmul.f32 %v8582_v39, %v7332_v11  ;;  %3971 = vbcast.lane.b32.xlu0 %v7268_v24, 376  ;;  %3647 = vbcast.lane.b32.xlu1 %v7290_v54, 336  ;;  %v3670_v35 = vmul.f32 %v5129_v36, %v7529_v52  ;;  %v7696_v11 = vld [vmem:[%s5786_s29 + $0xf0] sm:$0xff]   ;;  %v8586_v24 = vunpack.c.l.bf16 %v7469_v51  ;;  %v8587_v42 = vunpack.c.l.bf16 %v7484_v59 }
 0x4f9   : >> { %v3417_v6 = vsel %vm8584_vm7, %v3339_v57, 0.0  ;;  %v3428_v29 = vsel %vm8585_vm8, %v3342_v7, 0.0  ;;  %v8588_v57 = vunpack.c.h.bf16 %v7433_v18  ;;  %v3701_v18 = vsel %vm8593_vm13, %v3659_v17, 0.0  ;;  %vm8601_vm7 = vmmov %vm8537_vm3 }
 0x4fa   : >> { %v3329_v63 = vmul.f32 %v8586_v24, %v7322_v56  ;;  %v3653_v32 = vmul.f32 %v8587_v42, %v7328_v46  ;;  %v7705_v3 = vadd.f32 %v3417_v6, %v7446_v55  ;;  %v7707_v52 = vadd.f32 %v3428_v29, %v3427_v53  ;;  %v7709_v36 = vpop.permute.xlu0 %3307  ;;  %v3592_v43 = vpop.permute.xlu1 %3591  ;;  %vm8602_vm8 = vmmov %vm8537_vm3 }
 0x4fb   : >> { %v7714_v7 = vmul.f32 %v8588_v57, %v7324_v22  ;;  %v8589_v56 = vunpack.c.h.bf16 %v7457_v20  ;;  %v3699_v24 = vsel %vm8590_vm9, %v3658_v8, 0.0  ;;  %v3669_v46 = vmul.f32 %v5128_v27, %v3592_v43  ;;  %vm8603_vm9 = vmmov %vm8537_vm3 }
 0x4fc   : >> { %v3698_v55 = vsel %vm8591_vm10, %v3657_v12, 0.0  ;;  %v8592_v53 = vunpack.c.l.bf16 %v7535_v40  ;;  %3951 = vbcast.lane.b32.xlu1 %v7248_v38, 368  ;;  %v5164_v29 = vunpack.c.l.bf16 %v7693_v5  ;;  %v3738_v20 = vsel %vm8594_vm14, %v3670_v35, 0.0  ;;  %vm8604_vm10 = vmmov %vm8537_vm3 }
 0x4fd   : >> { %v2994_v39 = vmul.f32 %v8589_v56, %v7344_v21  ;;  %v8595_v21 = vunpack.c.h.bf16 %v7581_v30  ;;  %v3737_v8 = vsel %vm8537_vm3, %v3669_v46, 0.0  ;;  %v3388_v12 = vsel %vm8596_vm4, %v3329_v63, 0.0  ;;  %vm8608_vm13 = vmmov %vm8537_vm3 }
 0x4fe   : >> { %v2995_v6 = vmul.f32 %v8592_v53, %v7366_v48  ;;  %v7735_v48 = vsel %vm8597_vm5, %v3653_v32, 0.0  ;;  %v3700_v38 = vadd.f32 %v3699_v24, %v3698_v55  ;;  %v7737_v40 = vadd.f32 %v3738_v20, %v3737_v8  ;;  %v3556_v42 = vpop.permute.xlu0 %3555  ;;  %v3896_v43 = vpop.permute.xlu1 %3895  ;;  %v8606_v8 = vld [vmem:[#allocation27_spill] sm:$0xff]  ;;  %vm8616_vm14 = vmmov %vm8537_vm3 }
 0x4ff   : >> { %v3998_v27 = vmul.f32 %v8595_v21, %v7557_v23  ;;  %v3053_v17 = vsel %vm8598_vm6, %v2994_v39, 0.0  ;;  %v3660_v57 = vmul.f32 %v5109_v45, %v3556_v42  ;;  %v3997_v35 = vmul.f32 %v5176_v26, %v3896_v43  ;;  %v7770_v43 = vld [vmem:[%s5786_s29 + $0xe8] sm:$0xff]   ;;  %vm8618_vm4 = vmmov %vm8537_vm3  ;;  %v8624_v42 = vld [vmem:[#allocation36_spill] sm:$0xff] }
 0x500   : >> { %v5005_v56 = vunpack.c.h.bf16 %v7584_v4  ;;  %v8599_v23 = vunpack.c.h.bf16 %v7495_v60  ;;  %v8600_v63 = vunpack.c.h.bf16 %v7469_v51  ;;  %v3702_v46 = vadd.f32 %v3701_v18, %v3700_v38  ;;  %3979 = vbcast.lane.b32.xlu1 %v7290_v54, 360  ;;  %vm8626_vm5 = vmmov %vm8537_vm3 }
 0x501   : >> { %v3055_v39 = vsel %vm8601_vm7, %v2995_v6, 0.0  ;;  %v4048_v45 = vsel %vm8602_vm8, %v3998_v27, 0.0  ;;  %v3703_v26 = vsel %vm8603_vm9, %v3660_v57, 0.0  ;;  %v4047_v55 = vsel %vm8604_vm10, %v3997_v35, 0.0  ;;  %v8609_v57 = vld [vmem:[#allocation38_spill] sm:$0xff]  ;;  %vm8629_vm6 = vmmov %vm8537_vm3 }
 0x502   : >> { %v2998_v30 = vmul.f32 %v8599_v23, %v7342_v0  ;;  %v3330_v32 = vmul.f32 %v8600_v63, %v7356_v19  ;;  %v3054_v53 = vadd.f32 %v3053_v17, %v3052_v13  ;;  %v8605_v0 = vunpack.c.l.bf16 %v7502_v1  ;;  %v7760_v20 = vpop.permute.xlu0 %3607  ;;  %v2904_v21 = vpop.permute.xlu1 %2903  ;;  %v8611_v63 = vld [vmem:[#allocation31_spill] sm:$0xff]  ;;  %vm8630_vm7 = vmmov %vm8537_vm3 }
 0x503   : >> { %v7756_v19 = vadd.f32 %v3703_v26, %v3702_v46  ;;  %v7758_v18 = vadd.f32 %v4048_v45, %v4047_v55  ;;  %v8607_v6 = vunpack.c.l.bf16 %v7492_v33  ;;  %v2996_v38 = vmul.f32 %v4997_v10, %v2904_v21  ;;  %v8612_v46 = vld [vmem:[#allocation52_spill] sm:$0xff]  ;;  %v8613_v26 = vld [vmem:[#allocation33_spill] sm:$0xff]  ;;  %v8614_v55 = vld [vmem:[#allocation47_spill] sm:$0xff] }
 0x504   : >> { %v3333_v51 = vmul.f32 %v8605_v0, %v7348_v28  ;;  %v3066_v28 = vsel %vm8608_vm13, %v2998_v30, 0.0  ;;  %v3056_v17 = vadd.f32 %v3055_v39, %v3054_v53  ;;  %v8610_v35 = vunpack.c.l.bf16 %v7550_v61  ;;  %3939 = vbcast.lane.b32.xlu1 %v8611_v63, 376  ;;  %vm8631_vm8 = vmmov %vm8537_vm3 }
 0x505   : >> { %v7765_v27 = vmul.f32 %v8607_v6, %v8606_v8  ;;  %v8615_v10 = vunpack.c.l.bf16 %v8614_v55  ;;  %v3389_v21 = vsel %vm8616_vm14, %v3330_v32, 0.0  ;;  %v8617_v8 = vunpack.c.h.bf16 %v7595_v2  ;;  %v8619_v6 = vld [vmem:[#allocation35_spill] sm:$0xff]  ;;  %vm8635_vm9 = vmmov %vm8537_vm3 }
 0x506   : >> { %v3331_v23 = vmul.f32 %v8610_v35, %v8609_v57  ;;  %v3057_v39 = vsel %vm8537_vm3, %v2996_v38, 0.0  ;;  %v3401_v53 = vsel %vm8618_vm4, %v3333_v51, 0.0  ;;  %v8620_v57 = vld [vmem:[#allocation48_spill] sm:$0xff]  ;;  %v3872_v14 = vpop.permute.xlu0 %3871  ;;  %v2968_v45 = vpop.permute.xlu1 %2967  ;;  %v8623_v32 = vunpack.c.h.bf16 %v7484_v59  ;;  %vm8636_vm10 = vmmov %vm8537_vm3 }
 0x507   : >> { %v7781_v0 = vmul.f32 %v8615_v10, %v8613_v26  ;;  %v3010_v30 = vmul.f32 %v8617_v8, %v7640_v62  ;;  %v8621_v35 = vunpack.c.l.bf16 %v8620_v57  ;;  %v3058_v22 = vadd.f32 %v3057_v39, %v3056_v17  ;;  %v8622_v10 = vld [vmem:[#allocation29_spill] sm:$0xff]  ;;  %vm8639_vm13 = vmmov %vm8537_vm3 }
 0x508   : >> { %v3654_v13 = vmul.f32 %v8623_v32, %v8622_v10  ;;  %v8625_v62 = vunpack.c.l.bf16 %v7495_v60  ;;  %v3991_v38 = vmul.f32 %v5164_v29, %v3872_v14  ;;  %v3009_v51 = vmul.f32 %v5024_v41, %v2968_v45  ;;  %3651 = vbcast.lane.b32.xlu1 %v7290_v54, 344  ;;  %v8632_v29 = vld [vmem:[#allocation32_spill] sm:$0xff]  ;;  %vm8645_vm4 = vmmov %vm8537_vm3 }
 0x509   : >> { %v3661_v63 = vmul.f32 %v8621_v35, %v8619_v6  ;;  %v3390_v24 = vadd.f32 %v3389_v21, %v3388_v12  ;;  %v3391_v6 = vsel %vm8626_vm5, %v3331_v23, 0.0  ;;  %v3059_v17 = vrot.slane %v3058_v22, 4  ;;  %v8627_v35 = vld [vmem:[#allocation59_spill] sm:$0xff]  ;;  %vm8646_vm5 = vmmov %vm8537_vm3 }
 0x50a   : >> { %v2997_v8 = vmul.f32 %v8625_v62, %v8624_v42  ;;  %v749_v39 = vstv %s5597_s21  ;;  %v8628_v26 = vunpack.c.l.bf16 %v7584_v4  ;;  %v3105_v10 = vsel %vm8629_vm6, %v3010_v30, 0.0  ;;  %v8634_v42 = vld [vmem:[#allocation50_spill] sm:$0xff]  ;;  %v7818_v21 = vpop.permute.xlu0 %3911  ;;  %v3252_v32 = vpop.permute.xlu1 %3251  ;;  %v8637_v62 = vld [vmem:[#allocation39_spill] sm:$0xff]  ;;  %vm8647_vm6 = vmmov %vm8537_vm3  ;;  %s742_s21 = sadd.s32 1, %s5597_s21  }
 0x50b   : >> { %v4024_v60 = vsel %vm8630_vm7, %v3991_v38, 0.0  ;;  %v3104_v14 = vsel %vm8631_vm8, %v3009_v51, 0.0  ;;  %v8633_v2 = vunpack.c.h.bf16 %v7502_v1  ;;  %v3060_v12 = vadd.f32 %v3059_v17, %v3058_v22  ;;  %v7827_v22 = vpop.f32.mrb[0].mxu1  ;;  %vm8653_vm7 = vmmov %vm8537_vm3  ;;  %p739_p1 = scmp.ge.s32.totalorder %s742_s21, 7  }
 0x50c   : >> { %v2999_v59 = vmul.f32 %v8628_v26, %v8627_v35  ;;  %v7814_v23 = vadd.f32 %v4024_v60, %v8634_v42  ;;  %v7816_v45 = vadd.f32 %v3105_v10, %v3104_v14  ;;  %v3686_v26 = vsel %vm8635_vm9, %v3654_v13, 0.0  ;;  %3983 = vbcast.lane.b32.xlu1 %v7290_v54, 368  ;;  %v8641_v13 = vld [vmem:[#allocation22_spill] sm:$0xff]  ;;  %v5376_v14 = vpop.f32.mrb[1].mxu1  ;;  %vm8654_vm8 = vmmov %vm8537_vm3  ;;  %s4703_s16 = sshll.u32 (%p739_p1), %s5727_s9, 6  ;;  %s8760_s20 = sld [smem:[#allocation66_spill]] (%p739_p1) }
 0x50d   : >> { %v3334_v41 = vmul.f32 %v8633_v2, %v8632_v29  ;;  %v3065_v30 = vsel %vm8636_vm10, %v2997_v8, 0.0  ;;  %v8638_v38 = vunpack.c.l.bf16 %v7544_v49  ;;  %v3332_v1 = vmul.f32 %v5061_v9, %v3252_v32  ;;  %vm8655_vm9 = vmmov %vm8537_vm3  ;;  %v7880_v8 = vld [vmem:[%s5786_s29 + $0xb8] sm:$0xff]   ;;  %s4478_s23 = sshll.u32 (%p739_p1), %s5805_s26, 4  ;;  %s4461_s19 = scalar_lea.sflag (%p739_p1), [#allocation7], %s5764_s22  ;;  %s8260_s23 = int_to_ptr.vmem [resolvable:$true] %s4478_s23 }
 0x50e   : >> { %v3711_v17 = vsel %vm8639_vm13, %v3661_v63, 0.0  ;;  %v3392_v35 = vadd.f32 %v3391_v6, %v3390_v24  ;;  %v8640_v10 = vunpack.c.l.bf16 %v7608_v31  ;;  %vm7835_vm14 = vcmp.gt.s32.totalorder %v8641_v13, %v749_v39  ;;  %v4193_v6 = vpop.f32.mrb[2].mxu1  ;;  %v2923_v32 = vpop.permute.xlu0 %2922  ;;  %vm8656_vm10 = vmmov %vm8537_vm3  ;;  %s5606_s17 = smov (%p739_p1), [#allocation6]  }
 0x50f   : >> { %v3655_v51 = vmul.f32 %v8638_v38, %v8637_v62  ;;  %v3068_v61 = vsel %vm8537_vm3, %v2999_v59, 0.0  ;;  %v8644_v9 = vunpack.c.h.bf16 %v7627_v37  ;;  %v3061_v63 = vrot.slane %v3060_v12, 2  ;;  %v3304_v62 = vpop.permute.xlu1 %3303  ;;  %vm8657_vm13 = vmmov %vm8537_vm3 }
 0x510   : >> { %v3335_v60 = vmul.f32 %v8640_v10, %v7642_v15  ;;  %v3393_v24 = vsel %vm8645_vm4, %v3332_v1, 0.0  ;;  %v3687_v15 = vadd.f32 %v3686_v26, %v7735_v48  ;;  %v3067_v2 = vadd.f32 %v3066_v28, %v3065_v30  ;;  %v8648_v10 = vld [vmem:[#allocation40_spill] sm:$0xff]  ;;  %3987 = vbcast.lane.b32.xlu1 %v7290_v54, 376  ;;  %vm8661_vm4 = vmmov %vm8537_vm3 }
 0x511   : >> { %v3346_v29 = vmul.f32 %v8644_v9, %v7709_v36  ;;  %v3402_v42 = vsel %vm8646_vm5, %v3334_v41, 0.0  ;;  %v3394_v39 = vadd.f32 %v3393_v24, %v3392_v35  ;;  %v3688_v38 = vsel %vm8647_vm6, %v3655_v51, 0.0  ;;  %v5377_v9 = vpop.f32.mrb[3].mxu1  ;;  %v8651_v48 = vld [vmem:[#allocation44_spill] sm:$0xff]  ;;  %vm8662_vm5 = vmmov %vm8537_vm3 }
 0x512   : >> { %v8649_v59 = vunpack.c.h.bf16 %v8620_v57  ;;  %v3000_v36 = vmul.f32 %v5005_v56, %v2923_v32  ;;  %v8650_v1 = vunpack.c.l.bf16 %v7627_v37  ;;  %v8652_v28 = vunpack.c.l.bf16 %v8612_v46  ;;  %v744_v37 = vld [vmem:[#allocation3] sm:$0xff]  ;;  %vm8668_vm6 = vmmov %vm8537_vm3  ;;  %s8257_s25 = scalar_lea.hbm (%p739_p1), %s8760_s20, %s4703_s16 }
 0x513   : >> { %v3069_v26 = vadd.f32 %v3068_v61, %v3067_v2  ;;  %v3404_v30 = vsel %vm8653_vm7, %v3335_v60, 0.0  ;;  %v3395_v35 = vrot.slane %v3394_v39, 4  ;;  %v3441_v57 = vsel %vm8654_vm8, %v3346_v29, 0.0  ;;  %v3540_v61 = vpop.permute.xlu1 %3539  ;;  %vm8670_vm7 = vmmov %vm8537_vm3 }
 0x514   : >> { %v3662_v13 = vmul.f32 %v8649_v59, %v8648_v10  ;;  %v3345_v14 = vmul.f32 %v8650_v1, %v3304_v62  ;;  %v3663_v41 = vmul.f32 %v8652_v28, %v8651_v48  ;;  %v3062_v51 = vadd.f32 %v3061_v63, %v3060_v12  ;;  %v3268_v10 = vpop.permute.xlu0 %3267  ;;  %4404 = vrot.lane.b32.xlu1 %v744_v37, %s5603_s1  ;;  %vm8671_vm8 = vmmov %vm8537_vm3 }
 0x515   : >> { %v3070_v4 = vsel %vm8655_vm9, %v3000_v36, 0.0  ;;  %v3403_v24 = vadd.f32 %v3402_v42, %v3401_v53  ;;  %v3396_v6 = vadd.f32 %v3395_v35, %v3394_v39  ;;  %v8658_v54 = vunpack.c.h.bf16 %v7608_v31  ;;  %vm8672_vm9 = vmmov %vm8537_vm3 }
 0x516   : >> { %v3440_v56 = vsel %vm8656_vm10, %v3345_v14, 0.0  ;;  %v3071_v32 = vadd.f32 %v3070_v4, %v3069_v26  ;;  %v3712_v60 = vsel %vm8657_vm13, %v3662_v13, 0.0  ;;  %v8659_v12 = vunpack.c.h.bf16 %v7544_v49  ;;  %v5473_v13 = vld [vmem:[%s8352_s13] sm:$0xff]   ;;  %vm8673_vm10 = vmmov %vm8537_vm3 }
 0x517   : >> { %v7862_v62 = vadd.f32 %v3441_v57, %v3440_v56  ;;  %v3336_v2 = vmul.f32 %v8658_v54, %v3268_v10  ;;  %v8660_v63 = vmov 0   ;;  %v3689_v53 = vadd.f32 %v3688_v38, %v3687_v15  ;;  %v3584_v26 = vpop.permute.xlu1 %3583  ;;  %5379 = vmatpush3.bf16.msra.mxu0 %v5473_v13  ;;  %v7895_v54 = vld [vmem:[%s5786_s29 + $0x78] sm:$0xff]   ;;  %vm8674_vm13 = vmmov %vm8537_vm3 }
 0x518   : >> { %v3656_v29 = vmul.f32 %v8659_v12, %v3540_v61  ;;  %v4424_v59 = vsel %vm7835_vm14, 1, %v8660_v63  ;;  %v3405_v42 = vadd.f32 %v3404_v30, %v3403_v24  ;;  %v3397_v39 = vrot.slane %v3396_v6, 2  ;;  %v3572_v28 = vpop.permute.xlu0 %3571  ;;  %vm8667_vm14 = vmmov %vm8537_vm3 }
 0x519   : >> { %v3072_v36 = vrot.slane %v3071_v32, 4  ;;  %v3714_v31 = vsel %vm8537_vm3, %v3663_v41, 0.0  ;;  %v3063_v1 = vrot.slane %v3062_v51, 1  ;;  %v3406_v49 = vsel %vm8661_vm4, %v3336_v2, 0.0  ;;  %v5474_v41 = vld [vmem:[%s8352_s13 + $0x8] sm:$0xff]   ;;  %4426 = vperm.xlu1 %5468, %v4424_v59  }
 0x51a   : >> { %v3690_v14 = vsel %vm8662_vm5, %v3656_v29, 0.0  ;;  %v3398_v15 = vadd.f32 %v3397_v39, %v3396_v6  ;;  %v3407_v9 = vadd.f32 %v3406_v49, %v3405_v42  ;;  %v3713_v30 = vadd.f32 %v3712_v60, %v3711_v17  ;;  %vm8683_vm5 = vmmov %vm8661_vm4 }
 0x51b   : >> { %v3073_v38 = vadd.f32 %v3072_v36, %v3071_v32  ;;  %v7882_v48 = vadd.f32 %v3690_v14, %v3689_v53  ;;  %v8663_v35 = vunpack.c.h.bf16 %v8612_v46  ;;  %v8664_v4 = vunpack.c.l.bf16 %v7770_v43  ;;  %v3612_v39 = vpop.permute.xlu1 %3611  ;;  %v8669_v36 = vld [vmem:[#allocation49_spill] sm:$0xff] }
 0x51c   : >> { %v5137_v37 = vunpack.c.h.bf16 %v7656_v16  ;;  %v8665_v24 = vmov 0.0   ;;  %v3399_v6 = vrot.slane %v3398_v15, 1  ;;  %v3408_v10 = vrot.slane %v3407_v9, 4  ;;  %v7902_v59 = vpop.permute.xlu0 %3623 }
 0x51d   : >> { %v3664_v57 = vmul.f32 %v8663_v35, %v3572_v28  ;;  %v3667_v56 = vmul.f32 %v8664_v4, %v3584_v26  ;;  %5380 = vmatprep.subr.bf16.mxu0 %v8665_v24  ;;  %v3074_v32 = vrot.slane %v3073_v38, 2  ;;  %v5180_v61 = vunpack.c.l.bf16 %v7880_v8  ;;  %v748_v4 = vld [vmem:[%s747_s24] sm:$0xf]  ;;  %s5495_s24 = scalar_lea.vmem (%p739_p1), %s8260_s23, 448 }
 0x51e   : >> { %v3715_v2 = vadd.f32 %v3714_v31, %v3713_v30  ;;  %v8666_v46 = vunpack.c.l.bf16 %v7656_v16  ;;  %v3064_v29 = vadd.f32 %v3063_v1, %v3062_v51  ;;  %v3400_v63 = vadd.f32 %v3399_v6, %v3398_v15  ;;  %5381 = vmatpush3.bf16.msra.mxu0 %v5474_v41  ;;  %v5475_v16 = vld [vmem:[%s8351_s12] sm:$0xff]   ;;  %p5496_p2 = scmp.ne.s32.totalorder (%p739_p1), %s8260_s23, %s5495_s24 }
 0x51f   : >> { %v3716_v60 = vsel %vm8667_vm14, %v3664_v57, 0.0  ;;  %v3727_v12 = vsel %vm8668_vm6, %v3667_v56, 0.0  ;;  %v3075_v53 = vadd.f32 %v3074_v32, %v3073_v38  ;;  %v3409_v42 = vadd.f32 %v3408_v10, %v3407_v9  ;;  %5392 = vmatprep.subr.bf16.mxu0 %v8665_v24  ;;  %5387 = vmatpush3.bf16.msra.mxu1 %v5475_v16  ;;  %v3888_v35 = vpop.permute.xlu1 %3887  ;;  %v8675_v56 = vld [vmem:[#allocation37_spill] sm:$0xff]  ;;  %vm8685_vm14 = vmmov %vm8661_vm4  ;;  %v8064_v24 = vld [vmem:[%s5786_s29 + $0x1b0] sm:$0xff]  }
 0x520   : >> { %v3673_v17 = vmul.f32 %v8666_v46, %v7760_v20  ;;  %v3717_v20 = vadd.f32 %v3716_v60, %v3715_v2  ;;  %v7908_v13 = vadd.f32 %v3727_v12, %v8669_v36  ;;  %v3674_v31 = vmul.f32 %v5137_v37, %v3612_v39  ;;  %v8676_v37 = vld [vmem:[#allocation42_spill] sm:$0xff]  ;;  %v8678_v46 = vld [vmem:[#allocation45_spill] sm:$0xff]  ;;  %vm8686_vm6 = vmmov %vm8661_vm4  ;;  %p5497_p3 = pnand (%p739_p1), %p5496_p2, %p5745_p6 }
 0x521   : >> { %v5172_v51 = vunpack.c.l.bf16 %v7895_v54  ;;  %v3363_v1 = vsel %vm8670_vm7, %v7714_v7, 0.0  ;;  %v3029_v49 = vsel %vm8671_vm8, %v7765_v27, 0.0  ;;  %v7917_v14 = vadd.f32 %v3400_v63, %v3064_v29  ;;  %v3904_v27 = vpop.permute.xlu0 %3903  ;;  %v8680_v12 = vld [vmem:[#allocation41_spill] sm:$0xff]  ;;  %v7939_v39 = vld [vmem:[%s5786_s29 + $0x188] sm:$0xff]   ;;  %vm8687_vm7 = vmmov %vm8661_vm4 }
 0x522   : >> { %v3410_v15 = vrot.slane %v3409_v42, 2  ;;  %v3365_v38 = vsel %vm8672_vm9, %v7781_v0, 0.0  ;;  %v3750_v9 = vsel %vm8673_vm10, %v3673_v17, 0.0  ;;  %v3718_v28 = vrot.slane %v3717_v20, 4  ;;  %vm8688_vm8 = vmmov %vm8661_vm4  ;;  %p5498_p4 = pneg (%p739_p1), %p5497_p3 }
 0x523   : >> { %v3751_v26 = vsel %vm8674_vm13, %v3674_v31, 0.0  ;;  %v3076_v41 = vrot.slane %v3075_v53, 1  ;;  %v5185_v57 = vunpack.c.h.bf16 %v7696_v11  ;;  %v8677_v6 = vunpack.c.h.bf16 %v8676_v37  ;;  %vm8689_vm9 = vmmov %vm8661_vm4 }
 0x524   : >> { %v3411_v7 = vadd.f32 %v3410_v15, %v3409_v42  ;;  %v7926_v30 = vadd.f32 %v3751_v26, %v3750_v9  ;;  %v3719_v0 = vadd.f32 %v3718_v28, %v3717_v20  ;;  %v3999_v10 = vmul.f32 %v5180_v61, %v3904_v27  ;;  %v8684_v15 = vld [vmem:[#allocation51_spill] sm:$0xff]  ;;  %v3916_v26 = vpop.permute.xlu1 %3915  ;;  %vm8690_vm10 = vmmov %vm8661_vm4 }
 0x525   : >> { %v2984_v32 = vmul.f32 %v8677_v6, %v8675_v56  ;;  %v3995_v2 = vmul.f32 %v5172_v51, %v3888_v35  ;;  %v8679_v17 = vunpack.c.h.bf16 %v8614_v55  ;;  %v8681_v29 = vunpack.c.h.bf16 %v7492_v33  ;;  %v7952_v28 = vpop.permute.xlu0 %3931  ;;  %vm8694_vm13 = vmmov %vm8661_vm4 }
 0x526   : >> { %v3412_v42 = vrot.slane %v3411_v7, 1  ;;  %vm4287_vm3 = vcmask 130048   ;;  %v8682_v16 = vunpack.c.l.bf16 %v7696_v11  ;;  %v3720_v31 = vrot.slane %v3719_v0, 2 }
 0x527   : >> { %v3324_v60 = vmul.f32 %v8679_v17, %v8678_v46  ;;  %v2988_v63 = vmul.f32 %v8681_v29, %v8680_v12  ;;  %v4050_v61 = vsel %vm8661_vm4, %v3999_v10, 0.0  ;;  %v4037_v20 = vsel %vm8683_vm5, %v3995_v2, 0.0  ;;  %5389 = vmatmul.mubr.msk.bf16.vlgmr.msra.gmra.mrb[4].mxu1 %vm4287_vm3, %v748_v4  ;;  %v8692_v12 = vld [vmem:[#allocation46_spill] sm:$0xff]  ;;  %vm8698_vm3 = vmmov %vm8661_vm4 }
 0x528   : >> { %v4001_v36 = vmul.f32 %v8682_v16, %v7818_v21  ;;  %v3077_v55 = vadd.f32 %v3076_v41, %v3075_v53  ;;  %v3413_v51 = vadd.f32 %v3412_v42, %v3411_v7  ;;  %v7947_v33 = vadd.f32 %v4050_v61, %v7758_v18  ;;  %v7962_v7 = vld [vmem:[%s5786_s29 + $0x198] sm:$0xff]   ;;  %vm8699_vm4 = vmmov %vm8698_vm3 }
 0x529   : >> { %v7950_v9 = vadd.f32 %v4037_v20, %v8684_v15  ;;  %v3018_v11 = vsel %vm8685_vm14, %v2984_v32, 0.0  ;;  %v3721_v21 = vadd.f32 %v3720_v31, %v3719_v0  ;;  %v4002_v27 = vmul.f32 %v5185_v57, %v3916_v26  ;;  %v2957_v0 = vpop.permute.xlu1 %2956  ;;  %v8697_v31 = vld [vmem:[#allocation53_spill] sm:$0xff]  ;;  %vm8700_vm5 = vmmov %vm8698_vm3 }
 0x52a   : >> { %v5020_v35 = vunpack.c.l.bf16 %v7939_v39  ;;  %v3364_v56 = vadd.f32 %v3363_v1, %v7648_v50  ;;  %v3030_v53 = vadd.f32 %v3029_v49, %v7660_v58  ;;  %v3031_v41 = vsel %vm8686_vm6, %v2988_v63, 0.0  ;;  %v7972_v49 = vpop.permute.xlu0 %2975  ;;  %v5328_v15 = vld [vmem:[%s5786_s29 + $0x1a0] sm:$0xff]   ;;  %vm8701_vm14 = vmmov %vm8698_vm3 }
 0x52b   : >> { %v7959_v18 = vadd.f32 %v3413_v51, %v3077_v55  ;;  %v3367_v4 = vsel %vm8687_vm7, %v3324_v60, 0.0  ;;  %v4060_v37 = vsel %vm8688_vm8, %v4001_v36, 0.0  ;;  %v3722_v6 = vrot.slane %v3721_v21, 1  ;;  %v8691_v60 = vld [vmem:[#allocation26_spill] sm:$0xff]  ;;  %vm8702_vm6 = vmmov %vm8698_vm3 }
 0x52c   : >> { %v4061_v57 = vsel %vm8689_vm9, %v4002_v27, 0.0  ;;  %v3350_v32 = vsel %vm8690_vm10, %v7672_v47, 0.0  ;;  %v3366_v50 = vadd.f32 %v3365_v38, %v3364_v56  ;;  %v3019_v58 = vadd.f32 %v3018_v11, %v7658_v34  ;;  %v7979_v47 = vld [vmem:[%s5786_s29 + $0x128] sm:$0xff]   ;;  %vm8706_vm7 = vmmov %vm8698_vm3 }
 0x52d   : >> { %v7970_v1 = vadd.f32 %v4061_v57, %v4060_v37  ;;  %v3032_v10 = vadd.f32 %v3031_v41, %v3030_v53  ;;  %v3723_v2 = vadd.f32 %v3722_v6, %v3721_v21  ;;  %v3007_v46 = vmul.f32 %v5020_v35, %v2957_v0  ;;  %v8695_v38 = vld [vmem:[#allocation34_spill] sm:$0xff]  ;;  %v5340_v0 = vld [vmem:[%s5786_s29 + $0x130] sm:$0xff]   ;;  %vm8707_vm8 = vmmov %vm8698_vm3 }
 0x52e   : >> { %v5084_v17 = vunpack.c.l.bf16 %v7962_v7  ;;  %v8693_v29 = vunpack.c.l.bf16 %v8692_v12  ;;  %v3368_v42 = vadd.f32 %v3367_v4, %v3366_v50  ;;  %v3349_v34 = vsel %vm8694_vm13, %v7665_v25, 0.0  ;;  %v7994_v11 = vpop.permute.xlu0 %3311  ;;  %v3296_v25 = vpop.permute.xlu1 %3295  ;;  %v5294_v41 = vld [vmem:[%s5786_s29 + $0x140] sm:$0xff]   ;;  %v8001_v37 = vld [vmem:[%s5786_s29 + $0x148] sm:$0xff]   ;;  %vm8708_vm9 = vmmov %vm8698_vm3 }
 0x52f   : >> { %v8696_v16 = vunpack.c.h.bf16 %v8692_v12  ;;  %v7987_v61 = vadd.f32 %v3723_v2, %v8697_v31  ;;  %v3094_v20 = vsel %vm8698_vm3, %v3007_v46, 0.0  ;;  %v3351_v55 = vadd.f32 %v3350_v32, %v3349_v34  ;;  %vm8709_vm10 = vmmov %vm8698_vm3 }
 0x530   : >> { %v3319_v63 = vmul.f32 %v8693_v29, %v8691_v60  ;;  %v3020_v51 = vrot.slane %v3019_v58, 4  ;;  %v7992_v26 = vadd.f32 %v3094_v20, %v7638_v44  ;;  %v3033_v21 = vrot.slane %v3032_v10, 4  ;;  %vm8710_vm13 = vmmov %vm8698_vm3 }
 0x531   : >> { %v3320_v36 = vmul.f32 %v8696_v16, %v8695_v38  ;;  %v3343_v27 = vmul.f32 %v5084_v17, %v3296_v25  ;;  %v5132_v35 = vunpack.c.l.bf16 %v7979_v47  ;;  %v3369_v53 = vrot.slane %v3368_v42, 4 }
 0x532   : >> { %v3352_v56 = vsel %vm8699_vm4, %v3319_v63, 0.0  ;;  %v3705_v6 = vrot.slane %v7756_v19, 4  ;;  %v5144_v44 = vunpack.c.l.bf16 %v5328_v15  ;;  %v3021_v32 = vadd.f32 %v3020_v51, %v3019_v58  ;;  %v8009_v46 = vpop.permute.xlu0 %3615  ;;  %v3600_v17 = vpop.permute.xlu1 %3599  ;;  %vm8711_vm4 = vmmov %vm8698_vm3 }
 0x533   : >> { %v3354_v4 = vsel %vm8700_vm5, %v3320_v36, 0.0  ;;  %v3430_v57 = vsel %vm8701_vm14, %v3343_v27, 0.0  ;;  %v3353_v50 = vadd.f32 %v3352_v56, %v3351_v55  ;;  %v3034_v60 = vadd.f32 %v3033_v21, %v3032_v10  ;;  %v8703_v21 = vld [vmem:[#allocation43_spill] sm:$0xff]  ;;  %vm8712_vm5 = vmmov %vm8698_vm3 }
 0x534   : >> { %v8007_v2 = vadd.f32 %v3430_v57, %v7707_v52  ;;  %v5008_v12 = vunpack.c.l.bf16 %v5294_v41  ;;  %v3671_v29 = vmul.f32 %v5132_v35, %v3600_v17  ;;  %v5145_v63 = vunpack.c.h.bf16 %v5328_v15  ;;  %vm8714_vm14 = vmmov %vm8698_vm3 }
 0x535   : >> { %v5009_v34 = vunpack.c.h.bf16 %v5294_v41  ;;  %v3370_v38 = vadd.f32 %v3369_v53, %v3368_v42  ;;  %v3355_v16 = vadd.f32 %v3354_v4, %v3353_v50  ;;  %v5012_v36 = vunpack.c.l.bf16 %v8001_v37  ;;  %v8705_v4 = vld [vmem:[#allocation54_spill] sm:$0xff] }
 0x536   : >> { %v3706_v31 = vadd.f32 %v3705_v6, %v7756_v19  ;;  %v3677_v58 = vmul.f32 %v5144_v44, %v7902_v59  ;;  %v5193_v20 = vunpack.c.h.bf16 %v5340_v0  ;;  %v3740_v52 = vsel %vm8702_vm6, %v3671_v29, 0.0  ;;  %v8018_v10 = vpop.permute.xlu0 %3643  ;;  %v3628_v25 = vpop.permute.xlu1 %3627  ;;  %v8704_v19 = vld [vmem:[#allocation30_spill] sm:$0xff]  ;;  %vm8715_vm6 = vmmov %vm8698_vm3 }
 0x537   : >> { %v3022_v55 = vrot.slane %v3021_v32, 2  ;;  %v8016_v51 = vadd.f32 %v3740_v52, %v7737_v40  ;;  %v5173_v15 = vunpack.c.h.bf16 %v7895_v54  ;;  %v3035_v42 = vrot.slane %v3034_v60, 2 }
 0x538   : >> { %v3001_v27 = vmul.f32 %v5008_v12, %v8703_v21  ;;  %v3678_v35 = vmul.f32 %v5145_v63, %v3628_v25  ;;  %v5192_v56 = vunpack.c.l.bf16 %v5340_v0  ;;  %v3002_v53 = vmul.f32 %v5009_v34, %v8704_v19 }
 0x539   : >> { %v3371_v59 = vrot.slane %v3370_v38, 2  ;;  %v3356_v41 = vrot.slane %v3355_v16, 4  ;;  %v3003_v6 = vmul.f32 %v5012_v36, %v8705_v4  ;;  %v3707_v44 = vrot.slane %v3706_v31, 2  ;;  %v8713_v4 = vld [vmem:[#allocation57_spill] sm:$0xff] }
 0x53a   : >> { %v3763_v40 = vsel %vm8706_vm7, %v3677_v58, 0.0  ;;  %v4006_v57 = vmul.f32 %v5193_v20, %v7952_v28  ;;  %v3764_v50 = vsel %vm8707_vm8, %v3678_v35, 0.0  ;;  %v3023_v54 = vadd.f32 %v3022_v55, %v3021_v32  ;;  %v3892_v12 = vpop.permute.xlu0 %3891  ;;  %v3928_v29 = vpop.permute.xlu1 %3927  ;;  %v8034_v32 = vld [vmem:[%s5786_s29 + $0x1c8] sm:$0xff]   ;;  %vm8716_vm7 = vmmov %vm8698_vm3 }
 0x53b   : >> { %v8027_v17 = vadd.f32 %v3764_v50, %v3763_v40  ;;  %v5013_v0 = vunpack.c.h.bf16 %v8001_v37  ;;  %v3036_v63 = vadd.f32 %v3035_v42, %v3034_v60  ;;  %v3078_v34 = vsel %vm8708_vm9, %v3001_v27, 0.0  ;;  %v8043_v35 = vld [vmem:[%s5786_s29 + $0x168] sm:$0xff]   ;;  %vm8717_vm8 = vmmov %vm8698_vm3 }
 0x53c   : >> { %v3996_v36 = vmul.f32 %v5173_v15, %v3892_v12  ;;  %v4005_v52 = vmul.f32 %v5192_v56, %v3928_v29  ;;  %v3079_v58 = vsel %vm8709_vm10, %v3002_v53, 0.0  ;;  %v3372_v25 = vadd.f32 %v3371_v59, %v3370_v38  ;;  %v8040_v15 = vld [vmem:[%s5786_s29 + $0x1d8] sm:$0xff]   ;;  %v8052_v59 = vld [vmem:[%s5786_s29 + $0x170] sm:$0xff]   ;;  %vm8718_vm9 = vmmov %vm8698_vm3 }
 0x53d   : >> { %v3357_v28 = vadd.f32 %v3356_v41, %v3355_v16  ;;  %v3081_v20 = vsel %vm8710_vm13, %v3003_v6, 0.0  ;;  %v3708_v55 = vadd.f32 %v3707_v44, %v3706_v31  ;;  %v4074_v21 = vsel %vm8698_vm3, %v4006_v57, 0.0  ;;  %vm8719_vm10 = vmmov %vm8698_vm3 }
 0x53e   : >> { %v4039_v37 = vsel %vm8711_vm4, %v3996_v36, 0.0  ;;  %v4073_v60 = vsel %vm8712_vm5, %v4005_v52, 0.0  ;;  %v3024_v42 = vrot.slane %v3023_v54, 1  ;;  %v3080_v27 = vadd.f32 %v3079_v58, %v3078_v34  ;;  %v8048_v56 = vpop.permute.xlu0 %3943  ;;  %v2942_v19 = vpop.permute.xlu1 %2941  ;;  %vm8721_vm13 = vmmov %vm8698_vm3 }
 0x53f   : >> { %v4040_v38 = vadd.f32 %v4039_v37, %v7950_v9  ;;  %v8046_v16 = vadd.f32 %v4074_v21, %v4073_v60  ;;  %v3037_v31 = vrot.slane %v3036_v63, 1  ;;  %v3004_v41 = vmul.f32 %v5013_v0, %v2942_v19  ;;  %vm8723_vm4 = vmmov %vm8698_vm3 }
 0x540   : >> { %v5077_v6 = vunpack.c.h.bf16 %v8713_v4  ;;  %v3373_v44 = vrot.slane %v3372_v25, 1  ;;  %v3358_v40 = vrot.slane %v3357_v28, 2  ;;  %v3082_v57 = vadd.f32 %v3081_v20, %v3080_v27  ;;  %vm8724_vm5 = vmmov %vm8698_vm3 }
 0x541   : >> { %v4041_v50 = vrot.slane %v4040_v38, 4  ;;  %v3709_v12 = vrot.slane %v3708_v55, 1  ;;  %v3083_v34 = vsel %vm8714_vm14, %v3004_v41, 0.0  ;;  %v8058_v36 = vadd.f32 %v3024_v42, %v3023_v54  ;;  %vm8725_vm14 = vmmov %vm8698_vm3 }
 0x542   : >> { %v5200_v58 = vunpack.c.l.bf16 %v8052_v59  ;;  %v3084_v0 = vadd.f32 %v3083_v34, %v3082_v57  ;;  %v2961_v21 = vpop.permute.xlu0 %2960  ;;  %v3284_v37 = vpop.permute.xlu1 %3283  ;;  %v3038_v60 = vadd.f32 %v3037_v31, %v3036_v63  ;;  %v5133_v20 = vunpack.c.h.bf16 %v7979_v47 }
 0x543   : >> { %v4042_v52 = vadd.f32 %v4041_v50, %v4040_v38  ;;  %v3340_v19 = vmul.f32 %v5077_v6, %v3284_v37  ;;  %v5125_v27 = vunpack.c.h.bf16 %v7770_v43  ;;  %v3374_v4 = vadd.f32 %v3373_v44, %v3372_v25 }
 0x544   : >> { %v3359_v9 = vadd.f32 %v3358_v40, %v3357_v28  ;;  %v3085_v29 = vrot.slane %v3084_v0, 4  ;;  %v3710_v54 = vadd.f32 %v3709_v12, %v3708_v55  ;;  %v3692_v42 = vrot.slane %v7882_v48, 4 }
 0x545   : >> { %v4043_v53 = vrot.slane %v4042_v52, 2  ;;  %v5021_v38 = vunpack.c.h.bf16 %v7939_v39  ;;  %v3419_v41 = vsel %vm8715_vm6, %v3340_v19, 0.0  ;;  %v5181_v43 = vunpack.c.h.bf16 %v7880_v8  ;;  %vm8726_vm6 = vmmov %vm8698_vm3 }
 0x546   : >> { %v3086_v63 = vadd.f32 %v3085_v29, %v3084_v0  ;;  %v3420_v31 = vadd.f32 %v3419_v41, %v7705_v3  ;;  %v3604_v47 = vpop.permute.xlu0 %3603  ;;  %v3588_v6 = vpop.permute.xlu1 %3587  ;;  %v3454_v25 = vadd.f32 %v3374_v4, %v3038_v60  ;;  %v5208_v40 = vunpack.c.l.bf16 %v8064_v24 }
 0x547   : >> { %v4044_v57 = vadd.f32 %v4043_v53, %v4042_v52  ;;  %v3672_v28 = vmul.f32 %v5133_v20, %v3604_v47  ;;  %v3668_v44 = vmul.f32 %v5125_v27, %v3588_v6  ;;  %v3360_v55 = vrot.slane %v3359_v9, 1 }
 0x548   : >> { %v3087_v12 = vrot.slane %v3086_v63, 2  ;;  %v3421_v34 = vrot.slane %v3420_v31, 4  ;;  %v3790_v39 = vadd.f32 %v3710_v54, %v3454_v25  ;;  %v3693_v37 = vadd.f32 %v3692_v42, %v7882_v48 }
 0x549   : >> { %v4045_v50 = vrot.slane %v4044_v57, 1  ;;  %v3742_v53 = vsel %vm8716_vm7, %v3672_v28, 0.0  ;;  %v3729_v3 = vsel %vm8717_vm8, %v3668_v44, 0.0  ;;  %v3008_v8 = vmul.f32 %v5021_v38, %v2961_v21  ;;  %vm8727_vm7 = vmmov %vm8698_vm3 }
 0x54a   : >> { %v3088_v52 = vadd.f32 %v3087_v12, %v3086_v63  ;;  %v3422_v0 = vadd.f32 %v3421_v34, %v3420_v31  ;;  %v3908_v60 = vpop.permute.xlu0 %3907  ;;  %v8075_v19 = vpop.permute.xlu1 %3639  ;;  %v3743_v20 = vadd.f32 %v3742_v53, %v8016_v51  ;;  %v3730_v27 = vadd.f32 %v3729_v3, %v7908_v13  ;;  %vm8728_vm8 = vmmov %vm8698_vm3 }
 0x54b   : >> { %v4046_v29 = vadd.f32 %v4045_v50, %v4044_v57  ;;  %v4000_v4 = vmul.f32 %v5181_v43, %v3908_v60  ;;  %v5165_v54 = vunpack.c.h.bf16 %v7693_v5  ;;  %v3361_v48 = vadd.f32 %v3360_v55, %v3359_v9  ;;  %v8084_v57 = vld [vmem:[%s5786_s29 + $0xf8] sm:$0xff]  }
 0x54c   : >> { %v3423_v41 = vrot.slane %v3422_v0, 2  ;;  %v5029_v47 = vunpack.c.h.bf16 %v8034_v32  ;;  %v3694_v21 = vrot.slane %v3693_v37, 2  ;;  %v3744_v38 = vrot.slane %v3743_v20, 4 }
 0x54d   : >> { %v8080_v42 = vadd.f32 %v4046_v29, %v3790_v39  ;;  %v3731_v63 = vrot.slane %v3730_v27, 4  ;;  %v4052_v31 = vsel %vm8718_vm9, %v4000_v4, 0.0  ;;  %v3089_v6 = vrot.slane %v3088_v52, 1  ;;  %vm8729_vm9 = vmmov %vm8698_vm3 }
 0x54e   : >> { %v3096_v51 = vsel %vm8719_vm10, %v3008_v8, 0.0  ;;  %v3424_v13 = vadd.f32 %v3423_v41, %v3422_v0  ;;  %v4053_v43 = vadd.f32 %v4052_v31, %v7947_v33  ;;  %v8089_v5 = vpop.permute.xlu0 %3959  ;;  %v3876_v9 = vpop.permute.xlu1 %3875  ;;  %v3745_v25 = vadd.f32 %v3744_v38, %v3743_v20 }
 0x54f   : >> { %v3732_v28 = vadd.f32 %v3731_v63, %v3730_v27  ;;  %v5188_v44 = vunpack.c.l.bf16 %v8084_v57  ;;  %v5141_v55 = vunpack.c.h.bf16 %v8043_v35  ;;  %v8720_v50 = vunpack.c.l.bf16 %v8043_v35 }
 0x550   : >> { %v3425_v34 = vrot.slane %v3424_v13, 1  ;;  %v4054_v39 = vrot.slane %v4053_v43, 4  ;;  %v3992_v53 = vmul.f32 %v5165_v54, %v3876_v9  ;;  %v3695_v3 = vadd.f32 %v3694_v21, %v3693_v37 }
 0x551   : >> { %v3675_v12 = vmul.f32 %v8720_v50, %v8009_v46  ;;  %v3097_v29 = vadd.f32 %v3096_v51, %v7992_v26  ;;  %v3746_v33 = vrot.slane %v3745_v25, 2  ;;  %v3733_v8 = vrot.slane %v3732_v28, 2 }
 0x552   : >> { %v3090_v0 = vadd.f32 %v3089_v6, %v3088_v52  ;;  %v3426_v60 = vadd.f32 %v3425_v34, %v3424_v13  ;;  %v4055_v20 = vadd.f32 %v4054_v39, %v4053_v43  ;;  %v4026_v27 = vsel %vm8721_vm13, %v3992_v53, 0.0  ;;  %v2980_v4 = vpop.permute.xlu0 %2979  ;;  %v3920_v41 = vpop.permute.xlu1 %3919 }
 0x553   : >> { %v3453_v38 = vadd.f32 %v3361_v48, %v8058_v36  ;;  %v3747_v63 = vadd.f32 %v3746_v33, %v3745_v25  ;;  %v3734_v35 = vadd.f32 %v3733_v8, %v3732_v28  ;;  %v4027_v46 = vadd.f32 %v4026_v27, %v7814_v23 }
 0x554   : >> { %v3753_v54 = vsel %vm8698_vm3, %v3675_v12, 0.0  ;;  %v8101_v37 = vadd.f32 %v3426_v60, %v3090_v0  ;;  %v4056_v26 = vrot.slane %v4055_v20, 2  ;;  %v5201_v21 = vunpack.c.h.bf16 %v8052_v59 }
 0x555   : >> { %v3748_v52 = vrot.slane %v3747_v63, 1  ;;  %v3735_v31 = vrot.slane %v3734_v35, 1  ;;  %v4028_v6 = vrot.slane %v4027_v46, 4  ;;  %v4003_v51 = vmul.f32 %v5188_v44, %v3920_v41 }
 0x556   : >> { %v3696_v13 = vrot.slane %v3695_v3, 1  ;;  %v3098_v43 = vrot.slane %v3097_v29, 4  ;;  %v4057_v9 = vadd.f32 %v4056_v26, %v4055_v20  ;;  %v3620_v36 = vpop.permute.xlu0 %3619  ;;  %v8104_v48 = vpop.permute.xlu1 %3947  ;;  %v5189_v23 = vunpack.c.h.bf16 %v8084_v57  ;;  %v5329_v20 = vld [vmem:[%s5786_s29 + $0x1a8] sm:$0xff]  }
 0x557   : >> { %v3749_v25 = vadd.f32 %v3748_v52, %v3747_v63  ;;  %v3736_v28 = vadd.f32 %v3735_v31, %v3734_v35  ;;  %v4029_v50 = vadd.f32 %v4028_v6, %v4027_v46  ;;  %v5085_v12 = vunpack.c.h.bf16 %v7962_v7 }
 0x558   : >> { %v8722_v34 = vunpack.c.l.bf16 %v8034_v32  ;;  %v3754_v44 = vadd.f32 %v3753_v54, %v7926_v30  ;;  %v4058_v53 = vrot.slane %v4057_v9, 1  ;;  %v3676_v33 = vmul.f32 %v5141_v55, %v3620_v36 }
 0x559   : >> { %v8113_v8 = vadd.f32 %v3749_v25, %v7959_v18  ;;  %v8116_v0 = vadd.f32 %v3736_v28, %v7917_v14  ;;  %v4030_v57 = vrot.slane %v4029_v50, 2  ;;  %v4063_v60 = vsel %vm8723_vm4, %v4003_v51, 0.0  ;;  %vm8733_vm4 = vmmov %vm8698_vm3 }
 0x55a   : >> { %v3011_v39 = vmul.f32 %v8722_v34, %v7972_v49  ;;  %v3697_v27 = vadd.f32 %v3696_v13, %v3695_v3  ;;  %v3099_v7 = vadd.f32 %v3098_v43, %v3097_v29  ;;  %v4059_v41 = vadd.f32 %v4058_v53, %v4057_v9  ;;  %v3924_v49 = vpop.permute.xlu0 %3923  ;;  %v3300_v35 = vpop.permute.xlu1 %3299 }
 0x55b   : >> { %v3755_v63 = vsel %vm8724_vm5, %v3676_v33, 0.0  ;;  %v4031_v30 = vadd.f32 %v4030_v57, %v4029_v50  ;;  %v3012_v55 = vmul.f32 %v5029_v47, %v2980_v4  ;;  %v4004_v46 = vmul.f32 %v5189_v23, %v3924_v49  ;;  %vm8734_vm5 = vmmov %vm8698_vm3 }
 0x55c   : >> { %v3756_v18 = vadd.f32 %v3755_v63, %v3754_v44  ;;  %v4127_v14 = vadd.f32 %v4059_v41, %v7987_v61  ;;  %v4064_v54 = vadd.f32 %v4063_v60, %v7970_v1  ;;  %v3344_v26 = vmul.f32 %v5085_v12, %v3300_v35 }
 0x55d   : >> { %v5148_v52 = vunpack.c.l.bf16 %v5329_v20  ;;  %v3107_v3 = vsel %vm8725_vm14, %v3011_v39, 0.0  ;;  %v4032_v29 = vrot.slane %v4031_v30, 1  ;;  %v4065_v6 = vsel %vm8726_vm6, %v4004_v46, 0.0  ;;  %v8134_v39 = vld [vmem:[%s5786_s29 + $0x1b8] sm:$0xff]   ;;  %vm8735_vm14 = vmmov %vm8698_vm3 }
 0x55e   : >> { %v3757_v31 = vrot.slane %v3756_v18, 4  ;;  %v3789_v51 = vadd.f32 %v3697_v27, %v3453_v38  ;;  %v3100_v13 = vrot.slane %v3099_v7, 2  ;;  %v4066_v43 = vadd.f32 %v4065_v6, %v4064_v54  ;;  %v8128_v47 = vpop.permute.xlu0 %3975  ;;  %v3632_v4 = vpop.permute.xlu1 %3631  ;;  %vm8736_vm6 = vmmov %vm8698_vm3 }
 0x55f   : >> { %v3432_v32 = vsel %vm8727_vm7, %v3344_v26, 0.0  ;;  %v4033_v61 = vadd.f32 %v4032_v29, %v4031_v30  ;;  %v3109_v1 = vsel %vm8728_vm8, %v3012_v55, 0.0  ;;  %v3108_v23 = vadd.f32 %v3107_v3, %v7816_v45  ;;  %vm8737_vm7 = vmmov %vm8698_vm3 }
 0x560   : >> { %v3758_v9 = vadd.f32 %v3757_v31, %v3756_v18  ;;  %v3433_v36 = vadd.f32 %v3432_v32, %v8007_v2  ;;  %v4067_v25 = vrot.slane %v4066_v43, 4  ;;  %v3679_v28 = vmul.f32 %v5148_v52, %v3632_v4  ;;  %vm8738_vm8 = vmmov %vm8698_vm3 }
 0x561   : >> { %v5149_v50 = vunpack.c.h.bf16 %v5329_v20  ;;  %v4125_v38 = vadd.f32 %v4033_v61, %v3789_v51  ;;  %v5209_v44 = vunpack.c.h.bf16 %v8064_v24  ;;  %v3110_v53 = vadd.f32 %v3109_v1, %v3108_v23 }
 0x562   : >> { %v3759_v12 = vrot.slane %v3758_v9, 2  ;;  %v3434_v34 = vrot.slane %v3433_v36, 4  ;;  %v4068_v33 = vadd.f32 %v4067_v25, %v4066_v43  ;;  %v3766_v57 = vsel %vm8729_vm9, %v3679_v28, 0.0  ;;  %v3636_v60 = vpop.permute.xlu0 %3635  ;;  %v8138_v27 = vpop.permute.xlu1 %3935 }
 0x563   : >> { %v5093_v45 = vunpack.c.h.bf16 %v8040_v15  ;;  %v3101_v2 = vadd.f32 %v3100_v13, %v3099_v7  ;;  %vm8730_vm10 = vcmask 1041409   ;;  %vm8731_vm13 = vcmask 1042434   ;;  %v8150_v7 = vld [vmem:[%s5786_s29 + $0x178] sm:$0xff]  }
 0x564   : >> { %v4210_v20 = vsel %vm8730_vm10, %v8080_v42, %v4125_v38  ;;  %v3760_v41 = vadd.f32 %v3759_v12, %v3758_v9  ;;  %v3435_v63 = vadd.f32 %v3434_v34, %v3433_v36  ;;  %v4069_v49 = vrot.slane %v4068_v33, 2 }
 0x565   : >> { %v4211_v35 = vsel %vm8731_vm13, %v4127_v14, %v4210_v20  ;;  %v3680_v30 = vmul.f32 %v5149_v50, %v3636_v60  ;;  %v5212_v55 = vunpack.c.l.bf16 %v8134_v39  ;;  %v8732_v18 = vunpack.c.l.bf16 %v8040_v15 }
 0x566   : >> { %v3761_v54 = vrot.slane %v3760_v41, 1  ;;  %v3436_v26 = vrot.slane %v3435_v63, 2  ;;  %v3767_v52 = vadd.f32 %v3766_v57, %v8027_v17  ;;  %v4013_v42 = vmul.f32 %v5208_v40, %v8089_v5  ;;  %v3968_v31 = vpop.permute.xlu0 %3967  ;;  %v3964_v6 = vpop.permute.xlu1 %3963 }
 0x567   : >> { %v3347_v46 = vmul.f32 %v8732_v18, %v7994_v11  ;;  %v3111_v3 = vrot.slane %v3110_v53, 4  ;;  %v4070_v29 = vadd.f32 %v4069_v49, %v4068_v33  ;;  %v3768_v14 = vsel %vm8698_vm3, %v3680_v30, 0.0  ;;  %v5330_v18 = vld [vmem:[%s5786_s29 + $0x1e0] sm:$0xff]  }
 0x568   : >> { %v3102_v51 = vrot.slane %v3101_v2, 1  ;;  %v3762_v13 = vadd.f32 %v3761_v54, %v3760_v41  ;;  %v3437_v15 = vadd.f32 %v3436_v26, %v3435_v63  ;;  %v3769_v11 = vadd.f32 %v3768_v14, %v3767_v52  ;;  %v8181_v26 = vld [vmem:[%s5786_s29 + $0x1e8] sm:$0xff]   ;;  %v4685_v52 = vld [vmem:[%s8350_s11] ss:$0 sm:$0xff] }
 0x569   : >> { %v4071_v43 = vrot.slane %v4070_v29, 1  ;;  %v4014_v32 = vmul.f32 %v5209_v44, %v3964_v6  ;;  %v5205_v17 = vunpack.c.h.bf16 %v8150_v7  ;;  %v5213_v4 = vunpack.c.h.bf16 %v8134_v39 }
 0x56a   : >> { %v3443_v61 = vsel %vm8733_vm4, %v3347_v46, 0.0  ;;  %v8160_v24 = vadd.f32 %v3762_v13, %v8101_v37  ;;  %v3438_v40 = vrot.slane %v3437_v15, 1  ;;  %v3770_v5 = vrot.slane %v3769_v11, 4  ;;  %v3956_v25 = vpop.permute.xlu0 %3955  ;;  %v3316_v28 = vpop.permute.xlu1 %3315 }
 0x56b   : >> { %v4099_v1 = vsel %vm8734_vm5, %v4013_v42, 0.0  ;;  %v3112_v9 = vadd.f32 %v3111_v3, %v3110_v53  ;;  %v4072_v36 = vadd.f32 %v4071_v43, %v4070_v29  ;;  %v4100_v23 = vsel %vm8735_vm14, %v4014_v32, 0.0 }
 0x56c   : >> { %v3103_v50 = vadd.f32 %v3102_v51, %v3101_v2  ;;  %v3439_v38 = vadd.f32 %v3438_v40, %v3437_v15  ;;  %v3771_v12 = vadd.f32 %v3770_v5, %v3769_v11  ;;  %v4015_v34 = vmul.f32 %v5212_v55, %v3968_v31  ;;  %v5341_v2 = vld [vmem:[%s5786_s29 + $0x138] sm:$0xff]  }
 0x56d   : >> { %v4128_v39 = vadd.f32 %v4072_v36, %v8116_v0  ;;  %v4101_v44 = vadd.f32 %v4100_v23, %v4099_v1  ;;  %v3348_v37 = vmul.f32 %v5093_v45, %v3316_v28  ;;  %v5204_v33 = vunpack.c.l.bf16 %v8150_v7 }
 0x56e   : >> { %v3444_v57 = vadd.f32 %v3443_v61, %v7862_v62  ;;  %v4010_v53 = vmul.f32 %v5201_v21, %v8104_v48  ;;  %v3459_v60 = vadd.f32 %v3439_v38, %v3103_v50  ;;  %v3772_v20 = vrot.slane %v3771_v12, 2  ;;  %v3972_v49 = vpop.permute.xlu0 %3971  ;;  %v3648_v62 = vpop.permute.xlu1 %3647 }
 0x56f   : >> { %v4009_v41 = vmul.f32 %v5200_v58, %v8048_v56  ;;  %v3113_v0 = vrot.slane %v3112_v9, 2  ;;  %v8175_v45 = vsel %vm2131_vm0, %v4128_v39, %v4211_v35  ;;  %v3445_v63 = vsel %vm8736_vm6, %v3348_v37, 0.0  ;;  %vm8739_vm0 = vmmov %vm8698_vm3 }
 0x570   : >> { %v3773_v30 = vadd.f32 %v3772_v20, %v3771_v12  ;;  %v4102_v55 = vsel %vm8737_vm7, %v4015_v34, 0.0  ;;  %v3446_v21 = vadd.f32 %v3445_v63, %v3444_v57  ;;  %v4016_v48 = vmul.f32 %v5213_v4, %v3972_v49  ;;  %vm8740_vm9 = vmmov %vm8739_vm0  ;;  %v5346_v34 = vld [vmem:[%s5786_s29 + $0x1f0] sm:$0xff]   ;;  %v5347_v49 = vld [vmem:[%s5786_s29 + $0x1f8] sm:$0xff]   ;;  %s5499_s29 = sshll.u32 (%p739_p1), %s5606_s17, 4  ;;  %s5500_s29 = int_to_ptr.vmem [resolvable:$false] %s5499_s29 }
 0x571   : >> { %v5196_v46 = vunpack.c.l.bf16 %v5341_v2  ;;  %v4103_v54 = vadd.f32 %v4102_v55, %v4101_v44  ;;  %v4087_v56 = vsel %vm8738_vm8, %v4010_v53, 0.0  ;;  %v4086_v7 = vsel %vm8740_vm9, %v4009_v41, 0.0  ;;  %vm8741_vm10 = vmmov %vm8739_vm0  ;;  %s5501_s8 = scalar_lea.vmem (%p739_p1), %s5500_s29, 896  ;;  %p5502_p5 = scmp.lt.s32.totalorder (%p739_p1), %s8260_s23, %s5500_s29 }
 0x572   : >> { %v3774_v59 = vrot.slane %v3773_v30, 1  ;;  %v3447_v58 = vrot.slane %v3446_v21, 4  ;;  %v4104_v35 = vsel %vm8739_vm0, %v4016_v48, 0.0  ;;  %v5152_v42 = vunpack.c.l.bf16 %v5330_v18  ;;  %v3952_v14 = vpop.permute.xlu1 %3951  ;;  %vm8742_vm13 = vmmov %vm8739_vm0  ;;  %p5503_p7 = scmp.lt.s32.totalorder (%p739_p1), %s5501_s8, %s5495_s24 }
 0x573   : >> { %v3114_v3 = vadd.f32 %v3113_v0, %v3112_v9  ;;  %v4105_v29 = vadd.f32 %v4104_v35, %v4103_v54  ;;  %v4012_v6 = vmul.f32 %v5205_v17, %v3956_v25  ;;  %v4011_v13 = vmul.f32 %v5204_v33, %v3952_v14  ;;  %vm8743_vm3 = vmmov %vm8739_vm0 }
 0x574   : >> { %v3775_v31 = vadd.f32 %v3774_v59, %v3773_v30  ;;  %v3448_v51 = vadd.f32 %v3447_v58, %v3446_v21  ;;  %v5153_v15 = vunpack.c.h.bf16 %v5330_v18  ;;  %v4088_v11 = vadd.f32 %v4087_v56, %v4086_v7  ;;  %vm8744_vm4 = vmmov %vm8739_vm0  ;;  %p5504_p10 = por (%p739_p1), %p5503_p7, %p5502_p5 }
 0x575   : >> { %v5156_v43 = vunpack.c.l.bf16 %v8181_v26  ;;  %v4191_v32 = vadd.f32 %v4685_v52, %v7827_v22  ;;  %v4007_v61 = vmul.f32 %v5196_v46, %v8138_v27  ;;  %v4089_v5 = vsel %vm8741_vm10, %v4011_v13, 0.0  ;;  %vm8745_vm5 = vmmov %vm8739_vm0 }
 0x576   : >> { %v8191_v4 = vadd.f32 %v3775_v31, %v3459_v60  ;;  %v3449_v40 = vrot.slane %v3448_v51, 2  ;;  %v4106_v1 = vrot.slane %v4105_v29, 4  ;;  %v4090_v9 = vadd.f32 %v4089_v5, %v4088_v11  ;;  %v3980_v36 = vpop.permute.xlu1 %3979  ;;  %vm8746_vm14 = vmmov %vm8739_vm0  ;;  %p5505_p11 = pnand (%p739_p1), %p5504_p10, %p5498_p4 }
 0x577   : >> { %v5197_v17 = vunpack.c.h.bf16 %v5341_v2  ;;  %v3681_v23 = vmul.f32 %v5152_v42, %v8075_v19  ;;  %v3115_v25 = vrot.slane %v3114_v3, 1  ;;  %v4091_v28 = vsel %vm8742_vm13, %v4012_v6, 0.0  ;;  %vm8747_vm6 = vmmov %vm8739_vm0 }
 0x578   : >> { %v3450_v50 = vadd.f32 %v3449_v40, %v3448_v51  ;;  %v4092_v38 = vadd.f32 %v4091_v28, %v4090_v9  ;;  %v4689_v22 = vmul.f32 -1.442695, %v4191_v32  ;;  %v3682_v12 = vmul.f32 %v5153_v15, %v8018_v10  ;;  %vm8748_vm7 = vmmov %vm8739_vm0 }
 0x579   : >> { %v4076_v27 = vsel %vm8743_vm3, %v4007_v61, 0.0  ;;  %v3683_v44 = vmul.f32 %v5156_v43, %v3648_v62  ;;  %v4107_v37 = vadd.f32 %v4106_v1, %v4105_v29  ;;  %v5217_v57 = vunpack.c.h.bf16 %v5346_v34  ;;  %vm8749_vm8 = vmmov %vm8739_vm0 }
 0x57a   : >> { %v3451_v39 = vrot.slane %v3450_v50, 1  ;;  %v4093_v33 = vrot.slane %v4092_v38, 4  ;;  %v3940_v53 = vpop.permute.xlu1 %3939  ;;  %v5157_v19 = vunpack.c.h.bf16 %v8181_v26  ;;  %v3776_v60 = vsel %vm8744_vm4, %v3681_v23, 0.0  ;;  %vm8750_vm9 = vmmov %vm8739_vm0 }
 0x57b   : >> { %v3116_v20 = vadd.f32 %v3115_v25, %v3114_v3  ;;  %v4008_v41 = vmul.f32 %v5197_v17, %v3940_v53  ;;  %v5216_v0 = vunpack.c.l.bf16 %v5346_v34  ;;  %v4077_v10 = vadd.f32 %v4076_v27, %v8046_v16  ;;  %vm8751_vm10 = vmmov %vm8739_vm0 }
 0x57c   : >> { %v3452_v2 = vadd.f32 %v3451_v39, %v3450_v50  ;;  %v4094_v63 = vadd.f32 %v4093_v33, %v4092_v38  ;;  %5482 = vpow2.f32 %v4689_v22  ;;  %v3777_v30 = vsel %vm8745_vm5, %v3682_v12, 0.0 }
 0x57d   : >> { %v3779_v55 = vsel %vm8746_vm14, %v3683_v44, 0.0  ;;  %v4078_v21 = vsel %vm8747_vm6, %v4008_v41, 0.0  ;;  %v3778_v48 = vadd.f32 %v3777_v30, %v3776_v60  ;;  %v4108_v18 = vrot.slane %v4107_v37, 2 }
 0x57e   : >> { %v3460_v62 = vadd.f32 %v3452_v2, %v3116_v20  ;;  %v4095_v46 = vrot.slane %v4094_v63, 2  ;;  %v4079_v54 = vadd.f32 %v4078_v21, %v4077_v10  ;;  %v3652_v26 = vpop.permute.xlu1 %3651  ;;  %v4018_v56 = vmul.f32 %v5217_v57, %v3980_v36 }
 0x57f   : >> { %v3684_v59 = vmul.f32 %v5157_v19, %v3652_v26  ;;  %v5220_v58 = vunpack.c.l.bf16 %v5347_v49  ;;  %v3780_v35 = vadd.f32 %v3779_v55, %v3778_v48  ;;  %v4017_v52 = vmul.f32 %v5216_v0, %v8128_v47  ;;  %v5476_v48 = vld [vmem:[%s8353_s14] sm:$0xff]  }
 0x580   : >> { %v4080_v16 = vrot.slane %v4079_v54, 4  ;;  %v4096_v7 = vadd.f32 %v4095_v46, %v4094_v63  ;;  %v4109_v3 = vadd.f32 %v4108_v18, %v4107_v37  ;;  %v4113_v6 = vsel %vm8749_vm8, %v4018_v56, 0.0  ;;  %v8752_v18 = vld [vmem:[#allocation28_spill] sm:$0xff]  ;;  %v8755_v56 = vld [vmem:[#allocation23_spill] sm:$0xff] }
 0x581   : >> { %v3781_v42 = vsel %vm8748_vm7, %v3684_v59, 0.0  ;;  %v5221_v13 = vunpack.c.h.bf16 %v5347_v49  ;;  %v4112_v43 = vsel %vm8739_vm0, %v4017_v52, 0.0  ;;  %v8754_v26 = vmov 0.0  }
 0x582   : >> { %v4081_v29 = vadd.f32 %v4080_v16, %v4079_v54  ;;  %v3782_v14 = vadd.f32 %v3781_v42, %v3780_v35  ;;  %v3984_v31 = vpop.permute.xlu1 %3983  ;;  %v4097_v32 = vrot.slane %v4096_v7, 1  ;;  %v4110_v47 = vrot.slane %v4109_v3, 1 }
 0x583   : >> { %v4019_v51 = vmul.f32 %v5220_v58, %v3984_v31  ;;  %v4114_v5 = vadd.f32 %v4113_v6, %v4112_v43  ;;  %v4698_v31 = vld [vmem:[%s8354_s15] ss:$0 sm:$0xff]  ;;  %vm4454_vm13 = vcmask 257024  }
 0x584   : >> { %v4082_v15 = vrot.slane %v4081_v29, 2  ;;  %v3783_v11 = vrot.slane %v3782_v14, 4  ;;  %v4098_v50 = vadd.f32 %v4097_v32, %v4096_v7  ;;  %v4111_v12 = vadd.f32 %v4110_v47, %v4109_v3  ;;  %v5494_v43 = vld [vmem:[#allocation2] sm:$0xff] }
 0x585   : >> { %v4115_v61 = vsel %vm8750_vm9, %v4019_v51, 0.0  ;;  %4430 = vrot.lane.b32.xlu1 %v5494_v43, %s5604_s0 }
 0x586   : >> { %v5483_v40 = vpop.eup %5482  ;;  %v4083_v1 = vadd.f32 %v4082_v15, %v4081_v29  ;;  %v3784_v9 = vadd.f32 %v3783_v11, %v3782_v14  ;;  %v3988_v36 = vpop.permute.xlu1 %3987  ;;  %v4116_v28 = vadd.f32 %v4115_v61, %v4114_v5  ;;  %v4130_v33 = vadd.f32 %v4098_v50, %v8160_v24 }
 0x587   : >> { %v4020_v17 = vmul.f32 %v5221_v13, %v3988_v36  ;;  %v4199_v38 = vadd.f32 1.0, %v5483_v40  ;;  %v4131_v57 = vadd.f32 %v4111_v12, %v8191_v4 }
 0x588   : >> { %v4084_v23 = vrot.slane %v4083_v1, 1  ;;  %v3785_v25 = vrot.slane %v3784_v9, 2 }
 0x589   : >> { %v4117_v22 = vsel %vm8751_vm10, %v4020_v17, 0.0  ;;  %5484 = vrcp.f32 %v4199_v38 }
 0x58a   : >> { %v4085_v34 = vadd.f32 %v4084_v23, %v4083_v1  ;;  %v3786_v27 = vadd.f32 %v3785_v25, %v3784_v9  ;;  %v4118_v39 = vadd.f32 %v4117_v22, %v4116_v28  ;;  %v4405_v63 = vpop.permute.xlu1 %4404 }
 0x58c   : >> { %v4129_v44 = vadd.f32 %v4085_v34, %v8113_v8  ;;  %v4119_v37 = vrot.slane %v4118_v39, 4  ;;  %v3787_v19 = vrot.slane %v3786_v27, 1 }
 0x58e   : >> { %v4213_v53 = vsel %vm2133_vm1, %v4129_v44, %v8175_v45  ;;  %v4120_v60 = vadd.f32 %v4119_v37, %v4118_v39  ;;  %v3788_v0 = vadd.f32 %v3787_v19, %v3786_v27 }
 0x58f   : >> { %v4214_v20 = vsel %vm2135_vm2, %v4130_v33, %v4213_v53  ;;  %vm8753_vm2 = vmmov %vm8739_vm0 }
 0x590   : >> { %v4121_v2 = vrot.slane %v4120_v60, 2  ;;  %v4215_v41 = vsel %vm2137_vm15, %v4131_v57, %v4214_v20  ;;  %v3796_v24 = vadd.f32 %v3788_v0, %v3460_v62  ;;  %v5477_v62 = vld [vmem:[%s8353_s14 + $0x8] sm:$0xff]   ;;  %vm8757_vm15 = vmmov %vm8739_vm0 }
 0x592   : >> { %v4122_v8 = vadd.f32 %v4121_v2, %v4120_v60 }
 0x593   : >> { %v5485_v30 = vpop.eup %5484 }
 0x594   : >> { %v4123_v10 = vrot.slane %v4122_v8, 1 }
 0x596   : >> { %v4124_v49 = vadd.f32 %v4123_v10, %v4122_v8 }
 0x598   : >> { %v4132_v55 = vadd.f32 %v4124_v49, %v3796_v24  ;;  %v4427_v45 = vpop.permute.xlu1 %4426 }
 0x599   : >> { %vm4428_vm1 = vcmp.eq.s32.totalorder %v4427_v45, 1 }
 0x59a   : >> { %v4216_v4 = vsel %vm2139_vm11, %v4132_v55, %v4215_v41  ;;  %v4456_v46 = vsel %vm4428_vm1, %v8752_v18, 0.0  ;;  %vm8756_vm11 = vmmov %vm8739_vm0 }
 0x59b   : >> { %v4218_v21 = vmul.f32 %v5485_v30, %v4216_v4  ;;  %4459 = vst [vmem:[%s4458_s18] sm:$0xff] %v4456_v46 }
 0x59d   : >> { %v4221_v54 = vpack.c.bf16 %v4218_v21, %v4218_v21 }
 0x59f   : >> { %5383 = vmatmul.mubr.msk.bf16.vlgmr.msra.gmra.mrb[4].mxu0 %vm8753_vm2, %v4221_v54 }
 0x5a0   : >> { %5393 = vmatpush3.bf16.msra.mxu0 %v5476_v48  ;;  %5396 = vmatprep.mubr.msk.bf16.mxu0 %vm8518_vm12, %v8754_v26  ;;  %vm8758_vm12 = vmmov %vm8739_vm0 }
 0x5a1   : >> { %5394 = vmatprep.subr.bf16.mxu0 %v8754_v26 }
 0x5a4   : >> { %5395 = vmatpush3.bf16.msra.mxu0 %v5477_v62 }
 0x5a7   : >> { %5397 = vmatmul.mubr.msk.bf16.vlgmr.msra.gmra.mrb[8].mxu0 %vm8756_vm11, %v8755_v56 }
 0x5f7   : >> { %v4431_v50 = vpop.permute.xlu1 %4430 }
 0x5fa   : >> { %v4325_v59 = vpop.f32.mrb[4].mxu1 }
 0x5fb   : >> { %v5390_v58 = vpop.f32.mrb[5].mxu1 }
 0x5fc   : >> { %v4328_v35 = vpop.f32.mrb[6].mxu1 }
 0x5fd   : >> { %v5391_v16 = vpop.f32.mrb[7].mxu1 }
 0x672   : >> { %v4275_v52 = vpop.f32.mrb[4].mxu0 }
 0x673   : >> { %v4326_v7 = vadd.f32 %v4325_v59, %v4275_v52  ;;  %v5384_v42 = vpop.f32.mrb[5].mxu0 }
 0x674   : >> { %v4278_v3 = vpop.f32.mrb[6].mxu0 }
 0x675   : >> { %v5385_v29 = vpop.f32.mrb[7].mxu0 }
 0x67a   : >> { %v4381_v14 = vpop.f32.mrb[8].mxu0 }
 0x67b   : >> { %v4387_v6 = vadd.f32 %v4381_v14, %v4326_v7  ;;  %v5398_v51 = vpop.f32.mrb[9].mxu0 }
 0x67c   : >> { %v4384_v13 = vpop.f32.mrb[10].mxu0 }
 0x67d   : >> { %v4395_v15 = vadd.f32 %v4698_v31, %v4387_v6  ;;  %v5399_v11 = vpop.f32.mrb[11].mxu0 }
 0x67f   : >> { %5486 = vtanh.f32 %v4395_v15  ;;  %v4699_v61 = vmul.f32 -1.442695, %v4395_v15 }
 0x681   : >> { %5488 = vpow2.f32 %v4699_v61 }
 0x689   : >> { %v5487_v32 = vpop.eup %5486 }
 0x68a   : >> { %4409 = vrot.lane.b32.xlu0 %v5487_v32, %s5605_s28 }
 0x68b   : >> { %v5489_v40 = vpop.eup %5488 }
 0x68c   : >> { %v4399_v47 = vadd.f32 1.0, %v5489_v40 }
 0x68e   : >> { %5490 = vrcp.f32 %v4399_v47 }
 0x698   : >> { %v5491_v5 = vpop.eup %5490 }
 0x699   : >> { %v4407_v36 = vmul.f32 %v5491_v5, %v4405_v63 }
 0x6fc   : >> { %v4410_v1 = vpop.permute.xlu0 %4409 }
 0x6fd   : >> { %v4412_v9 = vmul.f32 %v5491_v5, %v4410_v1 }
 0x6ff   : >> { %4414 = vrot.lane.b32.xlu0 %v4412_v9, %s5603_s1 }
 0x771   : >> { %v4415_v17 = vpop.permute.xlu0 %4414 }
 0x772   : >> { %v4417_v23 = vadd.f32 %v4415_v17, %v4407_v36 }
 0x774   : >> { %5492 = vtanh.f32 %v4417_v23  ;;  %v4439_v25 = vsel %vm4428_vm1, %v4417_v23, %v4405_v63 }
 0x775   : >> { %4441 = vrot.lane.b32.xlu1 %v4439_v25, %s5604_s0 }
 0x77e   : >> { %v5493_v28 = vpop.eup %5492 }
 0x77f   : >> { %4420 = vrot.lane.b32.xlu0 %v5493_v28, %s5605_s28 }
 0x7e7   : >> { %v4442_v38 = vpop.permute.xlu1 %4441 }
 0x7e8   : >> { %4444 = vst.msk [vmem:[#allocation3] sm:$0xff] %vm8757_vm15, %v4442_v38 }
 0x7f1   : >> { %v4421_v22 = vpop.permute.xlu0 %4420 }
 0x7f2   : >> { %v4423_v12 = vmul.f32 %v5491_v5, %v4421_v22 }
 0x7f4   : >> { %v4433_v34 = vsel %vm4428_vm1, %v4423_v12, %v4431_v50  ;;  %v4709_v27 = vpack.c.bf16 %v4423_v12, %v4423_v12 }
 0x7f5   : >> { %4435 = vrot.lane.b32.xlu0 %v4433_v34, %s5603_s1 }
 0x7f9   : >> { %4449 = vrot.lane.b32.xlu0 %v4709_v27, %s5603_s1 }
 0x866   : > { %741 = sbr.rel (!%p739_p1) target bundleno = 77 (0x4d), region = 207 }
 0x867   : >> { %v4436_v39 = vpop.permute.xlu0 %4435 }
 0x868   : >> { %4438 = vst.msk [vmem:[#allocation2] sm:$0xff] %vm8758_vm12, %v4436_v39 }
 0x86b   : >> { %v4450_v44 = vpop.permute.xlu0 %4449 }
 0x86c   : >> { %4455 = vst.msk [vmem:[%s4453_s27] sm:$0xf] %vm4454_vm13, %v4450_v44 }
 0x86d   : > { %5508 = shalt.err (!%p5505_p11)
}
 0x86e   : > { %s5509_s26 = scalar_lea.hbm %s8257_s25, 448  ;;  %s5513_s28 = scalar_lea.hbm %s8760_s20, 896 }
 0x86f   : > { %p5510_p12 = scmp.ne.s32.totalorder %s8257_s25, %s5509_s26  ;;  %p5514_p1 = scmp.lt.u32.totalorder %s8257_s25, %s8760_s20 }
 0x870   : > { %p5515_p2 = scmp.lt.u32.totalorder %s5513_s28, %s5509_s26  ;;  %p5517_p4 = scmp.lt.u32.totalorder %s5509_s26, %s8257_s25 }
 0x871   : > { %p5511_p13 = pnand %p5510_p12, %p5745_p6 }
 0x872   : > { %p5516_p3 = por %p5515_p2, %p5514_p1 }
 0x873   : > { %p5512_p0 = pneg %p5511_p13 }
 0x874   : > { %p5518_p5 = por %p5517_p4, %p5516_p3 }
 0x876   : > { %p5519_p7 = pnand %p5518_p5, %p5512_p0 }
 0x878   : > { %5522 = shalt.err (!%p5519_p7)
}
 0x879   : > { %s5607_s1 = smov 64   ;;  %s5608_s4 = smov 128  }
 0x87a   : > { %s5609_s24 = smov 4   ;;  %s4704_s17 = sshll.u32 %s5727_s9, 7 }
 0x87b   : > { %5403 = dma.vmem_to_hbm [thread:$0]  (%p5745_p6), %s8260_s23, 448, %s8257_s25, %s4461_s19, %s5607_s1, %s5608_s4, %s5609_s24  }
 0x87c   : > { %s8761_s26 = sld [smem:[#allocation67_spill]]  ;;  %s4493_s28 = sshll.u32 %s5807_s30, 4  ;;  %s8294_s28 = int_to_ptr.vmem [resolvable:$true] %s4493_s28 }
 0x87d   : > { %s4466_s27 = scalar_lea.sflag [#allocation9], %s5764_s22  ;;  %s5523_s16 = scalar_lea.vmem %s8294_s28, 896 }
 0x87e   : > { %p5524_p10 = scmp.ne.s32.totalorder %s8294_s28, %s5523_s16  ;;  %s5610_s2 = smov [#allocation8]  }
 0x87f   : > { %s5527_s25 = sshll.u32 %s5610_s2, 4  ;;  %s5528_s25 = int_to_ptr.vmem [resolvable:$false] %s5527_s25 }
 0x880   : > { %p5525_p11 = pnand %p5524_p10, %p5745_p6  ;;  %s5529_s9 = scalar_lea.vmem %s5528_s25, 1792 }
 0x881   : > { %p5530_p13 = scmp.lt.s32.totalorder %s8294_s28, %s5528_s25  ;;  %p5531_p0 = scmp.lt.s32.totalorder %s5529_s9, %s5523_s16 }
 0x882   : > { %s8762_s21 = smov %s8761_s26  ;;  %s8291_s0 = scalar_lea.hbm %s8761_s26, %s4704_s17 }
 0x883   : > { %p5526_p12 = pneg %p5525_p11  ;;  %p5532_p1 = por %p5531_p0, %p5530_p13 }
 0x885   : > { %p5533_p2 = pnand %p5532_p1, %p5526_p12 }
 0x887   : > { %5536 = shalt.err (!%p5533_p2)
}
 0x888   : > { %s5537_s30 = scalar_lea.hbm %s8291_s0, 896  ;;  %s5541_s2 = scalar_lea.hbm %s8762_s21, 1792 }
 0x889   : > { %p5538_p3 = scmp.ne.s32.totalorder %s8291_s0, %s5537_s30  ;;  %p5542_p7 = scmp.lt.u32.totalorder %s8291_s0, %s8762_s21 }
 0x88a   : > { %p5543_p10 = scmp.lt.u32.totalorder %s5541_s2, %s5537_s30  ;;  %p5545_p12 = scmp.lt.u32.totalorder %s5537_s30, %s8291_s0 }
 0x88b   : > { %p5539_p4 = pnand %p5538_p3, %p5745_p6 }
 0x88c   : > { %p5544_p11 = por %p5543_p10, %p5542_p7 }
 0x88d   : > { %p5540_p5 = pneg %p5539_p4 }
 0x88e   : > { %p5546_p13 = por %p5545_p12, %p5544_p11 }
 0x890   : > { %p5547_p0 = pnand %p5546_p13, %p5540_p5 }
 0x892   : > { %5550 = shalt.err (!%p5547_p0)
}
 0x893   : > { %s5611_s17 = smov 256   ;;  %s5612_s29 = smov 8  }
 0x894   : > { %5404 = dma.vmem_to_hbm [thread:$0]  (%p5745_p6), %s8294_s28, 896, %s8291_s0, %s4466_s27, %s5608_s4, %s5611_s17, %s5612_s29  }
 0x895 PF: > { %s8763_s8 = sld [smem:[#allocation12_spill]]  ;;  %p5408_p1 = pnand %p4666_p9, %p5749_p8 }
 0x89b   : > { %s4508_s25 = sand.u32 1, %s8763_s8  }
 0x89c   : > { %s4509_s9 = scalar_lea.sflag [#allocation7], %s4508_s25 }
 0x89d   : > { %5572 = dma.done.wait (!%p5408_p1), %s4509_s9, 448  }
 0x89e   : > { %5574 = vsyncadd (!%p5408_p1), %s4509_s9, 4294966848  ;;  %s4518_s30 = scalar_lea.sflag [#allocation9], %s4508_s25 }
 0x89f   : > { %5576 = dma.done.wait (!%p5408_p1), %s4518_s30, 896  }
 0x8a0   : > { %5578 = vsyncadd (!%p5408_p1), %s4518_s30, 4294966400  ;;  %s8766_s29 = sld [smem:[#allocation16_spill]]  ;;  %s8767_s26 = sld [smem:[#allocation13_spill]] }
 0x8a1   : > { %s8768_s27 = sld [smem:[#allocation14_spill]]  ;;  %s8769_s28 = sld [smem:[#allocation17_spill]] }
 0x8a6   : > { %p33_p6 = scmp.ge.s32.totalorder %s8766_s29, 4  }
 0x8a8   :  { %35 = sbr.rel (!%p33_p6) target bundleno = 13 (0xd), region = 218 }
 0x8af   :  { %4523 = vsyncpa [#allocation7], 1 }
 0x8b0   :  { %4525 = vsyncpa [#allocation7 + $0x1], 1 }
 0x8b1   :  { %4526 = vsyncpa [#allocation9], 1 }
 0x8b2   :  { %4528 = vsyncpa [#allocation9 + $0x1], 1 }

// kernel: tpu_custom_call.1
= control target key start
LH: loop header
LB: loop body
LE: loop exit
PB: predicated region body
PF: predicated region fallthrough
CT: control target
= control target key end

     0   :  { %s8339_s0 = inlined_call_operand.vmem [shape: f32[16,32], index: 0, kind: input, shape index: {}]   ;;  %s8340_s1 = inlined_call_operand.vmem [shape: f32[16,32], index: 1, kind: input, shape index: {}]   ;;  %s8341_s2 = inlined_call_operand.vmem [shape: bf16[16,128,32], index: 2, kind: input, shape index: {}]   ;;  %s8342_s3 = inlined_call_operand.vmem [shape: bf16[16,128,32], index: 3, kind: input, shape index: {}]   ;;  %s8343_s4 = inlined_call_operand.vmem [shape: bf16[7,16,16], index: 4, kind: input, shape index: {}]   ;;  %s8344_s5 = inlined_call_operand.vmem [shape: s32[16,1], index: 5, kind: input, shape index: {}]   ;;  %s8345_s6 = inlined_call_operand.vmem [shape: bf16[32,32], index: 6, kind: input, shape index: {}]   ;;  %s8346_s7 = inlined_call_operand.vmem [shape: f32[1,32], index: 7, kind: input, shape index: {}]   ;;  %s8347_s8 = inlined_call_operand.vmem [shape: f32[1,32], index: 8, kind: input, shape index: {}]   ;;  %s8348_s9 = inlined_call_operand.<no memory space> [shape: f32[1,1], index: 9, kind: input, shape index: {}]   ;;  %s8349_s10 = inlined_call_operand.vmem [shape: bf16[32,32], index: 10, kind: input, shape index: {}]   ;;  %s8350_s11 = inlined_call_operand.vmem [shape: f32[1,32], index: 11, kind: input, shape index: {}]   ;;  %s8351_s12 = inlined_call_operand.vmem [shape: bf16[16,128], index: 12, kind: input, shape index: {}]   ;;  %s8352_s13 = inlined_call_operand.vmem [shape: bf16[32,128], index: 13, kind: input, shape index: {}]   ;;  %s8353_s14 = inlined_call_operand.vmem [shape: bf16[32,128], index: 14, kind: input, shape index: {}]   ;;  %s8354_s15 = inlined_call_operand.vmem [shape: f32[1,128], index: 15, kind: input, shape index: {}]   ;;  %s8355_s16 = inlined_call_operand.hbm [shape: bf16[7,16,32], index: 16, kind: output, shape index: {0}]   ;;  %s8356_s17 = inlined_call_operand.hbm [shape: f32[7,16,128], index: 17, kind: output, shape index: {1}]  }
   0x1   :  { %8401 = sst [smem:[#allocation61_spill]] %s8339_s0  ;;  %v23_v0 = vstv %s8348_s9 }
   0x2   :  { %8402 = sst [smem:[#allocation62_spill]] %s8340_s1  ;;  %24 = vst [vmem:[#allocation4] sm:$0x1] %v23_v0 }
   0x3   :  { %8403 = sst [smem:[#allocation63_spill]] %s8341_s2 }
   0x4   :  { %8404 = sst [smem:[#allocation64_spill]] %s8343_s4 }
   0x5   :  { %8405 = sst [smem:[#allocation65_spill]] %s8347_s8 }
   0x6   :  { %8406 = sst [smem:[#allocation66_spill]] %s8355_s16 }
   0x7   :  { %8407 = sst [smem:[#allocation67_spill]] %s8356_s17 }
   0x8   :  { %25 = vsyncpa [#allocation7], 0 }
   0x9   :  { %27 = vsyncpa [#allocation7 + $0x1], 0 }
   0xa   :  { %28 = vsyncpa [#allocation9], 0 }
   0xb   :  { %30 = vsyncpa [#allocation9 + $0x1], 0  ;;  %s5706_s26 = smov 0   ;;  %s5708_s27 = smov 0  }
   0xc   :  { %s5710_s28 = smov 0   ;;  %s5712_s29 = smov 0  }
   0xd LB: > { %8408 = sst [smem:[#allocation12_spill]] %s5581_s26  ;;  %s5727_s9 = sadd.s32 4294967295, %s5593_s29   ;;  %s5593_s29 = sphi %s5712_s29, %s8766_s29   ;;  %s5589_s28 = sphi %s5710_s28, %s8769_s28   ;;  %s5585_s27 = sphi %s5708_s27, %s8768_s27   ;;  %s5581_s26 = sphi %s5706_s26, %s8767_s26  }
   0xe   : > { %8409 = sst [smem:[#allocation13_spill]] %s5585_s27  ;;  %s4664_s0 = sadd.s32 4294967294, %s5593_s29  }
   0xf   : > { %8410 = sst [smem:[#allocation14_spill]] %s5589_s28  ;;  %s5731_s30 = sadd.s32 1, %s5593_s29  }
  0x10   : > { %8411 = sst [smem:[#allocation15_spill]] %s5593_s29  ;;  %s147_s18 = sadd.s32 1, %s5589_s28 }
  0x11   : > { %8412 = sst [smem:[#allocation16_spill]] %s5731_s30  ;;  %s144_s19 = ssub.s32 %s5593_s29, %s5731_s30 }
  0x12   : > { %p154_p0 = scmp.ne.s32.totalorder %s5589_s28, %s5585_s27  ;;  %p145_p1 = scmp.eq.s32.totalorder %s144_s19, 0 }
  0x13   : > { %p155_p2 = scmp.eq.s32.totalorder %s5593_s29, 0  ;;  %p420_p3 = scmp.eq.s32.totalorder %s5727_s9, 1 }
  0x14   : > { %p425_p4 = scmp.ne.s32.totalorder %s5585_s27, %s5581_s26  ;;  %p426_p7 = scmp.eq.s32.totalorder %s4664_s0, 1 }
  0x15   : > { %s5743_s1 = scalar_select %p145_p1, %s5589_s28, %s147_s18  }
  0x16   : > { %p156_p5 = por %p155_p2, %p154_p0  ;;  %p5745_p6 = por %p420_p3, %p154_p0 }
  0x17   : > { %8413 = sst [smem:[#allocation17_spill]] %s5743_s1  ;;  %p5749_p8 = por %p426_p7, %p425_p4 }
  0x18   : > { %s8414_s20 = scalar_select %p5745_p6, 1, 0 }
  0x19   : > { %s8416_s21 = scalar_select %p5749_p8, 1, 0 }
  0x1a   : > { %8415 = sst [smem:[#allocation18_spill]] %s8414_s20  ;;  %p4666_p9 = scmp.ge.s32.totalorder %s5593_s29, 2 }
  0x1b   : > { %8417 = sst [smem:[#allocation19_spill]] %s8416_s21 }
  0x1c   : > { %498 = sbr.rel (%p4666_p9) target bundleno = 49 (0x31), region = 56 }
  0x23   : > { %535 = sbr.rel (!%p156_p5) target bundleno = 49 (0x31), region = 76  ;;  %s537_s22 = sand.u32 (%p156_p5), 1, %s5589_s28  }
  0x24   : > { %s4667_s23 = sshll.u32 (%p156_p5), %s5593_s29, 2  ;;  %s5400_s24 = smul.u32 (%p156_p5), 28, %s537_s22 }
  0x25   : > { %s8418_s4 = sld [smem:[#allocation64_spill]] (%p156_p5) }
  0x26   : > { %s539_s0 = scalar_lea.vmem (%p156_p5), [#allocation5], %s5400_s24 }
  0x2b   : > { %s541_s19 = scalar_lea.vmem %s8418_s4, %s4667_s23 }
  0x2c   : > { %v557_v1 = vld [vmem:[%s541_s19] sm:$0xf]  ;;  %v559_v2 = vld [vmem:[%s541_s19 + $0x8] sm:$0xf]  ;;  %v561_v3 = vld [vmem:[%s541_s19 + $0x10] sm:$0xf] }
  0x2d   : > { %v563_v4 = vld [vmem:[%s541_s19 + $0x18] sm:$0xf]  ;;  %v565_v5 = vld [vmem:[%s541_s19 + $0x20] sm:$0xf]  ;;  %558 = vst [vmem:[%s539_s0] sm:$0xf] %v557_v1 }
  0x2e   : > { %560 = vst [vmem:[%s539_s0 + $0x4] sm:$0xf] %v559_v2  ;;  %562 = vst [vmem:[%s539_s0 + $0x8] sm:$0xf] %v561_v3  ;;  %v567_v6 = vld [vmem:[%s541_s19 + $0x28] sm:$0xf] }
  0x2f   : > { %564 = vst [vmem:[%s539_s0 + $0xc] sm:$0xf] %v563_v4  ;;  %566 = vst [vmem:[%s539_s0 + $0x10] sm:$0xf] %v565_v5  ;;  %v569_v7 = vld [vmem:[%s541_s19 + $0x30] sm:$0xf] }
  0x30   : > { %568 = vst [vmem:[%s539_s0 + $0x14] sm:$0xf] %v567_v6  ;;  %570 = vst [vmem:[%s539_s0 + $0x18] sm:$0xf] %v569_v7 }
  0x31 PF: > { %p4668_p10 = scmp.ge.s32.totalorder %s5593_s29, 1  ;;  %p613_p11 = scmp.lt.s32.totalorder %s5593_s29, 3 }
  0x33   : > { %p614_p12 = pnand %p4668_p10, %p613_p11 }
  0x35   : > { %617 = sbr.rel (%p614_p12) target bundleno = 2197 (0x895), region = 121 }
  0x3c   : > { %s5764_s22 = sand.u32 1, %s5585_s27   ;;  %p700_p13 = scmp.lt.s32.totalorder %s5727_s9, 1  ;;  %v8368_v9 = vlaneseq  ;;  %vm8383_vm1 = vcmask 261120  }
  0x3d   : > { %s8419_s8 = sld [smem:[#allocation65_spill]]  ;;  %s5401_s25 = smul.u32 28, %s5764_s22 }
  0x3e   : > { %s4671_s18 = sshll.u32 %s5727_s9, 3  ;;  %s5402_s19 = smul.u32 56, %s5764_s22  ;;  %v5776_v10 = vand.u32 127, %v8368_v9 }
  0x3f   : > { %p709_p0 = scmp.lt.s32.totalorder %s4671_s18, 15  ;;  %s8422_s27 = sld [smem:[#allocation61_spill]] }
  0x40   : > { %8421 = vst [vmem:[#allocation21_spill] sm:$0xff] %v5776_v10  ;;  %s701_s0 = scalar_select %p700_p13, %s5727_s9, 1 }
  0x41   : > { %s8771_s18 = smov (!%p709_p0, %s4671_s18), 15  ;;  %s8423_s2 = sld [smem:[#allocation63_spill]] }
  0x42   : > { %s4669_s4 = sshll.u32 %s701_s0, 3  ;;  %s4707_s24 = sshll.u32 %s8771_s18, 6 }
  0x43   : > { %v5770_v8 = vld [vmem:[%s8419_s8] ss:$0 sm:$0xff]  ;;  %s5791_s17 = scalar_lea.vmem %s8342_s3, %s4707_s24  ;;  %s725_s0 = scalar_lea.vmem %s8344_s5, %s4669_s4 }
  0x44   : > { %8420 = vst [vmem:[#allocation20_spill] sm:$0xff] %v5770_v8  ;;  %s8424_s1 = sld [smem:[#allocation62_spill]]  ;;  %v5800_v12 = vld [vmem:[%s725_s0] sm:$0xff]  ;;  %s5803_s8 = scalar_lea.vmem [#allocation5], %s5401_s25 }
  0x45   : > { %s703_s23 = scalar_lea.vmem %s8422_s27, %s4669_s4  ;;  %8425 = vst [vmem:[#allocation22_spill] sm:$0xff] %v5800_v12  ;;  %s5805_s26 = scalar_lea.vmem [#allocation6], %s5401_s25 }
  0x46   : > { %v727_v11 = vld [vmem:[%s703_s23] sm:$0xff]  ;;  %s5807_s30 = scalar_lea.vmem [#allocation8], %s5402_s19  ;;  %s5809_s21 = smov 0  }
  0x47   : > { %s5786_s29 = scalar_lea.vmem %s8423_s2, %s4707_s24  ;;  %729 = vst.msk [vmem:[#allocation2] sm:$0xff] %vm8383_vm1, %v727_v11 }
  0x4a   : > { %s707_s18 = scalar_lea.vmem %s8424_s1, %s4669_s4 }
  0x4b   : > { %v730_v13 = vld [vmem:[%s707_s18] sm:$0xff] }
  0x4c   : > { %731 = vst.msk [vmem:[#allocation3] sm:$0xff] %vm8383_vm1, %v730_v13 }
  0x4d LB: >> { %v8426_v10 = vld [vmem:[#allocation21_spill] sm:$0xff]  ;;  %v8427_v8 = vld [vmem:[#allocation20_spill] sm:$0xff]  ;;  %v8369_v15 = vmov 0.0   ;;  %v5470_v16 = vld [vmem:[%s8345_s6 + $0x8] sm:$0xff]   ;;  %vm8372_vm2 = vmmov 0   ;;  %vm8429_vm1 = vcmask 261120   ;;  %v8430_v9 = vlaneseq  ;;  %s5597_s21 = sphi %s5809_s21, %s742_s21  }
  0x4e   : >> { %v5469_v14 = vld [vmem:[%s8345_s6] sm:$0xff]   ;;  %5362 = vmatprep.subr.bf16.mxu0 %v8369_v15  ;;  %5370 = vmatprep.subr.bf16.mxu1 %v8369_v15  ;;  %v5601_v19 = vmov 1966171168   ;;  %v5237_v32 = vld [vmem:[%s5791_s17 + $0x10] sm:$0xff]   ;;  %v5238_v40 = vld [vmem:[%s5791_s17 + $0x18] sm:$0xff]   ;;  %vm1978_vm3 = vcmask 130112  }
  0x4f   : >> { %5363 = vmatpush3.bf16.msra.mxu0 %v5469_v14  ;;  %5366 = vmatprep.mubr.msk.bf16.mxu0 %vm8372_vm2, %v8369_v15  ;;  %v743_v17 = vld [vmem:[#allocation2] sm:$0xff]  ;;  %v884_v20 = vunpack.c.l.s4 %v5601_v19  ;;  %v5835_v22 = vshrl.u32 %v8430_v9, 7  ;;  %v4777_v38 = vunpack.c.h.bf16 %v5237_v32  ;;  %v5860_v46 = vld [vmem:[%s5791_s17 + $0x30] sm:$0xff]   ;;  %v5863_v47 = vld [vmem:[%s5791_s17 + $0x8] sm:$0xff]   ;;  %v4781_v50 = vunpack.c.h.bf16 %v5238_v40  ;;  %s5603_s1 = smov 32   ;;  %s4678_s23 = sshll.u32 %s5597_s21, 2 }
  0x50   : >> { %5364 = vmatprep.subr.bf16.mxu0 %v8369_v15  ;;  %5374 = vmatprep.mubr.msk.bf16.mxu1 %vm8372_vm2, %v8369_v15  ;;  %v5827_v18 = vpack.c.bf16 %v743_v17, %v743_v17  ;;  %v4679_v23 = vld [vmem:[%s8346_s7] ss:$0 sm:$0xff]  ;;  %v5270_v48 = vld [vmem:[%s5791_s17 + $0x38] sm:$0xff]   ;;  %v4776_v51 = vunpack.c.l.bf16 %v5237_v32  ;;  %v4905_v54 = vunpack.c.h.bf16 %v5860_v46  ;;  %v4716_v55 = vunpack.c.l.bf16 %v5863_v47  ;;  %s747_s24 = scalar_lea.vmem %s5803_s8, %s4678_s23 [#allocation5]  ;;  %s4702_s27 = sshll.u32 %s5597_s21, 3 }
  0x51   : >> { %v885_v21 = vunpack.c.0.s8 %v884_v20  ;;  %8431 = vst [vmem:[#allocation24_spill] sm:$0xff] %v5835_v22  ;;  %v4711_v33 = vld [vmem:[%s5791_s17] sm:$0xff]   ;;  %v5844_v34 = vsub.s32 0, %v5835_v22  ;;  %v4908_v56 = vunpack.c.l.bf16 %v5270_v48  ;;  %v4780_v0 = vunpack.c.l.bf16 %v5238_v40  ;;  %s4458_s18 = scalar_lea.vmem %s5807_s30, %s4702_s27 [#allocation8]  ;;  %s5604_s0 = smov 96  }
  0x52   : >> { %8428 = vst [vmem:[#allocation23_spill] sm:$0xff] %v5827_v18  ;;  %v5849_v37 = vld [vmem:[%s5791_s17 + $0x20] sm:$0xff]   ;;  %v4712_v39 = vunpack.c.l.bf16 %v4711_v33  ;;  %v4713_v45 = vunpack.c.h.bf16 %v4711_v33  ;;  %v4909_v20 = vunpack.c.h.bf16 %v5270_v48  ;;  %v4717_v33 = vunpack.c.h.bf16 %v5863_v47  ;;  %s5605_s28 = smov 64   ;;  %s4453_s27 = scalar_lea.vmem %s5805_s26, %s4678_s23 [#allocation6] }
  0x53   : >> { %5365 = vmatpush3.bf16.msra.mxu0 %v5470_v16  ;;  %v888_v24 = vsub.s32 %v885_v21, %v5835_v22  ;;  %8432 = vst [vmem:[#allocation25_spill] sm:$0xff] %v5844_v34  ;;  %v4841_v44 = vunpack.c.h.bf16 %v5849_v37  ;;  %v4840_v21 = vunpack.c.l.bf16 %v5849_v37  ;;  %vm2184_vm4 = vcmask 392512  }
  0x54   : >> { %5378 = vmatprep.subr.bf16.mxu0 %v8369_v15  ;;  %vm1985_vm5 = vcmask 195712   ;;  %vm2191_vm6 = vcmask 458112   ;;  %vm2198_vm7 = vcmask 523712   ;;  %vm2383_vm8 = vcmask 654912  }
  0x55   : >> { %vm1992_vm9 = vcmask 261312   ;;  %vm2390_vm10 = vcmask 720512   ;;  %vm8386_vm11 = vcmask 917312   ;;  %vm2589_vm12 = vcmask 982912  }
  0x56   : >> { %5367 = vmatmul.mubr.msk.bf16.vlgmr.msra.gmra.mrb[0].mxu0 %vm8429_vm1, %v5827_v18  ;;  %vm2596_vm13 = vcmask 1048512   ;;  %vm2397_vm14 = vcmask 786112   ;;  %vm8385_vm15 = vcmask 1041409   ;;  %vm2131_vm0 = vcmask 1043459  }
  0x57   : >> { %5382 = vmatprep.mubr.msk.bf16.mxu0 %vm8372_vm2, %v8369_v15  ;;  %vm8384_vm2 = vcmask 1042434  }
 0x129   : >> { %v811_v25 = vpop.f32.mrb[0].mxu0 }
 0x12a   : >> { %v812_v26 = vadd.f32 %v4679_v23, %v811_v25  ;;  %v5368_v27 = vpop.f32.mrb[1].mxu0 }
 0x12b   : >> { %v814_v28 = vpop.f32.mrb[2].mxu0 }
 0x12c   : >> { %v882_v29 = vcombine.high %v812_v26, %v812_v26  ;;  %v889_v30 = vrot.slane %v812_v26, %v888_v24  ;;  %v5369_v31 = vpop.f32.mrb[3].mxu0  ;;  %v5223_v28 = vld [vmem:[%s5791_s17 + $0x40] sm:$0xff]  }
 0x12e   : >> { %v896_v35 = vrot.slane %v882_v29, %v888_v24  ;;  %v5846_v36 = vrot.slane %v889_v30, %v888_v24  ;;  %v897_v61 = vcombine.high %v889_v30, %v889_v30 }
 0x130   : >> { %v898_v41 = vcombine.high %v896_v35, %v896_v35  ;;  %v5852_v42 = vrot.slane %v896_v35, %v888_v24  ;;  %v5856_v43 = vrot.slane %v5846_v36, %v5844_v34  ;;  %v5884_v19 = vrot.slane %v897_v61, %v888_v24 }
 0x131   : >> { %v4720_v35 = vunpack.c.l.bf16 %v5223_v28  ;;  %v4904_v61 = vunpack.c.l.bf16 %v5860_v46  ;;  %v927_v46 = vcombine.high %v5846_v36, %v5846_v36 }
 0x132   : >> { %v5866_v49 = vrot.slane %v898_v41, %v888_v24  ;;  %v1234_v52 = vadd.f32 %v4777_v38, %v5856_v43  ;;  %v971_v53 = vadd.f32 %v4712_v39, %v5856_v43  ;;  %v1490_v59 = vadd.f32 %v4841_v44, %v5856_v43  ;;  %v5254_v41 = vld [vmem:[%s5791_s17 + $0x28] sm:$0xff]  }
 0x133   : >> { %v972_v60 = vadd.f32 %v4713_v45, %v5856_v43  ;;  %v1236_v62 = vadd.f32 %v4781_v50, %v5856_v43  ;;  %v1233_v63 = vadd.f32 %v4776_v51, %v5856_v43  ;;  %v1746_v7 = vadd.f32 %v4905_v54, %v5856_v43 }
 0x134   : >> { %v1266_v57 = vmax.f32 %v1234_v52, 0.0  ;;  %v1003_v58 = vmax.f32 %v971_v53, 0.0  ;;  %v1522_v3 = vmax.f32 %v1490_v59, 0.0  ;;  %v973_v11 = vadd.f32 %v4716_v55, %v5856_v43 }
 0x135   : >> { %v1004_v4 = vmax.f32 %v972_v60, 0.0  ;;  %v1268_v5 = vmax.f32 %v1236_v62, 0.0  ;;  %v1265_v6 = vmax.f32 %v1233_v63, 0.0  ;;  %v1778_v26 = vmax.f32 %v1746_v7, 0.0 }
 0x136   : >> { %v1298_v1 = vmul.f32 %v8427_v8, %v1266_v57  ;;  %v1041_v2 = vmul.f32 %v8427_v8, %v1003_v58  ;;  %v1554_v16 = vmul.f32 %v8427_v8, %v1522_v3  ;;  %v1005_v27 = vmax.f32 %v973_v11, 0.0  ;;  %v5917_v3 = vld [vmem:[%s5791_s17 + $0x48] sm:$0xff]  }
 0x137   : >> { %v1042_v17 = vmul.f32 %v8427_v8, %v1004_v4  ;;  %v1300_v23 = vmul.f32 %v8427_v8, %v1268_v5  ;;  %v1297_v25 = vmul.f32 %v8427_v8, %v1265_v6  ;;  %v1747_v31 = vadd.f32 %v4908_v56, %v5856_v43  ;;  %v5239_v56 = vld [vmem:[%s5791_s17 + $0x50] sm:$0xff]  }
 0x138   : >> { %v1332_v13 = vsel %vm8429_vm1, %v1298_v1, 0.0  ;;  %v1073_v14 = vsel %vm8429_vm1, %v1041_v2, 0.0  ;;  %v1588_v29 = vsel %vm8429_vm1, %v1554_v16, 0.0  ;;  %v1235_v24 = vadd.f32 %v4780_v0, %v5856_v43 }
 0x139   : >> { %1333 = vadd.xlane.f32.xlu1 %v1332_v13  ;;  %1074 = vadd.xlane.f32.xlu0 %v1073_v14  ;;  %v1076_v30 = vsel %vm8429_vm1, %v1042_v17, 0.0  ;;  %v5896_v32 = vrot.slane %v5884_v19, %v5844_v34  ;;  %v1338_v37 = vsel %vm8429_vm1, %v1300_v23, 0.0  ;;  %v1329_v38 = vsel %vm8429_vm1, %v1297_v25, 0.0 }
 0x13a   : >> { %v1810_v39 = vmul.f32 %v8427_v8, %v1778_v26  ;;  %v1043_v40 = vmul.f32 %v8427_v8, %v1005_v27  ;;  %v1779_v44 = vmax.f32 %v1747_v31, 0.0  ;;  %v1267_v45 = vmax.f32 %v1235_v24, 0.0 }
 0x13b   : >> { %v1748_v48 = vadd.f32 %v4909_v20, %v5856_v43  ;;  %v1489_v50 = vadd.f32 %v4840_v21, %v5856_v43  ;;  %v4844_v47 = vunpack.c.l.bf16 %v5254_v41  ;;  %v4721_v51 = vunpack.c.h.bf16 %v5223_v28  ;;  %v5225_v21 = vld [vmem:[%s5791_s17 + $0x80] sm:$0xff]  }
 0x13c   : >> { %v1844_v52 = vsel %vm8429_vm1, %v1810_v39, 0.0  ;;  %v1079_v53 = vsel %vm8429_vm1, %v1043_v40, 0.0  ;;  %v974_v54 = vadd.f32 %v4717_v33, %v5856_v43  ;;  %v975_v55 = vadd.f32 %v4720_v35, %v5896_v32  ;;  %v5941_v35 = vld [vmem:[%s5791_s17 + $0x58] sm:$0xff]  }
 0x13d   : >> { %1589 = vadd.xlane.f32.xlu1 %v1588_v29  ;;  %1077 = vadd.xlane.f32.xlu0 %v1076_v30  ;;  %v1811_v57 = vmul.f32 %v8427_v8, %v1779_v44  ;;  %v1299_v58 = vmul.f32 %v8427_v8, %v1267_v45  ;;  %v1780_v59 = vmax.f32 %v1748_v48, 0.0  ;;  %v1521_v60 = vmax.f32 %v1489_v50, 0.0 }
 0x13e   : >> { %v4785_v62 = vunpack.c.h.bf16 %v5239_v56  ;;  %v1006_v63 = vmax.f32 %v974_v54, 0.0  ;;  %v1007_v0 = vmax.f32 %v975_v55, 0.0  ;;  %v1491_v1 = vadd.f32 %v4844_v47, %v5856_v43 }
 0x13f   : >> { %v976_v2 = vadd.f32 %v4721_v51, %v5896_v32  ;;  %v1847_v4 = vsel %vm8429_vm1, %v1811_v57, 0.0  ;;  %v1335_v5 = vsel %vm8429_vm1, %v1299_v58, 0.0  ;;  %v1812_v6 = vmul.f32 %v8427_v8, %v1780_v59  ;;  %v5241_v51 = vld [vmem:[%s5791_s17 + $0x90] sm:$0xff]  }
 0x140   : >> { %v1553_v7 = vmul.f32 %v8427_v8, %v1521_v60  ;;  %v4845_v11 = vunpack.c.h.bf16 %v5254_v41  ;;  %v4724_v13 = vunpack.c.l.bf16 %v5917_v3  ;;  %v1044_v14 = vmul.f32 %v8427_v8, %v1006_v63 }
 0x141   : >> { %1339 = vadd.xlane.f32.xlu1 %v1338_v37  ;;  %1330 = vadd.xlane.f32.xlu0 %v1329_v38  ;;  %v1045_v16 = vmul.f32 %v8427_v8, %v1007_v0  ;;  %v1523_v17 = vmax.f32 %v1491_v1, 0.0  ;;  %v1008_v20 = vmax.f32 %v976_v2, 0.0  ;;  %v1850_v23 = vsel %vm8429_vm1, %v1812_v6, 0.0 }
 0x142   : >> { %v1585_v25 = vsel %vm8429_vm1, %v1553_v7, 0.0  ;;  %v1745_v26 = vadd.f32 %v4904_v61, %v5856_v43  ;;  %v1238_v27 = vadd.f32 %v4785_v62, %v5896_v32  ;;  %v5934_v36 = vrot.slane %v927_v46, %v5844_v34  ;;  %v5255_v61 = vld [vmem:[%s5791_s17 + $0x60] sm:$0xff]  }
 0x143   : >> { %v4784_v28 = vunpack.c.l.bf16 %v5239_v56  ;;  %v4729_v29 = vunpack.c.h.bf16 %v5225_v21  ;;  %v1082_v30 = vsel %vm8429_vm1, %v1044_v14, 0.0  ;;  %v1085_v31 = vsel %vm8429_vm1, %v1045_v16, 0.0 }
 0x144   : >> { %v1555_v24 = vmul.f32 %v8427_v8, %v1523_v17  ;;  %v1046_v33 = vmul.f32 %v8427_v8, %v1008_v20  ;;  %v1777_v37 = vmax.f32 %v1745_v26, 0.0  ;;  %v1270_v38 = vmax.f32 %v1238_v27, 0.0 }
 0x145   : >> { %1845 = vadd.xlane.f32.xlu1 %v1844_v52  ;;  %1080 = vadd.xlane.f32.xlu0 %v1079_v53  ;;  %v1492_v39 = vadd.f32 %v4845_v11, %v5856_v43  ;;  %v977_v40 = vadd.f32 %v4724_v13, %v5896_v32  ;;  %v4728_v41 = vunpack.c.l.bf16 %v5225_v21  ;;  %v4788_v44 = vunpack.c.l.bf16 %v5941_v35  ;;  %v5963_v11 = vld [vmem:[%s5791_s17 + $0x88] sm:$0xff]  }
 0x146   : >> { %v1591_v45 = vsel %vm8429_vm1, %v1555_v24, 0.0  ;;  %v1088_v48 = vsel %vm8429_vm1, %v1046_v33, 0.0  ;;  %v1237_v50 = vadd.f32 %v4784_v28, %v5896_v32  ;;  %v980_v47 = vadd.f32 %v4729_v29, %v5934_v36  ;;  %v5976_v28 = vld [vmem:[%s5791_s17 + $0x98] sm:$0xff]  }
 0x147   : >> { %v1809_v52 = vmul.f32 %v8427_v8, %v1777_v37  ;;  %v1302_v43 = vmul.f32 %v8427_v8, %v1270_v38  ;;  %v1524_v53 = vmax.f32 %v1492_v39, 0.0  ;;  %v1009_v54 = vmax.f32 %v977_v40, 0.0 }
 0x148   : >> { %v4792_v55 = vunpack.c.l.bf16 %v5241_v51  ;;  %v4793_v56 = vunpack.c.h.bf16 %v5241_v51  ;;  %v1269_v57 = vmax.f32 %v1237_v50, 0.0  ;;  %v1012_v58 = vmax.f32 %v980_v47, 0.0 }
 0x149   : >> { %1848 = vadd.xlane.f32.xlu1 %v1847_v4  ;;  %1336 = vadd.xlane.f32.xlu0 %v1335_v5  ;;  %v979_v59 = vadd.f32 %v4728_v41, %v5934_v36  ;;  %v1239_v60 = vadd.f32 %v4788_v44, %v5896_v32  ;;  %v1841_v62 = vsel %vm8429_vm1, %v1809_v52, 0.0  ;;  %v1344_v63 = vsel %vm8429_vm1, %v1302_v43, 0.0  ;;  %v5257_v41 = vld [vmem:[%s5791_s17 + $0xa0] sm:$0xff]   ;;  %v5988_v44 = vld [vmem:[%s5791_s17 + $0x68] sm:$0xff]  }
 0x14a   : >> { %v1556_v0 = vmul.f32 %v8427_v8, %v1524_v53  ;;  %v1047_v1 = vmul.f32 %v8427_v8, %v1009_v54  ;;  %v4848_v2 = vunpack.c.l.bf16 %v5255_v61  ;;  %v4849_v4 = vunpack.c.h.bf16 %v5255_v61 }
 0x14b   : >> { %v1301_v5 = vmul.f32 %v8427_v8, %v1269_v57  ;;  %v1050_v6 = vmul.f32 %v8427_v8, %v1012_v58  ;;  %v1011_v7 = vmax.f32 %v979_v59, 0.0  ;;  %v1271_v46 = vmax.f32 %v1239_v60, 0.0 }
 0x14c   : >> { %v1594_v13 = vsel %vm8429_vm1, %v1556_v0, 0.0  ;;  %v1091_v14 = vsel %vm8429_vm1, %v1047_v1, 0.0  ;;  %v1241_v16 = vadd.f32 %v4792_v55, %v5934_v36  ;;  %v1242_v17 = vadd.f32 %v4793_v56, %v5934_v36  ;;  %v5271_v55 = vld [vmem:[%s5791_s17 + $0x70] sm:$0xff]  }
 0x14d   : >> { %1851 = vadd.xlane.f32.xlu1 %v1850_v23  ;;  %1586 = vadd.xlane.f32.xlu0 %v1585_v25  ;;  %v4732_v20 = vunpack.c.l.bf16 %v5963_v11  ;;  %v4725_v21 = vunpack.c.h.bf16 %v5917_v3  ;;  %v1341_v23 = vsel %vm8429_vm1, %v1301_v5, 0.0  ;;  %v1100_v25 = vsel %vm8429_vm1, %v1050_v6, 0.0 }
 0x14e   : >> { %v1049_v26 = vmul.f32 %v8427_v8, %v1011_v7  ;;  %v1303_v27 = vmul.f32 %v8427_v8, %v1271_v46  ;;  %v1273_v29 = vmax.f32 %v1241_v16, 0.0  ;;  %v1494_v24 = vadd.f32 %v4849_v4, %v5896_v32 }
 0x14f   : >> { %v4789_v3 = vunpack.c.h.bf16 %v5941_v35  ;;  %v4796_v33 = vunpack.c.l.bf16 %v5976_v28  ;;  %v981_v39 = vadd.f32 %v4732_v20, %v5934_v36  ;;  %v978_v40 = vadd.f32 %v4725_v21, %v5896_v32  ;;  %v5229_v20 = vld [vmem:[%s5791_s17 + $0x100] sm:$0xff]  }
 0x150   : >> { %v1097_v37 = vsel %vm8429_vm1, %v1049_v26, 0.0  ;;  %v1347_v38 = vsel %vm8429_vm1, %v1303_v27, 0.0  ;;  %v1526_v35 = vmax.f32 %v1494_v24, 0.0  ;;  %v4856_v47 = vunpack.c.l.bf16 %v5257_v41 }
 0x151   : >> { %1083 = vadd.xlane.f32.xlu0 %v1082_v30  ;;  %1086 = vadd.xlane.f32.xlu1 %v1085_v31  ;;  %v1274_v30 = vmax.f32 %v1242_v17, 0.0  ;;  %v1493_v31 = vadd.f32 %v4848_v2, %v5896_v32  ;;  %v4852_v51 = vunpack.c.l.bf16 %v5988_v44  ;;  %v1013_v52 = vmax.f32 %v981_v39, 0.0 }
 0x152   : >> { %v1010_v43 = vmax.f32 %v978_v40, 0.0  ;;  %v1240_v53 = vadd.f32 %v4789_v3, %v5896_v32  ;;  %v1243_v54 = vadd.f32 %v4796_v33, %v5934_v36  ;;  %v1558_v59 = vmul.f32 %v8427_v8, %v1526_v35  ;;  %v5245_v33 = vld [vmem:[%s5791_s17 + $0x110] sm:$0xff]  }
 0x153   : >> { %v1525_v50 = vmax.f32 %v1493_v31, 0.0  ;;  %v4912_v60 = vunpack.c.l.bf16 %v5271_v55  ;;  %v4857_v61 = vunpack.c.h.bf16 %v5257_v41  ;;  %v1497_v5 = vadd.f32 %v4856_v47, %v5934_v36 }
 0x154   : >> { %v1272_v0 = vmax.f32 %v1240_v53, 0.0  ;;  %v1275_v1 = vmax.f32 %v1243_v54, 0.0  ;;  %v1600_v4 = vsel %vm8429_vm1, %v1558_v59, 0.0  ;;  %v1495_v6 = vadd.f32 %v4852_v51, %v5896_v32  ;;  %v5273_v59 = vld [vmem:[%s5791_s17 + $0xb0] sm:$0xff]  }
 0x155   : >> { %1592 = vadd.xlane.f32.xlu0 %v1591_v45  ;;  %1089 = vadd.xlane.f32.xlu1 %v1088_v48  ;;  %v1305_v45 = vmul.f32 %v8427_v8, %v1273_v29  ;;  %v1306_v48 = vmul.f32 %v8427_v8, %v1274_v30  ;;  %v1557_v58 = vmul.f32 %v8427_v8, %v1525_v50  ;;  %v4733_v7 = vunpack.c.h.bf16 %v5963_v11 }
 0x156   : >> { %v4913_v46 = vunpack.c.h.bf16 %v5271_v55  ;;  %v1304_v16 = vmul.f32 %v8427_v8, %v1272_v0  ;;  %v1307_v17 = vmul.f32 %v8427_v8, %v1275_v1  ;;  %v1529_v21 = vmax.f32 %v1497_v5, 0.0 }
 0x157   : >> { %v1353_v56 = vsel %vm8429_vm1, %v1305_v45, 0.0  ;;  %v1356_v57 = vsel %vm8429_vm1, %v1306_v48, 0.0  ;;  %v1597_v2 = vsel %vm8429_vm1, %v1557_v58, 0.0  ;;  %v1498_v26 = vadd.f32 %v4857_v61, %v5934_v36 }
 0x158   : >> { %v6016_v11 = vrot.slane %v5852_v42, %v5844_v34  ;;  %v4745_v27 = vunpack.c.h.bf16 %v5229_v20  ;;  %v4744_v29 = vunpack.c.l.bf16 %v5229_v20  ;;  %v1350_v30 = vsel %vm8429_vm1, %v1304_v16, 0.0 }
 0x159   : >> { %1842 = vadd.xlane.f32.xlu0 %v1841_v62  ;;  %1345 = vadd.xlane.f32.xlu1 %v1344_v63  ;;  %v1051_v62 = vmul.f32 %v8427_v8, %v1013_v52  ;;  %v1048_v63 = vmul.f32 %v8427_v8, %v1010_v43  ;;  %v1359_v31 = vsel %vm8429_vm1, %v1307_v17, 0.0  ;;  %v982_v24 = vadd.f32 %v4733_v7, %v5934_v36  ;;  %v6046_v7 = vld [vmem:[%s5791_s17 + $0x78] sm:$0xff]  }
 0x15a   : >> { %v1750_v3 = vadd.f32 %v4913_v46, %v5896_v32  ;;  %v1530_v40 = vmax.f32 %v1498_v26, 0.0  ;;  %v4809_v41 = vunpack.c.h.bf16 %v5245_v33  ;;  %v4797_v45 = vunpack.c.h.bf16 %v5976_v28 }
 0x15b   : >> { %v1014_v48 = vmax.f32 %v982_v24, 0.0  ;;  %v988_v35 = vadd.f32 %v4745_v27, %v6016_v11  ;;  %v987_v47 = vadd.f32 %v4744_v29, %v6016_v11  ;;  %v4853_v28 = vunpack.c.h.bf16 %v5988_v44  ;;  %v6056_v27 = vld [vmem:[%s5791_s17 + $0x120] sm:$0xff]  }
 0x15c   : >> { %v1782_v50 = vmax.f32 %v1750_v3, 0.0  ;;  %v1562_v53 = vmul.f32 %v8427_v8, %v1530_v40  ;;  %v4808_v54 = vunpack.c.l.bf16 %v5245_v33  ;;  %v1244_v0 = vadd.f32 %v4797_v45, %v5934_v36  ;;  %v6067_v45 = vld [vmem:[%s5791_s17 + $0x108] sm:$0xff]  }
 0x15d   : >> { %1595 = vadd.xlane.f32.xlu0 %v1594_v13  ;;  %1092 = vadd.xlane.f32.xlu1 %v1091_v14  ;;  %v1103_v13 = vsel %vm8429_vm1, %v1051_v62, 0.0  ;;  %v1094_v14 = vsel %vm8429_vm1, %v1048_v63, 0.0  ;;  %v1052_v55 = vmul.f32 %v8427_v8, %v1014_v48  ;;  %v1019_v58 = vmax.f32 %v987_v47, 0.0 }
 0x15e   : >> { %v1612_v62 = vsel %vm8429_vm1, %v1562_v53, 0.0  ;;  %v1250_v63 = vadd.f32 %v4809_v41, %v6016_v11  ;;  %v4920_v44 = vunpack.c.l.bf16 %v5273_v59  ;;  %v1249_v16 = vadd.f32 %v4808_v54, %v6016_v11  ;;  %v6064_v41 = vld [vmem:[%s5791_s17 + $0xb8] sm:$0xff]  }
 0x15f   : >> { %v4916_v20 = vunpack.c.l.bf16 %v6046_v7  ;;  %v4872_v3 = vunpack.c.l.bf16 %v6056_v27  ;;  %v4921_v33 = vunpack.c.h.bf16 %v5273_v59 }
 0x160   : >> { %v1282_v46 = vmax.f32 %v1250_v63, 0.0  ;;  %v1281_v24 = vmax.f32 %v1249_v16, 0.0 }
 0x161   : >> { %1342 = vadd.xlane.f32.xlu0 %v1341_v23  ;;  %1101 = vadd.xlane.f32.xlu1 %v1100_v25  ;;  %v1527_v23 = vmax.f32 %v1495_v6, 0.0  ;;  %v1749_v25 = vadd.f32 %v4912_v60, %v5896_v32  ;;  %v5258_v60 = vld [vmem:[%s5791_s17 + $0xa8] sm:$0xff]   ;;  %v1057_v6 = vmul.f32 %v8427_v8, %v1019_v58  ;;  %v1751_v40 = vadd.f32 %v4916_v20, %v5896_v32 }
 0x162   : >> { %v4860_v1 = vunpack.c.l.bf16 %v5258_v60  ;;  %v4861_v17 = vunpack.c.h.bf16 %v5258_v60  ;;  %v1314_v29 = vmul.f32 %v8427_v8, %v1282_v46  ;;  %v1313_v47 = vmul.f32 %v8427_v8, %v1281_v24 }
 0x163   : >> { %v1781_v39 = vmax.f32 %v1749_v25, 0.0  ;;  %v1753_v25 = vadd.f32 %v4920_v44, %v5934_v36  ;;  %v1783_v54 = vmax.f32 %v1751_v40, 0.0  ;;  %v1505_v59 = vadd.f32 %v4872_v3, %v6016_v11 }
 0x164   : >> { %v1499_v26 = vadd.f32 %v4860_v1, %v5934_v36  ;;  %v1380_v48 = vsel %vm8429_vm1, %v1314_v29, 0.0  ;;  %v1377_v58 = vsel %vm8429_vm1, %v1313_v47, 0.0  ;;  %v1754_v60 = vadd.f32 %v4921_v33, %v5934_v36 }
 0x165   : >> { %1098 = vadd.xlane.f32.xlu0 %v1097_v37  ;;  %1348 = vadd.xlane.f32.xlu1 %v1347_v38  ;;  %v1561_v37 = vmul.f32 %v8427_v8, %v1529_v21  ;;  %v1559_v38 = vmul.f32 %v8427_v8, %v1527_v23  ;;  %v1813_v43 = vmul.f32 %v8427_v8, %v1781_v39  ;;  %v1121_v23 = vsel %vm8429_vm1, %v1057_v6, 0.0 }
 0x166   : >> { %v1500_v39 = vadd.f32 %v4861_v17, %v5934_v36  ;;  %v1815_v1 = vmul.f32 %v8427_v8, %v1783_v54  ;;  %v4917_v24 = vunpack.c.h.bf16 %v6046_v7  ;;  %v4749_v47 = vunpack.c.h.bf16 %v6067_v45 }
 0x167   : >> { %v1609_v51 = vsel %vm8429_vm1, %v1561_v37, 0.0  ;;  %v1603_v52 = vsel %vm8429_vm1, %v1559_v38, 0.0  ;;  %v1853_v61 = vsel %vm8429_vm1, %v1813_v43, 0.0  ;;  %v1785_v37 = vmax.f32 %v1753_v25, 0.0 }
 0x168   : >> { %v1531_v38 = vmax.f32 %v1499_v26, 0.0  ;;  %v1859_v17 = vsel %vm8429_vm1, %v1815_v1, 0.0 }
 0x169   : >> { %1354 = vadd.xlane.f32.xlu0 %v1353_v56  ;;  %1357 = vadd.xlane.f32.xlu1 %v1356_v57  ;;  %v1814_v56 = vmul.f32 %v8427_v8, %v1782_v50  ;;  %v1020_v57 = vmax.f32 %v988_v35, 0.0  ;;  %v1817_v43 = vmul.f32 %v8427_v8, %v1785_v37 }
 0x16a   : >> { %v1563_v53 = vmul.f32 %v8427_v8, %v1531_v38 }
 0x16b   : >> { %v1058_v5 = vmul.f32 %v8427_v8, %v1020_v57  ;;  %v1865_v63 = vsel %vm8429_vm1, %v1817_v43, 0.0 }
 0x16d   : >> { %1598 = vadd.xlane.f32.xlu0 %v1597_v2  ;;  %1601 = vadd.xlane.f32.xlu1 %v1600_v4  ;;  %v1106_v2 = vsel %vm8429_vm1, %v1052_v55, 0.0  ;;  %v1856_v4 = vsel %vm8429_vm1, %v1814_v56, 0.0  ;;  %v1124_v21 = vsel %vm8429_vm1, %v1058_v5, 0.0  ;;  %v6078_v55 = vld [vmem:[%s5791_s17 + $0x128] sm:$0xff]   ;;  %v6081_v56 = vld [vmem:[%s5791_s17 + $0x118] sm:$0xff]   ;;  %v1786_v5 = vmax.f32 %v1754_v60, 0.0 }
 0x16e   : >> { %v4813_v60 = vunpack.c.h.bf16 %v6081_v56 }
 0x16f   : >> { %v1818_v26 = vmul.f32 %v8427_v8, %v1786_v5  ;;  %v990_v5 = vadd.f32 %v4749_v47, %v6016_v11 }
 0x171   : >> { %1104 = vadd.xlane.f32.xlu0 %v1103_v13  ;;  %1095 = vadd.xlane.f32.xlu1 %v1094_v14  ;;  %v1276_v13 = vmax.f32 %v1244_v0, 0.0  ;;  %v1496_v14 = vadd.f32 %v4853_v28, %v5896_v32  ;;  %v1532_v28 = vmax.f32 %v1500_v39, 0.0  ;;  %v1615_v0 = vsel %vm8429_vm1, %v1563_v53, 0.0  ;;  %v6116_v39 = vld [vmem:[%s5791_s17 + $0xc0] sm:$0xff]  }
 0x173   : >> { %v1564_v44 = vmul.f32 %v8427_v8, %v1532_v28  ;;  %v6130_v28 = vld [vmem:[%s5791_s17 + $0xd0] sm:$0xff]  }
 0x175   : >> { %1351 = vadd.xlane.f32.xlu0 %v1350_v30  ;;  %1360 = vadd.xlane.f32.xlu1 %v1359_v31  ;;  %v1308_v30 = vmul.f32 %v8427_v8, %v1276_v13  ;;  %v1528_v31 = vmax.f32 %v1496_v14, 0.0  ;;  %v4873_v14 = vunpack.c.h.bf16 %v6056_v27  ;;  %v1618_v16 = vsel %vm8429_vm1, %v1564_v44, 0.0  ;;  %v6143_v44 = vld [vmem:[%s5791_s17 + $0xc8] sm:$0xff]  }
 0x176   : >> { %v929_v27 = vcombine.high %v5884_v19, %v5884_v19 }
 0x177   : >> { %v1362_v50 = vsel %vm8429_vm1, %v1308_v30, 0.0  ;;  %v1560_v35 = vmul.f32 %v8427_v8, %v1528_v31  ;;  %v1506_v38 = vadd.f32 %v4873_v14, %v6016_v11 }
 0x178   : >> { %v6123_v7 = vrot.slane %v929_v27, %v5844_v34 }
 0x179   : >> { %1610 = vadd.xlane.f32.xlu0 %v1609_v51  ;;  %1604 = vadd.xlane.f32.xlu1 %v1603_v52  ;;  %v4924_v51 = vunpack.c.l.bf16 %v6064_v41  ;;  %v4748_v52 = vunpack.c.l.bf16 %v6067_v45  ;;  %v1606_v57 = vsel %vm8429_vm1, %v1560_v35, 0.0  ;;  %v4736_v35 = vunpack.c.l.bf16 %v6116_v39 }
 0x17a   : >> { %v1538_v53 = vmax.f32 %v1506_v38, 0.0  ;;  %v4801_v45 = vunpack.c.h.bf16 %v6130_v28 }
 0x17b   : >> { %v1755_v6 = vadd.f32 %v4924_v51, %v5934_v36  ;;  %v989_v46 = vadd.f32 %v4748_v52, %v6016_v11 }
 0x17c   : >> { %v1246_v14 = vadd.f32 %v4801_v45, %v6123_v7  ;;  %v6184_v45 = vld [vmem:[%s5791_s17 + $0x140] sm:$0xff]  }
 0x17d   : >> { %1854 = vadd.xlane.f32.xlu0 %v1853_v61  ;;  %1613 = vadd.xlane.f32.xlu1 %v1612_v62  ;;  %v4876_v61 = vunpack.c.l.bf16 %v6078_v55  ;;  %v4812_v62 = vunpack.c.l.bf16 %v6081_v56  ;;  %v1787_v29 = vmax.f32 %v1755_v6, 0.0  ;;  %v1021_v30 = vmax.f32 %v989_v46, 0.0 }
 0x17e   : >> { %v4740_v56 = vunpack.c.l.bf16 %v6143_v44  ;;  %v4925_v6 = vunpack.c.h.bf16 %v6064_v41 }
 0x17f   : >> { %v1507_v20 = vadd.f32 %v4876_v61, %v6016_v11  ;;  %v1059_v19 = vmul.f32 %v8427_v8, %v1021_v30  ;;  %v1278_v30 = vmax.f32 %v1246_v14, 0.0 }
 0x181   : >> { %1107 = vadd.xlane.f32.xlu0 %v1106_v2  ;;  %1857 = vadd.xlane.f32.xlu1 %v1856_v4  ;;  %v6094_v2 = vld [vmem:[%s5791_s17 + $0x130] sm:$0xff]   ;;  %v1537_v4 = vmax.f32 %v1505_v59, 0.0  ;;  %v1539_v3 = vmax.f32 %v1507_v20, 0.0  ;;  %v1752_v59 = vadd.f32 %v4917_v24, %v5896_v32  ;;  %v983_v32 = vadd.f32 %v4736_v35, %v6123_v7 }
 0x182   : >> { %v4937_v13 = vunpack.c.h.bf16 %v6094_v2  ;;  %v1756_v24 = vadd.f32 %v4925_v6, %v5934_v36 }
 0x183   : >> { %v1569_v25 = vmul.f32 %v8427_v8, %v1537_v4  ;;  %v1571_v51 = vmul.f32 %v8427_v8, %v1539_v3  ;;  %v1784_v4 = vmax.f32 %v1752_v59, 0.0  ;;  %v6163_v3 = vld [vmem:[%s5791_s17 + $0xe0] sm:$0xff]  }
 0x184   : >> { %v1762_v37 = vadd.f32 %v4937_v13, %v6016_v11  ;;  %v1788_v35 = vmax.f32 %v1756_v24, 0.0 }
 0x185   : >> { %1125 = vadd.xlane.f32.xlu1 %v1124_v21  ;;  %1122 = vadd.xlane.f32.xlu0 %v1121_v23  ;;  %v1251_v21 = vadd.f32 %v4812_v62, %v6016_v11  ;;  %v6105_v23 = vld [vmem:[%s5791_s17 + $0x138] sm:$0xff]   ;;  %v1633_v40 = vsel %vm8429_vm1, %v1569_v25, 0.0  ;;  %v1639_v61 = vsel %vm8429_vm1, %v1571_v51, 0.0  ;;  %v1015_v25 = vmax.f32 %v983_v32, 0.0 }
 0x186   : >> { %v4940_v31 = vunpack.c.l.bf16 %v6105_v23  ;;  %v1794_v43 = vmax.f32 %v1762_v37, 0.0  ;;  %v1820_v59 = vmul.f32 %v8427_v8, %v1788_v35 }
 0x187   : >> { %v1283_v33 = vmax.f32 %v1251_v21, 0.0  ;;  %v1816_v21 = vmul.f32 %v8427_v8, %v1784_v4  ;;  %v1053_v38 = vmul.f32 %v8427_v8, %v1015_v25 }
 0x188   : >> { %v1874_v4 = vsel %vm8429_vm1, %v1820_v59, 0.0 }
 0x189   : >> { %1381 = vadd.xlane.f32.xlu1 %v1380_v48  ;;  %1363 = vadd.xlane.f32.xlu0 %v1362_v50  ;;  %v1868_v48 = vsel %vm8429_vm1, %v1818_v26, 0.0  ;;  %v1819_v50 = vmul.f32 %v8427_v8, %v1787_v29  ;;  %v1315_v52 = vmul.f32 %v8427_v8, %v1283_v33  ;;  %v1022_v26 = vmax.f32 %v990_v5, 0.0 }
 0x18a   : >> { %v4936_v29 = vunpack.c.l.bf16 %v6094_v2  ;;  %v1862_v37 = vsel %vm8429_vm1, %v1816_v21, 0.0  ;;  %v4864_v2 = vunpack.c.l.bf16 %v6163_v3  ;;  %v1109_v47 = vsel %vm8429_vm1, %v1053_v38, 0.0 }
 0x18b   : >> { %v1871_v54 = vsel %vm8429_vm1, %v1819_v50, 0.0  ;;  %v1383_v62 = vsel %vm8429_vm1, %v1315_v52, 0.0  ;;  %v1310_v50 = vmul.f32 %v8427_v8, %v1278_v30 }
 0x18d   : >> { %1607 = vadd.xlane.f32.xlu1 %v1606_v57  ;;  %1378 = vadd.xlane.f32.xlu0 %v1377_v58  ;;  %v1127_v57 = vsel %vm8429_vm1, %v1059_v19, 0.0  ;;  %v1763_v58 = vadd.f32 %v4940_v31, %v6016_v11  ;;  %v985_v31 = vadd.f32 %v4740_v56, %v6123_v7 }
 0x18f   : >> { %v1795_v1 = vmax.f32 %v1763_v58, 0.0  ;;  %v1017_v19 = vmax.f32 %v985_v31, 0.0  ;;  %v4865_v31 = vunpack.c.h.bf16 %v6163_v3 }
 0x191   : >> { %1866 = vadd.xlane.f32.xlu1 %v1865_v63  ;;  %1616 = vadd.xlane.f32.xlu0 %v1615_v0  ;;  %v1826_v63 = vmul.f32 %v8427_v8, %v1794_v43  ;;  %v1570_v0 = vmul.f32 %v8427_v8, %v1538_v53  ;;  %v1827_v20 = vmul.f32 %v8427_v8, %v1795_v1  ;;  %v4741_v53 = vunpack.c.h.bf16 %v6143_v44 }
 0x192   : >> { %v1761_v43 = vadd.f32 %v4936_v29, %v6016_v11  ;;  %v1055_v58 = vmul.f32 %v8427_v8, %v1017_v19  ;;  %v4752_v44 = vunpack.c.l.bf16 %v6184_v45  ;;  %v6214_v29 = vld [vmem:[%s5791_s17 + $0xe8] sm:$0xff]  }
 0x193   : >> { %v1892_v46 = vsel %vm8429_vm1, %v1826_v63, 0.0  ;;  %v1636_v13 = vsel %vm8429_vm1, %v1570_v0, 0.0  ;;  %v1895_v33 = vsel %vm8429_vm1, %v1827_v20, 0.0  ;;  %v4737_v0 = vunpack.c.h.bf16 %v6116_v39 }
 0x194   : >> { %v1115_v1 = vsel %vm8429_vm1, %v1055_v58, 0.0  ;;  %v986_v32 = vadd.f32 %v4741_v53, %v6123_v7  ;;  %v4800_v39 = vunpack.c.l.bf16 %v6130_v28 }
 0x195   : >> { %1619 = vadd.xlane.f32.xlu1 %v1618_v16  ;;  %1860 = vadd.xlane.f32.xlu0 %v1859_v17  ;;  %v1252_v16 = vadd.f32 %v4813_v60, %v6016_v11  ;;  %v6154_v17 = vld [vmem:[%s5791_s17 + $0xd8] sm:$0xff]   ;;  %v984_v25 = vadd.f32 %v4737_v0, %v6123_v7  ;;  %v6257_v0 = vld [vmem:[%s5791_s17 + $0x188] sm:$0xff]  }
 0x196   : >> { %v4804_v41 = vunpack.c.l.bf16 %v6154_v17  ;;  %v4805_v14 = vunpack.c.h.bf16 %v6154_v17  ;;  %v1018_v20 = vmax.f32 %v986_v32, 0.0  ;;  %v1245_v3 = vadd.f32 %v4800_v39, %v6123_v7 }
 0x197   : >> { %v1284_v27 = vmax.f32 %v1252_v16, 0.0  ;;  %v6203_v16 = vld [vmem:[%s5791_s17 + $0x150] sm:$0xff]   ;;  %v1016_v19 = vmax.f32 %v984_v25, 0.0  ;;  %v4869_v32 = vunpack.c.h.bf16 %v6214_v29  ;;  %v928_v25 = vcombine.high %v5852_v42, %v5852_v42 }
 0x198   : >> { %v1247_v52 = vadd.f32 %v4804_v41, %v6123_v7  ;;  %v6211_v41 = vld [vmem:[%s5791_s17 + $0x148] sm:$0xff]   ;;  %v4816_v24 = vunpack.c.l.bf16 %v6203_v16  ;;  %v4817_v38 = vunpack.c.h.bf16 %v6203_v16  ;;  %v1248_v35 = vadd.f32 %v4805_v14, %v6123_v7 }
 0x199   : >> { %1634 = vadd.xlane.f32.xlu1 %v1633_v40  ;;  %1869 = vadd.xlane.f32.xlu0 %v1868_v48  ;;  %v1060_v40 = vmul.f32 %v8427_v8, %v1022_v26  ;;  %v4877_v48 = vunpack.c.h.bf16 %v6078_v55  ;;  %v1316_v36 = vmul.f32 %v8427_v8, %v1284_v27  ;;  %v4941_v55 = vunpack.c.h.bf16 %v6105_v23  ;;  %v6208_v26 = vld [vmem:[%s5791_s17 + $0xf0] sm:$0xff]  }
 0x19a   : >> { %v1279_v60 = vmax.f32 %v1247_v52, 0.0  ;;  %v6190_v23 = vrot.slane %v5866_v49, %v5844_v34 }
 0x19b   : >> { %v1130_v51 = vsel %vm8429_vm1, %v1060_v40, 0.0  ;;  %v1508_v63 = vadd.f32 %v4877_v48, %v6016_v11  ;;  %v1764_v5 = vadd.f32 %v4941_v55, %v6016_v11  ;;  %v4756_v40 = vunpack.c.l.bf16 %v6211_v41  ;;  %v6228_v48 = vld [vmem:[%s5791_s17 + $0x180] sm:$0xff]  }
 0x19c   : >> { %v1311_v56 = vmul.f32 %v8427_v8, %v1279_v60  ;;  %v991_v11 = vadd.f32 %v4752_v44, %v6190_v23  ;;  %v4760_v59 = vunpack.c.l.bf16 %v6228_v48  ;;  %v1277_v44 = vmax.f32 %v1245_v3, 0.0 }
 0x19d   : >> { %1872 = vadd.xlane.f32.xlu1 %v1871_v54  ;;  %1128 = vadd.xlane.f32.xlu0 %v1127_v57  ;;  %v1368_v54 = vsel %vm8429_vm1, %v1310_v50, 0.0  ;;  %v1386_v57 = vsel %vm8429_vm1, %v1316_v36, 0.0  ;;  %v1796_v21 = vmax.f32 %v1764_v5, 0.0  ;;  %v6231_v50 = vld [vmem:[%s5791_s17 + $0x158] sm:$0xff]   ;;  %v1056_v36 = vmul.f32 %v8427_v8, %v1018_v20 }
 0x19e   : >> { %v1371_v28 = vsel %vm8429_vm1, %v1311_v56, 0.0  ;;  %v1023_v55 = vmax.f32 %v991_v11, 0.0  ;;  %v4820_v58 = vunpack.c.l.bf16 %v6231_v50  ;;  %v6262_v5 = vld [vmem:[%s5791_s17 + $0x198] sm:$0xff]   ;;  %v4764_v20 = vunpack.c.l.bf16 %v6257_v0 }
 0x19f   : >> { %v1828_v53 = vmul.f32 %v8427_v8, %v1796_v21  ;;  %v1118_v56 = vsel %vm8429_vm1, %v1056_v36, 0.0  ;;  %v4757_v21 = vunpack.c.h.bf16 %v6211_v41  ;;  %v1973_v36 = vadd.s32 4294967288, %v8426_v10 }
 0x1a0   : >> { %v1254_v9 = vadd.f32 %v4817_v38, %v6190_v23  ;;  %v1980_v38 = vadd.s32 4294967280, %v8426_v10 }
 0x1a1   : >> { %1640 = vadd.xlane.f32.xlu1 %v1639_v61  ;;  %1384 = vadd.xlane.f32.xlu0 %v1383_v62  ;;  %v1793_v61 = vmax.f32 %v1761_v43, 0.0  ;;  %v1501_v62 = vadd.f32 %v4864_v2, %v6123_v7  ;;  %v4868_v2 = vunpack.c.l.bf16 %v6214_v29 }
 0x1a3   : >> { %v1825_v6 = vmul.f32 %v8427_v8, %v1793_v61 }
 0x1a5   : >> { %1893 = vadd.xlane.f32.xlu1 %v1892_v46  ;;  %1637 = vadd.xlane.f32.xlu0 %v1636_v13  ;;  %v1533_v46 = vmax.f32 %v1501_v62, 0.0  ;;  %v1540_v13 = vmax.f32 %v1508_v63, 0.0  ;;  %v1889_v17 = vsel %vm8429_vm1, %v1825_v6, 0.0  ;;  %v6254_v63 = vld [vmem:[%s5791_s17 + $0xf8] sm:$0xff]   ;;  %v1898_v6 = vsel %vm8429_vm1, %v1828_v53, 0.0 }
 0x1a6   : >> { %v4932_v39 = vunpack.c.l.bf16 %v6254_v63  ;;  %v6342_v53 = vsub.s32 %v1980_v38, %v5835_v22 }
 0x1a7   : >> { %v1565_v30 = vmul.f32 %v8427_v8, %v1533_v46  ;;  %v1572_v27 = vmul.f32 %v8427_v8, %v1540_v13  ;;  %v1054_v46 = vmul.f32 %v8427_v8, %v1016_v19  ;;  %v1061_v13 = vmul.f32 %v8427_v8, %v1023_v55 }
 0x1a9   : >> { %1896 = vadd.xlane.f32.xlu1 %v1895_v33  ;;  %1863 = vadd.xlane.f32.xlu0 %v1862_v37  ;;  %v4753_v33 = vunpack.c.h.bf16 %v6184_v45  ;;  %v4929_v37 = vunpack.c.h.bf16 %v6208_v26  ;;  %v1621_v52 = vsel %vm8429_vm1, %v1565_v30, 0.0  ;;  %v1642_v43 = vsel %vm8429_vm1, %v1572_v27, 0.0  ;;  %v6277_v30 = vld [vmem:[%s5791_s17 + $0x168] sm:$0xff]   ;;  %v6280_v27 = vld [vmem:[%s5791_s17 + $0x1a0] sm:$0xff]  }
 0x1aa   : >> { %v1502_v45 = vadd.f32 %v4865_v31, %v6123_v7  ;;  %v1309_v31 = vmul.f32 %v8427_v8, %v1277_v44  ;;  %v1112_v3 = vsel %vm8429_vm1, %v1054_v46, 0.0  ;;  %v1133_v42 = vsel %vm8429_vm1, %v1061_v13, 0.0 }
 0x1ab   : >> { %v6294_v44 = vrot.slane %v928_v25, %v5844_v34  ;;  %v6305_v13 = vsub.s32 %v1973_v36, %v5835_v22 }
 0x1ac   : >> { %v1534_v11 = vmax.f32 %v1502_v45, 0.0 }
 0x1ad   : >> { %1110 = vadd.xlane.f32.xlu1 %v1109_v47  ;;  %1131 = vadd.xlane.f32.xlu0 %v1130_v51  ;;  %v6237_v47 = vld [vmem:[%s5791_s17 + $0x190] sm:$0xff]   ;;  %v6240_v51 = vld [vmem:[%s5791_s17 + $0x160] sm:$0xff]  }
 0x1ae   : >> { %v4825_v60 = vunpack.c.h.bf16 %v6237_v47  ;;  %v4824_v61 = vunpack.c.l.bf16 %v6237_v47  ;;  %v4881_v62 = vunpack.c.h.bf16 %v6240_v51  ;;  %v4880_v14 = vunpack.c.l.bf16 %v6240_v51 }
 0x1b1   : >> { %1369 = vadd.xlane.f32.xlu1 %v1368_v54  ;;  %1387 = vadd.xlane.f32.xlu0 %v1386_v57  ;;  %v4761_v54 = vunpack.c.h.bf16 %v6228_v48  ;;  %v4928_v57 = vunpack.c.l.bf16 %v6208_v26  ;;  %v1987_v48 = vadd.s32 4294967272, %v8426_v10 }
 0x1b5   : >> { %1116 = vadd.xlane.f32.xlu1 %v1115_v1  ;;  %1875 = vadd.xlane.f32.xlu0 %v1874_v4  ;;  %v1280_v1 = vmax.f32 %v1248_v35, 0.0  ;;  %v1253_v4 = vadd.f32 %v4816_v24, %v6190_v23  ;;  %v992_v35 = vadd.f32 %v4753_v33, %v6190_v23 }
 0x1b7   : >> { %v1312_v24 = vmul.f32 %v8427_v8, %v1280_v1  ;;  %v1285_v19 = vmax.f32 %v1253_v4, 0.0  ;;  %v6298_v4 = vsub.s32 %v8426_v10, %v5835_v22 }
 0x1b9   : >> { %1372 = vadd.xlane.f32.xlu1 %v1371_v28  ;;  %1890 = vadd.xlane.f32.xlu0 %v1889_v17  ;;  %v4828_v28 = vunpack.c.l.bf16 %v6262_v5  ;;  %v4821_v17 = vunpack.c.h.bf16 %v6231_v50  ;;  %v1374_v46 = vsel %vm8429_vm1, %v1312_v24, 0.0  ;;  %v1317_v25 = vmul.f32 %v8427_v8, %v1285_v19 }
 0x1bd   : >> { %1622 = vadd.xlane.f32.xlu1 %v1621_v52  ;;  %1643 = vadd.xlane.f32.xlu0 %v1642_v43  ;;  %v1758_v52 = vadd.f32 %v4929_v37, %v6123_v7  ;;  %v2179_v43 = vadd.s32 4294967256, %v8426_v10  ;;  %v1566_v37 = vmul.f32 %v8427_v8, %v1534_v11  ;;  %v993_v11 = vadd.f32 %v4756_v40, %v6190_v23 }
 0x1be   : >> { %v1503_v40 = vadd.f32 %v4868_v2, %v6123_v7  ;;  %v1286_v2 = vmax.f32 %v1254_v9, 0.0  ;;  %v1757_v9 = vadd.f32 %v4928_v57, %v6123_v7 }
 0x1bf   : >> { %v6315_v15 = vsub.s32 %v2179_v43, %v5835_v22  ;;  %v1624_v19 = vsel %vm8429_vm1, %v1566_v37, 0.0  ;;  %v1389_v37 = vsel %vm8429_vm1, %v1317_v25, 0.0  ;;  %v1025_v45 = vmax.f32 %v993_v11, 0.0 }
 0x1c1   : >> { %1119 = vadd.xlane.f32.xlu1 %v1118_v56  ;;  %1899 = vadd.xlane.f32.xlu0 %v1898_v6  ;;  %v2174_v56 = vadd.s32 4294967264, %v8426_v10  ;;  %v1365_v6 = vsel %vm8429_vm1, %v1309_v31, 0.0  ;;  %v2378_v31 = vadd.s32 4294967224, %v8426_v10 }
 0x1c3   : >> { %v6322_v16 = vsub.s32 %v2174_v56, %v5835_v22  ;;  %v996_v56 = vadd.f32 %v4761_v54, %v6294_v44  ;;  %v2186_v54 = vadd.s32 4294967248, %v8426_v10  ;;  %v6358_v26 = vsub.s32 %v2378_v31, %v5835_v22 }
 0x1c4   : >> { %v1789_v31 = vmax.f32 %v1757_v9, 0.0 }
 0x1c5   : >> { %1113 = vadd.xlane.f32.xlu0 %v1112_v3  ;;  %1134 = vadd.xlane.f32.xlu1 %v1133_v42  ;;  %v1024_v3 = vmax.f32 %v992_v35, 0.0  ;;  %v1790_v42 = vmax.f32 %v1758_v52, 0.0  ;;  %v8371_v35 = vmov 0  }
 0x1c6   : >> { %v1334_v1 = vpop.xlane.xlu1 %1333  ;;  %v1075_v33 = vpop.xlane.xlu0 %1074  ;;  %5467 = vset.pattern.permute.xlu0 %v8371_v35  ;;  %5468 = vset.pattern.permute.xlu1 %v8371_v35 }
 0x1c7   : >> { %v1972_v52 = vrot.slane %v1075_v33, %v6298_v4  ;;  %v2193_v33 = vadd.s32 4294967240, %v8426_v10 }
 0x1c9   : >> { %1366 = vadd.xlane.f32.xlu0 %v1365_v6  ;;  %1375 = vadd.xlane.f32.xlu1 %v1374_v46  ;;  %v1062_v6 = vmul.f32 %v8427_v8, %v1024_v3  ;;  %v1822_v46 = vmul.f32 %v8427_v8, %v1790_v42  ;;  %v1535_v3 = vmax.f32 %v1503_v40, 0.0  ;;  %v2183_v42 = vrot.slane %v1334_v1, %v6315_v15 }
 0x1ca   : >> { %v6318_v24 = vpop.xlane.xlu1 %1589  ;;  %v1078_v36 = vpop.xlane.xlu0 %1077  ;;  %v1063_v40 = vmul.f32 %v8427_v8, %v1025_v45  ;;  %v6361_v57 = vsub.s32 %v2193_v33, %v5835_v22  ;;  %v2373_v45 = vadd.s32 4294967232, %v8426_v10 }
 0x1cb   : >> { %v1977_v43 = vrot.slane %v1078_v36, %v6305_v13  ;;  %v2577_v36 = vadd.s32 4294967192, %v8426_v10  ;;  %v1880_v38 = vsel %vm8429_vm1, %v1822_v46, 0.0 }
 0x1cd   : >> { %v1979_v55 = vsel %vm1978_vm3, %v1977_v43, %v1972_v52  ;;  %1625 = vadd.xlane.f32.xlu0 %v1624_v19  ;;  %1390 = vadd.xlane.f32.xlu1 %v1389_v37  ;;  %v1028_v19 = vmax.f32 %v996_v56, 0.0  ;;  %v1255_v52 = vadd.f32 %v4820_v58, %v6190_v23  ;;  %v1136_v43 = vsel %vm8429_vm1, %v1062_v6, 0.0 }
 0x1ce   : >> { %v1340_v25 = vpop.xlane.xlu1 %1339  ;;  %v1331_v35 = vpop.xlane.xlu0 %1330  ;;  %v1318_v37 = vmul.f32 %v8427_v8, %v1286_v2  ;;  %v6367_v56 = vsub.s32 %v2186_v54, %v5835_v22  ;;  %v1567_v6 = vmul.f32 %v8427_v8, %v1535_v3  ;;  %v1258_v3 = vadd.f32 %v4825_v60, %v6294_v44 }
 0x1cf   : >> { %v2178_v11 = vrot.slane %v1331_v35, %v6322_v16  ;;  %v1066_v2 = vmul.f32 %v8427_v8, %v1028_v19  ;;  %v1287_v33 = vmax.f32 %v1255_v52, 0.0  ;;  %v2584_v19 = vadd.s32 4294967184, %v8426_v10 }
 0x1d0   : >> { %v1392_v54 = vsel %vm8429_vm1, %v1318_v37, 0.0  ;;  %v1627_v52 = vsel %vm8429_vm1, %v1567_v6, 0.0  ;;  %v1821_v60 = vmul.f32 %v8427_v8, %v1789_v31  ;;  %v1510_v6 = vadd.f32 %v4881_v62, %v6190_v23 }
 0x1d1   : >> { %v2185_v1 = vsel %vm2184_vm4, %v2183_v42, %v2178_v11  ;;  %1137 = vadd.xlane.f32.xlu0 %v1136_v43  ;;  %1881 = vadd.xlane.f32.xlu1 %v1880_v38  ;;  %v995_v42 = vadd.f32 %v4760_v59, %v6294_v44  ;;  %v6377_v11 = vsub.s32 %v2577_v36, %v5835_v22  ;;  %v1139_v43 = vsel %vm8429_vm1, %v1063_v40, 0.0 }
 0x1d2   : >> { %v6364_v58 = vpop.xlane.xlu1 %1845  ;;  %v1081_v35 = vpop.xlane.xlu0 %1080  ;;  %v6391_v38 = vsub.s32 %v2373_v45, %v5835_v22  ;;  %v1148_v37 = vsel %vm8429_vm1, %v1066_v2, 0.0  ;;  %v1319_v40 = vmul.f32 %v8427_v8, %v1287_v33  ;;  %v2591_v31 = vadd.s32 4294967176, %v8426_v10 }
 0x1d3   : >> { %v1984_v46 = vrot.slane %v1081_v35, %v6342_v53  ;;  %v1027_v35 = vmax.f32 %v995_v42, 0.0  ;;  %v6407_v2 = vsub.s32 %v1987_v48, %v5835_v22  ;;  %v2385_v62 = vadd.s32 4294967216, %v8426_v10 }
 0x1d4   : >> { %v2382_v42 = vrot.slane %v6318_v24, %v6358_v26  ;;  %v1395_v48 = vsel %vm8429_vm1, %v1319_v40, 0.0  ;;  %v6429_v29 = vsub.s32 %v2584_v19, %v5835_v22  ;;  %v4933_v40 = vunpack.c.h.bf16 %v6254_v63 }
 0x1d5   : >> { %v1986_v9 = vsel %vm1985_vm5, %v1984_v46, %v1979_v55  ;;  %1393 = vadd.xlane.f32.xlu0 %v1392_v54  ;;  %1140 = vadd.xlane.f32.xlu1 %v1139_v43  ;;  %v2197_v46 = vrot.slane %v1340_v25, %v6361_v57  ;;  %v1290_v54 = vmax.f32 %v1258_v3, 0.0  ;;  %v1257_v43 = vadd.f32 %v4824_v61, %v6294_v44 }
 0x1d6   : >> { %v6387_v59 = vpop.xlane.xlu1 %1848  ;;  %v1337_v36 = vpop.xlane.xlu0 %1336  ;;  %v1877_v61 = vsel %vm8429_vm1, %v1821_v60, 0.0  ;;  %v1759_v60 = vadd.f32 %v4932_v39, %v6123_v7  ;;  %v1509_v39 = vadd.f32 %v4880_v14, %v6190_v23  ;;  %v2392_v14 = vadd.s32 4294967208, %v8426_v10 }
 0x1d7   : >> { %v2190_v55 = vrot.slane %v1337_v36, %v6367_v56  ;;  %v1065_v36 = vmul.f32 %v8427_v8, %v1027_v35 }
 0x1d9   : >> { %v2192_v45 = vsel %vm2191_vm6, %v2190_v55, %v2185_v1  ;;  %1628 = vadd.xlane.f32.xlu0 %v1627_v52  ;;  %1149 = vadd.xlane.f32.xlu1 %v1148_v37  ;;  %v1504_v1 = vadd.f32 %v4869_v32, %v6123_v7  ;;  %v1322_v52 = vmul.f32 %v8427_v8, %v1290_v54  ;;  %v1289_v55 = vmax.f32 %v1257_v43, 0.0 }
 0x1da   : >> { %v6410_v25 = vsel %vm2198_vm7, %v2197_v46, %v2192_v45  ;;  %v6412_v33 = vpop.xlane.xlu1 %1851  ;;  %v1587_v47 = vpop.xlane.xlu0 %1586  ;;  %v1542_v37 = vmax.f32 %v1510_v6, 0.0  ;;  %v6432_v32 = vsub.s32 %v2591_v31, %v5835_v22  ;;  %v2572_v54 = vadd.s32 4294967200, %v8426_v10 }
 0x1db   : >> { %v2377_v3 = vrot.slane %v1587_v47, %v6391_v38  ;;  %v1536_v43 = vmax.f32 %v1504_v1, 0.0  ;;  %v1145_v6 = vsel %vm8429_vm1, %v1065_v36, 0.0  ;;  %v6443_v45 = vsub.s32 %v2385_v62, %v5835_v22 }
 0x1dc   : >> { %v997_v31 = vadd.f32 %v4764_v20, %v6294_v44  ;;  %v1404_v47 = vsel %vm8429_vm1, %v1322_v52, 0.0  ;;  %v1574_v1 = vmul.f32 %v8427_v8, %v1542_v37  ;;  %v6456_v20 = vsub.s32 %v2572_v54, %v5835_v22 }
 0x1dd   : >> { %v2384_v24 = vsel %vm2383_vm8, %v2382_v42, %v2377_v3  ;;  %1878 = vadd.xlane.f32.xlu0 %v1877_v61  ;;  %1396 = vadd.xlane.f32.xlu1 %v1395_v48  ;;  %v1321_v61 = vmul.f32 %v8427_v8, %v1289_v55  ;;  %v1791_v42 = vmax.f32 %v1759_v60, 0.0  ;;  %v1568_v48 = vmul.f32 %v8427_v8, %v1536_v43 }
 0x1de   : >> { %v1084_v35 = vpop.xlane.xlu0 %1083  ;;  %v1087_v46 = vpop.xlane.xlu1 %1086  ;;  %v1541_v36 = vmax.f32 %v1509_v39, 0.0  ;;  %v994_v52 = vadd.f32 %v4757_v21, %v6190_v23  ;;  %v1029_v60 = vmax.f32 %v997_v31, 0.0  ;;  %v1648_v54 = vsel %vm8429_vm1, %v1574_v1, 0.0  ;;  %v6484_v1 = vld [vmem:[%s5791_s17 + $0x170] sm:$0xff]  }
 0x1df   : >> { %v1991_v19 = vrot.slane %v1084_v35, %v6407_v2  ;;  %v1401_v35 = vsel %vm8429_vm1, %v1321_v61, 0.0  ;;  %v1259_v43 = vadd.f32 %v4828_v28, %v6294_v44  ;;  %v1630_v31 = vsel %vm8429_vm1, %v1568_v48, 0.0 }
 0x1e0   : >> { %v1256_v61 = vadd.f32 %v4821_v17, %v6190_v23  ;;  %v8433_v28 = vunpack.c.l.bf16 %v6277_v30  ;;  %v2588_v48 = vrot.slane %v6387_v59, %v6429_v29 }
 0x1e1   : >> { %v6452_v51 = vsel %vm1992_vm9, %v1991_v19, %v1986_v9  ;;  %1146 = vadd.xlane.f32.xlu0 %v1145_v6  ;;  %1405 = vadd.xlane.f32.xlu1 %v1404_v47  ;;  %v1997_v9 = vrot.slane %v1087_v46, %v6298_v4  ;;  %v1823_v19 = vmul.f32 %v8427_v8, %v1791_v42  ;;  %v1026_v47 = vmax.f32 %v994_v52, 0.0 }
 0x1e2   : >> { %v1593_v62 = vpop.xlane.xlu0 %1592  ;;  %v1090_v3 = vpop.xlane.xlu1 %1089  ;;  %v6474_v46 = vsub.s32 %v2392_v14, %v5835_v22  ;;  %v2581_v42 = vrot.slane %v6364_v58, %v6377_v11  ;;  %v1291_v17 = vmax.f32 %v1259_v43, 0.0  ;;  %v2595_v52 = vrot.slane %v6412_v33, %v6432_v32 }
 0x1e3   : >> { %v2389_v55 = vrot.slane %v1593_v62, %v6443_v45  ;;  %v2001_v37 = vrot.slane %v1090_v3, %v6305_v13  ;;  %v1573_v62 = vmul.f32 %v8427_v8, %v1541_v36  ;;  %v1067_v3 = vmul.f32 %v8427_v8, %v1029_v60 }
 0x1e4   : >> { %v1883_v50 = vsel %vm8429_vm1, %v1823_v19, 0.0  ;;  %v4945_v58 = vunpack.c.h.bf16 %v6484_v1  ;;  %v1064_v59 = vmul.f32 %v8427_v8, %v1026_v47  ;;  %v1288_v60 = vmax.f32 %v1256_v61, 0.0 }
 0x1e5   : >> { %v2391_v41 = vsel %vm2390_vm10, %v2389_v55, %v2384_v24  ;;  %v2002_v21 = vsel %vm1978_vm3, %v2001_v37, %v1997_v9  ;;  %1402 = vadd.xlane.f32.xlu0 %v1401_v35  ;;  %1649 = vadd.xlane.f32.xlu1 %v1648_v54  ;;  %v1511_v24 = vadd.f32 %v8433_v28, %v6190_v23  ;;  %v8434_v35 = vunpack.c.l.bf16 %v6280_v27 }
 0x1e6   : >> { %v1843_v39 = vpop.xlane.xlu0 %1842  ;;  %v1346_v6 = vpop.xlane.xlu1 %1345  ;;  %v1151_v28 = vsel %vm8429_vm1, %v1067_v3, 0.0  ;;  %v8435_v47 = vunpack.c.h.bf16 %v6280_v27  ;;  %v1320_v3 = vmul.f32 %v8427_v8, %v1288_v60  ;;  %v1760_v27 = vadd.f32 %v4933_v40, %v6123_v7 }
 0x1e7   : >> { %v2576_v14 = vrot.slane %v1843_v39, %v6456_v20  ;;  %v1513_v54 = vadd.f32 %v8434_v35, %v6294_v44  ;;  %v1543_v43 = vmax.f32 %v1511_v24, 0.0  ;;  %v4765_v40 = vunpack.c.h.bf16 %v6257_v0 }
 0x1e8   : >> { %v1514_v61 = vadd.f32 %v8435_v47, %v6294_v44 }
 0x1e9   : >> { %v2583_v9 = vsel %vm8386_vm11, %v2581_v42, %v2576_v14  ;;  %1631 = vadd.xlane.f32.xlu0 %v1630_v31  ;;  %1884 = vadd.xlane.f32.xlu1 %v1883_v50  ;;  %v1645_v31 = vsel %vm8429_vm1, %v1573_v62, 0.0  ;;  %v1323_v42 = vmul.f32 %v8427_v8, %v1291_v17  ;;  %v6515_v14 = vld [vmem:[%s5791_s17 + $0x1a8] sm:$0xff]   ;;  %v1545_v17 = vmax.f32 %v1513_v54, 0.0 }
 0x1ea   : >> { %v2590_v36 = vsel %vm2589_vm12, %v2588_v48, %v2583_v9  ;;  %v1596_v55 = vpop.xlane.xlu0 %1595  ;;  %v1093_v37 = vpop.xlane.xlu1 %1092  ;;  %v2207_v9 = vrot.slane %v1346_v6, %v6315_v15  ;;  %v1575_v35 = vmul.f32 %v8427_v8, %v1543_v43  ;;  %v1546_v7 = vmax.f32 %v1514_v61, 0.0 }
 0x1eb   : >> { %v2396_v33 = vrot.slane %v1596_v55, %v6474_v46  ;;  %v2006_v19 = vrot.slane %v1093_v37, %v6342_v53  ;;  %v6506_v39 = vsel %vm2596_vm13, %v2595_v52, %v2590_v36  ;;  %v4944_v52 = vunpack.c.l.bf16 %v6484_v1  ;;  %v6533_v55 = vld [vmem:[%s5791_s17 + $0x178] sm:$0xff]  }
 0x1ec   : >> { %v4892_v36 = vunpack.c.l.bf16 %v6515_v14  ;;  %v1142_v37 = vsel %vm8429_vm1, %v1064_v59, 0.0  ;;  %v1407_v60 = vsel %vm8429_vm1, %v1323_v42, 0.0  ;;  %v1577_v54 = vmul.f32 %v8427_v8, %v1545_v17  ;;  %v6547_v42 = vld [vmem:[%s5791_s17 + $0x1b0] sm:$0xff]  }
 0x1ed   : >> { %v6518_v48 = vsel %vm2397_vm14, %v2396_v33, %v2391_v41  ;;  %v6521_v24 = vsel %vm1985_vm5, %v2006_v19, %v2002_v21  ;;  %1646 = vadd.xlane.f32.xlu0 %v1645_v31  ;;  %1152 = vadd.xlane.f32.xlu1 %v1151_v28  ;;  %v1766_v21 = vadd.f32 %v4945_v58, %v6190_v23  ;;  %v1398_v58 = vsel %vm8429_vm1, %v1320_v3, 0.0 }
 0x1ee   : >> { %v1343_v62 = vpop.xlane.xlu0 %1342  ;;  %v1102_v50 = vpop.xlane.xlu1 %1101  ;;  %v1792_v33 = vmax.f32 %v1760_v27, 0.0  ;;  %v4948_v59 = vunpack.c.l.bf16 %v6533_v55  ;;  %v1651_v0 = vsel %vm8429_vm1, %v1575_v35, 0.0  ;;  %v1578_v47 = vmul.f32 %v8427_v8, %v1546_v7  ;;  %v6566_v7 = vld [vmem:[%s5791_s17 + $0x1b8] sm:$0xff]  }
 0x1ef   : >> { %v2203_v41 = vrot.slane %v1343_v62, %v6322_v16  ;;  %v2020_v19 = vrot.slane %v1102_v50, %v6305_v13  ;;  %v1798_v28 = vmax.f32 %v1766_v21, 0.0  ;;  %v1765_v61 = vadd.f32 %v4944_v52, %v6190_v23 }
 0x1f0   : >> { %v1515_v62 = vadd.f32 %v4892_v36, %v6294_v44  ;;  %v4829_v21 = vunpack.c.h.bf16 %v6262_v5  ;;  %v4953_v52 = vunpack.c.h.bf16 %v6547_v42 }
 0x1f1   : >> { %v2208_v63 = vsel %vm2184_vm4, %v2207_v9, %v2203_v41  ;;  %1143 = vadd.xlane.f32.xlu0 %v1142_v37  ;;  %1408 = vadd.xlane.f32.xlu1 %v1407_v60  ;;  %v1657_v9 = vsel %vm8429_vm1, %v1577_v54, 0.0  ;;  %v998_v41 = vadd.f32 %v4765_v40, %v6294_v44  ;;  %v1824_v60 = vmul.f32 %v8427_v8, %v1792_v33 }
 0x1f2   : >> { %v1099_v6 = vpop.xlane.xlu0 %1098  ;;  %v1349_v1 = vpop.xlane.xlu1 %1348  ;;  %v1830_v35 = vmul.f32 %v8427_v8, %v1798_v28  ;;  %v1767_v40 = vadd.f32 %v4948_v59, %v6190_v23  ;;  %v930_v54 = vcombine.high %v5866_v49, %v5866_v49  ;;  %v4956_v28 = vunpack.c.l.bf16 %v6566_v7 }
 0x1f3   : >> { %v2016_v43 = vrot.slane %v1099_v6, %v6298_v4  ;;  %v2212_v31 = vrot.slane %v1349_v1, %v6367_v56  ;;  %v1797_v6 = vmax.f32 %v1765_v61, 0.0  ;;  %v1547_v1 = vmax.f32 %v1515_v62, 0.0 }
 0x1f4   : >> { %v1886_v61 = vsel %vm8429_vm1, %v1824_v60, 0.0 }
 0x1f5   : >> { %v2021_v3 = vsel %vm1978_vm3, %v2020_v19, %v2016_v43  ;;  %v6555_v50 = vsel %vm2191_vm6, %v2212_v31, %v2208_v63  ;;  %1399 = vadd.xlane.f32.xlu0 %v1398_v58  ;;  %1652 = vadd.xlane.f32.xlu1 %v1651_v0  ;;  %v1660_v63 = vsel %vm8429_vm1, %v1578_v47, 0.0  ;;  %v4885_v58 = vunpack.c.h.bf16 %v6277_v30  ;;  %v6579_v0 = vld [vmem:[%s5791_s17 + $0x1c0] sm:$0xff]  }
 0x1f6   : >> { %v1355_v17 = vpop.xlane.xlu0 %1354  ;;  %v1358_v27 = vpop.xlane.xlu1 %1357  ;;  %v1030_v43 = vmax.f32 %v998_v41, 0.0  ;;  %v1260_v31 = vadd.f32 %v4829_v21, %v6294_v44  ;;  %v1904_v30 = vsel %vm8429_vm1, %v1830_v35, 0.0  ;;  %v1829_v62 = vmul.f32 %v8427_v8, %v1797_v6 }
 0x1f7   : >> { %v2222_v37 = vrot.slane %v1355_v17, %v6322_v16  ;;  %v2226_v36 = vrot.slane %v1358_v27, %v6315_v15  ;;  %v1579_v49 = vmul.f32 %v8427_v8, %v1547_v1  ;;  %v1799_v17 = vmax.f32 %v1767_v40, 0.0 }
 0x1f8   : >> { %v1770_v27 = vadd.f32 %v4953_v52, %v6294_v44  ;;  %v4952_v41 = vunpack.c.l.bf16 %v6547_v42  ;;  %v4769_v21 = vunpack.c.h.bf16 %v6579_v0  ;;  %v1068_v35 = vmul.f32 %v8427_v8, %v1030_v43  ;;  %v6602_v42 = vld [vmem:[%s5791_s17 + $0x1d0] sm:$0xff]  }
 0x1f9   : >> { %v6571_v5 = vsel %vm2184_vm4, %v2226_v36, %v2222_v37  ;;  %1658 = vadd.xlane.f32.xlu0 %v1657_v9  ;;  %1661 = vadd.xlane.f32.xlu1 %v1660_v63  ;;  %v6594_v37 = vrot.slane %v930_v54, %v5844_v34  ;;  %v1292_v63 = vmax.f32 %v1260_v31, 0.0  ;;  %v1512_v1 = vadd.f32 %v4885_v58, %v6190_v23 }
 0x1fa   : >> { %v1599_v33 = vpop.xlane.xlu0 %1598  ;;  %v1602_v19 = vpop.xlane.xlu1 %1601  ;;  %v1771_v40 = vadd.f32 %v4956_v28, %v6294_v44  ;;  %v1663_v54 = vsel %vm8429_vm1, %v1579_v49, 0.0 }
 0x1fb   : >> { %v2402_v59 = vrot.slane %v1599_v33, %v6391_v38  ;;  %v2406_v47 = vrot.slane %v1602_v19, %v6358_v26  ;;  %v1901_v33 = vsel %vm8429_vm1, %v1829_v62, 0.0  ;;  %v1831_v19 = vmul.f32 %v8427_v8, %v1799_v17 }
 0x1fc   : >> { %v4833_v62 = vunpack.c.h.bf16 %v6602_v42  ;;  %v1324_v49 = vmul.f32 %v8427_v8, %v1292_v63  ;;  %v1803_v17 = vmax.f32 %v1771_v40, 0.0 }
 0x1fd   : >> { %v6589_v9 = vsel %vm2383_vm8, %v2406_v47, %v2402_v59  ;;  %1887 = vadd.xlane.f32.xlu0 %v1886_v61  ;;  %1905 = vadd.xlane.f32.xlu1 %v1904_v30  ;;  %v1802_v59 = vmax.f32 %v1770_v27, 0.0  ;;  %v1154_v61 = vsel %vm8429_vm1, %v1068_v35, 0.0  ;;  %v4893_v30 = vunpack.c.h.bf16 %v6515_v14  ;;  %v6624_v27 = vld [vmem:[%s5791_s17 + $0x1c8] sm:$0xff]  }
 0x1fe   : >> { %v1105_v36 = vpop.xlane.xlu0 %1104  ;;  %v1096_v60 = vpop.xlane.xlu1 %1095  ;;  %v1000_v35 = vadd.f32 %v4769_v21, %v6594_v37  ;;  %v4772_v40 = vunpack.c.l.bf16 %v6624_v27 }
 0x1ff   : >> { %v2025_v52 = vrot.slane %v1105_v36, %v6342_v53  ;;  %v2011_v6 = vrot.slane %v1096_v60, %v6407_v2  ;;  %v1834_v36 = vmul.f32 %v8427_v8, %v1802_v59  ;;  %v1769_v60 = vadd.f32 %v4952_v41, %v6294_v44 }
 0x200   : >> { %v1410_v41 = vsel %vm8429_vm1, %v1324_v49, 0.0  ;;  %v1032_v59 = vmax.f32 %v1000_v35, 0.0 }
 0x201   : >> { %v6608_v43 = vsel %vm1985_vm5, %v2025_v52, %v2021_v3  ;;  %v2012_v31 = vsel %vm1992_vm9, %v2011_v6, %v6521_v24  ;;  %1902 = vadd.xlane.f32.xlu0 %v1901_v33  ;;  %1664 = vadd.xlane.f32.xlu1 %v1663_v54  ;;  %v1544_v24 = vmax.f32 %v1512_v1, 0.0  ;;  %v4949_v1 = vunpack.c.h.bf16 %v6533_v55  ;;  %v5252_v54 = vld [vmem:[%s5791_s17 + $0x1d8] sm:$0xff]  }
 0x202   : >> { %v6614_v58 = vsel %vm8385_vm15, %v2012_v31, %v6452_v51  ;;  %v1352_v28 = vpop.xlane.xlu0 %1351  ;;  %v6616_v47 = vpop.xlane.xlu1 %1360  ;;  %v1907_v51 = vsel %vm8429_vm1, %v1831_v19, 0.0  ;;  %v1516_v33 = vadd.f32 %v4893_v30, %v6294_v44  ;;  %v1801_v19 = vmax.f32 %v1769_v60, 0.0 }
 0x203   : >> { %v2217_v3 = vrot.slane %v1352_v28, %v6361_v57  ;;  %v1576_v21 = vmul.f32 %v8427_v8, %v1544_v24  ;;  %v1262_v31 = vadd.f32 %v4833_v62, %v6594_v37  ;;  %v1001_v24 = vadd.f32 %v4772_v40, %v6594_v37 }
 0x204   : >> { %v1548_v30 = vmax.f32 %v1516_v33, 0.0  ;;  %v1833_v62 = vmul.f32 %v8427_v8, %v1801_v19  ;;  %v1070_v60 = vmul.f32 %v8427_v8, %v1032_v59  ;;  %v4832_v40 = vunpack.c.l.bf16 %v6602_v42 }
 0x205   : >> { %v2218_v14 = vsel %vm2198_vm7, %v2217_v3, %v6555_v50  ;;  %1155 = vadd.xlane.f32.xlu0 %v1154_v61  ;;  %1908 = vadd.xlane.f32.xlu1 %v1907_v51  ;;  %v1835_v50 = vmul.f32 %v8427_v8, %v1803_v17  ;;  %v1768_v61 = vadd.f32 %v4949_v1, %v6190_v23  ;;  %v4836_v3 = vunpack.c.l.bf16 %v5252_v54  ;;  %v5267_v51 = vld [vmem:[%s5791_s17 + $0x1e0] sm:$0xff]  }
 0x206   : >> { %v6634_v63 = vsel %vm8385_vm15, %v2218_v14, %v6410_v25  ;;  %v6636_v52 = vpop.xlane.xlu0 %1610  ;;  %v6638_v6 = vpop.xlane.xlu1 %1604  ;;  %v1916_v25 = vsel %vm8429_vm1, %v1834_v36, 0.0  ;;  %v1654_v49 = vsel %vm8429_vm1, %v1576_v21, 0.0  ;;  %v4768_v17 = vunpack.c.l.bf16 %v6579_v0 }
 0x207   : >> { %v1919_v36 = vsel %vm8429_vm1, %v1835_v50, 0.0  ;;  %v1294_v35 = vmax.f32 %v1262_v31, 0.0  ;;  %v1800_v1 = vmax.f32 %v1768_v61, 0.0  ;;  %v4897_v21 = vunpack.c.h.bf16 %v5267_v51 }
 0x208   : >> { %v1033_v50 = vmax.f32 %v1001_v24, 0.0  ;;  %v999_v33 = vadd.f32 %v4768_v17, %v6594_v37  ;;  %v1160_v19 = vsel %vm8429_vm1, %v1070_v60, 0.0  ;;  %v1580_v59 = vmul.f32 %v8427_v8, %v1548_v30 }
 0x209   : >> { %1411 = vadd.xlane.f32.xlu0 %v1410_v41  ;;  %1917 = vadd.xlane.f32.xlu1 %v1916_v25  ;;  %v1263_v41 = vadd.f32 %v4836_v3, %v6594_v37  ;;  %v1913_v25 = vsel %vm8429_vm1, %v1833_v62, 0.0  ;;  %v1326_v31 = vmul.f32 %v8427_v8, %v1294_v35  ;;  %v4837_v42 = vunpack.c.h.bf16 %v5252_v54 }
 0x20a   : >> { %v6649_v55 = vpop.xlane.xlu0 %1854  ;;  %v6651_v28 = vpop.xlane.xlu1 %1613  ;;  %v4896_v3 = vunpack.c.l.bf16 %v5267_v51  ;;  %v1832_v30 = vmul.f32 %v8427_v8, %v1800_v1  ;;  %v1518_v62 = vadd.f32 %v4897_v21, %v6594_v37  ;;  %v1031_v60 = vmax.f32 %v999_v33, 0.0 }
 0x20b   : >> { %v2231_v54 = vrot.slane %v6616_v47, %v6367_v56  ;;  %v1666_v51 = vsel %vm8429_vm1, %v1580_v59, 0.0  ;;  %v1261_v35 = vadd.f32 %v4832_v40, %v6594_v37  ;;  %v1264_v1 = vadd.f32 %v4837_v42, %v6594_v37 }
 0x20c   : >> { %v1517_v33 = vadd.f32 %v4896_v3, %v6594_v37 }
 0x20d   : >> { %1655 = vadd.xlane.f32.xlu0 %v1654_v49  ;;  %1920 = vadd.xlane.f32.xlu1 %v1919_v36  ;;  %v1295_v36 = vmax.f32 %v1263_v41, 0.0  ;;  %v1293_v42 = vmax.f32 %v1261_v35, 0.0 }
 0x20e   : >> { %v1108_v14 = vpop.xlane.xlu0 %1107  ;;  %v6661_v23 = vpop.xlane.xlu1 %1857 }
 0x20f   : >> { %v2030_v0 = vrot.slane %v1108_v14, %v6407_v2  ;;  %v6690_v14 = vld [vmem:[%s5791_s17 + $0x1e8] sm:$0xff]   ;;  %v1327_v47 = vmul.f32 %v8427_v8, %v1295_v36  ;;  %v5283_v36 = vld [vmem:[%s5791_s17 + $0x1f0] sm:$0xff]  }
 0x210   : >> { %v4900_v59 = vunpack.c.l.bf16 %v6690_v14  ;;  %v4961_v35 = vunpack.c.h.bf16 %v5283_v36 }
 0x211   : >> { %v2031_v61 = vsel %vm1992_vm9, %v2030_v0, %v6608_v43  ;;  %1914 = vadd.xlane.f32.xlu0 %v1913_v25  ;;  %1161 = vadd.xlane.f32.xlu1 %v1160_v19  ;;  %v1071_v43 = vmul.f32 %v8427_v8, %v1033_v50  ;;  %v1910_v0 = vsel %vm8429_vm1, %v1832_v30, 0.0  ;;  %v1550_v50 = vmax.f32 %v1518_v62, 0.0 }
 0x212   : >> { %v6675_v49 = vsel %vm8384_vm2, %v2031_v61, %v6614_v58  ;;  %v6677_v24 = vpop.xlane.xlu1 %1125  ;;  %v6679_v17 = vpop.xlane.xlu0 %1122  ;;  %v1416_v58 = vsel %vm8429_vm1, %v1326_v31, 0.0  ;;  %v1069_v19 = vmul.f32 %v8427_v8, %v1031_v60  ;;  %v2232_v31 = vsel %vm2191_vm6, %v2231_v54, %v6571_v5 }
 0x213   : >> { %8436 = vst [vmem:[#allocation26_spill] sm:$0xff] %v6675_v49  ;;  %v1163_v40 = vsel %vm8429_vm1, %v1071_v43, 0.0  ;;  %v2411_v61 = vrot.slane %v6638_v6, %v6443_v45  ;;  %v4773_v30 = vunpack.c.h.bf16 %v6624_v27  ;;  %v1296_v62 = vmax.f32 %v1264_v1, 0.0 }
 0x214   : >> { %v1419_v5 = vsel %vm8429_vm1, %v1327_v47, 0.0  ;;  %v1582_v6 = vmul.f32 %v8427_v8, %v1550_v50  ;;  %v1549_v54 = vmax.f32 %v1517_v33, 0.0 }
 0x215   : >> { %1667 = vadd.xlane.f32.xlu0 %v1666_v51  ;;  %1417 = vadd.xlane.f32.xlu1 %v1416_v58  ;;  %v1519_v58 = vadd.f32 %v4900_v59, %v6594_v37  ;;  %v2412_v1 = vsel %vm2390_vm10, %v2411_v61, %v6589_v9  ;;  %v1328_v9 = vmul.f32 %v8427_v8, %v1296_v62 }
 0x216   : >> { %v6693_v41 = vpop.xlane.xlu1 %1381  ;;  %v1364_v21 = vpop.xlane.xlu0 %1363  ;;  %v1672_v59 = vsel %vm8429_vm1, %v1582_v6, 0.0  ;;  %v1774_v61 = vadd.f32 %v4961_v35, %v6594_v37 }
 0x217   : >> { %v2236_v25 = vrot.slane %v1364_v21, %v6361_v57  ;;  %v4960_v21 = vunpack.c.l.bf16 %v5283_v36  ;;  %v1422_v6 = vsel %vm8429_vm1, %v1328_v9, 0.0 }
 0x219   : >> { %v2237_v3 = vsel %vm2198_vm7, %v2236_v25, %v2232_v31  ;;  %1911 = vadd.xlane.f32.xlu0 %v1910_v0  ;;  %1164 = vadd.xlane.f32.xlu1 %v1163_v40  ;;  %v1325_v0 = vmul.f32 %v8427_v8, %v1293_v42  ;;  %v1002_v25 = vadd.f32 %v4773_v30, %v6594_v37  ;;  %v1551_v31 = vmax.f32 %v1519_v58, 0.0 }
 0x21a   : >> { %v6711_v43 = vsel %vm8384_vm2, %v2237_v3, %v6634_v63  ;;  %v1608_v60 = vpop.xlane.xlu1 %1607  ;;  %v6713_v51 = vpop.xlane.xlu0 %1378  ;;  %v1157_v63 = vsel %vm8429_vm1, %v1069_v19, 0.0  ;;  %v1581_v19 = vmul.f32 %v8427_v8, %v1549_v54  ;;  %v1773_v42 = vadd.f32 %v4960_v21, %v6594_v37 }
 0x21b   : >> { %8437 = vst [vmem:[#allocation27_spill] sm:$0xff] %v6711_v43  ;;  %v2416_v27 = vrot.slane %v1608_v60, %v6474_v46  ;;  %v1413_v30 = vsel %vm8429_vm1, %v1325_v0, 0.0  ;;  %v1034_v36 = vmax.f32 %v1002_v25, 0.0  ;;  %v4901_v3 = vunpack.c.h.bf16 %v6690_v14  ;;  %v5284_v60 = vld [vmem:[%s5791_s17 + $0x1f8] sm:$0xff]  }
 0x21c   : >> { %v1669_v54 = vsel %vm8429_vm1, %v1581_v19, 0.0  ;;  %v1806_v58 = vmax.f32 %v1774_v61, 0.0  ;;  %v1805_v35 = vmax.f32 %v1773_v42, 0.0  ;;  %v4965_v21 = vunpack.c.h.bf16 %v5284_v60 }
 0x21d   : >> { %v2417_v47 = vsel %vm2397_vm14, %v2416_v27, %v2412_v1  ;;  %1420 = vadd.xlane.f32.xlu1 %v1419_v5  ;;  %1158 = vadd.xlane.f32.xlu0 %v1157_v63  ;;  %v1583_v27 = vmul.f32 %v8427_v8, %v1551_v31  ;;  %v1520_v1 = vadd.f32 %v4901_v3, %v6594_v37  ;;  %v4964_v63 = vunpack.c.l.bf16 %v5284_v60 }
 0x21e   : >> { %v6727_v50 = vsel %vm8385_vm15, %v2417_v47, %v6518_v48  ;;  %v6729_v33 = vpop.xlane.xlu1 %1866  ;;  %v6731_v40 = vpop.xlane.xlu0 %1616  ;;  %v4957_v48 = vunpack.c.h.bf16 %v6566_v7  ;;  %v1072_v7 = vmul.f32 %v8427_v8, %v1034_v36  ;;  %v1838_v9 = vmul.f32 %v8427_v8, %v1806_v58 }
 0x21f   : >> { %v1675_v47 = vsel %vm8429_vm1, %v1583_v27, 0.0  ;;  %v1837_v19 = vmul.f32 %v8427_v8, %v1805_v35  ;;  %v1552_v61 = vmax.f32 %v1520_v1, 0.0  ;;  %v1775_v42 = vadd.f32 %v4964_v63, %v6594_v37 }
 0x220   : >> { %v1772_v14 = vadd.f32 %v4957_v48, %v6294_v44  ;;  %v1166_v31 = vsel %vm8429_vm1, %v1072_v7, 0.0  ;;  %v1928_v48 = vsel %vm8429_vm1, %v1838_v9, 0.0 }
 0x221   : >> { %1673 = vadd.xlane.f32.xlu1 %v1672_v59  ;;  %1414 = vadd.xlane.f32.xlu0 %v1413_v30  ;;  %v1776_v59 = vadd.f32 %v4965_v21, %v6594_v37  ;;  %v1925_v60 = vsel %vm8429_vm1, %v1837_v19, 0.0  ;;  %v1807_v27 = vmax.f32 %v1775_v42, 0.0 }
 0x222   : >> { %v6742_v62 = vpop.xlane.xlu1 %1619  ;;  %v6744_v5 = vpop.xlane.xlu0 %1860  ;;  %v1804_v44 = vmax.f32 %v1772_v14, 0.0 }
 0x223   : >> { %v1808_v3 = vmax.f32 %v1776_v59, 0.0  ;;  %v1839_v14 = vmul.f32 %v8427_v8, %v1807_v27 }
 0x225   : >> { %1423 = vadd.xlane.f32.xlu1 %v1422_v6  ;;  %1670 = vadd.xlane.f32.xlu0 %v1669_v54  ;;  %v1836_v6 = vmul.f32 %v8427_v8, %v1804_v44  ;;  %v1584_v54 = vmul.f32 %v8427_v8, %v1552_v61  ;;  %v1840_v7 = vmul.f32 %v8427_v8, %v1808_v3  ;;  %v1931_v9 = vsel %vm8429_vm1, %v1839_v14, 0.0 }
 0x226   : >> { %v6752_v0 = vpop.xlane.xlu1 %1634  ;;  %v6754_v25 = vpop.xlane.xlu0 %1869 }
 0x227   : >> { %v1922_v35 = vsel %vm8429_vm1, %v1836_v6, 0.0  ;;  %v1678_v21 = vsel %vm8429_vm1, %v1584_v54, 0.0  ;;  %v4684_v54 = vld [vmem:[#allocation4] ss:$0 sm:$0xff] }
 0x229   : >> { %1676 = vadd.xlane.f32.xlu1 %v1675_v47  ;;  %1167 = vadd.xlane.f32.xlu0 %v1166_v31  ;;  %v1934_v47 = vsel %vm8429_vm1, %v1840_v7, 0.0  ;;  %vm2133_vm1 = vcmask 1044484  }
 0x22a   : >> { %v6762_v30 = vpop.xlane.xlu1 %1872  ;;  %v6764_v36 = vpop.xlane.xlu0 %1128 }
 0x22d   : >> { %1929 = vadd.xlane.f32.xlu1 %v1928_v48  ;;  %1926 = vadd.xlane.f32.xlu0 %v1925_v60 }
 0x22e   : >> { %v6770_v58 = vpop.xlane.xlu1 %1640  ;;  %v6772_v37 = vpop.xlane.xlu0 %1384 }
 0x231   : >> { %1923 = vadd.xlane.f32.xlu1 %v1922_v35  ;;  %1679 = vadd.xlane.f32.xlu0 %v1678_v21 }
 0x232   : >> { %v6778_v1 = vpop.xlane.xlu1 %1893  ;;  %v6780_v63 = vpop.xlane.xlu0 %1637 }
 0x235   : >> { %1935 = vadd.xlane.f32.xlu1 %v1934_v47  ;;  %1932 = vadd.xlane.f32.xlu0 %v1931_v9 }
 0x236   : >> { %v6784_v19 = vpop.xlane.xlu1 %1896  ;;  %v6786_v59 = vpop.xlane.xlu0 %1863 }
 0x23a   : >> { %v6788_v31 = vpop.xlane.xlu1 %1110  ;;  %v6790_v44 = vpop.xlane.xlu0 %1131 }
 0x23e   : >> { %v6792_v61 = vpop.xlane.xlu1 %1369  ;;  %v6794_v42 = vpop.xlane.xlu0 %1387 }
 0x242   : >> { %v6796_v48 = vpop.xlane.xlu1 %1116  ;;  %v6798_v3 = vpop.xlane.xlu0 %1875 }
 0x246   : >> { %v6800_v60 = vpop.xlane.xlu1 %1372  ;;  %v6802_v6 = vpop.xlane.xlu0 %1890 }
 0x24a   : >> { %v6804_v27 = vpop.xlane.xlu1 %1622  ;;  %v6806_v35 = vpop.xlane.xlu0 %1643 }
 0x24b   : >> { %8438 = vst [vmem:[#allocation28_spill] sm:$0xff] %v6804_v27  ;;  %2751 = vperm.xlu0 %5467, %v4684_v54  }
 0x24e   : >> { %v6808_v21 = vpop.xlane.xlu1 %1119  ;;  %v6810_v7 = vpop.xlane.xlu0 %1899 }
 0x24f   : >> { %8439 = vst [vmem:[#allocation29_spill] sm:$0xff] %v6810_v7 }
 0x252   : >> { %v6812_v14 = vpop.xlane.xlu0 %1113  ;;  %v6814_v47 = vpop.xlane.xlu1 %1134 }
 0x253   : >> { %8440 = vst [vmem:[#allocation30_spill] sm:$0xff] %v6814_v47 }
 0x256   : >> { %v6816_v9 = vpop.xlane.xlu0 %1366  ;;  %v6818_v8 = vpop.xlane.xlu1 %1375 }
 0x25a   : >> { %v6820_v12 = vpop.xlane.xlu0 %1625  ;;  %v6822_v18 = vpop.xlane.xlu1 %1390 }
 0x25b   : >> { %8441 = vst [vmem:[#allocation31_spill] sm:$0xff] %v6820_v12  ;;  %8442 = vst [vmem:[#allocation32_spill] sm:$0xff] %v6822_v18 }
 0x25e   : >> { %v6824_v34 = vpop.xlane.xlu0 %1137  ;;  %v6826_v22 = vpop.xlane.xlu1 %1881 }
 0x25f   : >> { %8443 = vst [vmem:[#allocation33_spill] sm:$0xff] %v6824_v34  ;;  %8444 = vst [vmem:[#allocation34_spill] sm:$0xff] %v6826_v22 }
 0x262   : >> { %v6828_v54 = vpop.xlane.xlu0 %1393  ;;  %v6830_v10 = vpop.xlane.xlu1 %1140 }
 0x263   : >> { %8445 = vst [vmem:[#allocation35_spill] sm:$0xff] %v6828_v54  ;;  %8446 = vst [vmem:[#allocation36_spill] sm:$0xff] %v6830_v10 }
 0x266   : >> { %v6832_v7 = vpop.xlane.xlu0 %1628  ;;  %v6834_v43 = vpop.xlane.xlu1 %1149 }
 0x267   : >> { %8447 = vst [vmem:[#allocation37_spill] sm:$0xff] %v6832_v7  ;;  %8448 = vst [vmem:[#allocation38_spill] sm:$0xff] %v6834_v43 }
 0x26a   : >> { %v6836_v47 = vpop.xlane.xlu0 %1878  ;;  %v6838_v49 = vpop.xlane.xlu1 %1396 }
 0x26b   : >> { %8449 = vst [vmem:[#allocation39_spill] sm:$0xff] %v6836_v47  ;;  %8450 = vst [vmem:[#allocation40_spill] sm:$0xff] %v6838_v49 }
 0x26e   : >> { %v6840_v27 = vpop.xlane.xlu0 %1146  ;;  %v6842_v12 = vpop.xlane.xlu1 %1405 }
 0x26f   : >> { %8451 = vst [vmem:[#allocation41_spill] sm:$0xff] %v6840_v27  ;;  %8452 = vst [vmem:[#allocation42_spill] sm:$0xff] %v6842_v12 }
 0x272   : >> { %v6844_v18 = vpop.xlane.xlu0 %1402  ;;  %v6846_v34 = vpop.xlane.xlu1 %1649 }
 0x273   : >> { %8453 = vst [vmem:[#allocation43_spill] sm:$0xff] %v6844_v18  ;;  %8454 = vst [vmem:[#allocation44_spill] sm:$0xff] %v6846_v34 }
 0x276   : >> { %v6848_v22 = vpop.xlane.xlu0 %1631  ;;  %v6850_v54 = vpop.xlane.xlu1 %1884 }
 0x277   : >> { %8455 = vst [vmem:[#allocation45_spill] sm:$0xff] %v6848_v22  ;;  %8456 = vst [vmem:[#allocation46_spill] sm:$0xff] %v6850_v54 }
 0x27a   : >> { %v6852_v10 = vpop.xlane.xlu0 %1646  ;;  %v6854_v7 = vpop.xlane.xlu1 %1152 }
 0x27b   : >> { %8457 = vst [vmem:[#allocation47_spill] sm:$0xff] %v6852_v10  ;;  %8458 = vst [vmem:[#allocation48_spill] sm:$0xff] %v6854_v7 }
 0x27e   : >> { %v6856_v43 = vpop.xlane.xlu0 %1143  ;;  %v6858_v47 = vpop.xlane.xlu1 %1408 }
 0x27f   : >> { %8459 = vst [vmem:[#allocation49_spill] sm:$0xff] %v6856_v43 }
 0x282   : >> { %v6860_v49 = vpop.xlane.xlu0 %1399  ;;  %v6862_v27 = vpop.xlane.xlu1 %1652 }
 0x283   : >> { %8460 = vst [vmem:[#allocation50_spill] sm:$0xff] %v6860_v49  ;;  %8461 = vst [vmem:[#allocation51_spill] sm:$0xff] %v6862_v27  ;;  %v2425_v49 = vrot.slane %v6651_v28, %v6358_v26  ;;  %v2421_v28 = vrot.slane %v6636_v52, %v6391_v38  ;;  %v2039_v52 = vrot.slane %v6812_v14, %v6305_v13 }
 0x284   : >> { %v2629_v14 = vrot.slane %v6762_v30, %v6429_v29 }
 0x286   : >> { %v6864_v12 = vpop.xlane.xlu0 %1658  ;;  %v6866_v18 = vpop.xlane.xlu1 %1661 }
 0x287   : >> { %8462 = vst [vmem:[#allocation52_spill] sm:$0xff] %v6864_v12  ;;  %8463 = vst [vmem:[#allocation53_spill] sm:$0xff] %v6866_v18  ;;  %v2605_v12 = vrot.slane %v6661_v23, %v6377_v11  ;;  %v2601_v23 = vrot.slane %v6649_v55, %v6456_v20 }
 0x28a   : >> { %v6868_v34 = vpop.xlane.xlu0 %1887  ;;  %v6870_v22 = vpop.xlane.xlu1 %1905 }
 0x28b   : >> { %8464 = vst [vmem:[#allocation54_spill] sm:$0xff] %v6868_v34  ;;  %8465 = vst [vmem:[#allocation55_spill] sm:$0xff] %v6870_v22  ;;  %v2058_v22 = vrot.slane %v6677_v24, %v6305_v13  ;;  %v2264_v24 = vrot.slane %v6693_v41, %v6315_v15  ;;  %v2606_v34 = vsel %vm8386_vm11, %v2605_v12, %v2601_v23 }
 0x28c   : >> { %v2620_v12 = vrot.slane %v6729_v33, %v6456_v20  ;;  %v2245_v33 = vrot.slane %v6792_v61, %v6315_v15  ;;  %v2468_v23 = vrot.slane %v6770_v58, %v6443_v45  ;;  %v2274_v58 = vrot.slane %v6794_v42, %v6361_v57 }
 0x28e   : >> { %v6872_v54 = vpop.xlane.xlu0 %1902  ;;  %v6874_v10 = vpop.xlane.xlu1 %1664 }
 0x28f   : >> { %8466 = vst [vmem:[#allocation56_spill] sm:$0xff] %v6872_v54  ;;  %8467 = vst [vmem:[#allocation57_spill] sm:$0xff] %v6874_v10  ;;  %v2054_v54 = vrot.slane %v6679_v17, %v6298_v4  ;;  %v2260_v10 = vrot.slane %v6713_v51, %v6322_v16  ;;  %v2610_v17 = vrot.slane %v6744_v5, %v6429_v29 }
 0x290   : >> { %v2426_v51 = vsel %vm2383_vm8, %v2425_v49, %v2421_v28  ;;  %v2241_v49 = vrot.slane %v6816_v9, %v6322_v16  ;;  %v2035_v28 = vrot.slane %v6788_v31, %v6298_v4  ;;  %v2063_v31 = vrot.slane %v6764_v36, %v6342_v53 }
 0x291   : >> { %v2265_v41 = vsel %vm2184_vm4, %v2264_v24, %v2260_v10  ;;  %v2463_v10 = vrot.slane %v6780_v63, %v6358_v26  ;;  %v2044_v63 = vrot.slane %v6796_v48, %v6342_v53  ;;  %v2269_v24 = vrot.slane %v6772_v37, %v6367_v56 }
 0x292   : >> { %v6876_v7 = vpop.xlane.xlu0 %1155  ;;  %v6878_v43 = vpop.xlane.xlu1 %1908  ;;  %v2040_v9 = vsel %vm1978_vm3, %v2039_v52, %v2035_v28  ;;  %v2246_v61 = vsel %vm2184_vm4, %v2245_v33, %v2241_v49  ;;  %v2250_v48 = vrot.slane %v6800_v60, %v6367_v56  ;;  %v2049_v37 = vrot.slane %v6808_v21, %v6407_v2 }
 0x293   : >> { %8468 = vst [vmem:[#allocation58_spill] sm:$0xff] %v6878_v43  ;;  %v2430_v43 = vrot.slane %v6731_v40, %v6443_v45  ;;  %v2624_v40 = vrot.slane %v6754_v25, %v6377_v11 }
 0x294   : >> { %v2251_v60 = vsel %vm2191_vm6, %v2250_v48, %v2246_v61  ;;  %v8475_v61 = vld [vmem:[#allocation33_spill] sm:$0xff] }
 0x295   : >> { %v2431_v5 = vsel %vm2390_vm10, %v2430_v43, %v2426_v51  ;;  %v2615_v43 = vrot.slane %v6786_v59, %v6432_v32  ;;  %v2625_v30 = vsel %vm8386_vm11, %v2624_v40, %v2620_v12  ;;  %v2634_v59 = vrot.slane %v6798_v3, %v6432_v32  ;;  %v8477_v48 = vld [vmem:[#allocation37_spill] sm:$0xff] }
 0x296   : >> { %v6884_v27 = vpop.xlane.xlu0 %1411  ;;  %v6886_v18 = vpop.xlane.xlu1 %1917  ;;  %v2630_v36 = vsel %vm2589_vm12, %v2629_v14, %v2625_v30  ;;  %v2662_v3 = vrot.slane %v6778_v1, %v6377_v11  ;;  %v2045_v51 = vsel %vm1985_vm5, %v2044_v63, %v2040_v9  ;;  %v2068_v40 = vrot.slane %v6790_v44, %v6407_v2  ;;  %v8472_v30 = vld [vmem:[#allocation31_spill] sm:$0xff]  ;;  %v8473_v9 = vld [vmem:[#allocation26_spill] sm:$0xff] }
 0x297   : >> { %8469 = vst [vmem:[#allocation59_spill] sm:$0xff] %v6884_v27  ;;  %8470 = vst [vmem:[#allocation60_spill] sm:$0xff] %v6886_v18  ;;  %v2435_v18 = vrot.slane %v6742_v62, %v6474_v46  ;;  %v2059_v62 = vsel %vm1978_vm3, %v2058_v22, %v2054_v54  ;;  %v2611_v22 = vsel %vm2589_vm12, %v2610_v17, %v2606_v34 }
 0x298   : >> { %v2473_v12 = vrot.slane %v6806_v35, %v6474_v46  ;;  %v2255_v44 = vrot.slane %v6818_v8, %v6361_v57  ;;  %v2064_v21 = vsel %vm1985_vm5, %v2063_v31, %v2059_v62  ;;  %v2667_v14 = vrot.slane %v6784_v19, %v6429_v29 }
 0x299   : >> { %v2436_v25 = vsel %vm2397_vm14, %v2435_v18, %v2431_v5  ;;  %v2459_v18 = vrot.slane %v6752_v0, %v6391_v38  ;;  %v2658_v0 = vrot.slane %v6802_v6, %v6456_v20  ;;  %v2616_v6 = vsel %vm2596_vm13, %v2615_v43, %v2611_v22 }
 0x29a   : >> { %v6912_v55 = vpop.xlane.xlu0 %1655  ;;  %v6914_v27 = vpop.xlane.xlu1 %1920  ;;  %v2635_v5 = vsel %vm2596_vm13, %v2634_v59, %v2630_v36  ;;  %v2533_v42 = vsel %vm8384_vm2, %v2436_v25, %v6727_v50  ;;  %v2050_v28 = vsel %vm1992_vm9, %v2049_v37, %v2045_v51  ;;  %v2270_v22 = vsel %vm2191_vm6, %v2269_v24, %v2265_v41  ;;  %v8474_v59 = vld [vmem:[#allocation27_spill] sm:$0xff]  ;;  %v8479_v51 = vld [vmem:[#allocation30_spill] sm:$0xff] }
 0x29b   : >> { %v2464_v17 = vsel %vm2383_vm8, %v2463_v10, %v2459_v18  ;;  %v2663_v49 = vsel %vm8386_vm11, %v2662_v3, %v2658_v0  ;;  %v2731_v10 = vsel %vm8385_vm15, %v2616_v6, %v6506_v39  ;;  %v2256_v43 = vsel %vm2198_vm7, %v2255_v44, %v2251_v60  ;;  %v8471_v39 = vld [vmem:[#allocation28_spill] sm:$0xff]  ;;  %v8481_v60 = vld [vmem:[#allocation45_spill] sm:$0xff]  ;;  %v8483_v44 = vld [vmem:[#allocation39_spill] sm:$0xff] }
 0x29c   : >> { %v2469_v35 = vsel %vm2390_vm10, %v2468_v23, %v2464_v17  ;;  %v2069_v8 = vsel %vm1992_vm9, %v2068_v40, %v2064_v21  ;;  %v2275_v50 = vsel %vm2198_vm7, %v2274_v58, %v2270_v22  ;;  %v6995_v62 = vsel %vm8384_vm2, %v2635_v5, %v2731_v10  ;;  %v8476_v23 = vld [vmem:[#allocation35_spill] sm:$0xff]  ;;  %v8478_v17 = vld [vmem:[#allocation29_spill] sm:$0xff]  ;;  %v8480_v58 = vld [vmem:[#allocation36_spill] sm:$0xff] }
 0x29d   : >> { %v6998_v19 = vsel %vm2589_vm12, %v2667_v14, %v2663_v49  ;;  %v2440_v33 = vrot.slane %v8471_v39, %v6391_v38  ;;  %v2474_v18 = vsel %vm2397_vm14, %v2473_v12, %v2469_v35  ;;  %v2444_v31 = vrot.slane %v8472_v30, %v6358_v26  ;;  %v8482_v49 = vld [vmem:[#allocation32_spill] sm:$0xff]  ;;  %v8485_v39 = vld [vmem:[#allocation41_spill] sm:$0xff] }
 0x29e   : >> { %v6941_v34 = vpop.xlane.xlu0 %1914  ;;  %v6943_v54 = vpop.xlane.xlu1 %1161  ;;  %v2132_v63 = vsel %vm2131_vm0, %v2050_v28, %v8473_v9  ;;  %v2335_v0 = vsel %vm2131_vm0, %v2256_v43, %v8474_v59  ;;  %v2077_v36 = vrot.slane %v8475_v61, %v6305_v13  ;;  %v2283_v24 = vrot.slane %v8476_v23, %v6315_v15  ;;  %v8484_v14 = vld [vmem:[#allocation40_spill] sm:$0xff]  ;;  %v8486_v9 = vld [vmem:[#allocation43_spill] sm:$0xff] }
 0x29f   : >> { %v2449_v3 = vrot.slane %v8477_v48, %v6443_v45  ;;  %v2672_v6 = vrot.slane %v8478_v17, %v6432_v32  ;;  %v2073_v40 = vrot.slane %v8479_v51, %v6298_v4  ;;  %v2082_v37 = vrot.slane %v8480_v58, %v6342_v53  ;;  %v8487_v48 = vld [vmem:[#allocation34_spill] sm:$0xff] }
 0x2a0   : >> { %v2454_v5 = vrot.slane %v8481_v60, %v6474_v46  ;;  %v2279_v12 = vrot.slane %v8482_v49, %v6322_v16  ;;  %v2639_v21 = vrot.slane %v8483_v44, %v6456_v20  ;;  %v2288_v28 = vrot.slane %v8484_v14, %v6367_v56  ;;  %v8489_v60 = vld [vmem:[#allocation42_spill] sm:$0xff] }
 0x2a1   : >> { %v2134_v22 = vsel %vm2133_vm1, %v2069_v8, %v2132_v63  ;;  %vm2135_vm2 = vcmask 1045509   ;;  %v2445_v43 = vsel %vm2383_vm8, %v2444_v31, %v2440_v33  ;;  %v2092_v30 = vrot.slane %v8485_v39, %v6298_v4  ;;  %v8488_v33 = vld [vmem:[#allocation38_spill] sm:$0xff] }
 0x2a2   : >> { %v6971_v52 = vpop.xlane.xlu0 %1667  ;;  %v6973_v1 = vpop.xlane.xlu1 %1417  ;;  %v2298_v59 = vrot.slane %v8486_v9, %v6322_v16  ;;  %v2336_v61 = vsel %vm2133_vm1, %v2275_v50, %v2335_v0  ;;  %v2078_v23 = vsel %vm1978_vm3, %v2077_v36, %v2073_v40  ;;  %v2643_v51 = vrot.slane %v8487_v48, %v6377_v11  ;;  %v8490_v36 = vld [vmem:[#allocation46_spill] sm:$0xff]  ;;  %v8493_v9 = vld [vmem:[#allocation47_spill] sm:$0xff]  ;;  %v8494_v48 = vld [vmem:[#allocation48_spill] sm:$0xff] }
 0x2a3   : >> { %v2284_v8 = vsel %vm2184_vm4, %v2283_v24, %v2279_v12  ;;  %v2450_v63 = vsel %vm2390_vm10, %v2449_v3, %v2445_v43  ;;  %v2083_v58 = vsel %vm1985_vm5, %v2082_v37, %v2078_v23  ;;  %v2096_v31 = vrot.slane %v8488_v33, %v6305_v13  ;;  %v8491_v24 = vld [vmem:[#allocation49_spill] sm:$0xff] }
 0x2a4   : >> { %v2302_v49 = vrot.slane %v8489_v60, %v6315_v15  ;;  %v2455_v44 = vsel %vm2397_vm14, %v2454_v5, %v2450_v63  ;;  %v2644_v50 = vsel %vm8386_vm11, %v2643_v51, %v2639_v21  ;;  %v2289_v0 = vsel %vm2191_vm6, %v2288_v28, %v2284_v8  ;;  %v8492_v5 = vld [vmem:[#allocation44_spill] sm:$0xff]  ;;  %v8496_v63 = vld [vmem:[#allocation51_spill] sm:$0xff] }
 0x2a5   : >> { %v2648_v40 = vrot.slane %v8490_v36, %v6429_v29  ;;  %v2087_v3 = vrot.slane %v8491_v24, %v6407_v2  ;;  %vm2137_vm15 = vcmask 1046534   ;;  %v2097_v14 = vsel %vm1978_vm3, %v2096_v31, %v2092_v30  ;;  %v8495_v30 = vld [vmem:[#allocation50_spill] sm:$0xff] }
 0x2a6   : >> { %v7000_v25 = vpop.xlane.xlu0 %1911  ;;  %v7002_v41 = vpop.xlane.xlu1 %1164  ;;  %v2303_v43 = vsel %vm2184_vm4, %v2302_v49, %v2298_v59  ;;  %v2482_v39 = vrot.slane %v8492_v5, %v6358_v26  ;;  %vm2139_vm11 = vcmask 1047559   ;;  %v2534_v28 = vsel %vm2131_vm0, %v2455_v44, %v2533_v42 }
 0x2a7   : >> { %v2478_v23 = vrot.slane %v8493_v9, %v6391_v38  ;;  %v2101_v51 = vrot.slane %v8494_v48, %v6342_v53  ;;  %v2307_v8 = vrot.slane %v6858_v47, %v6367_v56  ;;  %v2293_v59 = vrot.slane %v8495_v30, %v6361_v57  ;;  %v8497_v47 = vld [vmem:[#allocation59_spill] sm:$0xff] }
 0x2a8   : >> { %v2487_v33 = vrot.slane %v8496_v63, %v6443_v45  ;;  %v2649_v31 = vsel %vm2589_vm12, %v2648_v40, %v2644_v50  ;;  %v2088_v60 = vsel %vm1992_vm9, %v2087_v3, %v2083_v58  ;;  %v2106_v49 = vrot.slane %v6876_v7, %v6407_v2 }
 0x2a9   : >> { %v2312_v44 = vrot.slane %v8497_v47, %v6361_v57  ;;  %v2115_v5 = vrot.slane %v6943_v54, %v6305_v13  ;;  %v2308_v7 = vsel %vm2191_vm6, %v2307_v8, %v2303_v43  ;;  %v2136_v50 = vsel %vm2135_vm2, %v2088_v60, %v2134_v22 }
 0x2aa   : >> { %v1421_v10 = vpop.xlane.xlu1 %1420  ;;  %v1159_v35 = vpop.xlane.xlu0 %1158  ;;  %v2294_v40 = vsel %vm2198_vm7, %v2293_v59, %v2289_v0  ;;  %v2120_v3 = vrot.slane %v7002_v41, %v6342_v53  ;;  %v8501_v53 = vld [vmem:[#allocation57_spill] sm:$0xff]  ;;  %v2492_v59 = vrot.slane %v6912_v55, %v6474_v46 }
 0x2ab   : >> { %v2111_v42 = vrot.slane %v1159_v35, %v6298_v4  ;;  %v2102_v35 = vsel %vm1985_vm5, %v2101_v51, %v2097_v14  ;;  %v2326_v58 = vrot.slane %v1421_v10, %v6367_v56  ;;  %v8498_v56 = vld [vmem:[#allocation52_spill] sm:$0xff]  ;;  %v8499_v10 = vld [vmem:[#allocation53_spill] sm:$0xff]  ;;  %v2337_v9 = vsel %vm2135_vm2, %v2294_v40, %v2336_v61 }
 0x2ac   : >> { %v2107_v54 = vsel %vm1992_vm9, %v2106_v49, %v2102_v35  ;;  %v2497_v22 = vrot.slane %v8498_v56, %v6391_v38  ;;  %v2501_v0 = vrot.slane %v8499_v10, %v6358_v26  ;;  %v2506_v41 = vrot.slane %v8501_v53, %v6443_v45  ;;  %v8502_v61 = vld [vmem:[#allocation56_spill] sm:$0xff]  ;;  %v8505_v35 = vld [vmem:[#allocation58_spill] sm:$0xff] }
 0x2ad   : >> { %v2116_v13 = vsel %vm1978_vm3, %v2115_v5, %v2111_v42  ;;  %vm2740_vm3 = vcmask 523264   ;;  %v2138_v8 = vsel %vm2137_vm15, %v2107_v54, %v2136_v50  ;;  %v2677_v63 = vrot.slane %v8502_v61, %v6456_v20 }
 0x2ae   : >> { %v7057_v37 = vpop.xlane.xlu1 %1673  ;;  %v1415_v12 = vpop.xlane.xlu0 %1414  ;;  %v2121_v51 = vsel %vm1985_vm5, %v2120_v3, %v2116_v13  ;;  %v2502_v47 = vsel %vm2383_vm8, %v2501_v0, %v2497_v22  ;;  %vm8507_vm5 = vcmask 917312  }
 0x2af   : >> { %v2317_v21 = vrot.slane %v1415_v12, %v6322_v16  ;;  %v2321_v16 = vrot.slane %v6973_v1, %v6315_v15  ;;  %v2535_v12 = vsel %vm2133_vm1, %v2474_v18, %v2534_v28  ;;  %v2483_v1 = vsel %vm2383_vm8, %v2482_v39, %v2478_v23  ;;  %v8500_v23 = vld [vmem:[#allocation54_spill] sm:$0xff] }
 0x2b0   : >> { %v2488_v18 = vsel %vm2390_vm10, %v2487_v33, %v2483_v1  ;;  %v2653_v48 = vrot.slane %v8500_v23, %v6432_v32  ;;  %v2511_v33 = vrot.slane %v6971_v52, %v6474_v46 }
 0x2b1   : >> { %v2322_v15 = vsel %vm2184_vm4, %v2321_v16, %v2317_v21  ;;  %vm8503_vm4 = vcmask 261120  }
 0x2b2   : >> { %v1424_v36 = vpop.xlane.xlu1 %1423  ;;  %v1671_v24 = vpop.xlane.xlu0 %1670  ;;  %v2327_v14 = vsel %vm2191_vm6, %v2326_v58, %v2322_v15  ;;  %v2654_v5 = vsel %vm2596_vm13, %v2653_v48, %v2649_v31  ;;  %v8504_v15 = vld [vmem:[#allocation55_spill] sm:$0xff]  ;;  %v8506_v58 = vld [vmem:[#allocation60_spill] sm:$0xff]  ;;  %vm8508_vm6 = vmmov %vm8507_vm5 }
 0x2b3   : >> { %v2331_v4 = vrot.slane %v1424_v36, %v6361_v57  ;;  %v2313_v57 = vsel %vm2198_vm7, %v2312_v44, %v2308_v7  ;;  %v2696_v44 = vrot.slane %v6941_v34, %v6456_v20  ;;  %v2516_v55 = vrot.slane %v1671_v24, %v6391_v38 }
 0x2b4   : >> { %v2338_v30 = vsel %vm2137_vm15, %v2313_v57, %v2337_v9  ;;  %v2681_v52 = vrot.slane %v8504_v15, %v6377_v11  ;;  %v2686_v7 = vrot.slane %v8505_v35, %v6429_v29  ;;  %v2700_v50 = vrot.slane %v8506_v58, %v6377_v11  ;;  %v5472_v35 = vld [vmem:[%s8349_s10 + $0x8] sm:$0xff]  }
 0x2b5   : >> { %v2332_v21 = vsel %vm2198_vm7, %v2331_v4, %v2327_v14  ;;  %v2507_v4 = vsel %vm2390_vm10, %v2506_v41, %v2502_v47  ;;  %v2493_v34 = vsel %vm2397_vm14, %v2492_v59, %v2488_v18  ;;  %v2520_v38 = vrot.slane %v7057_v37, %v6358_v26  ;;  %vm8509_vm7 = vmmov %vm8507_vm5 }
 0x2b6   : >> { %v1677_v43 = vpop.xlane.xlu1 %1676  ;;  %v1168_v39 = vpop.xlane.xlu0 %1167  ;;  %v2339_v49 = vsel %vm2139_vm11, %v2332_v21, %v2338_v30  ;;  %v2682_v31 = vsel %vm8507_vm5, %v2681_v52, %v2677_v63  ;;  %v2705_v24 = vrot.slane %v6914_v27, %v6429_v29  ;;  %v2512_v40 = vsel %vm2397_vm14, %v2511_v33, %v2507_v4  ;;  %v5471_v4 = vld [vmem:[%s8349_s10] sm:$0xff]  }
 0x2b7   : >> { %v2125_v28 = vrot.slane %v1168_v39, %v6407_v2  ;;  %v2525_v1 = vrot.slane %v1677_v43, %v6443_v45  ;;  %v2691_v45 = vrot.slane %v7000_v25, %v6432_v32  ;;  %v2701_v57 = vsel %vm8508_vm6, %v2700_v50, %v2696_v44  ;;  %v8514_v44 = vld [vmem:[#allocation25_spill] sm:$0xff]  ;;  %5371 = vmatpush3.bf16.msra.mxu1 %v5471_v4 }
 0x2b8   : >> { %v2521_v3 = vsel %vm2383_vm8, %v2520_v38, %v2516_v55  ;;  %v2536_v37 = vsel %vm2135_vm2, %v2493_v34, %v2535_v12  ;;  %v2733_v25 = vsel %vm2131_vm0, %v2654_v5, %v6995_v62  ;;  %v2687_v39 = vsel %vm2589_vm12, %v2686_v7, %v2682_v31  ;;  %v8516_v7 = vld [vmem:[#allocation23_spill] sm:$0xff] }
 0x2b9   : >> { %v2126_v2 = vsel %vm1992_vm9, %v2125_v28, %v2121_v51  ;;  %v2526_v14 = vsel %vm2390_vm10, %v2525_v1, %v2521_v3  ;;  %v2537_v56 = vsel %vm2137_vm15, %v2512_v40, %v2536_v37  ;;  %v2692_v12 = vsel %vm2596_vm13, %v2691_v45, %v2687_v39  ;;  %vm8517_vm10 = vmmov %vm8503_vm4 }
 0x2ba   : >> { %v1930_v16 = vpop.xlane.xlu1 %1929  ;;  %v1927_v42 = vpop.xlane.xlu0 %1926  ;;  %v2140_v60 = vsel %vm2139_vm11, %v2126_v2, %v2138_v8  ;;  %vm2742_vm8 = vcmask 785408   ;;  %v8510_v8 = vld [vmem:[#allocation21_spill] sm:$0xff]  ;;  %v8515_v1 = vmov 0.0  }
 0x2bb   : >> { %v2739_v36 = vsel %vm8503_vm4, %v2140_v60, %v2339_v49  ;;  %v2719_v27 = vrot.slane %v1930_v16, %v6377_v11  ;;  %v2715_v43 = vrot.slane %v1927_v42, %v6456_v20  ;;  %v2706_v11 = vsel %vm2589_vm12, %v2705_v24, %v2701_v57  ;;  %v8512_v16 = vld [vmem:[#allocation24_spill] sm:$0xff]  ;;  %5372 = vmatprep.subr.bf16.mxu1 %v8515_v1 }
 0x2bc   : >> { %vm8511_vm9 = vcmp.ge.s32.totalorder %v8510_v8, 16  ;;  %v2850_v42 = vsub.s32 1, %v8512_v16  ;;  %v2869_v47 = vsub.s32 2, %v8512_v16  ;;  %v2888_v15 = vsub.s32 3, %v8512_v16  ;;  %5373 = vmatpush3.bf16.msra.mxu1 %v5472_v35  ;;  %v5304_v35 = vld [vmem:[%s5786_s29 + $0x90] sm:$0xff]  }
 0x2bd   : >> { %5386 = vmatprep.subr.bf16.mxu1 %v8515_v1  ;;  %v2907_v58 = vsub.s32 4, %v8512_v16  ;;  %v2926_v34 = vsub.s32 5, %v8512_v16  ;;  %v2945_v31 = vsub.s32 6, %v8512_v16  ;;  %v2964_v40 = vsub.s32 7, %v8512_v16 }
 0x2be   : >> { %v1924_v13 = vpop.xlane.xlu1 %1923  ;;  %v1680_v54 = vpop.xlane.xlu0 %1679 }
 0x2bf   : >> { %v2710_v18 = vrot.slane %v1924_v13, %v6432_v32  ;;  %v2530_v26 = vrot.slane %v1680_v54, %v6474_v46  ;;  %v2673_v46 = vsel %vm2596_vm13, %v2672_v6, %v6998_v19  ;;  %v2720_v19 = vsel %vm8509_vm7, %v2719_v27, %v2715_v43  ;;  %5375 = vmatmul.mubr.msk.bf16.vlgmr.msra.gmra.mrb[0].mxu1 %vm8517_vm10, %v8516_v7 }
 0x2c0   : >> { %v2734_v17 = vsel %vm2133_vm1, %v2673_v46, %v2733_v25 }
 0x2c1   : >> { %v2531_v22 = vsel %vm2397_vm14, %v2530_v26, %v2526_v14  ;;  %v2711_v0 = vsel %vm2596_vm13, %v2710_v18, %v2706_v11  ;;  %v2735_v6 = vsel %vm2135_vm2, %v2692_v12, %v2734_v17  ;;  %vm8536_vm14 = vmmov %vm8503_vm4 }
 0x2c2   : >> { %v1936_v20 = vpop.xlane.xlu1 %1935  ;;  %v1933_v10 = vpop.xlane.xlu0 %1932  ;;  %v2538_v62 = vsel %vm2139_vm11, %v2531_v22, %v2537_v56  ;;  %v2736_v53 = vsel %vm2137_vm15, %v2711_v0, %v2735_v6 }
 0x2c3   : >> { %v2729_v21 = vrot.slane %v1936_v20, %v6432_v32  ;;  %v2724_v28 = vrot.slane %v1933_v10, %v6429_v29  ;;  %v2741_v9 = vsel %vm2740_vm3, %v2739_v36, %v2538_v62  ;;  %vm8537_vm3 = vmmov %vm8503_vm4 }
 0x2c4   : >> { %vm8540_vm5 = vmmov %vm8537_vm3 }
 0x2c5   : >> { %v2725_v23 = vsel %vm2589_vm12, %v2724_v28, %v2720_v19  ;;  %vm8518_vm12 = vmmov 0   ;;  %vm8541_vm6 = vmmov %vm8537_vm3 }
 0x2c6   : >> { %v2730_v48 = vsel %vm2596_vm13, %v2729_v21, %v2725_v23  ;;  %5388 = vmatprep.mubr.msk.bf16.mxu1 %vm8518_vm12, %v8515_v1  ;;  %vm8535_vm13 = vmmov %vm8503_vm4  ;;  %v7502_v1 = vld [vmem:[%s5786_s29 + $0x110] sm:$0xff]  }
 0x2c7   : >> { %v2737_v41 = vsel %vm2139_vm11, %v2730_v48, %v2736_v53  ;;  %vm8539_vm4 = vmmov %vm8537_vm3 }
 0x2c8   : >> { %v2743_v32 = vsel %vm2742_vm8, %v2741_v9, %v2737_v41  ;;  %vm8542_vm7 = vmmov %vm8537_vm3 }
 0x2c9   : >> { %vm8543_vm8 = vmmov %vm8537_vm3 }
 0x2ca   : >> { %v2752_v51 = vpop.permute.xlu0 %2751  ;;  %vm8547_vm10 = vmmov %vm8537_vm3 }
 0x2cb   : >> { %v2754_v29 = vadd.f32 %v2752_v51, %v2743_v32 }
 0x2cd   : >> { %v2755_v30 = vsel %vm8511_vm9, -1e+30, %v2754_v29  ;;  %vm8544_vm9 = vmmov %vm8537_vm3 }
 0x2ce   : >> { %2756 = vmax.xlane.f32.xlu1 %v2755_v30 }
 0x35b   : >> { %v2757_v59 = vpop.xlane.xlu1 %2756 }
 0x35c   : >> { %v2758_v2 = vsub.f32 %v2755_v30, %v2757_v59 }
 0x35e   : >> { %v2759_v61 = vmul.f32 1.442695, %v2758_v2 }
 0x360   : >> { %5478 = vpow2.f32 %v2759_v61  ;;  %v5288_v61 = vld [vmem:[%s5786_s29 + $0x80] sm:$0xff]  }
 0x36a   : >> { %v5479_v63 = vpop.eup %5478 }
 0x36b   : >> { %2761 = vadd.xlane.f32.xlu1 %v5479_v63 }
 0x3f8   : >> { %v2762_v33 = vpop.xlane.xlu1 %2761 }
 0x3f9   : >> { %5480 = vrcp.f32 %v2762_v33 }
 0x403   : >> { %v5481_v60 = vpop.eup %5480 }
 0x404   : >> { %v7183_v49 = vmul.f32 %v5481_v60, %v5479_v63  ;;  %v5289_v63 = vld [vmem:[%s5786_s29 + $0x88] sm:$0xff]   ;;  %v4984_v60 = vunpack.c.l.bf16 %v5288_v61 }
 0x406   : >> { %8513 = vst [vmem:[#allocation28_spill] sm:$0xff] %v7183_v49  ;;  %v7188_v55 = vrot.slane %v7183_v49, %v8514_v44  ;;  %v7191_v36 = vrot.slane %v7183_v49, %v2850_v42  ;;  %v7196_v5 = vrot.slane %v7183_v49, %v2869_v47  ;;  %v7206_v52 = vrot.slane %v7183_v49, %v2888_v15 }
 0x407   : >> { %v7234_v50 = vrot.slane %v7183_v49, %v2907_v58  ;;  %v7248_v38 = vrot.slane %v7183_v49, %v2926_v34  ;;  %v7268_v24 = vrot.slane %v7183_v49, %v2945_v31  ;;  %v7290_v54 = vrot.slane %v7183_v49, %v2964_v40  ;;  %v5305_v34 = vld [vmem:[%s5786_s29 + $0x98] sm:$0xff]   ;;  %v5310_v31 = vld [vmem:[%s5786_s29 + $0x150] sm:$0xff]  }
 0x408   : >> { %3207 = vbcast.lane.b32.xlu0 %v7191_v36, 288  ;;  %2834 = vbcast.lane.b32.xlu1 %v7188_v55, 256  ;;  %v4985_v42 = vunpack.c.h.bf16 %v5288_v61  ;;  %v4988_v47 = vunpack.c.l.bf16 %v5289_v63  ;;  %v5049_v49 = vunpack.c.h.bf16 %v5304_v35 }
 0x409   : >> { %8519 = vst [vmem:[#allocation31_spill] sm:$0xff] %v7234_v50 }
 0x40c   : >> { %2872 = vbcast.lane.b32.xlu0 %v7196_v5, 256  ;;  %2838 = vbcast.lane.b32.xlu1 %v7188_v55, 264 }
 0x410   : >> { %3223 = vbcast.lane.b32.xlu0 %v7196_v5, 288  ;;  %2853 = vbcast.lane.b32.xlu1 %v7191_v36, 256 }
 0x414   : >> { %2842 = vbcast.lane.b32.xlu0 %v7188_v55, 272  ;;  %2857 = vbcast.lane.b32.xlu1 %v7191_v36, 264 }
 0x418   : >> { %2891 = vbcast.lane.b32.xlu0 %v7206_v52, 256  ;;  %3191 = vbcast.lane.b32.xlu1 %v7188_v55, 288 }
 0x41c   : >> { %3199 = vbcast.lane.b32.xlu0 %v7188_v55, 304  ;;  %3195 = vbcast.lane.b32.xlu1 %v7188_v55, 296 }
 0x420   : >> { %3239 = vbcast.lane.b32.xlu0 %v7206_v52, 288  ;;  %3211 = vbcast.lane.b32.xlu1 %v7191_v36, 296 }
 0x424   : >> { %3527 = vbcast.lane.b32.xlu0 %v7188_v55, 320  ;;  %2876 = vbcast.lane.b32.xlu1 %v7196_v5, 264 }
 0x428   : >> { %3543 = vbcast.lane.b32.xlu0 %v7191_v36, 320  ;;  %3227 = vbcast.lane.b32.xlu1 %v7196_v5, 296 }
 0x42c   : >> { %2880 = vbcast.lane.b32.xlu0 %v7196_v5, 272  ;;  %2861 = vbcast.lane.b32.xlu1 %v7191_v36, 272 }
 0x430   : >> { %2914 = vbcast.lane.b32.xlu0 %v7234_v50, 264  ;;  %2895 = vbcast.lane.b32.xlu1 %v7206_v52, 264 }
 0x434   : >> { %3255 = vbcast.lane.b32.xlu0 %v7234_v50, 288  ;;  %3215 = vbcast.lane.b32.xlu1 %v7191_v36, 304 }
 0x438   : >> { %3559 = vbcast.lane.b32.xlu0 %v7196_v5, 320  ;;  %3243 = vbcast.lane.b32.xlu1 %v7206_v52, 296 }
 0x43c   : >> { %2846 = vbcast.lane.b32.xlu0 %v7188_v55, 280  ;;  %3531 = vbcast.lane.b32.xlu1 %v7188_v55, 328 }
 0x440   : >> { %2899 = vbcast.lane.b32.xlu0 %v7206_v52, 272  ;;  %3547 = vbcast.lane.b32.xlu1 %v7191_v36, 328 }
 0x444   : >> { %2933 = vbcast.lane.b32.xlu0 %v7248_v38, 264  ;;  %2910 = vbcast.lane.b32.xlu1 %v7234_v50, 256 }
 0x448   : >> { %3219 = vbcast.lane.b32.xlu0 %v7191_v36, 312  ;;  %3231 = vbcast.lane.b32.xlu1 %v7196_v5, 304 }
 0x44c   : >> { %3271 = vbcast.lane.b32.xlu0 %v7248_v38, 288  ;;  %3259 = vbcast.lane.b32.xlu1 %v7234_v50, 296 }
 0x450   : >> { %3535 = vbcast.lane.b32.xlu0 %v7188_v55, 336  ;;  %3563 = vbcast.lane.b32.xlu1 %v7196_v5, 328 }
 0x454   : >> { %3575 = vbcast.lane.b32.xlu0 %v7206_v52, 320  ;;  %2865 = vbcast.lane.b32.xlu1 %v7191_v36, 280 }
 0x458   : >> { %3863 = vbcast.lane.b32.xlu0 %v7188_v55, 352  ;;  %2929 = vbcast.lane.b32.xlu1 %v7248_v38, 256 }
 0x45c   : >> { %3879 = vbcast.lane.b32.xlu0 %v7191_v36, 352  ;;  %3203 = vbcast.lane.b32.xlu1 %v7188_v55, 312 }
 0x460   : >> { %2884 = vbcast.lane.b32.xlu0 %v7196_v5, 280  ;;  %3247 = vbcast.lane.b32.xlu1 %v7206_v52, 304 }
 0x464   : >> { %2948 = vbcast.lane.b32.xlu0 %v7268_v24, 256  ;;  %3275 = vbcast.lane.b32.xlu1 %v7248_v38, 296 }
 0x468   : >> { %3235 = vbcast.lane.b32.xlu0 %v7196_v5, 312  ;;  %3551 = vbcast.lane.b32.xlu1 %v7191_v36, 336 }
 0x46c   : >> { %3287 = vbcast.lane.b32.xlu0 %v7268_v24, 288  ;;  %3579 = vbcast.lane.b32.xlu1 %v7206_v52, 328 }
 0x470   : >> { %3567 = vbcast.lane.b32.xlu0 %v7196_v5, 336  ;;  %3867 = vbcast.lane.b32.xlu1 %v7188_v55, 360 }
 0x474   : >> { %3595 = vbcast.lane.b32.xlu0 %v7234_v50, 328  ;;  %3883 = vbcast.lane.b32.xlu1 %v7191_v36, 360 }
 0x478   : >> { %3899 = vbcast.lane.b32.xlu0 %v7196_v5, 360  ;;  %2918 = vbcast.lane.b32.xlu1 %v7234_v50, 272 }
 0x47a   : >> { %v7283_v45 = vpop.permute.xlu0 %3207  ;;  %v7285_v13 = vpop.permute.xlu1 %2834 }
 0x47c   : >> { %2937 = vbcast.lane.b32.xlu0 %v7248_v38, 272  ;;  %2952 = vbcast.lane.b32.xlu1 %v7268_v24, 264 }
 0x47e   : >> { %v7292_v57 = vpop.permute.xlu0 %2872  ;;  %v7294_v3 = vpop.permute.xlu1 %2838 }
 0x47f   : >> { %v2989_v4 = vmul.f32 %v4984_v60, %v7292_v57 }
 0x480   : >> { %2971 = vbcast.lane.b32.xlu0 %v7290_v54, 264  ;;  %3263 = vbcast.lane.b32.xlu1 %v7234_v50, 304 }
 0x482   : >> { %v7298_v18 = vpop.permute.xlu0 %3223  ;;  %v7300_v26 = vpop.permute.xlu1 %2853 }
 0x484   : >> { %3279 = vbcast.lane.b32.xlu0 %v7248_v38, 304  ;;  %3291 = vbcast.lane.b32.xlu1 %v7268_v24, 296 }
 0x486   : >> { %v7304_v37 = vpop.permute.xlu0 %2842  ;;  %v7306_v14 = vpop.permute.xlu1 %2857 }
 0x488   : >> { %3307 = vbcast.lane.b32.xlu0 %v7290_v54, 296  ;;  %3591 = vbcast.lane.b32.xlu1 %v7234_v50, 320 }
 0x48a   : >> { %v7310_v27 = vpop.permute.xlu0 %2891  ;;  %v7312_v43 = vpop.permute.xlu1 %3191 }
 0x48c   : >> { %3555 = vbcast.lane.b32.xlu0 %v7191_v36, 344  ;;  %3895 = vbcast.lane.b32.xlu1 %v7196_v5, 352 }
 0x48e   : >> { %v7316_v25 = vpop.permute.xlu0 %3199  ;;  %v7318_v39 = vpop.permute.xlu1 %3195 }
 0x48f   : >> { %8520 = vst [vmem:[#allocation26_spill] sm:$0xff] %v7316_v25 }
 0x490   : >> { %3607 = vbcast.lane.b32.xlu0 %v7248_v38, 320  ;;  %2903 = vbcast.lane.b32.xlu1 %v7206_v52, 280 }
 0x492   : >> { %v7322_v56 = vpop.permute.xlu0 %3239  ;;  %v7324_v22 = vpop.permute.xlu1 %3211 }
 0x494   : >> { %3871 = vbcast.lane.b32.xlu0 %v7188_v55, 368  ;;  %2967 = vbcast.lane.b32.xlu1 %v7290_v54, 256 }
 0x496   : >> { %v7328_v46 = vpop.permute.xlu0 %3527  ;;  %v2877_v12 = vpop.permute.xlu1 %2876 }
 0x497   : >> { %v2990_v15 = vmul.f32 %v4985_v42, %v2877_v12  ;;  %v3039_v12 = vsel %vm8536_vm14, %v2989_v4, 0.0  ;;  %v5072_v42 = vunpack.c.l.bf16 %v5310_v31  ;;  %vm8549_vm14 = vmmov %vm8537_vm3 }
 0x498   : >> { %3911 = vbcast.lane.b32.xlu0 %v7206_v52, 352  ;;  %3251 = vbcast.lane.b32.xlu1 %v7206_v52, 312 }
 0x499   : >> { %v3040_v61 = vsel %vm8535_vm13, %v2990_v15, 0.0  ;;  %vm8548_vm13 = vmmov %vm8537_vm3 }
 0x49a   : >> { %v7332_v11 = vpop.permute.xlu0 %3543  ;;  %v7334_v20 = vpop.permute.xlu1 %3227  ;;  %v3041_v60 = vadd.f32 %v3040_v61, %v3039_v12 }
 0x49b   : >> { %v3326_v15 = vmul.f32 %v5049_v49, %v7334_v20 }
 0x49c   : >> { %2922 = vbcast.lane.b32.xlu0 %v7234_v50, 280  ;;  %3303 = vbcast.lane.b32.xlu1 %v7290_v54, 288 }
 0x49d   : >> { %v3376_v20 = vsel %vm8540_vm5, %v3326_v15, 0.0  ;;  %vm8556_vm5 = vmmov %vm8537_vm3 }
 0x49e   : >> { %v2881_v10 = vpop.permute.xlu0 %2880  ;;  %v7338_v62 = vpop.permute.xlu1 %2861 }
 0x49f   : >> { %8521 = vst [vmem:[#allocation27_spill] sm:$0xff] %v7338_v62  ;;  %v2991_v58 = vmul.f32 %v4988_v47, %v2881_v10  ;;  %v5052_v10 = vunpack.c.l.bf16 %v5305_v34 }
 0x4a0   : >> { %3267 = vbcast.lane.b32.xlu0 %v7234_v50, 312  ;;  %3539 = vbcast.lane.b32.xlu1 %v7188_v55, 344 }
 0x4a1   : >> { %v3042_v57 = vsel %vm8537_vm3, %v2991_v58, 0.0 }
 0x4a2   : >> { %v7342_v0 = vpop.permute.xlu0 %2914  ;;  %v7344_v21 = vpop.permute.xlu1 %2895 }
 0x4a4   : >> { %3571 = vbcast.lane.b32.xlu0 %v7196_v5, 344  ;;  %3583 = vbcast.lane.b32.xlu1 %v7206_v52, 336 }
 0x4a6   : >> { %v7348_v28 = vpop.permute.xlu0 %3255  ;;  %v7350_v9 = vpop.permute.xlu1 %3215 }
 0x4a7   : >> { %8522 = vst [vmem:[#allocation33_spill] sm:$0xff] %v7350_v9 }
 0x4a8   : >> { %3623 = vbcast.lane.b32.xlu0 %v7268_v24, 320  ;;  %3611 = vbcast.lane.b32.xlu1 %v7248_v38, 328 }
 0x4aa   : >> { %v7354_v17 = vpop.permute.xlu0 %3559  ;;  %v7356_v19 = vpop.permute.xlu1 %3243 }
 0x4ab   : >> { %8523 = vst [vmem:[#allocation35_spill] sm:$0xff] %v7354_v17 }
 0x4ac   : >> { %3903 = vbcast.lane.b32.xlu0 %v7196_v5, 368  ;;  %3887 = vbcast.lane.b32.xlu1 %v7191_v36, 368 }
 0x4ae   : >> { %v7360_v6 = vpop.permute.xlu0 %2846  ;;  %v7362_v23 = vpop.permute.xlu1 %3531 }
 0x4af   : >> { %8524 = vst [vmem:[#allocation37_spill] sm:$0xff] %v7360_v6  ;;  %8525 = vst [vmem:[#allocation29_spill] sm:$0xff] %v7362_v23 }
 0x4b0   : >> { %3931 = vbcast.lane.b32.xlu0 %v7234_v50, 360  ;;  %3915 = vbcast.lane.b32.xlu1 %v7206_v52, 360 }
 0x4b2   : >> { %v7366_v48 = vpop.permute.xlu0 %2899  ;;  %v7368_v53 = vpop.permute.xlu1 %3547 }
 0x4b4   : >> { %2975 = vbcast.lane.b32.xlu0 %v7290_v54, 272  ;;  %2956 = vbcast.lane.b32.xlu1 %v7268_v24, 272 }
 0x4b6   : >> { %v7372_v41 = vpop.permute.xlu0 %2933  ;;  %v7374_v32 = vpop.permute.xlu1 %2910 }
 0x4b7   : >> { %8526 = vst [vmem:[#allocation30_spill] sm:$0xff] %v7372_v41  ;;  %8527 = vst [vmem:[#allocation36_spill] sm:$0xff] %v7374_v32  ;;  %v4989_v41 = vunpack.c.h.bf16 %v5289_v63  ;;  %v5073_v63 = vunpack.c.h.bf16 %v5310_v31 }
 0x4b8   : >> { %3311 = vbcast.lane.b32.xlu0 %v7290_v54, 304  ;;  %3295 = vbcast.lane.b32.xlu1 %v7268_v24, 304 }
 0x4ba   : >> { %v7378_v51 = vpop.permute.xlu0 %3219  ;;  %v3232_v29 = vpop.permute.xlu1 %3231 }
 0x4bb   : >> { %8528 = vst [vmem:[#allocation45_spill] sm:$0xff] %v7378_v51  ;;  %v3327_v58 = vmul.f32 %v5052_v10, %v3232_v29  ;;  %v5322_v51 = vld [vmem:[%s5786_s29 + $0xe0] sm:$0xff]  }
 0x4bc   : >> { %3615 = vbcast.lane.b32.xlu0 %v7248_v38, 336  ;;  %3599 = vbcast.lane.b32.xlu1 %v7234_v50, 336  ;;  %v5120_v31 = vunpack.c.l.bf16 %v5322_v51  ;;  %v7443_v10 = vld [vmem:[%s5786_s29 + $0x40] sm:$0xff]  }
 0x4be   : >> { %v3272_v8 = vpop.permute.xlu0 %3271  ;;  %v7382_v30 = vpop.permute.xlu1 %3259 }
 0x4bf   : >> { %8529 = vst [vmem:[#allocation32_spill] sm:$0xff] %v7382_v30 }
 0x4c0   : >> { %3643 = vbcast.lane.b32.xlu0 %v7290_v54, 328  ;;  %3627 = vbcast.lane.b32.xlu1 %v7268_v24, 328 }
 0x4c2   : >> { %v7386_v59 = vpop.permute.xlu0 %3535  ;;  %v7388_v2 = vpop.permute.xlu1 %3563 }
 0x4c3   : >> { %8530 = vst [vmem:[#allocation39_spill] sm:$0xff] %v7386_v59  ;;  %8531 = vst [vmem:[#allocation40_spill] sm:$0xff] %v7388_v2  ;;  %v7484_v59 = vld [vmem:[%s5786_s29 + $0x20] sm:$0xff]  }
 0x4c4   : >> { %3891 = vbcast.lane.b32.xlu0 %v7191_v36, 376  ;;  %3927 = vbcast.lane.b32.xlu1 %v7234_v50, 352 }
 0x4c6   : >> { %v7394_v33 = vpop.permute.xlu0 %3575  ;;  %v7396_v16 = vpop.permute.xlu1 %2865 }
 0x4c7   : >> { %8532 = vst [vmem:[#allocation41_spill] sm:$0xff] %v7396_v16  ;;  %v3337_v16 = vmul.f32 %v5072_v42, %v3272_v8  ;;  %v3378_v8 = vsel %vm8542_vm7, %v3327_v58, 0.0  ;;  %v5121_v58 = vunpack.c.h.bf16 %v5322_v51  ;;  %v7469_v51 = vld [vmem:[%s5786_s29 + $0xd0] sm:$0xff]   ;;  %vm8568_vm7 = vmmov %vm8537_vm3 }
 0x4c8   : >> { %3943 = vbcast.lane.b32.xlu0 %v7248_v38, 352  ;;  %2941 = vbcast.lane.b32.xlu1 %v7248_v38, 280 }
 0x4ca   : >> { %v7400_v44 = vpop.permute.xlu0 %3863  ;;  %v7402_v36 = vpop.permute.xlu1 %2929 }
 0x4cb   : >> { %8533 = vst [vmem:[#allocation43_spill] sm:$0xff] %v7402_v36  ;;  %v5048_v36 = vunpack.c.l.bf16 %v5304_v35  ;;  %v3043_v35 = vadd.f32 %v3042_v57, %v3041_v60  ;;  %v5332_v60 = vld [vmem:[%s5786_s29 + $0x30] sm:$0xff]  }
 0x4cc   : >> { %2960 = vbcast.lane.b32.xlu0 %v7268_v24, 280  ;;  %3283 = vbcast.lane.b32.xlu1 %v7248_v38, 312  ;;  %v5161_v2 = vunpack.c.h.bf16 %v5332_v60 }
 0x4cd   : >> { %v3325_v4 = vmul.f32 %v5048_v36, %v7298_v18  ;;  %v7433_v18 = vld [vmem:[%s5786_s29 + $0x50] sm:$0xff]   ;;  %v3414_v36 = vsel %vm8543_vm8, %v3337_v16, 0.0  ;;  %vm8571_vm8 = vmmov %vm8537_vm3 }
 0x4ce   : >> { %v7410_v40 = vpop.permute.xlu0 %3879  ;;  %v7412_v7 = vpop.permute.xlu1 %3203 }
 0x4cf   : >> { %8534 = vst [vmem:[#allocation34_spill] sm:$0xff] %v7412_v7  ;;  %v3375_v29 = vsel %vm8541_vm6, %v3325_v4, 0.0  ;;  %vm8557_vm6 = vmmov %vm8537_vm3 }
 0x4d0   : >> { %3603 = vbcast.lane.b32.xlu0 %v7234_v50, 344  ;;  %3587 = vbcast.lane.b32.xlu1 %v7206_v52, 344  ;;  %v3377_v42 = vadd.f32 %v3376_v20, %v3375_v29  ;;  %v7457_v20 = vld [vmem:[%s5786_s29 + $0xc0] sm:$0xff]   ;;  %v3665_v29 = vmul.f32 %v5120_v31, %v7394_v33  ;;  %v7492_v33 = vld [vmem:[%s5786_s29 + $0x48] sm:$0xff]  }
 0x4d2   : >> { %v2885_v47 = vpop.permute.xlu0 %2884  ;;  %v7419_v25 = vpop.permute.xlu1 %3247 }
 0x4d3   : >> { %8538 = vst [vmem:[#allocation38_spill] sm:$0xff] %v7419_v25  ;;  %v2992_v7 = vmul.f32 %v4989_v41, %v2885_v47  ;;  %v5053_v41 = vunpack.c.h.bf16 %v5305_v34 }
 0x4d4   : >> { %3907 = vbcast.lane.b32.xlu0 %v7196_v5, 376  ;;  %3639 = vbcast.lane.b32.xlu1 %v7290_v54, 320 }
 0x4d5   : >> { %v3044_v61 = vsel %vm8539_vm4, %v2992_v7, 0.0  ;;  %v7436_v7 = vld [vmem:[%s5786_s29] sm:$0xff]   ;;  %vm8554_vm4 = vmmov %vm8537_vm3 }
 0x4d6   : >> { %v3045_v12 = vadd.f32 %v3044_v61, %v3043_v35  ;;  %v7427_v6 = vpop.permute.xlu0 %2948  ;;  %v3276_v49 = vpop.permute.xlu1 %3275  ;;  %v7451_v35 = vld [vmem:[%s5786_s29 + $0x8] sm:$0xff]  }
 0x4d7   : >> { %v3338_v5 = vmul.f32 %v5073_v63, %v3276_v49  ;;  %8545 = vst [vmem:[#allocation42_spill] sm:$0xff] %v7451_v35 }
 0x4d8   : >> { %v3046_v57 = vrot.slane %v3045_v12, 4  ;;  %3959 = vbcast.lane.b32.xlu0 %v7268_v24, 352  ;;  %3875 = vbcast.lane.b32.xlu1 %v7188_v55, 376 }
 0x4d9   : >> { %v3415_v34 = vsel %vm8544_vm9, %v3338_v5, 0.0  ;;  %v3379_v5 = vadd.f32 %v3378_v8, %v3377_v42  ;;  %v5334_v42 = vld [vmem:[%s5786_s29 + $0x70] sm:$0xff]   ;;  %vm8572_vm9 = vmmov %vm8537_vm3 }
 0x4da   : >> { %v3047_v47 = vadd.f32 %v3046_v57, %v3045_v12  ;;  %v7446_v55 = vadd.f32 %v3415_v34, %v3414_v36  ;;  %v3236_v15 = vpop.permute.xlu0 %3235  ;;  %v7448_v63 = vpop.permute.xlu1 %3551  ;;  %v7460_v12 = vld [vmem:[%s5786_s29 + $0x10] sm:$0xff]   ;;  %v5160_v36 = vunpack.c.l.bf16 %v5332_v60  ;;  %v7495_v60 = vld [vmem:[%s5786_s29 + $0x100] sm:$0xff]  }
 0x4db   : >> { %v3328_v4 = vmul.f32 %v5053_v41, %v3236_v15  ;;  %v7466_v41 = vld [vmem:[%s5786_s29 + $0x18] sm:$0xff]   ;;  %v5296_v15 = vld [vmem:[%s5786_s29 + $0x180] sm:$0xff]  }
 0x4dc   : >> { %2979 = vbcast.lane.b32.xlu0 %v7290_v54, 280  ;;  %3919 = vbcast.lane.b32.xlu1 %v7206_v52, 368  ;;  %8546 = vst [vmem:[#allocation46_spill] sm:$0xff] %v7466_v41  ;;  %v3048_v16 = vrot.slane %v3047_v47, 2  ;;  %v8565_v41 = vunpack.c.h.bf16 %v7443_v10 }
 0x4dd   : >> { %v3380_v34 = vsel %vm8547_vm10, %v3328_v4, 0.0  ;;  %v5168_v4 = vunpack.c.l.bf16 %v5334_v42  ;;  %vm8573_vm10 = vmmov %vm8537_vm3 }
 0x4de   : >> { %v3381_v61 = vadd.f32 %v3380_v34, %v3379_v5  ;;  %v7476_v57 = vpop.permute.xlu0 %3287  ;;  %v3580_v49 = vpop.permute.xlu1 %3579  ;;  %v7487_v5 = vld [vmem:[%s5786_s29 + $0x60] sm:$0xff]   ;;  %v3049_v30 = vadd.f32 %v3048_v16, %v3047_v47 }
 0x4df   : >> { %v3666_v31 = vmul.f32 %v5121_v58, %v3580_v49  ;;  %v3724_v58 = vsel %vm8548_vm13, %v3665_v29, 0.0  ;;  %v3989_v49 = vmul.f32 %v5160_v36, %v7400_v44  ;;  %v7511_v44 = vld [vmem:[%s5786_s29 + $0x58] sm:$0xff]   ;;  %v7517_v16 = vld [vmem:[%s5786_s29 + $0xa0] sm:$0xff]   ;;  %v8564_v29 = vunpack.c.l.bf16 %v7451_v35  ;;  %vm8574_vm13 = vmmov %vm8537_vm3 }
 0x4e0   : >> { %v3382_v34 = vrot.slane %v3381_v61, 4  ;;  %3619 = vbcast.lane.b32.xlu0 %v7248_v38, 344  ;;  %3947 = vbcast.lane.b32.xlu1 %v7248_v38, 360  ;;  %8552 = vst [vmem:[#allocation47_spill] sm:$0xff] %v7511_v44  ;;  %8553 = vst [vmem:[#allocation48_spill] sm:$0xff] %v7517_v16  ;;  %v7624_v35 = vld [vmem:[%s5786_s29 + $0x158] sm:$0xff]  }
 0x4e1   : >> { %v3725_v8 = vsel %vm8549_vm14, %v3666_v31, 0.0  ;;  %v5169_v31 = vunpack.c.h.bf16 %v5334_v42  ;;  %8570 = vst [vmem:[#allocation57_spill] sm:$0xff] %v7624_v35  ;;  %vm8575_vm14 = vmmov %vm8537_vm3 }
 0x4e2   : >> { %v3383_v32 = vadd.f32 %v3382_v34, %v3381_v61  ;;  %v7504_v23 = vadd.f32 %v3725_v8, %v3724_v58  ;;  %v7506_v17 = vpop.permute.xlu0 %3567  ;;  %v3868_v9 = vpop.permute.xlu1 %3867  ;;  %v4021_v34 = vsel %vm8537_vm3, %v3989_v49, 0.0  ;;  %v3050_v58 = vrot.slane %v3049_v30, 1  ;;  %v7544_v49 = vld [vmem:[%s5786_s29 + $0x28] sm:$0xff]  }
 0x4e3   : >> { %8551 = vst [vmem:[#allocation44_spill] sm:$0xff] %v7506_v17  ;;  %v3990_v36 = vmul.f32 %v5161_v2, %v3868_v9  ;;  %v3993_v9 = vmul.f32 %v5168_v4, %v7410_v40  ;;  %v7535_v40 = vld [vmem:[%s5786_s29 + $0xc8] sm:$0xff]  }
 0x4e4   : >> { %8550 = vst [vmem:[#allocation49_spill] sm:$0xff] %v7504_v23  ;;  %v3384_v61 = vrot.slane %v3383_v32, 2  ;;  %3923 = vbcast.lane.b32.xlu0 %v7206_v52, 376  ;;  %3299 = vbcast.lane.b32.xlu1 %v7268_v24, 312  ;;  %v3051_v42 = vadd.f32 %v3050_v58, %v3049_v30  ;;  %v7565_v58 = vld [vmem:[%s5786_s29 + $0x190] sm:$0xff]  }
 0x4e5   : >> { %v4022_v2 = vsel %vm8554_vm4, %v3990_v36, 0.0  ;;  %v7581_v30 = vld [vmem:[%s5786_s29 + $0xb0] sm:$0xff]   ;;  %vm8577_vm4 = vmmov %vm8537_vm3 }
 0x4e6   : >> { %v3385_v62 = vadd.f32 %v3384_v61, %v3383_v32  ;;  %v7527_v47 = vadd.f32 %v4022_v2, %v4021_v34  ;;  %v7529_v52 = vpop.permute.xlu0 %3595  ;;  %v3884_v25 = vpop.permute.xlu1 %3883  ;;  %v7550_v61 = vld [vmem:[%s5786_s29 + $0xd8] sm:$0xff]   ;;  %v7553_v32 = vld [vmem:[%s5786_s29 + $0x68] sm:$0xff]  }
 0x4e7   : >> { %v3994_v4 = vmul.f32 %v5169_v31, %v3884_v25  ;;  %v4034_v25 = vsel %vm8556_vm5, %v3993_v9, 0.0  ;;  %v5016_v31 = vunpack.c.l.bf16 %v5296_v15  ;;  %v7578_v9 = vld [vmem:[%s5786_s29 + $0x120] sm:$0xff]   ;;  %vm8579_vm5 = vmmov %vm8537_vm3 }
 0x4e8   : >> { %8555 = vst [vmem:[#allocation50_spill] sm:$0xff] %v7527_v47  ;;  %v3386_v34 = vrot.slane %v3385_v62, 1  ;;  %3975 = vbcast.lane.b32.xlu0 %v7290_v54, 352  ;;  %3631 = vbcast.lane.b32.xlu1 %v7268_v24, 336 }
 0x4e9   : >> { %v4035_v36 = vsel %vm8557_vm6, %v3994_v4, 0.0  ;;  %v7584_v4 = vld [vmem:[%s5786_s29 + $0x108] sm:$0xff]   ;;  %vm8583_vm6 = vmmov %vm8537_vm3 }
 0x4ea   : >> { %v3387_v8 = vadd.f32 %v3386_v34, %v3385_v62  ;;  %v7555_v2 = vadd.f32 %v4035_v36, %v4034_v25  ;;  %v7557_v23 = vpop.permute.xlu0 %3899  ;;  %v7559_v17 = vpop.permute.xlu1 %2918  ;;  %v7568_v62 = vld [vmem:[%s5786_s29 + $0xa8] sm:$0xff]   ;;  %v5017_v34 = vunpack.c.h.bf16 %v5296_v15  ;;  %v8561_v36 = vunpack.c.h.bf16 %v7436_v7 }
 0x4eb   : >> { %8559 = vst [vmem:[#allocation59_spill] sm:$0xff] %v7559_v17  ;;  %8560 = vst [vmem:[#allocation52_spill] sm:$0xff] %v7568_v62  ;;  %v2986_v17 = vmul.f32 %v8565_v41, %v7306_v14  ;;  %v8567_v14 = vunpack.c.l.bf16 %v7433_v18 }
 0x4ec   : >> { %8558 = vst [vmem:[#allocation51_spill] sm:$0xff] %v7555_v2  ;;  %v2982_v25 = vmul.f32 %v8561_v36, %v7294_v3  ;;  %v7575_v47 = vadd.f32 %v3387_v8, %v3051_v42  ;;  %3635 = vbcast.lane.b32.xlu0 %v7268_v24, 344  ;;  %3935 = vbcast.lane.b32.xlu1 %v7234_v50, 368  ;;  %v8563_v3 = vunpack.c.l.bf16 %v7436_v7  ;;  %v5108_v42 = vunpack.c.l.bf16 %v7553_v32  ;;  %v7595_v2 = vld [vmem:[%s5786_s29 + $0x1c0] sm:$0xff]  }
 0x4ed   : >> { %v3005_v8 = vmul.f32 %v5016_v31, %v7427_v6  ;;  %v5080_v7 = vunpack.c.l.bf16 %v7565_v58  ;;  %v7608_v31 = vld [vmem:[%s5786_s29 + $0x118] sm:$0xff]   ;;  %v5129_v36 = vunpack.c.h.bf16 %v7578_v9  ;;  %v3321_v41 = vmul.f32 %v8567_v14, %v7283_v45 }
 0x4ee   : >> { %8562 = vst [vmem:[#allocation53_spill] sm:$0xff] %v7575_v47  ;;  %v2981_v15 = vmul.f32 %v8563_v3, %v7285_v13  ;;  %v2983_v47 = vmul.f32 %v8564_v29, %v7304_v37  ;;  %v7605_v3 = vpop.permute.xlu0 %2937  ;;  %v2953_v6 = vpop.permute.xlu1 %2952  ;;  %v3014_v16 = vsel %vm8568_vm7, %v2982_v25, 0.0  ;;  %v8569_v13 = vunpack.c.l.bf16 %v7443_v10  ;;  %v7627_v37 = vld [vmem:[%s5786_s29 + $0x1d0] sm:$0xff]   ;;  %vm8584_vm7 = vmmov %vm8537_vm3 }
 0x4ef   : >> { %8566 = vst [vmem:[#allocation54_spill] sm:$0xff] %v7605_v3  ;;  %v3006_v29 = vmul.f32 %v5017_v34, %v2953_v6  ;;  %v3091_v45 = vsel %vm8572_vm9, %v3005_v8, 0.0  ;;  %v3027_v10 = vsel %vm8575_vm14, %v2986_v17, 0.0  ;;  %v5081_v6 = vunpack.c.h.bf16 %v7565_v58  ;;  %vm8590_vm9 = vmmov %vm8537_vm3 }
 0x4f0   : >> { %v2985_v3 = vmul.f32 %v8569_v13, %v7300_v26  ;;  %3967 = vbcast.lane.b32.xlu0 %v7268_v24, 368  ;;  %3963 = vbcast.lane.b32.xlu1 %v7268_v24, 360  ;;  %v3013_v34 = vsel %vm8571_vm8, %v2981_v15, 0.0  ;;  %v3016_v26 = vsel %vm8574_vm13, %v2983_v47, 0.0  ;;  %v8576_v13 = vunpack.c.l.bf16 %v7457_v20  ;;  %vm8585_vm8 = vmmov %vm8537_vm3 }
 0x4f1   : >> { %v3092_v25 = vsel %vm8573_vm10, %v3006_v29, 0.0  ;;  %v3015_v8 = vadd.f32 %v3014_v16, %v3013_v34  ;;  %v5076_v29 = vunpack.c.l.bf16 %v7624_v35  ;;  %v7648_v50 = vsel %vm8537_vm3, %v3321_v41, 0.0  ;;  %v7656_v16 = vld [vmem:[%s5786_s29 + $0x160] sm:$0xff]   ;;  %vm8591_vm10 = vmmov %vm8537_vm3 }
 0x4f2   : >> { %v2993_v14 = vmul.f32 %v8576_v13, %v7310_v27  ;;  %v7638_v44 = vadd.f32 %v3092_v25, %v3091_v45  ;;  %v7640_v62 = vpop.permute.xlu0 %2971  ;;  %v7642_v15 = vpop.permute.xlu1 %3263  ;;  %v3026_v17 = vsel %vm8577_vm4, %v2985_v3, 0.0  ;;  %v5128_v27 = vunpack.c.l.bf16 %v7578_v9  ;;  %vm8593_vm13 = vmmov %vm8537_vm3 }
 0x4f3   : >> { %v5109_v45 = vunpack.c.h.bf16 %v7553_v32  ;;  %v7658_v34 = vadd.f32 %v3016_v26, %v3015_v8  ;;  %v7660_v58 = vadd.f32 %v3027_v10, %v3026_v17  ;;  %v8578_v41 = vunpack.c.l.bf16 %v7460_v12  ;;  %vm8594_vm14 = vmmov %vm8537_vm3 }
 0x4f4   : >> { %3955 = vbcast.lane.b32.xlu0 %v7248_v38, 376  ;;  %3315 = vbcast.lane.b32.xlu1 %v7290_v54, 312  ;;  %v3341_v3 = vmul.f32 %v5080_v7, %v7476_v57  ;;  %v3052_v13 = vsel %vm8579_vm5, %v2993_v14, 0.0  ;;  %v8580_v9 = vunpack.c.h.bf16 %v7460_v12  ;;  %v5176_v26 = vunpack.c.l.bf16 %v7581_v30  ;;  %vm8596_vm4 = vmmov %vm8537_vm3 }
 0x4f5   : >> { %v7665_v25 = vmul.f32 %v8578_v41, %v7312_v43  ;;  %v4997_v10 = vunpack.c.h.bf16 %v7535_v40  ;;  %v8581_v43 = vunpack.c.h.bf16 %v7487_v5  ;;  %v3659_v17 = vmul.f32 %v5108_v42, %v7448_v63  ;;  %vm8597_vm5 = vmmov %vm8537_vm3 }
 0x4f6   : >> { %v7672_v47 = vmul.f32 %v8580_v9, %v7318_v39  ;;  %v3280_v32 = vpop.permute.xlu0 %3279  ;;  %v3292_v35 = vpop.permute.xlu1 %3291  ;;  %v8582_v39 = vunpack.c.l.bf16 %v7487_v5  ;;  %v5024_v41 = vunpack.c.l.bf16 %v7595_v2  ;;  %v5061_v9 = vunpack.c.h.bf16 %v7550_v61  ;;  %v7693_v5 = vld [vmem:[%s5786_s29 + $0x38] sm:$0xff]  }
 0x4f7   : >> { %v3658_v8 = vmul.f32 %v8581_v43, %v7368_v53  ;;  %v3339_v57 = vmul.f32 %v5076_v29, %v3280_v32  ;;  %v3342_v7 = vmul.f32 %v5081_v6, %v3292_v35  ;;  %v3427_v53 = vsel %vm8583_vm6, %v3341_v3, 0.0  ;;  %vm8598_vm6 = vmmov %vm8537_vm3 }
 0x4f8   : >> { %v3657_v12 = vmul.f32 %v8582_v39, %v7332_v11  ;;  %3971 = vbcast.lane.b32.xlu0 %v7268_v24, 376  ;;  %3647 = vbcast.lane.b32.xlu1 %v7290_v54, 336  ;;  %v3670_v35 = vmul.f32 %v5129_v36, %v7529_v52  ;;  %v7696_v11 = vld [vmem:[%s5786_s29 + $0xf0] sm:$0xff]   ;;  %v8586_v24 = vunpack.c.l.bf16 %v7469_v51  ;;  %v8587_v42 = vunpack.c.l.bf16 %v7484_v59 }
 0x4f9   : >> { %v3417_v6 = vsel %vm8584_vm7, %v3339_v57, 0.0  ;;  %v3428_v29 = vsel %vm8585_vm8, %v3342_v7, 0.0  ;;  %v8588_v57 = vunpack.c.h.bf16 %v7433_v18  ;;  %v3701_v18 = vsel %vm8593_vm13, %v3659_v17, 0.0  ;;  %vm8601_vm7 = vmmov %vm8537_vm3 }
 0x4fa   : >> { %v3329_v63 = vmul.f32 %v8586_v24, %v7322_v56  ;;  %v3653_v32 = vmul.f32 %v8587_v42, %v7328_v46  ;;  %v7705_v3 = vadd.f32 %v3417_v6, %v7446_v55  ;;  %v7707_v52 = vadd.f32 %v3428_v29, %v3427_v53  ;;  %v7709_v36 = vpop.permute.xlu0 %3307  ;;  %v3592_v43 = vpop.permute.xlu1 %3591  ;;  %vm8602_vm8 = vmmov %vm8537_vm3 }
 0x4fb   : >> { %v7714_v7 = vmul.f32 %v8588_v57, %v7324_v22  ;;  %v8589_v56 = vunpack.c.h.bf16 %v7457_v20  ;;  %v3699_v24 = vsel %vm8590_vm9, %v3658_v8, 0.0  ;;  %v3669_v46 = vmul.f32 %v5128_v27, %v3592_v43  ;;  %vm8603_vm9 = vmmov %vm8537_vm3 }
 0x4fc   : >> { %v3698_v55 = vsel %vm8591_vm10, %v3657_v12, 0.0  ;;  %v8592_v53 = vunpack.c.l.bf16 %v7535_v40  ;;  %3951 = vbcast.lane.b32.xlu1 %v7248_v38, 368  ;;  %v5164_v29 = vunpack.c.l.bf16 %v7693_v5  ;;  %v3738_v20 = vsel %vm8594_vm14, %v3670_v35, 0.0  ;;  %vm8604_vm10 = vmmov %vm8537_vm3 }
 0x4fd   : >> { %v2994_v39 = vmul.f32 %v8589_v56, %v7344_v21  ;;  %v8595_v21 = vunpack.c.h.bf16 %v7581_v30  ;;  %v3737_v8 = vsel %vm8537_vm3, %v3669_v46, 0.0  ;;  %v3388_v12 = vsel %vm8596_vm4, %v3329_v63, 0.0  ;;  %vm8608_vm13 = vmmov %vm8537_vm3 }
 0x4fe   : >> { %v2995_v6 = vmul.f32 %v8592_v53, %v7366_v48  ;;  %v7735_v48 = vsel %vm8597_vm5, %v3653_v32, 0.0  ;;  %v3700_v38 = vadd.f32 %v3699_v24, %v3698_v55  ;;  %v7737_v40 = vadd.f32 %v3738_v20, %v3737_v8  ;;  %v3556_v42 = vpop.permute.xlu0 %3555  ;;  %v3896_v43 = vpop.permute.xlu1 %3895  ;;  %v8606_v8 = vld [vmem:[#allocation27_spill] sm:$0xff]  ;;  %vm8616_vm14 = vmmov %vm8537_vm3 }
 0x4ff   : >> { %v3998_v27 = vmul.f32 %v8595_v21, %v7557_v23  ;;  %v3053_v17 = vsel %vm8598_vm6, %v2994_v39, 0.0  ;;  %v3660_v57 = vmul.f32 %v5109_v45, %v3556_v42  ;;  %v3997_v35 = vmul.f32 %v5176_v26, %v3896_v43  ;;  %v7770_v43 = vld [vmem:[%s5786_s29 + $0xe8] sm:$0xff]   ;;  %vm8618_vm4 = vmmov %vm8537_vm3  ;;  %v8624_v42 = vld [vmem:[#allocation36_spill] sm:$0xff] }
 0x500   : >> { %v5005_v56 = vunpack.c.h.bf16 %v7584_v4  ;;  %v8599_v23 = vunpack.c.h.bf16 %v7495_v60  ;;  %v8600_v63 = vunpack.c.h.bf16 %v7469_v51  ;;  %v3702_v46 = vadd.f32 %v3701_v18, %v3700_v38  ;;  %3979 = vbcast.lane.b32.xlu1 %v7290_v54, 360  ;;  %vm8626_vm5 = vmmov %vm8537_vm3 }
 0x501   : >> { %v3055_v39 = vsel %vm8601_vm7, %v2995_v6, 0.0  ;;  %v4048_v45 = vsel %vm8602_vm8, %v3998_v27, 0.0  ;;  %v3703_v26 = vsel %vm8603_vm9, %v3660_v57, 0.0  ;;  %v4047_v55 = vsel %vm8604_vm10, %v3997_v35, 0.0  ;;  %v8609_v57 = vld [vmem:[#allocation38_spill] sm:$0xff]  ;;  %vm8629_vm6 = vmmov %vm8537_vm3 }
 0x502   : >> { %v2998_v30 = vmul.f32 %v8599_v23, %v7342_v0  ;;  %v3330_v32 = vmul.f32 %v8600_v63, %v7356_v19  ;;  %v3054_v53 = vadd.f32 %v3053_v17, %v3052_v13  ;;  %v8605_v0 = vunpack.c.l.bf16 %v7502_v1  ;;  %v7760_v20 = vpop.permute.xlu0 %3607  ;;  %v2904_v21 = vpop.permute.xlu1 %2903  ;;  %v8611_v63 = vld [vmem:[#allocation31_spill] sm:$0xff]  ;;  %vm8630_vm7 = vmmov %vm8537_vm3 }
 0x503   : >> { %v7756_v19 = vadd.f32 %v3703_v26, %v3702_v46  ;;  %v7758_v18 = vadd.f32 %v4048_v45, %v4047_v55  ;;  %v8607_v6 = vunpack.c.l.bf16 %v7492_v33  ;;  %v2996_v38 = vmul.f32 %v4997_v10, %v2904_v21  ;;  %v8612_v46 = vld [vmem:[#allocation52_spill] sm:$0xff]  ;;  %v8613_v26 = vld [vmem:[#allocation33_spill] sm:$0xff]  ;;  %v8614_v55 = vld [vmem:[#allocation47_spill] sm:$0xff] }
 0x504   : >> { %v3333_v51 = vmul.f32 %v8605_v0, %v7348_v28  ;;  %v3066_v28 = vsel %vm8608_vm13, %v2998_v30, 0.0  ;;  %v3056_v17 = vadd.f32 %v3055_v39, %v3054_v53  ;;  %v8610_v35 = vunpack.c.l.bf16 %v7550_v61  ;;  %3939 = vbcast.lane.b32.xlu1 %v8611_v63, 376  ;;  %vm8631_vm8 = vmmov %vm8537_vm3 }
 0x505   : >> { %v7765_v27 = vmul.f32 %v8607_v6, %v8606_v8  ;;  %v8615_v10 = vunpack.c.l.bf16 %v8614_v55  ;;  %v3389_v21 = vsel %vm8616_vm14, %v3330_v32, 0.0  ;;  %v8617_v8 = vunpack.c.h.bf16 %v7595_v2  ;;  %v8619_v6 = vld [vmem:[#allocation35_spill] sm:$0xff]  ;;  %vm8635_vm9 = vmmov %vm8537_vm3 }
 0x506   : >> { %v3331_v23 = vmul.f32 %v8610_v35, %v8609_v57  ;;  %v3057_v39 = vsel %vm8537_vm3, %v2996_v38, 0.0  ;;  %v3401_v53 = vsel %vm8618_vm4, %v3333_v51, 0.0  ;;  %v8620_v57 = vld [vmem:[#allocation48_spill] sm:$0xff]  ;;  %v3872_v14 = vpop.permute.xlu0 %3871  ;;  %v2968_v45 = vpop.permute.xlu1 %2967  ;;  %v8623_v32 = vunpack.c.h.bf16 %v7484_v59  ;;  %vm8636_vm10 = vmmov %vm8537_vm3 }
 0x507   : >> { %v7781_v0 = vmul.f32 %v8615_v10, %v8613_v26  ;;  %v3010_v30 = vmul.f32 %v8617_v8, %v7640_v62  ;;  %v8621_v35 = vunpack.c.l.bf16 %v8620_v57  ;;  %v3058_v22 = vadd.f32 %v3057_v39, %v3056_v17  ;;  %v8622_v10 = vld [vmem:[#allocation29_spill] sm:$0xff]  ;;  %vm8639_vm13 = vmmov %vm8537_vm3 }
 0x508   : >> { %v3654_v13 = vmul.f32 %v8623_v32, %v8622_v10  ;;  %v8625_v62 = vunpack.c.l.bf16 %v7495_v60  ;;  %v3991_v38 = vmul.f32 %v5164_v29, %v3872_v14  ;;  %v3009_v51 = vmul.f32 %v5024_v41, %v2968_v45  ;;  %3651 = vbcast.lane.b32.xlu1 %v7290_v54, 344  ;;  %v8632_v29 = vld [vmem:[#allocation32_spill] sm:$0xff]  ;;  %vm8645_vm4 = vmmov %vm8537_vm3 }
 0x509   : >> { %v3661_v63 = vmul.f32 %v8621_v35, %v8619_v6  ;;  %v3390_v24 = vadd.f32 %v3389_v21, %v3388_v12  ;;  %v3391_v6 = vsel %vm8626_vm5, %v3331_v23, 0.0  ;;  %v3059_v17 = vrot.slane %v3058_v22, 4  ;;  %v8627_v35 = vld [vmem:[#allocation59_spill] sm:$0xff]  ;;  %vm8646_vm5 = vmmov %vm8537_vm3 }
 0x50a   : >> { %v2997_v8 = vmul.f32 %v8625_v62, %v8624_v42  ;;  %v749_v39 = vstv %s5597_s21  ;;  %v8628_v26 = vunpack.c.l.bf16 %v7584_v4  ;;  %v3105_v10 = vsel %vm8629_vm6, %v3010_v30, 0.0  ;;  %v8634_v42 = vld [vmem:[#allocation50_spill] sm:$0xff]  ;;  %v7818_v21 = vpop.permute.xlu0 %3911  ;;  %v3252_v32 = vpop.permute.xlu1 %3251  ;;  %v8637_v62 = vld [vmem:[#allocation39_spill] sm:$0xff]  ;;  %vm8647_vm6 = vmmov %vm8537_vm3  ;;  %s742_s21 = sadd.s32 1, %s5597_s21  }
 0x50b   : >> { %v4024_v60 = vsel %vm8630_vm7, %v3991_v38, 0.0  ;;  %v3104_v14 = vsel %vm8631_vm8, %v3009_v51, 0.0  ;;  %v8633_v2 = vunpack.c.h.bf16 %v7502_v1  ;;  %v3060_v12 = vadd.f32 %v3059_v17, %v3058_v22  ;;  %v7827_v22 = vpop.f32.mrb[0].mxu1  ;;  %vm8653_vm7 = vmmov %vm8537_vm3  ;;  %p739_p1 = scmp.ge.s32.totalorder %s742_s21, 7  }
 0x50c   : >> { %v2999_v59 = vmul.f32 %v8628_v26, %v8627_v35  ;;  %v7814_v23 = vadd.f32 %v4024_v60, %v8634_v42  ;;  %v7816_v45 = vadd.f32 %v3105_v10, %v3104_v14  ;;  %v3686_v26 = vsel %vm8635_vm9, %v3654_v13, 0.0  ;;  %3983 = vbcast.lane.b32.xlu1 %v7290_v54, 368  ;;  %v8641_v13 = vld [vmem:[#allocation22_spill] sm:$0xff]  ;;  %v5376_v14 = vpop.f32.mrb[1].mxu1  ;;  %vm8654_vm8 = vmmov %vm8537_vm3  ;;  %s4703_s16 = sshll.u32 (%p739_p1), %s5727_s9, 6  ;;  %s8760_s20 = sld [smem:[#allocation66_spill]] (%p739_p1) }
 0x50d   : >> { %v3334_v41 = vmul.f32 %v8633_v2, %v8632_v29  ;;  %v3065_v30 = vsel %vm8636_vm10, %v2997_v8, 0.0  ;;  %v8638_v38 = vunpack.c.l.bf16 %v7544_v49  ;;  %v3332_v1 = vmul.f32 %v5061_v9, %v3252_v32  ;;  %vm8655_vm9 = vmmov %vm8537_vm3  ;;  %v7880_v8 = vld [vmem:[%s5786_s29 + $0xb8] sm:$0xff]   ;;  %s4478_s23 = sshll.u32 (%p739_p1), %s5805_s26, 4  ;;  %s4461_s19 = scalar_lea.sflag (%p739_p1), [#allocation7], %s5764_s22  ;;  %s8260_s23 = int_to_ptr.vmem [resolvable:$true] %s4478_s23 }
 0x50e   : >> { %v3711_v17 = vsel %vm8639_vm13, %v3661_v63, 0.0  ;;  %v3392_v35 = vadd.f32 %v3391_v6, %v3390_v24  ;;  %v8640_v10 = vunpack.c.l.bf16 %v7608_v31  ;;  %vm7835_vm14 = vcmp.gt.s32.totalorder %v8641_v13, %v749_v39  ;;  %v4193_v6 = vpop.f32.mrb[2].mxu1  ;;  %v2923_v32 = vpop.permute.xlu0 %2922  ;;  %vm8656_vm10 = vmmov %vm8537_vm3  ;;  %s5606_s17 = smov (%p739_p1), [#allocation6]  }
 0x50f   : >> { %v3655_v51 = vmul.f32 %v8638_v38, %v8637_v62  ;;  %v3068_v61 = vsel %vm8537_vm3, %v2999_v59, 0.0  ;;  %v8644_v9 = vunpack.c.h.bf16 %v7627_v37  ;;  %v3061_v63 = vrot.slane %v3060_v12, 2  ;;  %v3304_v62 = vpop.permute.xlu1 %3303  ;;  %vm8657_vm13 = vmmov %vm8537_vm3 }
 0x510   : >> { %v3335_v60 = vmul.f32 %v8640_v10, %v7642_v15  ;;  %v3393_v24 = vsel %vm8645_vm4, %v3332_v1, 0.0  ;;  %v3687_v15 = vadd.f32 %v3686_v26, %v7735_v48  ;;  %v3067_v2 = vadd.f32 %v3066_v28, %v3065_v30  ;;  %v8648_v10 = vld [vmem:[#allocation40_spill] sm:$0xff]  ;;  %3987 = vbcast.lane.b32.xlu1 %v7290_v54, 376  ;;  %vm8661_vm4 = vmmov %vm8537_vm3 }
 0x511   : >> { %v3346_v29 = vmul.f32 %v8644_v9, %v7709_v36  ;;  %v3402_v42 = vsel %vm8646_vm5, %v3334_v41, 0.0  ;;  %v3394_v39 = vadd.f32 %v3393_v24, %v3392_v35  ;;  %v3688_v38 = vsel %vm8647_vm6, %v3655_v51, 0.0  ;;  %v5377_v9 = vpop.f32.mrb[3].mxu1  ;;  %v8651_v48 = vld [vmem:[#allocation44_spill] sm:$0xff]  ;;  %vm8662_vm5 = vmmov %vm8537_vm3 }
 0x512   : >> { %v8649_v59 = vunpack.c.h.bf16 %v8620_v57  ;;  %v3000_v36 = vmul.f32 %v5005_v56, %v2923_v32  ;;  %v8650_v1 = vunpack.c.l.bf16 %v7627_v37  ;;  %v8652_v28 = vunpack.c.l.bf16 %v8612_v46  ;;  %v744_v37 = vld [vmem:[#allocation3] sm:$0xff]  ;;  %vm8668_vm6 = vmmov %vm8537_vm3  ;;  %s8257_s25 = scalar_lea.hbm (%p739_p1), %s8760_s20, %s4703_s16 }
 0x513   : >> { %v3069_v26 = vadd.f32 %v3068_v61, %v3067_v2  ;;  %v3404_v30 = vsel %vm8653_vm7, %v3335_v60, 0.0  ;;  %v3395_v35 = vrot.slane %v3394_v39, 4  ;;  %v3441_v57 = vsel %vm8654_vm8, %v3346_v29, 0.0  ;;  %v3540_v61 = vpop.permute.xlu1 %3539  ;;  %vm8670_vm7 = vmmov %vm8537_vm3 }
 0x514   : >> { %v3662_v13 = vmul.f32 %v8649_v59, %v8648_v10  ;;  %v3345_v14 = vmul.f32 %v8650_v1, %v3304_v62  ;;  %v3663_v41 = vmul.f32 %v8652_v28, %v8651_v48  ;;  %v3062_v51 = vadd.f32 %v3061_v63, %v3060_v12  ;;  %v3268_v10 = vpop.permute.xlu0 %3267  ;;  %4404 = vrot.lane.b32.xlu1 %v744_v37, %s5603_s1  ;;  %vm8671_vm8 = vmmov %vm8537_vm3 }
 0x515   : >> { %v3070_v4 = vsel %vm8655_vm9, %v3000_v36, 0.0  ;;  %v3403_v24 = vadd.f32 %v3402_v42, %v3401_v53  ;;  %v3396_v6 = vadd.f32 %v3395_v35, %v3394_v39  ;;  %v8658_v54 = vunpack.c.h.bf16 %v7608_v31  ;;  %vm8672_vm9 = vmmov %vm8537_vm3 }
 0x516   : >> { %v3440_v56 = vsel %vm8656_vm10, %v3345_v14, 0.0  ;;  %v3071_v32 = vadd.f32 %v3070_v4, %v3069_v26  ;;  %v3712_v60 = vsel %vm8657_vm13, %v3662_v13, 0.0  ;;  %v8659_v12 = vunpack.c.h.bf16 %v7544_v49  ;;  %v5473_v13 = vld [vmem:[%s8352_s13] sm:$0xff]   ;;  %vm8673_vm10 = vmmov %vm8537_vm3 }
 0x517   : >> { %v7862_v62 = vadd.f32 %v3441_v57, %v3440_v56  ;;  %v3336_v2 = vmul.f32 %v8658_v54, %v3268_v10  ;;  %v8660_v63 = vmov 0   ;;  %v3689_v53 = vadd.f32 %v3688_v38, %v3687_v15  ;;  %v3584_v26 = vpop.permute.xlu1 %3583  ;;  %5379 = vmatpush3.bf16.msra.mxu0 %v5473_v13  ;;  %v7895_v54 = vld [vmem:[%s5786_s29 + $0x78] sm:$0xff]   ;;  %vm8674_vm13 = vmmov %vm8537_vm3 }
 0x518   : >> { %v3656_v29 = vmul.f32 %v8659_v12, %v3540_v61  ;;  %v4424_v59 = vsel %vm7835_vm14, 1, %v8660_v63  ;;  %v3405_v42 = vadd.f32 %v3404_v30, %v3403_v24  ;;  %v3397_v39 = vrot.slane %v3396_v6, 2  ;;  %v3572_v28 = vpop.permute.xlu0 %3571  ;;  %vm8667_vm14 = vmmov %vm8537_vm3 }
 0x519   : >> { %v3072_v36 = vrot.slane %v3071_v32, 4  ;;  %v3714_v31 = vsel %vm8537_vm3, %v3663_v41, 0.0  ;;  %v3063_v1 = vrot.slane %v3062_v51, 1  ;;  %v3406_v49 = vsel %vm8661_vm4, %v3336_v2, 0.0  ;;  %v5474_v41 = vld [vmem:[%s8352_s13 + $0x8] sm:$0xff]   ;;  %4426 = vperm.xlu1 %5468, %v4424_v59  }
 0x51a   : >> { %v3690_v14 = vsel %vm8662_vm5, %v3656_v29, 0.0  ;;  %v3398_v15 = vadd.f32 %v3397_v39, %v3396_v6  ;;  %v3407_v9 = vadd.f32 %v3406_v49, %v3405_v42  ;;  %v3713_v30 = vadd.f32 %v3712_v60, %v3711_v17  ;;  %vm8683_vm5 = vmmov %vm8661_vm4 }
 0x51b   : >> { %v3073_v38 = vadd.f32 %v3072_v36, %v3071_v32  ;;  %v7882_v48 = vadd.f32 %v3690_v14, %v3689_v53  ;;  %v8663_v35 = vunpack.c.h.bf16 %v8612_v46  ;;  %v8664_v4 = vunpack.c.l.bf16 %v7770_v43  ;;  %v3612_v39 = vpop.permute.xlu1 %3611  ;;  %v8669_v36 = vld [vmem:[#allocation49_spill] sm:$0xff] }
 0x51c   : >> { %v5137_v37 = vunpack.c.h.bf16 %v7656_v16  ;;  %v8665_v24 = vmov 0.0   ;;  %v3399_v6 = vrot.slane %v3398_v15, 1  ;;  %v3408_v10 = vrot.slane %v3407_v9, 4  ;;  %v7902_v59 = vpop.permute.xlu0 %3623 }
 0x51d   : >> { %v3664_v57 = vmul.f32 %v8663_v35, %v3572_v28  ;;  %v3667_v56 = vmul.f32 %v8664_v4, %v3584_v26  ;;  %5380 = vmatprep.subr.bf16.mxu0 %v8665_v24  ;;  %v3074_v32 = vrot.slane %v3073_v38, 2  ;;  %v5180_v61 = vunpack.c.l.bf16 %v7880_v8  ;;  %v748_v4 = vld [vmem:[%s747_s24] sm:$0xf]  ;;  %s5495_s24 = scalar_lea.vmem (%p739_p1), %s8260_s23, 448 }
 0x51e   : >> { %v3715_v2 = vadd.f32 %v3714_v31, %v3713_v30  ;;  %v8666_v46 = vunpack.c.l.bf16 %v7656_v16  ;;  %v3064_v29 = vadd.f32 %v3063_v1, %v3062_v51  ;;  %v3400_v63 = vadd.f32 %v3399_v6, %v3398_v15  ;;  %5381 = vmatpush3.bf16.msra.mxu0 %v5474_v41  ;;  %v5475_v16 = vld [vmem:[%s8351_s12] sm:$0xff]   ;;  %p5496_p2 = scmp.ne.s32.totalorder (%p739_p1), %s8260_s23, %s5495_s24 }
 0x51f   : >> { %v3716_v60 = vsel %vm8667_vm14, %v3664_v57, 0.0  ;;  %v3727_v12 = vsel %vm8668_vm6, %v3667_v56, 0.0  ;;  %v3075_v53 = vadd.f32 %v3074_v32, %v3073_v38  ;;  %v3409_v42 = vadd.f32 %v3408_v10, %v3407_v9  ;;  %5392 = vmatprep.subr.bf16.mxu0 %v8665_v24  ;;  %5387 = vmatpush3.bf16.msra.mxu1 %v5475_v16  ;;  %v3888_v35 = vpop.permute.xlu1 %3887  ;;  %v8675_v56 = vld [vmem:[#allocation37_spill] sm:$0xff]  ;;  %vm8685_vm14 = vmmov %vm8661_vm4  ;;  %v8064_v24 = vld [vmem:[%s5786_s29 + $0x1b0] sm:$0xff]  }
 0x520   : >> { %v3673_v17 = vmul.f32 %v8666_v46, %v7760_v20  ;;  %v3717_v20 = vadd.f32 %v3716_v60, %v3715_v2  ;;  %v7908_v13 = vadd.f32 %v3727_v12, %v8669_v36  ;;  %v3674_v31 = vmul.f32 %v5137_v37, %v3612_v39  ;;  %v8676_v37 = vld [vmem:[#allocation42_spill] sm:$0xff]  ;;  %v8678_v46 = vld [vmem:[#allocation45_spill] sm:$0xff]  ;;  %vm8686_vm6 = vmmov %vm8661_vm4  ;;  %p5497_p3 = pnand (%p739_p1), %p5496_p2, %p5745_p6 }
 0x521   : >> { %v5172_v51 = vunpack.c.l.bf16 %v7895_v54  ;;  %v3363_v1 = vsel %vm8670_vm7, %v7714_v7, 0.0  ;;  %v3029_v49 = vsel %vm8671_vm8, %v7765_v27, 0.0  ;;  %v7917_v14 = vadd.f32 %v3400_v63, %v3064_v29  ;;  %v3904_v27 = vpop.permute.xlu0 %3903  ;;  %v8680_v12 = vld [vmem:[#allocation41_spill] sm:$0xff]  ;;  %v7939_v39 = vld [vmem:[%s5786_s29 + $0x188] sm:$0xff]   ;;  %vm8687_vm7 = vmmov %vm8661_vm4 }
 0x522   : >> { %v3410_v15 = vrot.slane %v3409_v42, 2  ;;  %v3365_v38 = vsel %vm8672_vm9, %v7781_v0, 0.0  ;;  %v3750_v9 = vsel %vm8673_vm10, %v3673_v17, 0.0  ;;  %v3718_v28 = vrot.slane %v3717_v20, 4  ;;  %vm8688_vm8 = vmmov %vm8661_vm4  ;;  %p5498_p4 = pneg (%p739_p1), %p5497_p3 }
 0x523   : >> { %v3751_v26 = vsel %vm8674_vm13, %v3674_v31, 0.0  ;;  %v3076_v41 = vrot.slane %v3075_v53, 1  ;;  %v5185_v57 = vunpack.c.h.bf16 %v7696_v11  ;;  %v8677_v6 = vunpack.c.h.bf16 %v8676_v37  ;;  %vm8689_vm9 = vmmov %vm8661_vm4 }
 0x524   : >> { %v3411_v7 = vadd.f32 %v3410_v15, %v3409_v42  ;;  %v7926_v30 = vadd.f32 %v3751_v26, %v3750_v9  ;;  %v3719_v0 = vadd.f32 %v3718_v28, %v3717_v20  ;;  %v3999_v10 = vmul.f32 %v5180_v61, %v3904_v27  ;;  %v8684_v15 = vld [vmem:[#allocation51_spill] sm:$0xff]  ;;  %v3916_v26 = vpop.permute.xlu1 %3915  ;;  %vm8690_vm10 = vmmov %vm8661_vm4 }
 0x525   : >> { %v2984_v32 = vmul.f32 %v8677_v6, %v8675_v56  ;;  %v3995_v2 = vmul.f32 %v5172_v51, %v3888_v35  ;;  %v8679_v17 = vunpack.c.h.bf16 %v8614_v55  ;;  %v8681_v29 = vunpack.c.h.bf16 %v7492_v33  ;;  %v7952_v28 = vpop.permute.xlu0 %3931  ;;  %vm8694_vm13 = vmmov %vm8661_vm4 }
 0x526   : >> { %v3412_v42 = vrot.slane %v3411_v7, 1  ;;  %vm4287_vm3 = vcmask 130048   ;;  %v8682_v16 = vunpack.c.l.bf16 %v7696_v11  ;;  %v3720_v31 = vrot.slane %v3719_v0, 2 }
 0x527   : >> { %v3324_v60 = vmul.f32 %v8679_v17, %v8678_v46  ;;  %v2988_v63 = vmul.f32 %v8681_v29, %v8680_v12  ;;  %v4050_v61 = vsel %vm8661_vm4, %v3999_v10, 0.0  ;;  %v4037_v20 = vsel %vm8683_vm5, %v3995_v2, 0.0  ;;  %5389 = vmatmul.mubr.msk.bf16.vlgmr.msra.gmra.mrb[4].mxu1 %vm4287_vm3, %v748_v4  ;;  %v8692_v12 = vld [vmem:[#allocation46_spill] sm:$0xff]  ;;  %vm8698_vm3 = vmmov %vm8661_vm4 }
 0x528   : >> { %v4001_v36 = vmul.f32 %v8682_v16, %v7818_v21  ;;  %v3077_v55 = vadd.f32 %v3076_v41, %v3075_v53  ;;  %v3413_v51 = vadd.f32 %v3412_v42, %v3411_v7  ;;  %v7947_v33 = vadd.f32 %v4050_v61, %v7758_v18  ;;  %v7962_v7 = vld [vmem:[%s5786_s29 + $0x198] sm:$0xff]   ;;  %vm8699_vm4 = vmmov %vm8698_vm3 }
 0x529   : >> { %v7950_v9 = vadd.f32 %v4037_v20, %v8684_v15  ;;  %v3018_v11 = vsel %vm8685_vm14, %v2984_v32, 0.0  ;;  %v3721_v21 = vadd.f32 %v3720_v31, %v3719_v0  ;;  %v4002_v27 = vmul.f32 %v5185_v57, %v3916_v26  ;;  %v2957_v0 = vpop.permute.xlu1 %2956  ;;  %v8697_v31 = vld [vmem:[#allocation53_spill] sm:$0xff]  ;;  %vm8700_vm5 = vmmov %vm8698_vm3 }
 0x52a   : >> { %v5020_v35 = vunpack.c.l.bf16 %v7939_v39  ;;  %v3364_v56 = vadd.f32 %v3363_v1, %v7648_v50  ;;  %v3030_v53 = vadd.f32 %v3029_v49, %v7660_v58  ;;  %v3031_v41 = vsel %vm8686_vm6, %v2988_v63, 0.0  ;;  %v7972_v49 = vpop.permute.xlu0 %2975  ;;  %v5328_v15 = vld [vmem:[%s5786_s29 + $0x1a0] sm:$0xff]   ;;  %vm8701_vm14 = vmmov %vm8698_vm3 }
 0x52b   : >> { %v7959_v18 = vadd.f32 %v3413_v51, %v3077_v55  ;;  %v3367_v4 = vsel %vm8687_vm7, %v3324_v60, 0.0  ;;  %v4060_v37 = vsel %vm8688_vm8, %v4001_v36, 0.0  ;;  %v3722_v6 = vrot.slane %v3721_v21, 1  ;;  %v8691_v60 = vld [vmem:[#allocation26_spill] sm:$0xff]  ;;  %vm8702_vm6 = vmmov %vm8698_vm3 }
 0x52c   : >> { %v4061_v57 = vsel %vm8689_vm9, %v4002_v27, 0.0  ;;  %v3350_v32 = vsel %vm8690_vm10, %v7672_v47, 0.0  ;;  %v3366_v50 = vadd.f32 %v3365_v38, %v3364_v56  ;;  %v3019_v58 = vadd.f32 %v3018_v11, %v7658_v34  ;;  %v7979_v47 = vld [vmem:[%s5786_s29 + $0x128] sm:$0xff]   ;;  %vm8706_vm7 = vmmov %vm8698_vm3 }
 0x52d   : >> { %v7970_v1 = vadd.f32 %v4061_v57, %v4060_v37  ;;  %v3032_v10 = vadd.f32 %v3031_v41, %v3030_v53  ;;  %v3723_v2 = vadd.f32 %v3722_v6, %v3721_v21  ;;  %v3007_v46 = vmul.f32 %v5020_v35, %v2957_v0  ;;  %v8695_v38 = vld [vmem:[#allocation34_spill] sm:$0xff]  ;;  %v5340_v0 = vld [vmem:[%s5786_s29 + $0x130] sm:$0xff]   ;;  %vm8707_vm8 = vmmov %vm8698_vm3 }
 0x52e   : >> { %v5084_v17 = vunpack.c.l.bf16 %v7962_v7  ;;  %v8693_v29 = vunpack.c.l.bf16 %v8692_v12  ;;  %v3368_v42 = vadd.f32 %v3367_v4, %v3366_v50  ;;  %v3349_v34 = vsel %vm8694_vm13, %v7665_v25, 0.0  ;;  %v7994_v11 = vpop.permute.xlu0 %3311  ;;  %v3296_v25 = vpop.permute.xlu1 %3295  ;;  %v5294_v41 = vld [vmem:[%s5786_s29 + $0x140] sm:$0xff]   ;;  %v8001_v37 = vld [vmem:[%s5786_s29 + $0x148] sm:$0xff]   ;;  %vm8708_vm9 = vmmov %vm8698_vm3 }
 0x52f   : >> { %v8696_v16 = vunpack.c.h.bf16 %v8692_v12  ;;  %v7987_v61 = vadd.f32 %v3723_v2, %v8697_v31  ;;  %v3094_v20 = vsel %vm8698_vm3, %v3007_v46, 0.0  ;;  %v3351_v55 = vadd.f32 %v3350_v32, %v3349_v34  ;;  %vm8709_vm10 = vmmov %vm8698_vm3 }
 0x530   : >> { %v3319_v63 = vmul.f32 %v8693_v29, %v8691_v60  ;;  %v3020_v51 = vrot.slane %v3019_v58, 4  ;;  %v7992_v26 = vadd.f32 %v3094_v20, %v7638_v44  ;;  %v3033_v21 = vrot.slane %v3032_v10, 4  ;;  %vm8710_vm13 = vmmov %vm8698_vm3 }
 0x531   : >> { %v3320_v36 = vmul.f32 %v8696_v16, %v8695_v38  ;;  %v3343_v27 = vmul.f32 %v5084_v17, %v3296_v25  ;;  %v5132_v35 = vunpack.c.l.bf16 %v7979_v47  ;;  %v3369_v53 = vrot.slane %v3368_v42, 4 }
 0x532   : >> { %v3352_v56 = vsel %vm8699_vm4, %v3319_v63, 0.0  ;;  %v3705_v6 = vrot.slane %v7756_v19, 4  ;;  %v5144_v44 = vunpack.c.l.bf16 %v5328_v15  ;;  %v3021_v32 = vadd.f32 %v3020_v51, %v3019_v58  ;;  %v8009_v46 = vpop.permute.xlu0 %3615  ;;  %v3600_v17 = vpop.permute.xlu1 %3599  ;;  %vm8711_vm4 = vmmov %vm8698_vm3 }
 0x533   : >> { %v3354_v4 = vsel %vm8700_vm5, %v3320_v36, 0.0  ;;  %v3430_v57 = vsel %vm8701_vm14, %v3343_v27, 0.0  ;;  %v3353_v50 = vadd.f32 %v3352_v56, %v3351_v55  ;;  %v3034_v60 = vadd.f32 %v3033_v21, %v3032_v10  ;;  %v8703_v21 = vld [vmem:[#allocation43_spill] sm:$0xff]  ;;  %vm8712_vm5 = vmmov %vm8698_vm3 }
 0x534   : >> { %v8007_v2 = vadd.f32 %v3430_v57, %v7707_v52  ;;  %v5008_v12 = vunpack.c.l.bf16 %v5294_v41  ;;  %v3671_v29 = vmul.f32 %v5132_v35, %v3600_v17  ;;  %v5145_v63 = vunpack.c.h.bf16 %v5328_v15  ;;  %vm8714_vm14 = vmmov %vm8698_vm3 }
 0x535   : >> { %v5009_v34 = vunpack.c.h.bf16 %v5294_v41  ;;  %v3370_v38 = vadd.f32 %v3369_v53, %v3368_v42  ;;  %v3355_v16 = vadd.f32 %v3354_v4, %v3353_v50  ;;  %v5012_v36 = vunpack.c.l.bf16 %v8001_v37  ;;  %v8705_v4 = vld [vmem:[#allocation54_spill] sm:$0xff] }
 0x536   : >> { %v3706_v31 = vadd.f32 %v3705_v6, %v7756_v19  ;;  %v3677_v58 = vmul.f32 %v5144_v44, %v7902_v59  ;;  %v5193_v20 = vunpack.c.h.bf16 %v5340_v0  ;;  %v3740_v52 = vsel %vm8702_vm6, %v3671_v29, 0.0  ;;  %v8018_v10 = vpop.permute.xlu0 %3643  ;;  %v3628_v25 = vpop.permute.xlu1 %3627  ;;  %v8704_v19 = vld [vmem:[#allocation30_spill] sm:$0xff]  ;;  %vm8715_vm6 = vmmov %vm8698_vm3 }
 0x537   : >> { %v3022_v55 = vrot.slane %v3021_v32, 2  ;;  %v8016_v51 = vadd.f32 %v3740_v52, %v7737_v40  ;;  %v5173_v15 = vunpack.c.h.bf16 %v7895_v54  ;;  %v3035_v42 = vrot.slane %v3034_v60, 2 }
 0x538   : >> { %v3001_v27 = vmul.f32 %v5008_v12, %v8703_v21  ;;  %v3678_v35 = vmul.f32 %v5145_v63, %v3628_v25  ;;  %v5192_v56 = vunpack.c.l.bf16 %v5340_v0  ;;  %v3002_v53 = vmul.f32 %v5009_v34, %v8704_v19 }
 0x539   : >> { %v3371_v59 = vrot.slane %v3370_v38, 2  ;;  %v3356_v41 = vrot.slane %v3355_v16, 4  ;;  %v3003_v6 = vmul.f32 %v5012_v36, %v8705_v4  ;;  %v3707_v44 = vrot.slane %v3706_v31, 2  ;;  %v8713_v4 = vld [vmem:[#allocation57_spill] sm:$0xff] }
 0x53a   : >> { %v3763_v40 = vsel %vm8706_vm7, %v3677_v58, 0.0  ;;  %v4006_v57 = vmul.f32 %v5193_v20, %v7952_v28  ;;  %v3764_v50 = vsel %vm8707_vm8, %v3678_v35, 0.0  ;;  %v3023_v54 = vadd.f32 %v3022_v55, %v3021_v32  ;;  %v3892_v12 = vpop.permute.xlu0 %3891  ;;  %v3928_v29 = vpop.permute.xlu1 %3927  ;;  %v8034_v32 = vld [vmem:[%s5786_s29 + $0x1c8] sm:$0xff]   ;;  %vm8716_vm7 = vmmov %vm8698_vm3 }
 0x53b   : >> { %v8027_v17 = vadd.f32 %v3764_v50, %v3763_v40  ;;  %v5013_v0 = vunpack.c.h.bf16 %v8001_v37  ;;  %v3036_v63 = vadd.f32 %v3035_v42, %v3034_v60  ;;  %v3078_v34 = vsel %vm8708_vm9, %v3001_v27, 0.0  ;;  %v8043_v35 = vld [vmem:[%s5786_s29 + $0x168] sm:$0xff]   ;;  %vm8717_vm8 = vmmov %vm8698_vm3 }
 0x53c   : >> { %v3996_v36 = vmul.f32 %v5173_v15, %v3892_v12  ;;  %v4005_v52 = vmul.f32 %v5192_v56, %v3928_v29  ;;  %v3079_v58 = vsel %vm8709_vm10, %v3002_v53, 0.0  ;;  %v3372_v25 = vadd.f32 %v3371_v59, %v3370_v38  ;;  %v8040_v15 = vld [vmem:[%s5786_s29 + $0x1d8] sm:$0xff]   ;;  %v8052_v59 = vld [vmem:[%s5786_s29 + $0x170] sm:$0xff]   ;;  %vm8718_vm9 = vmmov %vm8698_vm3 }
 0x53d   : >> { %v3357_v28 = vadd.f32 %v3356_v41, %v3355_v16  ;;  %v3081_v20 = vsel %vm8710_vm13, %v3003_v6, 0.0  ;;  %v3708_v55 = vadd.f32 %v3707_v44, %v3706_v31  ;;  %v4074_v21 = vsel %vm8698_vm3, %v4006_v57, 0.0  ;;  %vm8719_vm10 = vmmov %vm8698_vm3 }
 0x53e   : >> { %v4039_v37 = vsel %vm8711_vm4, %v3996_v36, 0.0  ;;  %v4073_v60 = vsel %vm8712_vm5, %v4005_v52, 0.0  ;;  %v3024_v42 = vrot.slane %v3023_v54, 1  ;;  %v3080_v27 = vadd.f32 %v3079_v58, %v3078_v34  ;;  %v8048_v56 = vpop.permute.xlu0 %3943  ;;  %v2942_v19 = vpop.permute.xlu1 %2941  ;;  %vm8721_vm13 = vmmov %vm8698_vm3 }
 0x53f   : >> { %v4040_v38 = vadd.f32 %v4039_v37, %v7950_v9  ;;  %v8046_v16 = vadd.f32 %v4074_v21, %v4073_v60  ;;  %v3037_v31 = vrot.slane %v3036_v63, 1  ;;  %v3004_v41 = vmul.f32 %v5013_v0, %v2942_v19  ;;  %vm8723_vm4 = vmmov %vm8698_vm3 }
 0x540   : >> { %v5077_v6 = vunpack.c.h.bf16 %v8713_v4  ;;  %v3373_v44 = vrot.slane %v3372_v25, 1  ;;  %v3358_v40 = vrot.slane %v3357_v28, 2  ;;  %v3082_v57 = vadd.f32 %v3081_v20, %v3080_v27  ;;  %vm8724_vm5 = vmmov %vm8698_vm3 }
 0x541   : >> { %v4041_v50 = vrot.slane %v4040_v38, 4  ;;  %v3709_v12 = vrot.slane %v3708_v55, 1  ;;  %v3083_v34 = vsel %vm8714_vm14, %v3004_v41, 0.0  ;;  %v8058_v36 = vadd.f32 %v3024_v42, %v3023_v54  ;;  %vm8725_vm14 = vmmov %vm8698_vm3 }
 0x542   : >> { %v5200_v58 = vunpack.c.l.bf16 %v8052_v59  ;;  %v3084_v0 = vadd.f32 %v3083_v34, %v3082_v57  ;;  %v2961_v21 = vpop.permute.xlu0 %2960  ;;  %v3284_v37 = vpop.permute.xlu1 %3283  ;;  %v3038_v60 = vadd.f32 %v3037_v31, %v3036_v63  ;;  %v5133_v20 = vunpack.c.h.bf16 %v7979_v47 }
 0x543   : >> { %v4042_v52 = vadd.f32 %v4041_v50, %v4040_v38  ;;  %v3340_v19 = vmul.f32 %v5077_v6, %v3284_v37  ;;  %v5125_v27 = vunpack.c.h.bf16 %v7770_v43  ;;  %v3374_v4 = vadd.f32 %v3373_v44, %v3372_v25 }
 0x544   : >> { %v3359_v9 = vadd.f32 %v3358_v40, %v3357_v28  ;;  %v3085_v29 = vrot.slane %v3084_v0, 4  ;;  %v3710_v54 = vadd.f32 %v3709_v12, %v3708_v55  ;;  %v3692_v42 = vrot.slane %v7882_v48, 4 }
 0x545   : >> { %v4043_v53 = vrot.slane %v4042_v52, 2  ;;  %v5021_v38 = vunpack.c.h.bf16 %v7939_v39  ;;  %v3419_v41 = vsel %vm8715_vm6, %v3340_v19, 0.0  ;;  %v5181_v43 = vunpack.c.h.bf16 %v7880_v8  ;;  %vm8726_vm6 = vmmov %vm8698_vm3 }
 0x546   : >> { %v3086_v63 = vadd.f32 %v3085_v29, %v3084_v0  ;;  %v3420_v31 = vadd.f32 %v3419_v41, %v7705_v3  ;;  %v3604_v47 = vpop.permute.xlu0 %3603  ;;  %v3588_v6 = vpop.permute.xlu1 %3587  ;;  %v3454_v25 = vadd.f32 %v3374_v4, %v3038_v60  ;;  %v5208_v40 = vunpack.c.l.bf16 %v8064_v24 }
 0x547   : >> { %v4044_v57 = vadd.f32 %v4043_v53, %v4042_v52  ;;  %v3672_v28 = vmul.f32 %v5133_v20, %v3604_v47  ;;  %v3668_v44 = vmul.f32 %v5125_v27, %v3588_v6  ;;  %v3360_v55 = vrot.slane %v3359_v9, 1 }
 0x548   : >> { %v3087_v12 = vrot.slane %v3086_v63, 2  ;;  %v3421_v34 = vrot.slane %v3420_v31, 4  ;;  %v3790_v39 = vadd.f32 %v3710_v54, %v3454_v25  ;;  %v3693_v37 = vadd.f32 %v3692_v42, %v7882_v48 }
 0x549   : >> { %v4045_v50 = vrot.slane %v4044_v57, 1  ;;  %v3742_v53 = vsel %vm8716_vm7, %v3672_v28, 0.0  ;;  %v3729_v3 = vsel %vm8717_vm8, %v3668_v44, 0.0  ;;  %v3008_v8 = vmul.f32 %v5021_v38, %v2961_v21  ;;  %vm8727_vm7 = vmmov %vm8698_vm3 }
 0x54a   : >> { %v3088_v52 = vadd.f32 %v3087_v12, %v3086_v63  ;;  %v3422_v0 = vadd.f32 %v3421_v34, %v3420_v31  ;;  %v3908_v60 = vpop.permute.xlu0 %3907  ;;  %v8075_v19 = vpop.permute.xlu1 %3639  ;;  %v3743_v20 = vadd.f32 %v3742_v53, %v8016_v51  ;;  %v3730_v27 = vadd.f32 %v3729_v3, %v7908_v13  ;;  %vm8728_vm8 = vmmov %vm8698_vm3 }
 0x54b   : >> { %v4046_v29 = vadd.f32 %v4045_v50, %v4044_v57  ;;  %v4000_v4 = vmul.f32 %v5181_v43, %v3908_v60  ;;  %v5165_v54 = vunpack.c.h.bf16 %v7693_v5  ;;  %v3361_v48 = vadd.f32 %v3360_v55, %v3359_v9  ;;  %v8084_v57 = vld [vmem:[%s5786_s29 + $0xf8] sm:$0xff]  }
 0x54c   : >> { %v3423_v41 = vrot.slane %v3422_v0, 2  ;;  %v5029_v47 = vunpack.c.h.bf16 %v8034_v32  ;;  %v3694_v21 = vrot.slane %v3693_v37, 2  ;;  %v3744_v38 = vrot.slane %v3743_v20, 4 }
 0x54d   : >> { %v8080_v42 = vadd.f32 %v4046_v29, %v3790_v39  ;;  %v3731_v63 = vrot.slane %v3730_v27, 4  ;;  %v4052_v31 = vsel %vm8718_vm9, %v4000_v4, 0.0  ;;  %v3089_v6 = vrot.slane %v3088_v52, 1  ;;  %vm8729_vm9 = vmmov %vm8698_vm3 }
 0x54e   : >> { %v3096_v51 = vsel %vm8719_vm10, %v3008_v8, 0.0  ;;  %v3424_v13 = vadd.f32 %v3423_v41, %v3422_v0  ;;  %v4053_v43 = vadd.f32 %v4052_v31, %v7947_v33  ;;  %v8089_v5 = vpop.permute.xlu0 %3959  ;;  %v3876_v9 = vpop.permute.xlu1 %3875  ;;  %v3745_v25 = vadd.f32 %v3744_v38, %v3743_v20 }
 0x54f   : >> { %v3732_v28 = vadd.f32 %v3731_v63, %v3730_v27  ;;  %v5188_v44 = vunpack.c.l.bf16 %v8084_v57  ;;  %v5141_v55 = vunpack.c.h.bf16 %v8043_v35  ;;  %v8720_v50 = vunpack.c.l.bf16 %v8043_v35 }
 0x550   : >> { %v3425_v34 = vrot.slane %v3424_v13, 1  ;;  %v4054_v39 = vrot.slane %v4053_v43, 4  ;;  %v3992_v53 = vmul.f32 %v5165_v54, %v3876_v9  ;;  %v3695_v3 = vadd.f32 %v3694_v21, %v3693_v37 }
 0x551   : >> { %v3675_v12 = vmul.f32 %v8720_v50, %v8009_v46  ;;  %v3097_v29 = vadd.f32 %v3096_v51, %v7992_v26  ;;  %v3746_v33 = vrot.slane %v3745_v25, 2  ;;  %v3733_v8 = vrot.slane %v3732_v28, 2 }
 0x552   : >> { %v3090_v0 = vadd.f32 %v3089_v6, %v3088_v52  ;;  %v3426_v60 = vadd.f32 %v3425_v34, %v3424_v13  ;;  %v4055_v20 = vadd.f32 %v4054_v39, %v4053_v43  ;;  %v4026_v27 = vsel %vm8721_vm13, %v3992_v53, 0.0  ;;  %v2980_v4 = vpop.permute.xlu0 %2979  ;;  %v3920_v41 = vpop.permute.xlu1 %3919 }
 0x553   : >> { %v3453_v38 = vadd.f32 %v3361_v48, %v8058_v36  ;;  %v3747_v63 = vadd.f32 %v3746_v33, %v3745_v25  ;;  %v3734_v35 = vadd.f32 %v3733_v8, %v3732_v28  ;;  %v4027_v46 = vadd.f32 %v4026_v27, %v7814_v23 }
 0x554   : >> { %v3753_v54 = vsel %vm8698_vm3, %v3675_v12, 0.0  ;;  %v8101_v37 = vadd.f32 %v3426_v60, %v3090_v0  ;;  %v4056_v26 = vrot.slane %v4055_v20, 2  ;;  %v5201_v21 = vunpack.c.h.bf16 %v8052_v59 }
 0x555   : >> { %v3748_v52 = vrot.slane %v3747_v63, 1  ;;  %v3735_v31 = vrot.slane %v3734_v35, 1  ;;  %v4028_v6 = vrot.slane %v4027_v46, 4  ;;  %v4003_v51 = vmul.f32 %v5188_v44, %v3920_v41 }
 0x556   : >> { %v3696_v13 = vrot.slane %v3695_v3, 1  ;;  %v3098_v43 = vrot.slane %v3097_v29, 4  ;;  %v4057_v9 = vadd.f32 %v4056_v26, %v4055_v20  ;;  %v3620_v36 = vpop.permute.xlu0 %3619  ;;  %v8104_v48 = vpop.permute.xlu1 %3947  ;;  %v5189_v23 = vunpack.c.h.bf16 %v8084_v57  ;;  %v5329_v20 = vld [vmem:[%s5786_s29 + $0x1a8] sm:$0xff]  }
 0x557   : >> { %v3749_v25 = vadd.f32 %v3748_v52, %v3747_v63  ;;  %v3736_v28 = vadd.f32 %v3735_v31, %v3734_v35  ;;  %v4029_v50 = vadd.f32 %v4028_v6, %v4027_v46  ;;  %v5085_v12 = vunpack.c.h.bf16 %v7962_v7 }
 0x558   : >> { %v8722_v34 = vunpack.c.l.bf16 %v8034_v32  ;;  %v3754_v44 = vadd.f32 %v3753_v54, %v7926_v30  ;;  %v4058_v53 = vrot.slane %v4057_v9, 1  ;;  %v3676_v33 = vmul.f32 %v5141_v55, %v3620_v36 }
 0x559   : >> { %v8113_v8 = vadd.f32 %v3749_v25, %v7959_v18  ;;  %v8116_v0 = vadd.f32 %v3736_v28, %v7917_v14  ;;  %v4030_v57 = vrot.slane %v4029_v50, 2  ;;  %v4063_v60 = vsel %vm8723_vm4, %v4003_v51, 0.0  ;;  %vm8733_vm4 = vmmov %vm8698_vm3 }
 0x55a   : >> { %v3011_v39 = vmul.f32 %v8722_v34, %v7972_v49  ;;  %v3697_v27 = vadd.f32 %v3696_v13, %v3695_v3  ;;  %v3099_v7 = vadd.f32 %v3098_v43, %v3097_v29  ;;  %v4059_v41 = vadd.f32 %v4058_v53, %v4057_v9  ;;  %v3924_v49 = vpop.permute.xlu0 %3923  ;;  %v3300_v35 = vpop.permute.xlu1 %3299 }
 0x55b   : >> { %v3755_v63 = vsel %vm8724_vm5, %v3676_v33, 0.0  ;;  %v4031_v30 = vadd.f32 %v4030_v57, %v4029_v50  ;;  %v3012_v55 = vmul.f32 %v5029_v47, %v2980_v4  ;;  %v4004_v46 = vmul.f32 %v5189_v23, %v3924_v49  ;;  %vm8734_vm5 = vmmov %vm8698_vm3 }
 0x55c   : >> { %v3756_v18 = vadd.f32 %v3755_v63, %v3754_v44  ;;  %v4127_v14 = vadd.f32 %v4059_v41, %v7987_v61  ;;  %v4064_v54 = vadd.f32 %v4063_v60, %v7970_v1  ;;  %v3344_v26 = vmul.f32 %v5085_v12, %v3300_v35 }
 0x55d   : >> { %v5148_v52 = vunpack.c.l.bf16 %v5329_v20  ;;  %v3107_v3 = vsel %vm8725_vm14, %v3011_v39, 0.0  ;;  %v4032_v29 = vrot.slane %v4031_v30, 1  ;;  %v4065_v6 = vsel %vm8726_vm6, %v4004_v46, 0.0  ;;  %v8134_v39 = vld [vmem:[%s5786_s29 + $0x1b8] sm:$0xff]   ;;  %vm8735_vm14 = vmmov %vm8698_vm3 }
 0x55e   : >> { %v3757_v31 = vrot.slane %v3756_v18, 4  ;;  %v3789_v51 = vadd.f32 %v3697_v27, %v3453_v38  ;;  %v3100_v13 = vrot.slane %v3099_v7, 2  ;;  %v4066_v43 = vadd.f32 %v4065_v6, %v4064_v54  ;;  %v8128_v47 = vpop.permute.xlu0 %3975  ;;  %v3632_v4 = vpop.permute.xlu1 %3631  ;;  %vm8736_vm6 = vmmov %vm8698_vm3 }
 0x55f   : >> { %v3432_v32 = vsel %vm8727_vm7, %v3344_v26, 0.0  ;;  %v4033_v61 = vadd.f32 %v4032_v29, %v4031_v30  ;;  %v3109_v1 = vsel %vm8728_vm8, %v3012_v55, 0.0  ;;  %v3108_v23 = vadd.f32 %v3107_v3, %v7816_v45  ;;  %vm8737_vm7 = vmmov %vm8698_vm3 }
 0x560   : >> { %v3758_v9 = vadd.f32 %v3757_v31, %v3756_v18  ;;  %v3433_v36 = vadd.f32 %v3432_v32, %v8007_v2  ;;  %v4067_v25 = vrot.slane %v4066_v43, 4  ;;  %v3679_v28 = vmul.f32 %v5148_v52, %v3632_v4  ;;  %vm8738_vm8 = vmmov %vm8698_vm3 }
 0x561   : >> { %v5149_v50 = vunpack.c.h.bf16 %v5329_v20  ;;  %v4125_v38 = vadd.f32 %v4033_v61, %v3789_v51  ;;  %v5209_v44 = vunpack.c.h.bf16 %v8064_v24  ;;  %v3110_v53 = vadd.f32 %v3109_v1, %v3108_v23 }
 0x562   : >> { %v3759_v12 = vrot.slane %v3758_v9, 2  ;;  %v3434_v34 = vrot.slane %v3433_v36, 4  ;;  %v4068_v33 = vadd.f32 %v4067_v25, %v4066_v43  ;;  %v3766_v57 = vsel %vm8729_vm9, %v3679_v28, 0.0  ;;  %v3636_v60 = vpop.permute.xlu0 %3635  ;;  %v8138_v27 = vpop.permute.xlu1 %3935 }
 0x563   : >> { %v5093_v45 = vunpack.c.h.bf16 %v8040_v15  ;;  %v3101_v2 = vadd.f32 %v3100_v13, %v3099_v7  ;;  %vm8730_vm10 = vcmask 1041409   ;;  %vm8731_vm13 = vcmask 1042434   ;;  %v8150_v7 = vld [vmem:[%s5786_s29 + $0x178] sm:$0xff]  }
 0x564   : >> { %v4210_v20 = vsel %vm8730_vm10, %v8080_v42, %v4125_v38  ;;  %v3760_v41 = vadd.f32 %v3759_v12, %v3758_v9  ;;  %v3435_v63 = vadd.f32 %v3434_v34, %v3433_v36  ;;  %v4069_v49 = vrot.slane %v4068_v33, 2 }
 0x565   : >> { %v4211_v35 = vsel %vm8731_vm13, %v4127_v14, %v4210_v20  ;;  %v3680_v30 = vmul.f32 %v5149_v50, %v3636_v60  ;;  %v5212_v55 = vunpack.c.l.bf16 %v8134_v39  ;;  %v8732_v18 = vunpack.c.l.bf16 %v8040_v15 }
 0x566   : >> { %v3761_v54 = vrot.slane %v3760_v41, 1  ;;  %v3436_v26 = vrot.slane %v3435_v63, 2  ;;  %v3767_v52 = vadd.f32 %v3766_v57, %v8027_v17  ;;  %v4013_v42 = vmul.f32 %v5208_v40, %v8089_v5  ;;  %v3968_v31 = vpop.permute.xlu0 %3967  ;;  %v3964_v6 = vpop.permute.xlu1 %3963 }
 0x567   : >> { %v3347_v46 = vmul.f32 %v8732_v18, %v7994_v11  ;;  %v3111_v3 = vrot.slane %v3110_v53, 4  ;;  %v4070_v29 = vadd.f32 %v4069_v49, %v4068_v33  ;;  %v3768_v14 = vsel %vm8698_vm3, %v3680_v30, 0.0  ;;  %v5330_v18 = vld [vmem:[%s5786_s29 + $0x1e0] sm:$0xff]  }
 0x568   : >> { %v3102_v51 = vrot.slane %v3101_v2, 1  ;;  %v3762_v13 = vadd.f32 %v3761_v54, %v3760_v41  ;;  %v3437_v15 = vadd.f32 %v3436_v26, %v3435_v63  ;;  %v3769_v11 = vadd.f32 %v3768_v14, %v3767_v52  ;;  %v8181_v26 = vld [vmem:[%s5786_s29 + $0x1e8] sm:$0xff]   ;;  %v4685_v52 = vld [vmem:[%s8350_s11] ss:$0 sm:$0xff] }
 0x569   : >> { %v4071_v43 = vrot.slane %v4070_v29, 1  ;;  %v4014_v32 = vmul.f32 %v5209_v44, %v3964_v6  ;;  %v5205_v17 = vunpack.c.h.bf16 %v8150_v7  ;;  %v5213_v4 = vunpack.c.h.bf16 %v8134_v39 }
 0x56a   : >> { %v3443_v61 = vsel %vm8733_vm4, %v3347_v46, 0.0  ;;  %v8160_v24 = vadd.f32 %v3762_v13, %v8101_v37  ;;  %v3438_v40 = vrot.slane %v3437_v15, 1  ;;  %v3770_v5 = vrot.slane %v3769_v11, 4  ;;  %v3956_v25 = vpop.permute.xlu0 %3955  ;;  %v3316_v28 = vpop.permute.xlu1 %3315 }
 0x56b   : >> { %v4099_v1 = vsel %vm8734_vm5, %v4013_v42, 0.0  ;;  %v3112_v9 = vadd.f32 %v3111_v3, %v3110_v53  ;;  %v4072_v36 = vadd.f32 %v4071_v43, %v4070_v29  ;;  %v4100_v23 = vsel %vm8735_vm14, %v4014_v32, 0.0 }
 0x56c   : >> { %v3103_v50 = vadd.f32 %v3102_v51, %v3101_v2  ;;  %v3439_v38 = vadd.f32 %v3438_v40, %v3437_v15  ;;  %v3771_v12 = vadd.f32 %v3770_v5, %v3769_v11  ;;  %v4015_v34 = vmul.f32 %v5212_v55, %v3968_v31  ;;  %v5341_v2 = vld [vmem:[%s5786_s29 + $0x138] sm:$0xff]  }
 0x56d   : >> { %v4128_v39 = vadd.f32 %v4072_v36, %v8116_v0  ;;  %v4101_v44 = vadd.f32 %v4100_v23, %v4099_v1  ;;  %v3348_v37 = vmul.f32 %v5093_v45, %v3316_v28  ;;  %v5204_v33 = vunpack.c.l.bf16 %v8150_v7 }
 0x56e   : >> { %v3444_v57 = vadd.f32 %v3443_v61, %v7862_v62  ;;  %v4010_v53 = vmul.f32 %v5201_v21, %v8104_v48  ;;  %v3459_v60 = vadd.f32 %v3439_v38, %v3103_v50  ;;  %v3772_v20 = vrot.slane %v3771_v12, 2  ;;  %v3972_v49 = vpop.permute.xlu0 %3971  ;;  %v3648_v62 = vpop.permute.xlu1 %3647 }
 0x56f   : >> { %v4009_v41 = vmul.f32 %v5200_v58, %v8048_v56  ;;  %v3113_v0 = vrot.slane %v3112_v9, 2  ;;  %v8175_v45 = vsel %vm2131_vm0, %v4128_v39, %v4211_v35  ;;  %v3445_v63 = vsel %vm8736_vm6, %v3348_v37, 0.0  ;;  %vm8739_vm0 = vmmov %vm8698_vm3 }
 0x570   : >> { %v3773_v30 = vadd.f32 %v3772_v20, %v3771_v12  ;;  %v4102_v55 = vsel %vm8737_vm7, %v4015_v34, 0.0  ;;  %v3446_v21 = vadd.f32 %v3445_v63, %v3444_v57  ;;  %v4016_v48 = vmul.f32 %v5213_v4, %v3972_v49  ;;  %vm8740_vm9 = vmmov %vm8739_vm0  ;;  %v5346_v34 = vld [vmem:[%s5786_s29 + $0x1f0] sm:$0xff]   ;;  %v5347_v49 = vld [vmem:[%s5786_s29 + $0x1f8] sm:$0xff]   ;;  %s5499_s29 = sshll.u32 (%p739_p1), %s5606_s17, 4  ;;  %s5500_s29 = int_to_ptr.vmem [resolvable:$false] %s5499_s29 }
 0x571   : >> { %v5196_v46 = vunpack.c.l.bf16 %v5341_v2  ;;  %v4103_v54 = vadd.f32 %v4102_v55, %v4101_v44  ;;  %v4087_v56 = vsel %vm8738_vm8, %v4010_v53, 0.0  ;;  %v4086_v7 = vsel %vm8740_vm9, %v4009_v41, 0.0  ;;  %vm8741_vm10 = vmmov %vm8739_vm0  ;;  %s5501_s8 = scalar_lea.vmem (%p739_p1), %s5500_s29, 896  ;;  %p5502_p5 = scmp.lt.s32.totalorder (%p739_p1), %s8260_s23, %s5500_s29 }
 0x572   : >> { %v3774_v59 = vrot.slane %v3773_v30, 1  ;;  %v3447_v58 = vrot.slane %v3446_v21, 4  ;;  %v4104_v35 = vsel %vm8739_vm0, %v4016_v48, 0.0  ;;  %v5152_v42 = vunpack.c.l.bf16 %v5330_v18  ;;  %v3952_v14 = vpop.permute.xlu1 %3951  ;;  %vm8742_vm13 = vmmov %vm8739_vm0  ;;  %p5503_p7 = scmp.lt.s32.totalorder (%p739_p1), %s5501_s8, %s5495_s24 }
 0x573   : >> { %v3114_v3 = vadd.f32 %v3113_v0, %v3112_v9  ;;  %v4105_v29 = vadd.f32 %v4104_v35, %v4103_v54  ;;  %v4012_v6 = vmul.f32 %v5205_v17, %v3956_v25  ;;  %v4011_v13 = vmul.f32 %v5204_v33, %v3952_v14  ;;  %vm8743_vm3 = vmmov %vm8739_vm0 }
 0x574   : >> { %v3775_v31 = vadd.f32 %v3774_v59, %v3773_v30  ;;  %v3448_v51 = vadd.f32 %v3447_v58, %v3446_v21  ;;  %v5153_v15 = vunpack.c.h.bf16 %v5330_v18  ;;  %v4088_v11 = vadd.f32 %v4087_v56, %v4086_v7  ;;  %vm8744_vm4 = vmmov %vm8739_vm0  ;;  %p5504_p10 = por (%p739_p1), %p5503_p7, %p5502_p5 }
 0x575   : >> { %v5156_v43 = vunpack.c.l.bf16 %v8181_v26  ;;  %v4191_v32 = vadd.f32 %v4685_v52, %v7827_v22  ;;  %v4007_v61 = vmul.f32 %v5196_v46, %v8138_v27  ;;  %v4089_v5 = vsel %vm8741_vm10, %v4011_v13, 0.0  ;;  %vm8745_vm5 = vmmov %vm8739_vm0 }
 0x576   : >> { %v8191_v4 = vadd.f32 %v3775_v31, %v3459_v60  ;;  %v3449_v40 = vrot.slane %v3448_v51, 2  ;;  %v4106_v1 = vrot.slane %v4105_v29, 4  ;;  %v4090_v9 = vadd.f32 %v4089_v5, %v4088_v11  ;;  %v3980_v36 = vpop.permute.xlu1 %3979  ;;  %vm8746_vm14 = vmmov %vm8739_vm0  ;;  %p5505_p11 = pnand (%p739_p1), %p5504_p10, %p5498_p4 }
 0x577   : >> { %v5197_v17 = vunpack.c.h.bf16 %v5341_v2  ;;  %v3681_v23 = vmul.f32 %v5152_v42, %v8075_v19  ;;  %v3115_v25 = vrot.slane %v3114_v3, 1  ;;  %v4091_v28 = vsel %vm8742_vm13, %v4012_v6, 0.0  ;;  %vm8747_vm6 = vmmov %vm8739_vm0 }
 0x578   : >> { %v3450_v50 = vadd.f32 %v3449_v40, %v3448_v51  ;;  %v4092_v38 = vadd.f32 %v4091_v28, %v4090_v9  ;;  %v4689_v22 = vmul.f32 -1.442695, %v4191_v32  ;;  %v3682_v12 = vmul.f32 %v5153_v15, %v8018_v10  ;;  %vm8748_vm7 = vmmov %vm8739_vm0 }
 0x579   : >> { %v4076_v27 = vsel %vm8743_vm3, %v4007_v61, 0.0  ;;  %v3683_v44 = vmul.f32 %v5156_v43, %v3648_v62  ;;  %v4107_v37 = vadd.f32 %v4106_v1, %v4105_v29  ;;  %v5217_v57 = vunpack.c.h.bf16 %v5346_v34  ;;  %vm8749_vm8 = vmmov %vm8739_vm0 }
 0x57a   : >> { %v3451_v39 = vrot.slane %v3450_v50, 1  ;;  %v4093_v33 = vrot.slane %v4092_v38, 4  ;;  %v3940_v53 = vpop.permute.xlu1 %3939  ;;  %v5157_v19 = vunpack.c.h.bf16 %v8181_v26  ;;  %v3776_v60 = vsel %vm8744_vm4, %v3681_v23, 0.0  ;;  %vm8750_vm9 = vmmov %vm8739_vm0 }
 0x57b   : >> { %v3116_v20 = vadd.f32 %v3115_v25, %v3114_v3  ;;  %v4008_v41 = vmul.f32 %v5197_v17, %v3940_v53  ;;  %v5216_v0 = vunpack.c.l.bf16 %v5346_v34  ;;  %v4077_v10 = vadd.f32 %v4076_v27, %v8046_v16  ;;  %vm8751_vm10 = vmmov %vm8739_vm0 }
 0x57c   : >> { %v3452_v2 = vadd.f32 %v3451_v39, %v3450_v50  ;;  %v4094_v63 = vadd.f32 %v4093_v33, %v4092_v38  ;;  %5482 = vpow2.f32 %v4689_v22  ;;  %v3777_v30 = vsel %vm8745_vm5, %v3682_v12, 0.0 }
 0x57d   : >> { %v3779_v55 = vsel %vm8746_vm14, %v3683_v44, 0.0  ;;  %v4078_v21 = vsel %vm8747_vm6, %v4008_v41, 0.0  ;;  %v3778_v48 = vadd.f32 %v3777_v30, %v3776_v60  ;;  %v4108_v18 = vrot.slane %v4107_v37, 2 }
 0x57e   : >> { %v3460_v62 = vadd.f32 %v3452_v2, %v3116_v20  ;;  %v4095_v46 = vrot.slane %v4094_v63, 2  ;;  %v4079_v54 = vadd.f32 %v4078_v21, %v4077_v10  ;;  %v3652_v26 = vpop.permute.xlu1 %3651  ;;  %v4018_v56 = vmul.f32 %v5217_v57, %v3980_v36 }
 0x57f   : >> { %v3684_v59 = vmul.f32 %v5157_v19, %v3652_v26  ;;  %v5220_v58 = vunpack.c.l.bf16 %v5347_v49  ;;  %v3780_v35 = vadd.f32 %v3779_v55, %v3778_v48  ;;  %v4017_v52 = vmul.f32 %v5216_v0, %v8128_v47  ;;  %v5476_v48 = vld [vmem:[%s8353_s14] sm:$0xff]  }
 0x580   : >> { %v4080_v16 = vrot.slane %v4079_v54, 4  ;;  %v4096_v7 = vadd.f32 %v4095_v46, %v4094_v63  ;;  %v4109_v3 = vadd.f32 %v4108_v18, %v4107_v37  ;;  %v4113_v6 = vsel %vm8749_vm8, %v4018_v56, 0.0  ;;  %v8752_v18 = vld [vmem:[#allocation28_spill] sm:$0xff]  ;;  %v8755_v56 = vld [vmem:[#allocation23_spill] sm:$0xff] }
 0x581   : >> { %v3781_v42 = vsel %vm8748_vm7, %v3684_v59, 0.0  ;;  %v5221_v13 = vunpack.c.h.bf16 %v5347_v49  ;;  %v4112_v43 = vsel %vm8739_vm0, %v4017_v52, 0.0  ;;  %v8754_v26 = vmov 0.0  }
 0x582   : >> { %v4081_v29 = vadd.f32 %v4080_v16, %v4079_v54  ;;  %v3782_v14 = vadd.f32 %v3781_v42, %v3780_v35  ;;  %v3984_v31 = vpop.permute.xlu1 %3983  ;;  %v4097_v32 = vrot.slane %v4096_v7, 1  ;;  %v4110_v47 = vrot.slane %v4109_v3, 1 }
 0x583   : >> { %v4019_v51 = vmul.f32 %v5220_v58, %v3984_v31  ;;  %v4114_v5 = vadd.f32 %v4113_v6, %v4112_v43  ;;  %v4698_v31 = vld [vmem:[%s8354_s15] ss:$0 sm:$0xff]  ;;  %vm4454_vm13 = vcmask 257024  }
 0x584   : >> { %v4082_v15 = vrot.slane %v4081_v29, 2  ;;  %v3783_v11 = vrot.slane %v3782_v14, 4  ;;  %v4098_v50 = vadd.f32 %v4097_v32, %v4096_v7  ;;  %v4111_v12 = vadd.f32 %v4110_v47, %v4109_v3  ;;  %v5494_v43 = vld [vmem:[#allocation2] sm:$0xff] }
 0x585   : >> { %v4115_v61 = vsel %vm8750_vm9, %v4019_v51, 0.0  ;;  %4430 = vrot.lane.b32.xlu1 %v5494_v43, %s5604_s0 }
 0x586   : >> { %v5483_v40 = vpop.eup %5482  ;;  %v4083_v1 = vadd.f32 %v4082_v15, %v4081_v29  ;;  %v3784_v9 = vadd.f32 %v3783_v11, %v3782_v14  ;;  %v3988_v36 = vpop.permute.xlu1 %3987  ;;  %v4116_v28 = vadd.f32 %v4115_v61, %v4114_v5  ;;  %v4130_v33 = vadd.f32 %v4098_v50, %v8160_v24 }
 0x587   : >> { %v4020_v17 = vmul.f32 %v5221_v13, %v3988_v36  ;;  %v4199_v38 = vadd.f32 1.0, %v5483_v40  ;;  %v4131_v57 = vadd.f32 %v4111_v12, %v8191_v4 }
 0x588   : >> { %v4084_v23 = vrot.slane %v4083_v1, 1  ;;  %v3785_v25 = vrot.slane %v3784_v9, 2 }
 0x589   : >> { %v4117_v22 = vsel %vm8751_vm10, %v4020_v17, 0.0  ;;  %5484 = vrcp.f32 %v4199_v38 }
 0x58a   : >> { %v4085_v34 = vadd.f32 %v4084_v23, %v4083_v1  ;;  %v3786_v27 = vadd.f32 %v3785_v25, %v3784_v9  ;;  %v4118_v39 = vadd.f32 %v4117_v22, %v4116_v28  ;;  %v4405_v63 = vpop.permute.xlu1 %4404 }
 0x58c   : >> { %v4129_v44 = vadd.f32 %v4085_v34, %v8113_v8  ;;  %v4119_v37 = vrot.slane %v4118_v39, 4  ;;  %v3787_v19 = vrot.slane %v3786_v27, 1 }
 0x58e   : >> { %v4213_v53 = vsel %vm2133_vm1, %v4129_v44, %v8175_v45  ;;  %v4120_v60 = vadd.f32 %v4119_v37, %v4118_v39  ;;  %v3788_v0 = vadd.f32 %v3787_v19, %v3786_v27 }
 0x58f   : >> { %v4214_v20 = vsel %vm2135_vm2, %v4130_v33, %v4213_v53  ;;  %vm8753_vm2 = vmmov %vm8739_vm0 }
 0x590   : >> { %v4121_v2 = vrot.slane %v4120_v60, 2  ;;  %v4215_v41 = vsel %vm2137_vm15, %v4131_v57, %v4214_v20  ;;  %v3796_v24 = vadd.f32 %v3788_v0, %v3460_v62  ;;  %v5477_v62 = vld [vmem:[%s8353_s14 + $0x8] sm:$0xff]   ;;  %vm8757_vm15 = vmmov %vm8739_vm0 }
 0x592   : >> { %v4122_v8 = vadd.f32 %v4121_v2, %v4120_v60 }
 0x593   : >> { %v5485_v30 = vpop.eup %5484 }
 0x594   : >> { %v4123_v10 = vrot.slane %v4122_v8, 1 }
 0x596   : >> { %v4124_v49 = vadd.f32 %v4123_v10, %v4122_v8 }
 0x598   : >> { %v4132_v55 = vadd.f32 %v4124_v49, %v3796_v24  ;;  %v4427_v45 = vpop.permute.xlu1 %4426 }
 0x599   : >> { %vm4428_vm1 = vcmp.eq.s32.totalorder %v4427_v45, 1 }
 0x59a   : >> { %v4216_v4 = vsel %vm2139_vm11, %v4132_v55, %v4215_v41  ;;  %v4456_v46 = vsel %vm4428_vm1, %v8752_v18, 0.0  ;;  %vm8756_vm11 = vmmov %vm8739_vm0 }
 0x59b   : >> { %v4218_v21 = vmul.f32 %v5485_v30, %v4216_v4  ;;  %4459 = vst [vmem:[%s4458_s18] sm:$0xff] %v4456_v46 }
 0x59d   : >> { %v4221_v54 = vpack.c.bf16 %v4218_v21, %v4218_v21 }
 0x59f   : >> { %5383 = vmatmul.mubr.msk.bf16.vlgmr.msra.gmra.mrb[4].mxu0 %vm8753_vm2, %v4221_v54 }
 0x5a0   : >> { %5393 = vmatpush3.bf16.msra.mxu0 %v5476_v48  ;;  %5396 = vmatprep.mubr.msk.bf16.mxu0 %vm8518_vm12, %v8754_v26  ;;  %vm8758_vm12 = vmmov %vm8739_vm0 }
 0x5a1   : >> { %5394 = vmatprep.subr.bf16.mxu0 %v8754_v26 }
 0x5a4   : >> { %5395 = vmatpush3.bf16.msra.mxu0 %v5477_v62 }
 0x5a7   : >> { %5397 = vmatmul.mubr.msk.bf16.vlgmr.msra.gmra.mrb[8].mxu0 %vm8756_vm11, %v8755_v56 }
 0x5f7   : >> { %v4431_v50 = vpop.permute.xlu1 %4430 }
 0x5fa   : >> { %v4325_v59 = vpop.f32.mrb[4].mxu1 }
 0x5fb   : >> { %v5390_v58 = vpop.f32.mrb[5].mxu1 }
 0x5fc   : >> { %v4328_v35 = vpop.f32.mrb[6].mxu1 }
 0x5fd   : >> { %v5391_v16 = vpop.f32.mrb[7].mxu1 }
 0x672   : >> { %v4275_v52 = vpop.f32.mrb[4].mxu0 }
 0x673   : >> { %v4326_v7 = vadd.f32 %v4325_v59, %v4275_v52  ;;  %v5384_v42 = vpop.f32.mrb[5].mxu0 }
 0x674   : >> { %v4278_v3 = vpop.f32.mrb[6].mxu0 }
 0x675   : >> { %v5385_v29 = vpop.f32.mrb[7].mxu0 }
 0x67a   : >> { %v4381_v14 = vpop.f32.mrb[8].mxu0 }
 0x67b   : >> { %v4387_v6 = vadd.f32 %v4381_v14, %v4326_v7  ;;  %v5398_v51 = vpop.f32.mrb[9].mxu0 }
 0x67c   : >> { %v4384_v13 = vpop.f32.mrb[10].mxu0 }
 0x67d   : >> { %v4395_v15 = vadd.f32 %v4698_v31, %v4387_v6  ;;  %v5399_v11 = vpop.f32.mrb[11].mxu0 }
 0x67f   : >> { %5486 = vtanh.f32 %v4395_v15  ;;  %v4699_v61 = vmul.f32 -1.442695, %v4395_v15 }
 0x681   : >> { %5488 = vpow2.f32 %v4699_v61 }
 0x689   : >> { %v5487_v32 = vpop.eup %5486 }
 0x68a   : >> { %4409 = vrot.lane.b32.xlu0 %v5487_v32, %s5605_s28 }
 0x68b   : >> { %v5489_v40 = vpop.eup %5488 }
 0x68c   : >> { %v4399_v47 = vadd.f32 1.0, %v5489_v40 }
 0x68e   : >> { %5490 = vrcp.f32 %v4399_v47 }
 0x698   : >> { %v5491_v5 = vpop.eup %5490 }
 0x699   : >> { %v4407_v36 = vmul.f32 %v5491_v5, %v4405_v63 }
 0x6fc   : >> { %v4410_v1 = vpop.permute.xlu0 %4409 }
 0x6fd   : >> { %v4412_v9 = vmul.f32 %v5491_v5, %v4410_v1 }
 0x6ff   : >> { %4414 = vrot.lane.b32.xlu0 %v4412_v9, %s5603_s1 }
 0x771   : >> { %v4415_v17 = vpop.permute.xlu0 %4414 }
 0x772   : >> { %v4417_v23 = vadd.f32 %v4415_v17, %v4407_v36 }
 0x774   : >> { %5492 = vtanh.f32 %v4417_v23  ;;  %v4439_v25 = vsel %vm4428_vm1, %v4417_v23, %v4405_v63 }
 0x775   : >> { %4441 = vrot.lane.b32.xlu1 %v4439_v25, %s5604_s0 }
 0x77e   : >> { %v5493_v28 = vpop.eup %5492 }
 0x77f   : >> { %4420 = vrot.lane.b32.xlu0 %v5493_v28, %s5605_s28 }
 0x7e7   : >> { %v4442_v38 = vpop.permute.xlu1 %4441 }
 0x7e8   : >> { %4444 = vst.msk [vmem:[#allocation3] sm:$0xff] %vm8757_vm15, %v4442_v38 }
 0x7f1   : >> { %v4421_v22 = vpop.permute.xlu0 %4420 }
 0x7f2   : >> { %v4423_v12 = vmul.f32 %v5491_v5, %v4421_v22 }
 0x7f4   : >> { %v4433_v34 = vsel %vm4428_vm1, %v4423_v12, %v4431_v50  ;;  %v4709_v27 = vpack.c.bf16 %v4423_v12, %v4423_v12 }
 0x7f5   : >> { %4435 = vrot.lane.b32.xlu0 %v4433_v34, %s5603_s1 }
 0x7f9   : >> { %4449 = vrot.lane.b32.xlu0 %v4709_v27, %s5603_s1 }
 0x866   : > { %741 = sbr.rel (!%p739_p1) target bundleno = 77 (0x4d), region = 207 }
 0x867   : >> { %v4436_v39 = vpop.permute.xlu0 %4435 }
 0x868   : >> { %4438 = vst.msk [vmem:[#allocation2] sm:$0xff] %vm8758_vm12, %v4436_v39 }
 0x86b   : >> { %v4450_v44 = vpop.permute.xlu0 %4449 }
 0x86c   : >> { %4455 = vst.msk [vmem:[%s4453_s27] sm:$0xf] %vm4454_vm13, %v4450_v44 }
 0x86d   : > { %5508 = shalt.err (!%p5505_p11)
}
 0x86e   : > { %s5509_s26 = scalar_lea.hbm %s8257_s25, 448  ;;  %s5513_s28 = scalar_lea.hbm %s8760_s20, 896 }
 0x86f   : > { %p5510_p12 = scmp.ne.s32.totalorder %s8257_s25, %s5509_s26  ;;  %p5514_p1 = scmp.lt.u32.totalorder %s8257_s25, %s8760_s20 }
 0x870   : > { %p5515_p2 = scmp.lt.u32.totalorder %s5513_s28, %s5509_s26  ;;  %p5517_p4 = scmp.lt.u32.totalorder %s5509_s26, %s8257_s25 }
 0x871   : > { %p5511_p13 = pnand %p5510_p12, %p5745_p6 }
 0x872   : > { %p5516_p3 = por %p5515_p2, %p5514_p1 }
 0x873   : > { %p5512_p0 = pneg %p5511_p13 }
 0x874   : > { %p5518_p5 = por %p5517_p4, %p5516_p3 }
 0x876   : > { %p5519_p7 = pnand %p5518_p5, %p5512_p0 }
 0x878   : > { %5522 = shalt.err (!%p5519_p7)
}
 0x879   : > { %s5607_s1 = smov 64   ;;  %s5608_s4 = smov 128  }
 0x87a   : > { %s5609_s24 = smov 4   ;;  %s4704_s17 = sshll.u32 %s5727_s9, 7 }
 0x87b   : > { %5403 = dma.vmem_to_hbm [thread:$0]  (%p5745_p6), %s8260_s23, 448, %s8257_s25, %s4461_s19, %s5607_s1, %s5608_s4, %s5609_s24  }
 0x87c   : > { %s8761_s26 = sld [smem:[#allocation67_spill]]  ;;  %s4493_s28 = sshll.u32 %s5807_s30, 4  ;;  %s8294_s28 = int_to_ptr.vmem [resolvable:$true] %s4493_s28 }
 0x87d   : > { %s4466_s27 = scalar_lea.sflag [#allocation9], %s5764_s22  ;;  %s5523_s16 = scalar_lea.vmem %s8294_s28, 896 }
 0x87e   : > { %p5524_p10 = scmp.ne.s32.totalorder %s8294_s28, %s5523_s16  ;;  %s5610_s2 = smov [#allocation8]  }
 0x87f   : > { %s5527_s25 = sshll.u32 %s5610_s2, 4  ;;  %s5528_s25 = int_to_ptr.vmem [resolvable:$false] %s5527_s25 }
 0x880   : > { %p5525_p11 = pnand %p5524_p10, %p5745_p6  ;;  %s5529_s9 = scalar_lea.vmem %s5528_s25, 1792 }
 0x881   : > { %p5530_p13 = scmp.lt.s32.totalorder %s8294_s28, %s5528_s25  ;;  %p5531_p0 = scmp.lt.s32.totalorder %s5529_s9, %s5523_s16 }
 0x882   : > { %s8762_s21 = smov %s8761_s26  ;;  %s8291_s0 = scalar_lea.hbm %s8761_s26, %s4704_s17 }
 0x883   : > { %p5526_p12 = pneg %p5525_p11  ;;  %p5532_p1 = por %p5531_p0, %p5530_p13 }
 0x885   : > { %p5533_p2 = pnand %p5532_p1, %p5526_p12 }
 0x887   : > { %5536 = shalt.err (!%p5533_p2)
}
 0x888   : > { %s5537_s30 = scalar_lea.hbm %s8291_s0, 896  ;;  %s5541_s2 = scalar_lea.hbm %s8762_s21, 1792 }
 0x889   : > { %p5538_p3 = scmp.ne.s32.totalorder %s8291_s0, %s5537_s30  ;;  %p5542_p7 = scmp.lt.u32.totalorder %s8291_s0, %s8762_s21 }
 0x88a   : > { %p5543_p10 = scmp.lt.u32.totalorder %s5541_s2, %s5537_s30  ;;  %p5545_p12 = scmp.lt.u32.totalorder %s5537_s30, %s8291_s0 }
 0x88b   : > { %p5539_p4 = pnand %p5538_p3, %p5745_p6 }
 0x88c   : > { %p5544_p11 = por %p5543_p10, %p5542_p7 }
 0x88d   : > { %p5540_p5 = pneg %p5539_p4 }
 0x88e   : > { %p5546_p13 = por %p5545_p12, %p5544_p11 }
 0x890   : > { %p5547_p0 = pnand %p5546_p13, %p5540_p5 }
 0x892   : > { %5550 = shalt.err (!%p5547_p0)
}
 0x893   : > { %s5611_s17 = smov 256   ;;  %s5612_s29 = smov 8  }
 0x894   : > { %5404 = dma.vmem_to_hbm [thread:$0]  (%p5745_p6), %s8294_s28, 896, %s8291_s0, %s4466_s27, %s5608_s4, %s5611_s17, %s5612_s29  }
 0x895 PF: > { %s8763_s8 = sld [smem:[#allocation12_spill]]  ;;  %p5408_p1 = pnand %p4666_p9, %p5749_p8 }
 0x89b   : > { %s4508_s25 = sand.u32 1, %s8763_s8  }
 0x89c   : > { %s4509_s9 = scalar_lea.sflag [#allocation7], %s4508_s25 }
 0x89d   : > { %5572 = dma.done.wait (!%p5408_p1), %s4509_s9, 448  }
 0x89e   : > { %5574 = vsyncadd (!%p5408_p1), %s4509_s9, 4294966848  ;;  %s4518_s30 = scalar_lea.sflag [#allocation9], %s4508_s25 }
 0x89f   : > { %5576 = dma.done.wait (!%p5408_p1), %s4518_s30, 896  }
 0x8a0   : > { %5578 = vsyncadd (!%p5408_p1), %s4518_s30, 4294966400  ;;  %s8766_s29 = sld [smem:[#allocation16_spill]]  ;;  %s8767_s26 = sld [smem:[#allocation13_spill]] }
 0x8a1   : > { %s8768_s27 = sld [smem:[#allocation14_spill]]  ;;  %s8769_s28 = sld [smem:[#allocation17_spill]] }
 0x8a6   : > { %p33_p6 = scmp.ge.s32.totalorder %s8766_s29, 4  }
 0x8a8   :  { %35 = sbr.rel (!%p33_p6) target bundleno = 13 (0xd), region = 218 }
 0x8af   :  { %4523 = vsyncpa [#allocation7], 1 }
 0x8b0   :  { %4525 = vsyncpa [#allocation7 + $0x1], 1 }
 0x8b1   :  { %4526 = vsyncpa [#allocation9], 1 }
 0x8b2   :  { %4528 = vsyncpa [#allocation9 + $0x1], 1 }

</bundles_post_ra>
